<compile_context>
chip_gen: v7x
topology: tpu7x:2x2x1
jax: 0.10.0
libtpu: 0.0.40
codegen_flags: <defaults>
</compile_context>

<pallas_src>
import functools

import jax
import jax.numpy as jnp
from jax.experimental import pallas as pl
from jax.experimental.pallas import tpu as pltpu


def _fused_kernel(x464_ref, x436_ref, w4_ref, b4_ref, w5_ref, b5_ref, o_ref,
                  *, eps):
    # linear4: (tm, 768) @ (768, 768) + b4 — bf16 operands, f32 accumulation.
    # x464 arrives already bf16 (cast once in the wrapper).
    h = jnp.dot(x464_ref[...], w4_ref[...],
                preferred_element_type=jnp.float32) + b4_ref[...]

    # dropout2 (p=0.1): inference mode -> identity
    # TODO(synk): training-mode dropout (mask + 1/(1-p) scale) not implemented.

    # residual add (f32, residual kept f32 for LayerNorm-statistics parity)
    y = x436_ref[...] + h

    # layernorm over last axis (768), eps=1e-12.  gamma/beta are folded into
    # W5/b5 (prepare_params), so only the normalization happens here.
    mean = jnp.mean(y, axis=-1, keepdims=True)
    centered = y - mean
    var = jnp.mean(centered * centered, axis=-1, keepdims=True)
    rstd = jax.lax.rsqrt(var + eps)
    ynorm = centered * rstd

    # linear5 (with folded affine): (tm, 768) @ (768, 3072) + b5' — bf16 on MXU,
    # f32 accumulation; cast to the (bf16) output dtype only at the store.
    out = jnp.dot(ynorm.astype(jnp.bfloat16), w5_ref[...],
                  preferred_element_type=jnp.float32) + b5_ref[...]
    o_ref[...] = out.astype(o_ref.dtype)


def prepare_params(w4, b4, gamma, beta, w5, b5):
    """One-time parameter prep (outside the per-call path).

    * W4 cast to bf16 (MXU-native; halves its HBM + VMEM footprint).
    * LayerNorm affine folded into linear5 in f32:
        W5' = diag(gamma) @ W5,   b5' = beta @ W5 + b5
      then W5' cast to bf16.
    * Bias rows reshaped to (1, N) for lane-dense broadcast.
    """
    gamma32 = gamma.astype(jnp.float32)
    beta32 = beta.astype(jnp.float32)
    w5_32 = w5.astype(jnp.float32)
    w5_folded = gamma32[:, None] * w5_32
    b5_folded = beta32 @ w5_32 + b5.astype(jnp.float32)
    return (
        w4.astype(jnp.bfloat16),
        b4.reshape(1, -1).astype(jnp.float32),
        w5_folded.astype(jnp.bfloat16),
        b5_folded.reshape(1, -1).astype(jnp.float32),
    )


def _pick_tm(M):
    """Pick the row-tile size for pipeline depth, not maximum tile.

    Targets a grid of ~4-8 steps (enough software-pipelining to hide the input
    DMA prologue and output writeback), prefers an even step count (balanced,
    multi-step work for both v7x TensorCores), and requires tm to be a
    multiple of 16 (bf16 sublane tiling) that divides M so no padding copies
    are needed.  The kernel is memory-bound, so shrinking the MXU M-fill is free.
    """
    best = None
    for tm in range(16, M + 1, 16):
        if M % tm:
            continue
        steps = M // tm
        if steps < 2:
            continue
        score = (not (4 <= steps <= 8),   # prefer 4-8 grid steps
                 steps % 2 != 0,          # prefer even (2 TCs on v7x)
                 abs(steps - 6),          # ~6 steps sweet spot
                 -tm)                     # then larger tile
        if best is None or score < best[1]:
            best = (tm, score)
    return best[0] if best is not None else 64   # fallback -> padded path


@functools.partial(jax.jit, static_argnames=("tm", "eps", "out_dtype"))
def fused_forward(x464, x436, w4_bf16, b4_r, w5_bf16, b5_r,
                  *, tm=None, eps=1e-12, out_dtype=jnp.bfloat16):
    """x464, x436: (B, S, 768) -> (B, S, 3072)."""
    B, S, H = x464.shape
    Hout = w5_bf16.shape[1]
    M = B * S

    if tm is None:
        tm = _pick_tm(M)
    Mpad = -(-M // tm) * tm  # ceil to tile multiple (== M when tm | M)

    # x464 is only ever the bf16 LHS of the first matmul -> stream it as bf16.
    x464_2d = x464.reshape(M, H).astype(jnp.bfloat16)
    # Residual stays f32 so LayerNorm statistics match the f32 reference.
    x436_2d = x436.reshape(M, H).astype(jnp.float32)
    if Mpad != M:
        # Fallback only; _pick_tm prefers divisors of M so this path is not hit
        # in the common case (padding would round-trip both inputs through HBM).
        pad = Mpad - M
        x464_2d = jnp.pad(x464_2d, ((0, pad), (0, 0)))
        x436_2d = jnp.pad(x436_2d, ((0, pad), (0, 0)))

    resident = pl.BlockSpec(memory_space=pltpu.MemorySpace.VMEM)

    out_bytes = jnp.dtype(out_dtype).itemsize
    bytes_accessed = (
        Mpad * H * 2          # x464 (bf16)
        + Mpad * H * 4        # x436 (f32)
        + H * H * 2           # W4 (bf16)
        + H * 4               # b4
        + H * Hout * 2        # W5' (bf16)
        + Hout * 4            # b5'
        + Mpad * Hout * out_bytes  # output
    )
    cost = pl.CostEstimate(
        flops=2 * Mpad * H * (H + Hout) + 10 * Mpad * H,
        transcendentals=Mpad,            # rsqrt per row
        bytes_accessed=bytes_accessed,
    )

    out_2d = pl.pallas_call(
        functools.partial(_fused_kernel, eps=eps),
        out_shape=jax.ShapeDtypeStruct((Mpad, Hout), out_dtype),
        grid_spec=pltpu.PrefetchScalarGridSpec(
            num_scalar_prefetch=0,
            grid=(Mpad // tm,),
            in_specs=[
                pl.BlockSpec((tm, H), lambda i: (i, 0)),   # x464 tile (bf16, streamed)
                pl.BlockSpec((tm, H), lambda i: (i, 0)),   # x436 tile (f32, streamed)
                resident,                                  # W4 (bf16, single copy)
                resident,                                  # b4
                resident,                                  # W5' (bf16, gamma-folded)
                resident,                                  # b5' (beta-folded)
            ],
            out_specs=pl.BlockSpec((tm, Hout), lambda i: (i, 0)),
        ),
        compiler_params=pltpu.CompilerParams(
            dimension_semantics=("parallel",),
            vmem_limit_bytes=32 * 1024 * 1024,
        ),
        cost_estimate=cost,
    )(x464_2d, x436_2d, w4_bf16, b4_r, w5_bf16, b5_r)

    if Mpad != M:
        out_2d = out_2d[:M]
    return out_2d.reshape(B, S, Hout)


def _reference(x464, x436, w4, b4, gamma, beta, w5, b5, eps=1e-12):
    h = x464 @ w4 + b4
    y = x436 + h
    mean = jnp.mean(y, axis=-1, keepdims=True)
    var = jnp.mean((y - mean) ** 2, axis=-1, keepdims=True)
    yn = (y - mean) / jnp.sqrt(var + eps) * gamma + beta
    return yn @ w5 + b5


if __name__ == "__main__":
    B, S, H, HOUT = 1, 384, 768, 3072

    key = jax.random.PRNGKey(0)
    k_x464, k_x436, k_w4, k_b4, k_w5, k_b5 = jax.random.split(key, 6)

    x464 = jax.random.normal(k_x464, (B, S, H), dtype=jnp.float32)
    x436 = jax.random.normal(k_x436, (B, S, H), dtype=jnp.float32)

    # Deterministic parameter init (PyTorch-Linear-style uniform bounds).
    lim4 = 1.0 / jnp.sqrt(jnp.float32(H))
    w4 = jax.random.uniform(k_w4, (H, H), jnp.float32, -lim4, lim4)
    b4 = jax.random.uniform(k_b4, (H,), jnp.float32, -lim4, lim4)
    gamma = jnp.ones((H,), jnp.float32)
    beta = jnp.zeros((H,), jnp.float32)
    lim5 = 1.0 / jnp.sqrt(jnp.float32(H))
    w5 = jax.random.uniform(k_w5, (H, HOUT), jnp.float32, -lim5, lim5)
    b5 = jax.random.uniform(k_b5, (HOUT,), jnp.float32, -lim5, lim5)

    # One-time parameter prep (bf16 weights, LN affine folded into linear5).
    params = prepare_params(w4, b4, gamma, beta, w5, b5)

    out = fused_forward(x464, x436, *params)
    out = jax.block_until_ready(out)

    ref = _reference(x464, x436, w4, b4, gamma, beta, w5, b5)
    assert out.shape == (B, S, HOUT), out.shape
    # bf16 weights/activations on the MXU (f32 accumulation) and bf16 output
    # vs. the full f32 reference: allow bf16-class tolerance.
    err = jnp.max(jnp.abs(out.astype(jnp.float32) - ref))
    assert jnp.allclose(out.astype(jnp.float32), ref, atol=5e-2, rtol=5e-2), float(err)

    print("KERNEL_OK")
</pallas_src>

<mosaic_0001>
module attributes {stable_mosaic.version = 11 : i64} {
  func.func @_fused_kernel(%arg0: i32, %arg1: memref<64x768xbf16, #tpu.memory_space<vmem>>, %arg2: memref<64x768xf32, #tpu.memory_space<vmem>>, %arg3: memref<768x768xbf16, #tpu.memory_space<vmem>>, %arg4: memref<1x768xf32, #tpu.memory_space<vmem>>, %arg5: memref<768x3072xbf16, #tpu.memory_space<vmem>>, %arg6: memref<1x3072xf32, #tpu.memory_space<vmem>>, %arg7: memref<64x3072xbf16, #tpu.memory_space<vmem>>) attributes {dimension_semantics = [#tpu.dimension_semantics<parallel>], iteration_bounds = array<i64: 6>, scalar_prefetch = 0 : i64, scratch_operands = 0 : i64, tpu.core_type = #tpu.core_type<tc>, window_params = [{transform_indices = @transform_0, window_bounds = array<i64: 64, 768>}, {transform_indices = @transform_1, window_bounds = array<i64: 64, 768>}, {pipeline_mode = #tpu.pipeline_mode<synchronous>, transform_indices = @transform_2, window_bounds = array<i64: 768, 768>}, {pipeline_mode = #tpu.pipeline_mode<synchronous>, transform_indices = @transform_3, window_bounds = array<i64: 1, 768>}, {pipeline_mode = #tpu.pipeline_mode<synchronous>, transform_indices = @transform_4, window_bounds = array<i64: 768, 3072>}, {pipeline_mode = #tpu.pipeline_mode<synchronous>, transform_indices = @transform_5, window_bounds = array<i64: 1, 3072>}, {transform_indices = @transform_6, window_bounds = array<i64: 64, 3072>}]} {
    %c0 = arith.constant 0 : index
    %c0_0 = arith.constant 0 : index
    %0 = vector.load %arg1[%c0, %c0_0] : memref<64x768xbf16, #tpu.memory_space<vmem>>, vector<64x768xbf16>
    %c0_1 = arith.constant 0 : index
    %c0_2 = arith.constant 0 : index
    %1 = vector.load %arg3[%c0_1, %c0_2] : memref<768x768xbf16, #tpu.memory_space<vmem>>, vector<768x768xbf16>
    %cst = arith.constant dense<0.000000e+00> : vector<64x768xf32>
    %2 = tpu.matmul %0, %1, %cst {dimension_numbers = #tpu.dot_dimension_numbers<[1], [0], [0], [1], [0, 0, 1, 1], [], []>} : vector<64x768xbf16>, vector<768x768xbf16>, vector<64x768xf32> -> vector<64x768xf32>
    %c0_3 = arith.constant 0 : index
    %c0_4 = arith.constant 0 : index
    %3 = vector.load %arg4[%c0_3, %c0_4] : memref<1x768xf32, #tpu.memory_space<vmem>>, vector<1x768xf32>
    %4 = vector.broadcast %3 : vector<1x768xf32> to vector<64x768xf32>
    %5 = arith.addf %2, %4 : vector<64x768xf32>
    %c0_5 = arith.constant 0 : index
    %c0_6 = arith.constant 0 : index
    %6 = vector.load %arg2[%c0_5, %c0_6] : memref<64x768xf32, #tpu.memory_space<vmem>>, vector<64x768xf32>
    %7 = arith.addf %6, %5 : vector<64x768xf32>
    %cst_7 = arith.constant dense<0.000000e+00> : vector<64xf32>
    %8 = vector.multi_reduction <add>, %7, %cst_7 [1] : vector<64x768xf32> to vector<64xf32>
    %9 = vector.shape_cast %8 : vector<64xf32> to vector<64x1xf32>
    %cst_8 = arith.constant 7.680000e+02 : f32
    %10 = vector.broadcast %cst_8 : f32 to vector<64x1xf32>
    %11 = arith.divf %9, %10 : vector<64x1xf32>
    %12 = vector.broadcast %11 : vector<64x1xf32> to vector<64x768xf32>
    %13 = arith.subf %7, %12 : vector<64x768xf32>
    %14 = arith.mulf %13, %13 : vector<64x768xf32>
    %cst_9 = arith.constant dense<0.000000e+00> : vector<64xf32>
    %15 = vector.multi_reduction <add>, %14, %cst_9 [1] : vector<64x768xf32> to vector<64xf32>
    %16 = vector.shape_cast %15 : vector<64xf32> to vector<64x1xf32>
    %cst_10 = arith.constant 7.680000e+02 : f32
    %17 = vector.broadcast %cst_10 : f32 to vector<64x1xf32>
    %18 = arith.divf %16, %17 : vector<64x1xf32>
    %cst_11 = arith.constant 9.99999996E-13 : f32
    %19 = vector.broadcast %cst_11 : f32 to vector<64x1xf32>
    %20 = arith.addf %18, %19 : vector<64x1xf32>
    %21 = math.rsqrt %20 : vector<64x1xf32>
    %22 = vector.broadcast %21 : vector<64x1xf32> to vector<64x768xf32>
    %23 = arith.mulf %13, %22 : vector<64x768xf32>
    %24 = arith.truncf %23 : vector<64x768xf32> to vector<64x768xbf16>
    %c0_12 = arith.constant 0 : index
    %c0_13 = arith.constant 0 : index
    %25 = vector.load %arg5[%c0_12, %c0_13] : memref<768x3072xbf16, #tpu.memory_space<vmem>>, vector<768x3072xbf16>
    %cst_14 = arith.constant dense<0.000000e+00> : vector<64x3072xf32>
    %26 = tpu.matmul %24, %25, %cst_14 {dimension_numbers = #tpu.dot_dimension_numbers<[1], [0], [0], [1], [0, 0, 1, 1], [], []>} : vector<64x768xbf16>, vector<768x3072xbf16>, vector<64x3072xf32> -> vector<64x3072xf32>
    %c0_15 = arith.constant 0 : index
    %c0_16 = arith.constant 0 : index
    %27 = vector.load %arg6[%c0_15, %c0_16] : memref<1x3072xf32, #tpu.memory_space<vmem>>, vector<1x3072xf32>
    %28 = vector.broadcast %27 : vector<1x3072xf32> to vector<64x3072xf32>
    %29 = arith.addf %26, %28 : vector<64x3072xf32>
    %30 = arith.truncf %29 : vector<64x3072xf32> to vector<64x3072xbf16>
    %c0_17 = arith.constant 0 : index
    %c0_18 = arith.constant 0 : index
    %31 = vector.load %arg7[%c0_17, %c0_18] : memref<64x3072xbf16, #tpu.memory_space<vmem>>, vector<64x3072xbf16>
    tpu.vector_store %arg7[%c0_17, %c0_18], %30 {strides = array<i32>} : memref<64x3072xbf16, #tpu.memory_space<vmem>>, vector<64x3072xbf16>,
    return
  }
  func.func @transform_0(%arg0: i32) -> (i32, i32) {
    %c0_i32 = arith.constant 0 : i32
    %c0_i32_0 = arith.constant 0 : i32
    return %arg0, %c0_i32 : i32, i32
  }
  func.func @transform_1(%arg0: i32) -> (i32, i32) {
    %c0_i32 = arith.constant 0 : i32
    %c0_i32_0 = arith.constant 0 : i32
    return %arg0, %c0_i32 : i32, i32
  }
  func.func @transform_2(%arg0: i32) -> (i32, i32) {
    %c0_i32 = arith.constant 0 : i32
    %c0_i32_0 = arith.constant 0 : i32
    %c0_i32_1 = arith.constant 0 : i32
    return %c0_i32, %c0_i32_0 : i32, i32
  }
  func.func @transform_3(%arg0: i32) -> (i32, i32) {
    %c0_i32 = arith.constant 0 : i32
    %c0_i32_0 = arith.constant 0 : i32
    %c0_i32_1 = arith.constant 0 : i32
    return %c0_i32, %c0_i32_0 : i32, i32
  }
  func.func @transform_4(%arg0: i32) -> (i32, i32) {
    %c0_i32 = arith.constant 0 : i32
    %c0_i32_0 = arith.constant 0 : i32
    %c0_i32_1 = arith.constant 0 : i32
    return %c0_i32, %c0_i32_0 : i32, i32
  }
  func.func @transform_5(%arg0: i32) -> (i32, i32) {
    %c0_i32 = arith.constant 0 : i32
    %c0_i32_0 = arith.constant 0 : i32
    %c0_i32_1 = arith.constant 0 : i32
    return %c0_i32, %c0_i32_0 : i32, i32
  }
  func.func @transform_6(%arg0: i32) -> (i32, i32) {
    %c0_i32 = arith.constant 0 : i32
    %c0_i32_0 = arith.constant 0 : i32
    return %arg0, %c0_i32 : i32, i32
  }
}

</mosaic_0001>

<bundles_post_ra>
// kernel: fused_forward.1
= control target key start
LH: loop header
LB: loop body
LE: loop exit
PB: predicated region body
PF: predicated region fallthrough
CT: control target
= control target key end

     0   :  { %11 = vsyncpa [#allocation3], 0  ;;  %s18813_s0 = inlined_call_operand.vmem [shape: bf16[384,768], index: 0, kind: input, shape index: {}]   ;;  %s18814_s1 = inlined_call_operand.vmem [shape: f32[384,768], index: 1, kind: input, shape index: {}]   ;;  %s18815_s2 = inlined_call_operand.hbm [shape: bf16[768,768], index: 2, kind: input, shape index: {}]   ;;  %s18816_s3 = inlined_call_operand.vmem [shape: f32[1,768], index: 3, kind: input, shape index: {}]   ;;  %s18817_s4 = inlined_call_operand.hbm [shape: bf16[768,3072], index: 4, kind: input, shape index: {}]   ;;  %s18818_s5 = inlined_call_operand.vmem [shape: f32[1,3072], index: 5, kind: input, shape index: {}]   ;;  %s18819_s6 = inlined_call_operand.hbm [shape: bf16[384,3072], index: 6, kind: output, shape index: {}]  }
   0x1   :  { %12 = vsyncpa [#allocation6], 0 }
   0x2   :  { %13 = vsyncpa [#allocation4], 0 }
   0x3   :  { %15 = vsyncpa [#allocation4 + $0x1], 0  ;;  %s16894_s21 = smov 0   ;;  %s16896_s22 = smov 0  }
   0x4   :  { %s16898_s23 = smov 0   ;;  %s16900_s24 = smov 0  }
   0x5 LB: > { %s16915_s25 = sadd.s32 4294967295, %s16848_s24   ;;  %s13730_s26 = sadd.s32 4294967294, %s16848_s24   ;;  %s16848_s24 = sphi %s16900_s24, %s18923_s24   ;;  %s16844_s23 = sphi %s16898_s23, %s18922_s23   ;;  %s16840_s22 = sphi %s16896_s22, %s18921_s22   ;;  %s16836_s21 = sphi %s16894_s21, %s18920_s21  }
   0x6   : > { %s16919_s27 = sadd.s32 1, %s16848_s24   ;;  %s164_s28 = sadd.s32 1, %s16844_s23 }
   0x7   : > { %s161_s29 = ssub.s32 %s16848_s24, %s16919_s27  ;;  %p174_p0 = scmp.ne.s32.totalorder %s16844_s23, %s16840_s22 }
   0x8   : > { %p162_p1 = scmp.eq.s32.totalorder %s161_s29, 0  ;;  %p175_p2 = scmp.eq.s32.totalorder %s16915_s25, 5 }
   0x9   : > { %p180_p3 = scmp.ne.s32.totalorder %s16840_s22, %s16836_s21  ;;  %p181_p4 = scmp.eq.s32.totalorder %s13730_s26, 5 }
   0xa   : > { %s16930_s30 = scalar_select %p162_p1, %s16844_s23, %s164_s28  }
   0xb   : > { %p16932_p5 = por %p175_p2, %p174_p0  ;;  %p16936_p6 = por %p181_p4, %p180_p3 }
   0xc   : > { %p13731_p7 = scmp.ge.s32.totalorder %s16848_s24, 1  ;;  %p188_p8 = scmp.lt.s32.totalorder %s16848_s24, 7 }
   0xd   : > { %s18857_s7 = scalar_select %p16932_p5, 1, 0 }
   0xe   : > { %s18858_s8 = scalar_select %p16936_p6, 1, 0 }
   0xf   : > { %p18820_p9 = scmp.eq.s32.totalorder %s16915_s25, 0  ;;  %p16943_p10 = pnand %p13731_p7, %p188_p8 }
  0x10   : > { %s16850_s10 = smov [#allocation2]   ;;  %s16851_s13 = smov [#allocation5]  }
  0x11   : > { %s18859_s9 = scalar_select %p16943_p10, 1, 0 }
  0x12   : > { %s200_s11 = sshll.u32 %s16850_s10, 4  ;;  %p16169_p11 = pneg %p16943_p10  ;;  %s201_s11 = int_to_ptr.vmem [resolvable:$true] %s200_s11 }
  0x13   : > { %s216_s14 = sshll.u32 %s16851_s13, 4  ;;  %s16722_s17 = scalar_lea.hbm %s18815_s2, 36864  ;;  %s16955_s14 = int_to_ptr.vmem [resolvable:$true] %s216_s14 }
  0x14   : > { %p16951_p12 = pnand %p18820_p9, %p16169_p11  ;;  %p16723_p13 = scmp.ne.s32.totalorder %s18815_s2, %s16722_s17 }
  0x15   : > { %p16729_p3 = scmp.lt.u32.totalorder %s16722_s17, %s18815_s2 }
  0x16   : > { %p16724_p0 = pneg %p16951_p12 }
  0x18   : > { %p16725_p1 = pnand %p16724_p0, %p16723_p13 }
  0x1a   : > { %p16726_p2 = pneg %p16725_p1 }
  0x1c   : > { %p16731_p4 = pnand %p16729_p3, %p16726_p2 }
  0x1e   : > { %16734 = shalt.err (!%p16731_p4)
}
  0x1f   : > { %s16735_s28 = scalar_lea.vmem %s201_s11, 36864  ;;  %p16743_p9 = scmp.lt.s32.totalorder %s201_s11, %s201_s11 }
  0x20   : > { %p16736_p7 = scmp.ne.s32.totalorder %s201_s11, %s16735_s28  ;;  %p16744_p6 = scmp.lt.s32.totalorder %s16735_s28, %s16735_s28 }
  0x22   : > { %p16738_p8 = pnand %p16736_p7, %p16724_p0  ;;  %p16745_p5 = por %p16744_p6, %p16743_p9 }
  0x24   : > { %p16739_p11 = pneg %p16738_p8 }
  0x26   : > { %p16746_p10 = pnand %p16745_p5, %p16739_p11 }
  0x28   : > { %16749 = shalt.err (!%p16746_p10)
}
  0x29   : > { %s16852_s29 = smov 384   ;;  %s16853_s10 = smov 24  }
  0x2a   : > { %16172 = dma.hbm_to_vmem [thread:$0]  (!%p16951_p12), %s18815_s2, 36864, %s201_s11, [#allocation3], %s16852_s29, %s16852_s29, %s16853_s10  }
  0x2b   : > { %s16750_s18 = scalar_lea.hbm %s18817_s4, 147456 }
  0x2c   : > { %p16751_p13 = scmp.ne.s32.totalorder %s18817_s4, %s16750_s18  ;;  %p16757_p9 = scmp.lt.u32.totalorder %s16750_s18, %s18817_s4 }
  0x2e   : > { %p16753_p5 = pnand %p16751_p13, %p16724_p0 }
  0x30   : > { %p16754_p6 = pneg %p16753_p5 }
  0x32   : > { %p16759_p10 = pnand %p16757_p9, %p16754_p6 }
  0x34   : > { %16762 = shalt.err (!%p16759_p10)
}
  0x35   : > { %s16763_s11 = scalar_lea.vmem %s16955_s14, 147456  ;;  %p16771_p4 = scmp.lt.s32.totalorder %s16955_s14, %s16955_s14 }
  0x36   : > { %p16764_p1 = scmp.ne.s32.totalorder %s16955_s14, %s16763_s11  ;;  %p16772_p7 = scmp.lt.s32.totalorder %s16763_s11, %s16763_s11 }
  0x38   : > { %p16766_p2 = pnand %p16764_p1, %p16724_p0  ;;  %p16773_p8 = por %p16772_p7, %p16771_p4 }
  0x3a   : > { %p16767_p3 = pneg %p16766_p2 }
  0x3c   : > { %p16774_p11 = pnand %p16773_p8, %p16767_p3 }
  0x3e   : > { %16777 = shalt.err (!%p16774_p11)
}
  0x3f   : > { %s16854_s29 = smov 1536   ;;  %s16855_s10 = smov 96  }
  0x40   : > { %16175 = dma.hbm_to_vmem [thread:$0]  (!%p16951_p12), %s18817_s4, 147456, %s16955_s14, [#allocation6], %s16854_s29, %s16854_s29, %s16855_s10  }
  0x41   : > { %p18861_p13 = scmp.ne.s32.totalorder %s18859_s9, 0 }
  0x43   : > { %255 = sbr.rel (%p18861_p13) target bundleno = 2359 (0x937), region = 44 }
  0x4a   : > { %p18862_p0 = scmp.eq.s32.totalorder %s16915_s25, 0 }
  0x4c   : > { %16823 = dma.done.wait (%p18862_p0), [#allocation3], 36864   ;;  %p18863_p5 = pmov %p18862_p0 }
  0x4d   : > { %p18864_p6 = pmov %p18862_p0 }
  0x4e   : > { %16825 = vsyncadd (%p18863_p5), [#allocation3], 4294930432 }
  0x4f   : > { %16827 = dma.done.wait (%p18864_p6), [#allocation6], 147456   ;;  %p18865_p9 = pmov %p18862_p0 }
  0x50   : > { %v16225_v0 = vld [vmem:[#allocation2 + $0x4] ss:$24 sps:$4 sm:$0xff]   ;;  %v16229_v2 = vld [vmem:[#allocation2] ss:$24 sps:$4 sm:$0xff]   ;;  %v16231_v4 = vld [vmem:[#allocation2 + $0x34] ss:$24 sps:$4 sm:$0xff]  }
  0x51   : > { %16829 = vsyncadd (%p18865_p9), [#allocation6], 4294819840  ;;  %v16227_v1 = vld [vmem:[#allocation2 + $0x304] ss:$24 sps:$4 sm:$0xff]   ;;  %2215 = vmatprep.subr.bf16.mxu1 %v16225_v0  ;;  %v16230_v3 = vld [vmem:[#allocation2 + $0x300] ss:$24 sps:$4 sm:$0xff]  }
  0x52   : > { %2288 = vmatprep.subr.bf16.mxu0 %v16227_v1  ;;  %2216 = vmatpush1.bf16.msra.mxu1 %v16229_v2  ;;  %v16233_v5 = vld [vmem:[#allocation2 + $0x334] ss:$24 sps:$4 sm:$0xff]   ;;  %v16235_v6 = vld [vmem:[#allocation2 + $0x30] ss:$24 sps:$4 sm:$0xff]   ;;  %v16237_v8 = vld [vmem:[#allocation2 + $0x64] ss:$24 sps:$4 sm:$0xff]  }
  0x53   : > { %2289 = vmatpush1.bf16.msra.mxu0 %v16230_v3  ;;  %2217 = vmatprep.subr.bf16.mxu1 %v16231_v4  ;;  %v16236_v7 = vld [vmem:[#allocation2 + $0x330] ss:$24 sps:$4 sm:$0xff]   ;;  %v16239_v9 = vld [vmem:[#allocation2 + $0x364] ss:$24 sps:$4 sm:$0xff]   ;;  %v16241_v10 = vld [vmem:[#allocation2 + $0x60] ss:$24 sps:$4 sm:$0xff]  }
  0x54   : > { %2290 = vmatprep.subr.bf16.mxu0 %v16233_v5  ;;  %v16242_v11 = vld [vmem:[#allocation2 + $0x360] ss:$24 sps:$4 sm:$0xff]   ;;  %v16243_v12 = vld [vmem:[#allocation2 + $0x94] ss:$24 sps:$4 sm:$0xff]   ;;  %v16247_v14 = vld [vmem:[#allocation2 + $0x90] ss:$24 sps:$4 sm:$0xff]  }
  0x55   : > { %v16245_v13 = vld [vmem:[#allocation2 + $0x394] ss:$24 sps:$4 sm:$0xff]   ;;  %v16248_v15 = vld [vmem:[#allocation2 + $0x390] ss:$24 sps:$4 sm:$0xff]   ;;  %v16249_v16 = vld [vmem:[#allocation2 + $0xc4] ss:$24 sps:$4 sm:$0xff]  }
  0x56   : > { %2218 = vmatpush1.bf16.msra.mxu1 %v16235_v6  ;;  %v16251_v17 = vld [vmem:[#allocation2 + $0x3c4] ss:$24 sps:$4 sm:$0xff]   ;;  %v16253_v18 = vld [vmem:[#allocation2 + $0xc0] ss:$24 sps:$4 sm:$0xff]   ;;  %v16255_v20 = vld [vmem:[#allocation2 + $0xf4] ss:$24 sps:$4 sm:$0xff]  }
  0x57   : > { %2291 = vmatpush1.bf16.msra.mxu0 %v16236_v7  ;;  %2219 = vmatprep.subr.bf16.mxu1 %v16237_v8  ;;  %v16254_v19 = vld [vmem:[#allocation2 + $0x3c0] ss:$24 sps:$4 sm:$0xff]   ;;  %v16257_v21 = vld [vmem:[#allocation2 + $0x3f4] ss:$24 sps:$4 sm:$0xff]   ;;  %v16259_v22 = vld [vmem:[#allocation2 + $0xf0] ss:$24 sps:$4 sm:$0xff]  }
  0x58   : > { %2292 = vmatprep.subr.bf16.mxu0 %v16239_v9  ;;  %v16260_v23 = vld [vmem:[#allocation2 + $0x3f0] ss:$24 sps:$4 sm:$0xff]   ;;  %v16261_v24 = vld [vmem:[#allocation2 + $0x124] ss:$24 sps:$4 sm:$0xff]   ;;  %v16265_v26 = vld [vmem:[#allocation2 + $0x120] ss:$24 sps:$4 sm:$0xff]  }
  0x59   : > { %v16263_v25 = vld [vmem:[#allocation2 + $0x424] ss:$24 sps:$4 sm:$0xff]   ;;  %v16266_v27 = vld [vmem:[#allocation2 + $0x420] ss:$24 sps:$4 sm:$0xff]   ;;  %v16267_v28 = vld [vmem:[#allocation2 + $0x154] ss:$24 sps:$4 sm:$0xff]  }
  0x5a   : > { %2220 = vmatpush1.bf16.msra.mxu1 %v16241_v10  ;;  %v16269_v29 = vld [vmem:[#allocation2 + $0x454] ss:$24 sps:$4 sm:$0xff]   ;;  %s13738_s9 = sshll.u32 %s16915_s25, 3  ;;  %v16271_v30 = vld [vmem:[#allocation2 + $0x150] ss:$24 sps:$4 sm:$0xff]   ;;  %s293_s13 = sand.u32 1, %s16840_s22  }
  0x5b   : > { %2293 = vmatpush1.bf16.msra.mxu0 %v16242_v11  ;;  %2221 = vmatprep.subr.bf16.mxu1 %v16243_v12  ;;  %v16272_v31 = vld [vmem:[#allocation2 + $0x450] ss:$24 sps:$4 sm:$0xff]   ;;  %v16273_v32 = vld [vmem:[#allocation2 + $0x184] ss:$24 sps:$4 sm:$0xff]   ;;  %p297_p12 = scmp.lt.s32.totalorder %s13738_s9, 47  ;;  %s18023_s15 = smul.u32 768, %s293_s13 }
  0x5c   : > { %2294 = vmatprep.subr.bf16.mxu0 %v16245_v13  ;;  %v16275_v33 = vld [vmem:[#allocation2 + $0x484] ss:$24 sps:$4 sm:$0xff]   ;;  %v16277_v34 = vld [vmem:[#allocation2 + $0x180] ss:$24 sps:$4 sm:$0xff]   ;;  %v16279_v36 = vld [vmem:[#allocation2 + $0x1b4] ss:$24 sps:$4 sm:$0xff]  }
  0x5d   : > { %v16278_v35 = vld [vmem:[#allocation2 + $0x480] ss:$24 sps:$4 sm:$0xff]   ;;  %s18925_s9 = smov (!%p297_p12, %s13738_s9), 47  ;;  %v16281_v37 = vld [vmem:[#allocation2 + $0x4b4] ss:$24 sps:$4 sm:$0xff]   ;;  %s16158_s28 = smul.u32 12288, %s16915_s25 }
  0x5e   : > { %2222 = vmatpush1.bf16.msra.mxu1 %v16247_v14  ;;  %v16283_v38 = vld [vmem:[#allocation2 + $0x1b0] ss:$24 sps:$4 sm:$0xff]   ;;  %v16285_v40 = vld [vmem:[#allocation2 + $0x1e4] ss:$24 sps:$4 sm:$0xff]   ;;  %s16156_s12 = smul.u32 24, %s18925_s9  ;;  %s18772_s25 = scalar_lea.sflag [#allocation4], %s293_s13 }
  0x5f   : > { %2295 = vmatpush1.bf16.msra.mxu0 %v16248_v15  ;;  %2223 = vmatprep.subr.bf16.mxu1 %v16249_v16  ;;  %v16284_v39 = vld [vmem:[#allocation2 + $0x4b0] ss:$24 sps:$4 sm:$0xff]   ;;  %v16287_v41 = vld [vmem:[#allocation2 + $0x4e4] ss:$24 sps:$4 sm:$0xff]   ;;  %v16289_v42 = vld [vmem:[#allocation2 + $0x1e0] ss:$24 sps:$4 sm:$0xff]  }
  0x60   : > { %2296 = vmatprep.subr.bf16.mxu0 %v16251_v17  ;;  %v16290_v43 = vld [vmem:[#allocation2 + $0x4e0] ss:$24 sps:$4 sm:$0xff]   ;;  %v16291_v44 = vld [vmem:[#allocation2 + $0x214] ss:$24 sps:$4 sm:$0xff]   ;;  %s17021_s17 = scalar_lea.vmem %s18813_s0, %s16156_s12  ;;  %v16295_v46 = vld [vmem:[#allocation2 + $0x210] ss:$24 sps:$4 sm:$0xff]  }
  0x61   : > { %v16293_v45 = vld [vmem:[#allocation2 + $0x514] ss:$24 sps:$4 sm:$0xff]   ;;  %v16296_v47 = vld [vmem:[#allocation2 + $0x510] ss:$24 sps:$4 sm:$0xff]   ;;  %v17024_v48 = vld [vmem:[%s17021_s17 + $0x4] ss:$24 sps:$4 sm:$0xff]  }
  0x62   : > { %2224 = vmatpush1.bf16.msra.mxu1 %v16253_v18  ;;  %v17027_v49 = vld [vmem:[%s17021_s17 + $0xc] ss:$24 sps:$4 sm:$0xff]   ;;  %2247 = vmatprep.mubr.bf16.mxu1 %v17024_v48  ;;  %v16301_v52 = vld [vmem:[#allocation2 + $0x240] ss:$24 sps:$4 sm:$0xff]   ;;  %v16307_v56 = vld [vmem:[#allocation2 + $0x270] ss:$24 sps:$4 sm:$0xff]  }
  0x63   : > { %2297 = vmatpush1.bf16.msra.mxu0 %v16254_v19  ;;  %2225 = vmatprep.subr.bf16.mxu1 %v16255_v20  ;;  %v16297_v50 = vld [vmem:[#allocation2 + $0x244] ss:$24 sps:$4 sm:$0xff]   ;;  %v16302_v53 = vld [vmem:[#allocation2 + $0x540] ss:$24 sps:$4 sm:$0xff]   ;;  %v16303_v54 = vld [vmem:[#allocation2 + $0x274] ss:$24 sps:$4 sm:$0xff]  }
  0x64   : > { %2298 = vmatprep.subr.bf16.mxu0 %v16257_v21  ;;  %v16299_v51 = vld [vmem:[#allocation2 + $0x544] ss:$24 sps:$4 sm:$0xff]   ;;  %2320 = vmatprep.mubr.bf16.mxu0 %v17027_v49  ;;  %v16305_v55 = vld [vmem:[#allocation2 + $0x574] ss:$24 sps:$4 sm:$0xff]   ;;  %v16308_v57 = vld [vmem:[#allocation2 + $0x570] ss:$24 sps:$4 sm:$0xff]  }
  0x65   : > { %v16309_v58 = vld [vmem:[#allocation2 + $0x2a4] ss:$24 sps:$4 sm:$0xff]   ;;  %v16313_v60 = vld [vmem:[#allocation2 + $0x2a0] ss:$24 sps:$4 sm:$0xff]   ;;  %v16315_v62 = vld [vmem:[#allocation2 + $0x2d4] ss:$24 sps:$4 sm:$0xff]  }
  0x66   : > { %2226 = vmatpush1.bf16.msra.mxu1 %v16259_v22  ;;  %v16311_v59 = vld [vmem:[#allocation2 + $0x5a4] ss:$24 sps:$4 sm:$0xff]   ;;  %v16314_v61 = vld [vmem:[#allocation2 + $0x5a0] ss:$24 sps:$4 sm:$0xff]   ;;  %v16317_v63 = vld [vmem:[#allocation2 + $0x5d4] ss:$24 sps:$4 sm:$0xff]  }
  0x67   : > { %2299 = vmatpush1.bf16.msra.mxu0 %v16260_v23  ;;  %2227 = vmatprep.subr.bf16.mxu1 %v16261_v24  ;;  %v16319_v0 = vld [vmem:[#allocation2 + $0x2d0] ss:$24 sps:$4 sm:$0xff]   ;;  %v16327_v2 = vld [vmem:[#allocation2 + $0x604] ss:$24 sps:$4 sm:$0xff]   ;;  %v16325_v4 = vld [vmem:[#allocation2 + $0x600] ss:$24 sps:$4 sm:$0xff]  }
  0x68   : > { %2300 = vmatprep.subr.bf16.mxu0 %v16263_v25  ;;  %v16320_v1 = vld [vmem:[#allocation2 + $0x5d0] ss:$24 sps:$4 sm:$0xff]   ;;  %v16330_v3 = vld [vmem:[#allocation2 + $0xc] ss:$24 sps:$4 sm:$0xff]   ;;  %v17032_v6 = vld [vmem:[%s17021_s17] ss:$24 sps:$4 sm:$0xff]  }
  0x69   : > { %v16328_v5 = vld [vmem:[#allocation2 + $0x8] ss:$24 sps:$4 sm:$0xff]   ;;  %v16335_v8 = vld [vmem:[#allocation2 + $0x634] ss:$24 sps:$4 sm:$0xff]   ;;  %v16336_v11 = vld [vmem:[#allocation2 + $0x38] ss:$24 sps:$4 sm:$0xff]  }
  0x6a   : > { %2228 = vmatpush1.bf16.msra.mxu1 %v16265_v26  ;;  %v16332_v7 = vld [vmem:[%s17021_s17 + $0x8] ss:$24 sps:$4 sm:$0xff]   ;;  %v16338_v9 = vld [vmem:[#allocation2 + $0x3c] ss:$24 sps:$4 sm:$0xff]   ;;  %v16344_v13 = vld [vmem:[#allocation2 + $0x6c] ss:$24 sps:$4 sm:$0xff]  }
  0x6b   : > { %2301 = vmatpush1.bf16.msra.mxu0 %v16266_v27  ;;  %2229 = vmatprep.subr.bf16.mxu1 %v16267_v28  ;;  %v16333_v10 = vld [vmem:[#allocation2 + $0x630] ss:$24 sps:$4 sm:$0xff]   ;;  %v16341_v12 = vld [vmem:[#allocation2 + $0x664] ss:$24 sps:$4 sm:$0xff]   ;;  %v16339_v14 = vld [vmem:[#allocation2 + $0x660] ss:$24 sps:$4 sm:$0xff]  }
  0x6c   : > { %2302 = vmatprep.subr.bf16.mxu0 %v16269_v29  ;;  %v16342_v15 = vld [vmem:[#allocation2 + $0x68] ss:$24 sps:$4 sm:$0xff]   ;;  %v16347_v16 = vld [vmem:[#allocation2 + $0x694] ss:$24 sps:$4 sm:$0xff]   ;;  %v17044_v20 = vld [vmem:[%s17021_s17 + $0x38] ss:$24 sps:$4 sm:$0xff]  }
  0x6d   : > { %v16350_v17 = vld [vmem:[#allocation2 + $0x9c] ss:$24 sps:$4 sm:$0xff]   ;;  %v16345_v21 = vld [vmem:[#allocation2 + $0x690] ss:$24 sps:$4 sm:$0xff]   ;;  %v16356_v24 = vld [vmem:[#allocation2 + $0xcc] ss:$24 sps:$4 sm:$0xff]  }
  0x6e   : > { %2230 = vmatpush1.bf16.msra.mxu1 %v16271_v30  ;;  %v17037_v18 = vld [vmem:[%s17021_s17 + $0x3c] ss:$24 sps:$4 sm:$0xff]   ;;  %v16348_v22 = vld [vmem:[#allocation2 + $0x98] ss:$24 sps:$4 sm:$0xff]   ;;  %v16354_v27 = vld [vmem:[#allocation2 + $0xc8] ss:$24 sps:$4 sm:$0xff]  }
  0x6f   : > { %2303 = vmatpush1.bf16.msra.mxu0 %v16272_v31  ;;  %2231 = vmatprep.subr.bf16.mxu1 %v16273_v32  ;;  %v17040_v19 = vld [vmem:[%s17021_s17 + $0x34] ss:$24 sps:$4 sm:$0xff]   ;;  %v16353_v23 = vld [vmem:[#allocation2 + $0x6c4] ss:$24 sps:$4 sm:$0xff]   ;;  %v17048_v25 = vld [vmem:[%s17021_s17 + $0x30] ss:$24 sps:$4 sm:$0xff]  }
  0x70   : > { %2304 = vmatprep.subr.bf16.mxu0 %v16275_v33  ;;  %v16351_v26 = vld [vmem:[#allocation2 + $0x6c0] ss:$24 sps:$4 sm:$0xff]   ;;  %v16359_v28 = vld [vmem:[#allocation2 + $0x6f4] ss:$24 sps:$4 sm:$0xff]   ;;  %v17056_v31 = vld [vmem:[%s17021_s17 + $0x64] ss:$24 sps:$4 sm:$0xff]  }
  0x71   : > { %v16362_v29 = vld [vmem:[#allocation2 + $0xfc] ss:$24 sps:$4 sm:$0xff]   ;;  %v17053_v30 = vld [vmem:[%s17021_s17 + $0x6c] ss:$24 sps:$4 sm:$0xff]   ;;  %v17060_v32 = vld [vmem:[%s17021_s17 + $0x68] ss:$24 sps:$4 sm:$0xff]  }
  0x72   : > { %2232 = vmatpush1.bf16.msra.mxu1 %v16277_v34  ;;  %v16357_v33 = vld [vmem:[#allocation2 + $0x6f0] ss:$24 sps:$4 sm:$0xff]   ;;  %s16157_s20 = smul.u32 48, %s18925_s9  ;;  %s18044_s9 = scalar_lea.vmem [#allocation7], %s18023_s15 }
  0x73   : > { %2305 = vmatpush1.bf16.msra.mxu0 %v16278_v35  ;;  %2233 = vmatprep.subr.bf16.mxu1 %v16279_v36  ;;  %v16360_v34 = vld [vmem:[#allocation2 + $0xf8] ss:$24 sps:$4 sm:$0xff]   ;;  %v16365_v35 = vld [vmem:[#allocation2 + $0x724] ss:$24 sps:$4 sm:$0xff]   ;;  %s18764_s15 = scalar_lea.hbm %s18819_s6, %s16158_s28  ;;  %p18918_p1 = scmp.ne.s32.totalorder %s18857_s7, 0 }
  0x74   : > { %2306 = vmatprep.subr.bf16.mxu0 %v16281_v37  ;;  %v16368_v36 = vld [vmem:[#allocation2 + $0x12c] ss:$24 sps:$4 sm:$0xff]   ;;  %v17064_v37 = vld [vmem:[%s17021_s17 + $0x60] ss:$24 sps:$4 sm:$0xff]   ;;  %s17221_s11 = scalar_lea.vmem %s18814_s1, %s16157_s20  ;;  %s16856_s14 = smov [#allocation7]  }
  0x75   : > { %s16782_s16 = sshll.u32 %s16856_s14, 4  ;;  %s16783_s16 = int_to_ptr.vmem [resolvable:$false] %s16782_s16 }
  0x76   : > { %2234 = vmatpush1.bf16.msra.mxu1 %v16283_v38  ;;  %v16363_v38 = vld [vmem:[#allocation2 + $0x720] ss:$24 sps:$4 sm:$0xff]  }
  0x77   : > { %2307 = vmatpush1.bf16.msra.mxu0 %v16284_v39  ;;  %2235 = vmatprep.subr.bf16.mxu1 %v16285_v40  ;;  %v16366_v39 = vld [vmem:[#allocation2 + $0x128] ss:$24 sps:$4 sm:$0xff]   ;;  %v16371_v40 = vld [vmem:[#allocation2 + $0x754] ss:$24 sps:$4 sm:$0xff]  }
  0x78   : > { %2308 = vmatprep.subr.bf16.mxu0 %v16287_v41  ;;  %v16374_v41 = vld [vmem:[#allocation2 + $0x15c] ss:$24 sps:$4 sm:$0xff]  }
  0x7a   : > { %2236 = vmatpush1.bf16.msra.mxu1 %v16289_v42  ;;  %v17069_v42 = vld [vmem:[%s17021_s17 + $0x9c] ss:$24 sps:$4 sm:$0xff]  }
  0x7b   : > { %2309 = vmatpush1.bf16.msra.mxu0 %v16290_v43  ;;  %2237 = vmatprep.subr.bf16.mxu1 %v16291_v44  ;;  %v17072_v43 = vld [vmem:[%s17021_s17 + $0x94] ss:$24 sps:$4 sm:$0xff]   ;;  %v17076_v44 = vld [vmem:[%s17021_s17 + $0x98] ss:$24 sps:$4 sm:$0xff]  }
  0x7c   : > { %2310 = vmatprep.subr.bf16.mxu0 %v16293_v45  ;;  %v16369_v45 = vld [vmem:[#allocation2 + $0x750] ss:$24 sps:$4 sm:$0xff]  }
  0x7e   : > { %2238 = vmatpush1.bf16.msra.mxu1 %v16295_v46  ;;  %v16372_v46 = vld [vmem:[#allocation2 + $0x158] ss:$24 sps:$4 sm:$0xff]  }
  0x7f   : > { %2311 = vmatpush1.bf16.msra.mxu0 %v16296_v47  ;;  %2239 = vmatprep.subr.bf16.mxu1 %v16297_v50  ;;  %v16377_v47 = vld [vmem:[#allocation2 + $0x784] ss:$24 sps:$4 sm:$0xff]  }
  0x80   : > { %2312 = vmatprep.subr.bf16.mxu0 %v16299_v51  ;;  %v16380_v50 = vld [vmem:[#allocation2 + $0x18c] ss:$24 sps:$4 sm:$0xff]   ;;  %v17080_v51 = vld [vmem:[%s17021_s17 + $0x90] ss:$24 sps:$4 sm:$0xff]  }
  0x82   : > { %2240 = vmatpush1.bf16.msra.mxu1 %v16301_v52  ;;  %v16375_v52 = vld [vmem:[#allocation2 + $0x780] ss:$24 sps:$4 sm:$0xff]  }
  0x83   : > { %2313 = vmatpush1.bf16.msra.mxu0 %v16302_v53  ;;  %2241 = vmatprep.subr.bf16.mxu1 %v16303_v54  ;;  %v16378_v53 = vld [vmem:[#allocation2 + $0x188] ss:$24 sps:$4 sm:$0xff]   ;;  %v16383_v54 = vld [vmem:[#allocation2 + $0x7b4] ss:$24 sps:$4 sm:$0xff]  }
  0x84   : > { %2314 = vmatprep.subr.bf16.mxu0 %v16305_v55  ;;  %v16386_v55 = vld [vmem:[#allocation2 + $0x1bc] ss:$24 sps:$4 sm:$0xff]  }
  0x86   : > { %2242 = vmatpush1.bf16.msra.mxu1 %v16307_v56  ;;  %v17085_v56 = vld [vmem:[%s17021_s17 + $0x14] ss:$24 sps:$4 sm:$0xff]  }
  0x87   : > { %2315 = vmatpush1.bf16.msra.mxu0 %v16308_v57  ;;  %2243 = vmatprep.subr.bf16.mxu1 %v16309_v58  ;;  %v16381_v57 = vld [vmem:[#allocation2 + $0x7b0] ss:$24 sps:$4 sm:$0xff]  }
  0x88   : > { %2316 = vmatprep.subr.bf16.mxu0 %v16311_v59  ;;  %v16384_v58 = vld [vmem:[#allocation2 + $0x1b8] ss:$24 sps:$4 sm:$0xff]   ;;  %v16394_v59 = vld [vmem:[#allocation2 + $0x7e4] ss:$24 sps:$4 sm:$0xff]  }
  0x8a   : > { %2244 = vmatpush1.bf16.msra.mxu1 %v16313_v60  ;;  %v16397_v60 = vld [vmem:[#allocation2 + $0x1ec] ss:$24 sps:$4 sm:$0xff]  }
  0x8b   : > { %2317 = vmatpush1.bf16.msra.mxu0 %v16314_v61  ;;  %2245 = vmatprep.subr.bf16.mxu1 %v16315_v62  ;;  %v16392_v61 = vld [vmem:[#allocation2 + $0x7e0] ss:$24 sps:$4 sm:$0xff]  }
  0x8c   : > { %2318 = vmatprep.subr.bf16.mxu0 %v16317_v63  ;;  %v16395_v62 = vld [vmem:[#allocation2 + $0x1e8] ss:$24 sps:$4 sm:$0xff]   ;;  %v16401_v63 = vld [vmem:[#allocation2 + $0x814] ss:$24 sps:$4 sm:$0xff]  }
  0x8e   : > { %2246 = vmatpush1.bf16.msra.mxu1 %v16319_v0  ;;  %v16404_v0 = vld [vmem:[#allocation2 + $0x21c] ss:$24 sps:$4 sm:$0xff]  }
  0x8f   : > { %2319 = vmatpush1.bf16.msra.mxu0 %v16320_v1  ;;  %2434 = vmatprep.subr.bf16.mxu1 %v16330_v3  ;;  %v16399_v1 = vld [vmem:[#allocation2 + $0x810] ss:$24 sps:$4 sm:$0xff]   ;;  %v16412_v3 = vld [vmem:[#allocation2 + $0x844] ss:$24 sps:$4 sm:$0xff]  }
  0x90   : > { %2361 = vmatprep.subr.bf16.mxu0 %v16327_v2  ;;  %v16402_v2 = vld [vmem:[#allocation2 + $0x218] ss:$24 sps:$4 sm:$0xff]  }
  0x91   : > { %2248 = vmatmul.mubr.bf16.vlgmr.msra.gmra.mrb[0].mxu1 %v17032_v6 }
  0x92   : > { %2321 = vmatmul.mubr.bf16.vlgmr.msra.gmra.mrb[0].mxu0 %v16332_v7  ;;  %2435 = vmatpush1.bf16.msra.mxu1 %v16328_v5  ;;  %v16410_v5 = vld [vmem:[#allocation2 + $0x840] ss:$24 sps:$4 sm:$0xff]  }
  0x93   : > { %2362 = vmatpush1.bf16.msra.mxu0 %v16325_v4  ;;  %2436 = vmatprep.subr.bf16.mxu1 %v16338_v9  ;;  %v16415_v4 = vld [vmem:[#allocation2 + $0x24c] ss:$24 sps:$4 sm:$0xff]   ;;  %v16413_v7 = vld [vmem:[#allocation2 + $0x248] ss:$24 sps:$4 sm:$0xff]   ;;  %v16422_v9 = vld [vmem:[#allocation2 + $0x27c] ss:$24 sps:$4 sm:$0xff]  }
  0x94   : > { %2363 = vmatprep.subr.bf16.mxu0 %v16335_v8  ;;  %2330 = vmatprep.mubr.bf16.mxu0 %v17037_v18  ;;  %v16419_v8 = vld [vmem:[#allocation2 + $0x874] ss:$24 sps:$4 sm:$0xff]  }
  0x95   : > { %2257 = vmatprep.mubr.bf16.mxu1 %v17040_v19 }
  0x96   : > { %2437 = vmatpush1.bf16.msra.mxu1 %v16336_v11  ;;  %v16420_v11 = vld [vmem:[#allocation2 + $0x278] ss:$24 sps:$4 sm:$0xff]  }
  0x97   : > { %2364 = vmatpush1.bf16.msra.mxu0 %v16333_v10  ;;  %2438 = vmatprep.subr.bf16.mxu1 %v16344_v13  ;;  %v16417_v10 = vld [vmem:[#allocation2 + $0x870] ss:$24 sps:$4 sm:$0xff]   ;;  %v16433_v13 = vld [vmem:[#allocation2 + $0x2ac] ss:$24 sps:$4 sm:$0xff]  }
  0x98   : > { %2365 = vmatprep.subr.bf16.mxu0 %v16341_v12  ;;  %v16430_v12 = vld [vmem:[#allocation2 + $0x8a4] ss:$24 sps:$4 sm:$0xff]  }
  0x99   : > { %2258 = vmatmul.mubr.bf16.gmra.mrb[4].mxu1 %v17048_v25 }
  0x9a   : > { %2439 = vmatpush1.bf16.msra.mxu1 %v16342_v15  ;;  %2331 = vmatmul.mubr.bf16.gmra.mrb[4].mxu0 %v17044_v20  ;;  %v16431_v15 = vld [vmem:[#allocation2 + $0x2a8] ss:$24 sps:$4 sm:$0xff]  }
  0x9b   : > { %2366 = vmatpush1.bf16.msra.mxu0 %v16339_v14  ;;  %2440 = vmatprep.subr.bf16.mxu1 %v16350_v17  ;;  %v16428_v14 = vld [vmem:[#allocation2 + $0x8a0] ss:$24 sps:$4 sm:$0xff]   ;;  %v16440_v17 = vld [vmem:[#allocation2 + $0x2dc] ss:$24 sps:$4 sm:$0xff]  }
  0x9c   : > { %2367 = vmatprep.subr.bf16.mxu0 %v16347_v16  ;;  %2340 = vmatprep.mubr.bf16.mxu0 %v17053_v30  ;;  %v16437_v16 = vld [vmem:[#allocation2 + $0x8d4] ss:$24 sps:$4 sm:$0xff]  }
  0x9d   : > { %2267 = vmatprep.mubr.bf16.mxu1 %v17056_v31 }
  0x9e   : > { %2441 = vmatpush1.bf16.msra.mxu1 %v16348_v22  ;;  %v16438_v22 = vld [vmem:[#allocation2 + $0x2d8] ss:$24 sps:$4 sm:$0xff]  }
  0x9f   : > { %2368 = vmatpush1.bf16.msra.mxu0 %v16345_v21  ;;  %2442 = vmatprep.subr.bf16.mxu1 %v16356_v24  ;;  %v16435_v21 = vld [vmem:[#allocation2 + $0x8d0] ss:$24 sps:$4 sm:$0xff]   ;;  %v16449_v24 = vld [vmem:[#allocation2 + $0x14] ss:$24 sps:$4 sm:$0xff]  }
  0xa0   : > { %2369 = vmatprep.subr.bf16.mxu0 %v16353_v23  ;;  %v16446_v23 = vld [vmem:[#allocation2 + $0x30c] ss:$24 sps:$4 sm:$0xff]  }
  0xa1   : > { %2268 = vmatmul.mubr.bf16.gmra.mrb[8].mxu1 %v17064_v37 }
  0xa2   : > { %2443 = vmatpush1.bf16.msra.mxu1 %v16354_v27  ;;  %2341 = vmatmul.mubr.bf16.gmra.mrb[8].mxu0 %v17060_v32  ;;  %v16444_v27 = vld [vmem:[#allocation2 + $0x308] ss:$24 sps:$4 sm:$0xff]  }
  0xa3   : > { %2370 = vmatpush1.bf16.msra.mxu0 %v16351_v26  ;;  %2444 = vmatprep.subr.bf16.mxu1 %v16362_v29  ;;  %v17090_v26 = vld [vmem:[%s17021_s17 + $0x10] ss:$24 sps:$4 sm:$0xff]   ;;  %v16452_v29 = vld [vmem:[#allocation2 + $0x33c] ss:$24 sps:$4 sm:$0xff]  }
  0xa4   : > { %2371 = vmatprep.subr.bf16.mxu0 %v16359_v28  ;;  %2350 = vmatprep.mubr.bf16.mxu0 %v17069_v42  ;;  %v16447_v28 = vld [vmem:[#allocation2 + $0x10] ss:$24 sps:$4 sm:$0xff]  }
  0xa5   : > { %2277 = vmatprep.mubr.bf16.mxu1 %v17072_v43 }
  0xa6   : > { %2445 = vmatpush1.bf16.msra.mxu1 %v16360_v34  ;;  %v17093_v34 = vld [vmem:[%s17021_s17 + $0x44] ss:$24 sps:$4 sm:$0xff]  }
  0xa7   : > { %2372 = vmatpush1.bf16.msra.mxu0 %v16357_v33  ;;  %2446 = vmatprep.subr.bf16.mxu1 %v16368_v36  ;;  %v16455_v33 = vld [vmem:[#allocation2 + $0x44] ss:$24 sps:$4 sm:$0xff]   ;;  %v16453_v36 = vld [vmem:[#allocation2 + $0x40] ss:$24 sps:$4 sm:$0xff]  }
  0xa8   : > { %2373 = vmatprep.subr.bf16.mxu0 %v16365_v35  ;;  %v16450_v35 = vld [vmem:[#allocation2 + $0x338] ss:$24 sps:$4 sm:$0xff]  }
  0xa9   : > { %2278 = vmatmul.mubr.bf16.gmra.mrb[12].mxu1 %v17080_v51 }
  0xaa   : > { %2447 = vmatpush1.bf16.msra.mxu1 %v16366_v39  ;;  %2351 = vmatmul.mubr.bf16.gmra.mrb[12].mxu0 %v17076_v44  ;;  %v16464_v39 = vld [vmem:[#allocation2 + $0x74] ss:$24 sps:$4 sm:$0xff]  }
  0xab   : > { %2374 = vmatpush1.bf16.msra.mxu0 %v16363_v38  ;;  %2448 = vmatprep.subr.bf16.mxu1 %v16374_v41  ;;  %v16461_v38 = vld [vmem:[#allocation2 + $0x36c] ss:$24 sps:$4 sm:$0xff]   ;;  %v16459_v41 = vld [vmem:[#allocation2 + $0x368] ss:$24 sps:$4 sm:$0xff]  }
  0xac   : > { %2375 = vmatprep.subr.bf16.mxu0 %v16371_v40  ;;  %2466 = vmatprep.mubr.bf16.mxu1 %v17024_v48  ;;  %v17099_v40 = vld [vmem:[%s17021_s17 + $0x40] ss:$24 sps:$4 sm:$0xff]  }
  0xad   : > { %2393 = vmatprep.mubr.bf16.mxu0 %v17085_v56 }
  0xae   : > { %2449 = vmatpush1.bf16.msra.mxu1 %v16372_v46  ;;  %v16470_v46 = vld [vmem:[#allocation2 + $0xa4] ss:$24 sps:$4 sm:$0xff]  }
  0xaf   : > { %2376 = vmatpush1.bf16.msra.mxu0 %v16369_v45  ;;  %2450 = vmatprep.subr.bf16.mxu1 %v16380_v50  ;;  %v16462_v45 = vld [vmem:[#allocation2 + $0x70] ss:$24 sps:$4 sm:$0xff]  }
  0xb0   : > { %2377 = vmatprep.subr.bf16.mxu0 %v16377_v47  ;;  %v17103_v47 = vld [vmem:[%s17021_s17 + $0x74] ss:$24 sps:$4 sm:$0xff]   ;;  %v16465_v50 = vld [vmem:[#allocation2 + $0x398] ss:$24 sps:$4 sm:$0xff]  }
  0xb2   : > { %2451 = vmatpush1.bf16.msra.mxu1 %v16378_v53  ;;  %v16476_v53 = vld [vmem:[#allocation2 + $0x3cc] ss:$24 sps:$4 sm:$0xff]  }
  0xb3   : > { %2378 = vmatpush1.bf16.msra.mxu0 %v16375_v52  ;;  %2452 = vmatprep.subr.bf16.mxu1 %v16386_v55  ;;  %v16468_v52 = vld [vmem:[#allocation2 + $0xa0] ss:$24 sps:$4 sm:$0xff]   ;;  %v17109_v55 = vld [vmem:[%s17021_s17 + $0x70] ss:$24 sps:$4 sm:$0xff]  }
  0xb4   : > { %2379 = vmatprep.subr.bf16.mxu0 %v16383_v54  ;;  %v16479_v54 = vld [vmem:[#allocation2 + $0xd4] ss:$24 sps:$4 sm:$0xff]  }
  0xb6   : > { %2453 = vmatpush1.bf16.msra.mxu1 %v16384_v58  ;;  %v16477_v58 = vld [vmem:[#allocation2 + $0xd0] ss:$24 sps:$4 sm:$0xff]  }
  0xb7   : > { %2380 = vmatpush1.bf16.msra.mxu0 %v16381_v57  ;;  %2454 = vmatprep.subr.bf16.mxu1 %v16397_v60  ;;  %v16474_v57 = vld [vmem:[#allocation2 + $0x3c8] ss:$24 sps:$4 sm:$0xff]   ;;  %v16485_v60 = vld [vmem:[#allocation2 + $0x104] ss:$24 sps:$4 sm:$0xff]  }
  0xb8   : > { %2381 = vmatprep.subr.bf16.mxu0 %v16394_v59  ;;  %v16482_v59 = vld [vmem:[#allocation2 + $0x3fc] ss:$24 sps:$4 sm:$0xff]  }
  0xba   : > { %2455 = vmatpush1.bf16.msra.mxu1 %v16395_v62  ;;  %v16480_v62 = vld [vmem:[#allocation2 + $0x3f8] ss:$24 sps:$4 sm:$0xff]  }
  0xbb   : > { %2382 = vmatpush1.bf16.msra.mxu0 %v16392_v61  ;;  %2456 = vmatprep.subr.bf16.mxu1 %v16404_v0  ;;  %v17113_v61 = vld [vmem:[%s17021_s17 + $0xa4] ss:$24 sps:$4 sm:$0xff]  }
  0xbc   : > { %2383 = vmatprep.subr.bf16.mxu0 %v16401_v63  ;;  %v16483_v63 = vld [vmem:[#allocation2 + $0x100] ss:$24 sps:$4 sm:$0xff]   ;;  %v16491_v0 = vld [vmem:[#allocation2 + $0x42c] ss:$24 sps:$4 sm:$0xff]  }
  0xbe   : > { %2457 = vmatpush1.bf16.msra.mxu1 %v16402_v2  ;;  %v17119_v2 = vld [vmem:[%s17021_s17 + $0xa0] ss:$24 sps:$4 sm:$0xff]  }
  0xbf   : > { %2384 = vmatpush1.bf16.msra.mxu0 %v16399_v1  ;;  %2458 = vmatprep.subr.bf16.mxu1 %v16415_v4  ;;  %v16494_v1 = vld [vmem:[#allocation2 + $0x134] ss:$24 sps:$4 sm:$0xff]   ;;  %v16492_v4 = vld [vmem:[#allocation2 + $0x130] ss:$24 sps:$4 sm:$0xff]  }
  0xc0   : > { %2385 = vmatprep.subr.bf16.mxu0 %v16412_v3  ;;  %v16489_v3 = vld [vmem:[#allocation2 + $0x428] ss:$24 sps:$4 sm:$0xff]  }
  0xc2   : > { %2459 = vmatpush1.bf16.msra.mxu1 %v16413_v7  ;;  %v16500_v7 = vld [vmem:[#allocation2 + $0x164] ss:$24 sps:$4 sm:$0xff]  }
  0xc3   : > { %2386 = vmatpush1.bf16.msra.mxu0 %v16410_v5  ;;  %2460 = vmatprep.subr.bf16.mxu1 %v16422_v9  ;;  %v16497_v5 = vld [vmem:[#allocation2 + $0x45c] ss:$24 sps:$4 sm:$0xff]   ;;  %v16498_v9 = vld [vmem:[#allocation2 + $0x160] ss:$24 sps:$4 sm:$0xff]  }
  0xc4   : > { %2387 = vmatprep.subr.bf16.mxu0 %v16419_v8  ;;  %v16495_v8 = vld [vmem:[#allocation2 + $0x458] ss:$24 sps:$4 sm:$0xff]  }
  0xc6   : > { %2461 = vmatpush1.bf16.msra.mxu1 %v16420_v11  ;;  %v16506_v11 = vld [vmem:[#allocation2 + $0x194] ss:$24 sps:$4 sm:$0xff]  }
  0xc7   : > { %2388 = vmatpush1.bf16.msra.mxu0 %v16417_v10  ;;  %2462 = vmatprep.subr.bf16.mxu1 %v16433_v13  ;;  %v16503_v10 = vld [vmem:[#allocation2 + $0x48c] ss:$24 sps:$4 sm:$0xff]   ;;  %v16504_v13 = vld [vmem:[#allocation2 + $0x190] ss:$24 sps:$4 sm:$0xff]  }
  0xc8   : > { %2389 = vmatprep.subr.bf16.mxu0 %v16430_v12  ;;  %v16501_v12 = vld [vmem:[#allocation2 + $0x488] ss:$24 sps:$4 sm:$0xff]  }
  0xca   : > { %2463 = vmatpush1.bf16.msra.mxu1 %v16431_v15  ;;  %v16512_v15 = vld [vmem:[#allocation2 + $0x1c4] ss:$24 sps:$4 sm:$0xff]  }
  0xcb   : > { %2390 = vmatpush1.bf16.msra.mxu0 %v16428_v14  ;;  %2464 = vmatprep.subr.bf16.mxu1 %v16440_v17  ;;  %v16509_v14 = vld [vmem:[#allocation2 + $0x4bc] ss:$24 sps:$4 sm:$0xff]   ;;  %v16510_v17 = vld [vmem:[#allocation2 + $0x1c0] ss:$24 sps:$4 sm:$0xff]  }
  0xcc   : > { %2391 = vmatprep.subr.bf16.mxu0 %v16437_v16  ;;  %v16507_v16 = vld [vmem:[#allocation2 + $0x4b8] ss:$24 sps:$4 sm:$0xff]  }
  0xce   : > { %2465 = vmatpush1.bf16.msra.mxu1 %v16438_v22  ;;  %v16518_v22 = vld [vmem:[#allocation2 + $0x1f4] ss:$24 sps:$4 sm:$0xff]  }
  0xcf   : > { %2392 = vmatpush1.bf16.msra.mxu0 %v16435_v21  ;;  %2507 = vmatprep.subr.bf16.mxu1 %v16446_v23  ;;  %v16515_v21 = vld [vmem:[#allocation2 + $0x4ec] ss:$24 sps:$4 sm:$0xff]   ;;  %v16513_v23 = vld [vmem:[#allocation2 + $0x4e8] ss:$24 sps:$4 sm:$0xff]  }
  0xd0   : > { %2653 = vmatprep.subr.bf16.mxu0 %v16449_v24  ;;  %v16524_v24 = vld [vmem:[#allocation2 + $0x224] ss:$24 sps:$4 sm:$0xff]  }
  0xd1   : > { %2467 = vmatmul.mubr.bf16.vlgmr.msra.gmra.mrb[16].mxu1 %v17032_v6  ;;  %v16467_v6 = vld [vmem:[#allocation2 + $0x39c] ss:$24 sps:$4 sm:$0xff]  }
  0xd2   : > { %2394 = vmatmul.mubr.bf16.vlgmr.msra.gmra.mrb[0].mxu0 %v17090_v26  ;;  %2508 = vmatpush1.bf16.msra.mxu1 %v16444_v27  ;;  %v16519_v27 = vld [vmem:[#allocation2 + $0x518] ss:$24 sps:$4 sm:$0xff]  }
  0xd3   : > { %2654 = vmatpush1.bf16.msra.mxu0 %v16447_v28  ;;  %2509 = vmatprep.subr.bf16.mxu1 %v16452_v29  ;;  %v16522_v28 = vld [vmem:[#allocation2 + $0x220] ss:$24 sps:$4 sm:$0xff]   ;;  %v16527_v29 = vld [vmem:[#allocation2 + $0x54c] ss:$24 sps:$4 sm:$0xff]  }
  0xd4   : > { %2655 = vmatprep.subr.bf16.mxu0 %v16455_v33  ;;  %2403 = vmatprep.mubr.bf16.mxu0 %v17093_v34  ;;  %v16530_v33 = vld [vmem:[#allocation2 + $0x254] ss:$24 sps:$4 sm:$0xff]  }
  0xd5   : > { %2476 = vmatprep.mubr.bf16.mxu1 %v17040_v19 }
  0xd6   : > { %2510 = vmatpush1.bf16.msra.mxu1 %v16450_v35  ;;  %v16525_v35 = vld [vmem:[#allocation2 + $0x548] ss:$24 sps:$4 sm:$0xff]  }
  0xd7   : > { %2656 = vmatpush1.bf16.msra.mxu0 %v16453_v36  ;;  %2511 = vmatprep.subr.bf16.mxu1 %v16461_v38  ;;  %v16528_v36 = vld [vmem:[#allocation2 + $0x250] ss:$24 sps:$4 sm:$0xff]   ;;  %v16533_v38 = vld [vmem:[#allocation2 + $0x57c] ss:$24 sps:$4 sm:$0xff]  }
  0xd8   : > { %2657 = vmatprep.subr.bf16.mxu0 %v16464_v39  ;;  %v16536_v39 = vld [vmem:[#allocation2 + $0x284] ss:$24 sps:$4 sm:$0xff]  }
  0xd9   : > { %2477 = vmatmul.mubr.bf16.gmra.mrb[20].mxu1 %v17048_v25 }
  0xda   : > { %2404 = vmatmul.mubr.bf16.gmra.mrb[4].mxu0 %v17099_v40  ;;  %2512 = vmatpush1.bf16.msra.mxu1 %v16459_v41  ;;  %v16531_v41 = vld [vmem:[#allocation2 + $0x578] ss:$24 sps:$4 sm:$0xff]  }
  0xdb   : > { %2658 = vmatpush1.bf16.msra.mxu0 %v16462_v45  ;;  %2513 = vmatprep.subr.bf16.mxu1 %v16467_v6  ;;  %v16534_v45 = vld [vmem:[#allocation2 + $0x280] ss:$24 sps:$4 sm:$0xff]   ;;  %v16539_v6 = vld [vmem:[#allocation2 + $0x5ac] ss:$24 sps:$4 sm:$0xff]  }
  0xdc   : > { %2659 = vmatprep.subr.bf16.mxu0 %v16470_v46  ;;  %2413 = vmatprep.mubr.bf16.mxu0 %v17103_v47  ;;  %v16542_v46 = vld [vmem:[#allocation2 + $0x2b4] ss:$24 sps:$4 sm:$0xff]  }
  0xdd   : > { %2486 = vmatprep.mubr.bf16.mxu1 %v17056_v31 }
  0xde   : > { %2514 = vmatpush1.bf16.msra.mxu1 %v16465_v50  ;;  %v16537_v50 = vld [vmem:[#allocation2 + $0x5a8] ss:$24 sps:$4 sm:$0xff]  }
  0xdf   : > { %2660 = vmatpush1.bf16.msra.mxu0 %v16468_v52  ;;  %2515 = vmatprep.subr.bf16.mxu1 %v16476_v53  ;;  %v16540_v52 = vld [vmem:[#allocation2 + $0x2b0] ss:$24 sps:$4 sm:$0xff]   ;;  %v16545_v53 = vld [vmem:[#allocation2 + $0x5dc] ss:$24 sps:$4 sm:$0xff]  }
  0xe0   : > { %2661 = vmatprep.subr.bf16.mxu0 %v16479_v54  ;;  %v16548_v54 = vld [vmem:[#allocation2 + $0x2e4] ss:$24 sps:$4 sm:$0xff]  }
  0xe1   : > { %2487 = vmatmul.mubr.bf16.gmra.mrb[24].mxu1 %v17064_v37 }
  0xe2   : > { %2414 = vmatmul.mubr.bf16.gmra.mrb[8].mxu0 %v17109_v55  ;;  %2516 = vmatpush1.bf16.msra.mxu1 %v16474_v57  ;;  %v16543_v57 = vld [vmem:[#allocation2 + $0x5d8] ss:$24 sps:$4 sm:$0xff]  }
  0xe3   : > { %2662 = vmatpush1.bf16.msra.mxu0 %v16477_v58  ;;  %2517 = vmatprep.subr.bf16.mxu1 %v16482_v59  ;;  %v16546_v58 = vld [vmem:[#allocation2 + $0x2e0] ss:$24 sps:$4 sm:$0xff]   ;;  %v16551_v59 = vld [vmem:[#allocation2 + $0x60c] ss:$24 sps:$4 sm:$0xff]  }
  0xe4   : > { %2663 = vmatprep.subr.bf16.mxu0 %v16485_v60  ;;  %2423 = vmatprep.mubr.bf16.mxu0 %v17113_v61  ;;  %v16554_v60 = vld [vmem:[#allocation2 + $0x314] ss:$24 sps:$4 sm:$0xff]  }
  0xe5   : > { %2496 = vmatprep.mubr.bf16.mxu1 %v17072_v43 }
  0xe6   : > { %2518 = vmatpush1.bf16.msra.mxu1 %v16480_v62  ;;  %v16549_v62 = vld [vmem:[#allocation2 + $0x608] ss:$24 sps:$4 sm:$0xff]  }
  0xe7   : > { %2664 = vmatpush1.bf16.msra.mxu0 %v16483_v63  ;;  %2519 = vmatprep.subr.bf16.mxu1 %v16491_v0  ;;  %v16552_v63 = vld [vmem:[#allocation2 + $0x310] ss:$24 sps:$4 sm:$0xff]   ;;  %v16557_v0 = vld [vmem:[#allocation2 + $0x63c] ss:$24 sps:$4 sm:$0xff]  }
  0xe8   : > { %2665 = vmatprep.subr.bf16.mxu0 %v16494_v1  ;;  %v16560_v1 = vld [vmem:[#allocation2 + $0x344] ss:$24 sps:$4 sm:$0xff]  }
  0xe9   : > { %2497 = vmatmul.mubr.bf16.gmra.mrb[28].mxu1 %v17080_v51 }
  0xea   : > { %2424 = vmatmul.mubr.bf16.gmra.mrb[12].mxu0 %v17119_v2  ;;  %2520 = vmatpush1.bf16.msra.mxu1 %v16489_v3  ;;  %v17127_v3 = vld [vmem:[%s17021_s17 + $0x8] ss:$24 sps:$4 sm:$0xff]  }
  0xeb   : > { %2666 = vmatpush1.bf16.msra.mxu0 %v16492_v4  ;;  %2521 = vmatprep.subr.bf16.mxu1 %v16497_v5  ;;  %v16710_v4 = vld [vmem:[%s17021_s17] ss:$24 sps:$4 sm:$0xff]  }
  0xec   : > { %2667 = vmatprep.subr.bf16.mxu0 %v16500_v7  ;;  %2539 = vmatprep.mubr.bf16.mxu1 %v17027_v49  ;;  %v16516_v49 = vld [vmem:[#allocation2 + $0x1f0] ss:$24 sps:$4 sm:$0xff]   ;;  %v16558_v7 = vld [vmem:[#allocation2 + $0x340] ss:$24 sps:$4 sm:$0xff]  }
  0xed   : > { %2685 = vmatprep.mubr.bf16.mxu0 %v17024_v48  ;;  %v16521_v48 = vld [vmem:[#allocation2 + $0x51c] ss:$24 sps:$4 sm:$0xff]   ;;  %v16555_v5 = vld [vmem:[#allocation2 + $0x638] ss:$24 sps:$4 sm:$0xff]  }
  0xee   : > { %2522 = vmatpush1.bf16.msra.mxu1 %v16495_v8  ;;  %v16563_v8 = vld [vmem:[#allocation2 + $0x66c] ss:$24 sps:$4 sm:$0xff]  }
  0xef   : > { %2668 = vmatpush1.bf16.msra.mxu0 %v16498_v9  ;;  %2523 = vmatprep.subr.bf16.mxu1 %v16503_v10  ;;  %v16566_v9 = vld [vmem:[#allocation2 + $0x374] ss:$24 sps:$4 sm:$0xff]   ;;  %v16561_v10 = vld [vmem:[#allocation2 + $0x668] ss:$24 sps:$4 sm:$0xff]  }
  0xf0   : > { %2669 = vmatprep.subr.bf16.mxu0 %v16506_v11  ;;  %v16564_v11 = vld [vmem:[#allocation2 + $0x370] ss:$24 sps:$4 sm:$0xff]  }
  0xf2   : > { %2524 = vmatpush1.bf16.msra.mxu1 %v16501_v12  ;;  %v16569_v12 = vld [vmem:[#allocation2 + $0x69c] ss:$24 sps:$4 sm:$0xff]  }
  0xf3   : > { %2670 = vmatpush1.bf16.msra.mxu0 %v16504_v13  ;;  %2525 = vmatprep.subr.bf16.mxu1 %v16509_v14  ;;  %v16572_v13 = vld [vmem:[#allocation2 + $0x3a4] ss:$24 sps:$4 sm:$0xff]   ;;  %v16567_v14 = vld [vmem:[#allocation2 + $0x698] ss:$24 sps:$4 sm:$0xff]  }
  0xf4   : > { %2671 = vmatprep.subr.bf16.mxu0 %v16512_v15  ;;  %v16570_v15 = vld [vmem:[#allocation2 + $0x3a0] ss:$24 sps:$4 sm:$0xff]  }
  0xf6   : > { %2526 = vmatpush1.bf16.msra.mxu1 %v16507_v16  ;;  %v16575_v16 = vld [vmem:[#allocation2 + $0x6cc] ss:$24 sps:$4 sm:$0xff]  }
  0xf7   : > { %2672 = vmatpush1.bf16.msra.mxu0 %v16510_v17  ;;  %2527 = vmatprep.subr.bf16.mxu1 %v16515_v21  ;;  %v16576_v17 = vld [vmem:[#allocation2 + $0x3d0] ss:$24 sps:$4 sm:$0xff]   ;;  %v16581_v21 = vld [vmem:[#allocation2 + $0x6fc] ss:$24 sps:$4 sm:$0xff]  }
  0xf8   : > { %2673 = vmatprep.subr.bf16.mxu0 %v16518_v22  ;;  %v16582_v22 = vld [vmem:[#allocation2 + $0x400] ss:$24 sps:$4 sm:$0xff]  }
  0xfa   : > { %2528 = vmatpush1.bf16.msra.mxu1 %v16513_v23  ;;  %v16585_v23 = vld [vmem:[#allocation2 + $0x728] ss:$24 sps:$4 sm:$0xff]  }
  0xfb   : > { %2674 = vmatpush1.bf16.msra.mxu0 %v16516_v49  ;;  %2529 = vmatprep.subr.bf16.mxu1 %v16521_v48  ;;  %v16588_v49 = vld [vmem:[#allocation2 + $0x430] ss:$24 sps:$4 sm:$0xff]  }
  0xfc   : > { %2675 = vmatprep.subr.bf16.mxu0 %v16524_v24  ;;  %v16591_v48 = vld [vmem:[#allocation2 + $0x758] ss:$24 sps:$4 sm:$0xff]  }
  0xfd   : > { %v16594_v24 = vld [vmem:[#allocation2 + $0x460] ss:$24 sps:$4 sm:$0xff]  }
  0xfe   : > { %2530 = vmatpush1.bf16.msra.mxu1 %v16519_v27  ;;  %v16711_v27 = vld [vmem:[%s17021_s17 + $0xc] ss:$24 sps:$4 sm:$0xff]  }
  0xff   : > { %2676 = vmatpush1.bf16.msra.mxu0 %v16522_v28  ;;  %2531 = vmatprep.subr.bf16.mxu1 %v16527_v29  ;;  %v16597_v28 = vld [vmem:[#allocation2 + $0x788] ss:$24 sps:$4 sm:$0xff]  }
 0x100   : > { %2677 = vmatprep.subr.bf16.mxu0 %v16530_v33  ;;  %v16600_v29 = vld [vmem:[#allocation2 + $0x490] ss:$24 sps:$4 sm:$0xff]  }
 0x101   : > { %v16603_v33 = vld [vmem:[#allocation2 + $0x7b8] ss:$24 sps:$4 sm:$0xff]  }
 0x102   : > { %2532 = vmatpush1.bf16.msra.mxu1 %v16525_v35  ;;  %v16606_v35 = vld [vmem:[#allocation2 + $0x4c0] ss:$24 sps:$4 sm:$0xff]  }
 0x103   : > { %2678 = vmatpush1.bf16.msra.mxu0 %v16528_v36  ;;  %2533 = vmatprep.subr.bf16.mxu1 %v16533_v38  ;;  %v16611_v36 = vld [vmem:[#allocation2 + $0x7ec] ss:$24 sps:$4 sm:$0xff]  }
 0x104   : > { %2679 = vmatprep.subr.bf16.mxu0 %v16536_v39  ;;  %v16614_v38 = vld [vmem:[#allocation2 + $0x4f4] ss:$24 sps:$4 sm:$0xff]   ;;  %v16612_v39 = vld [vmem:[#allocation2 + $0x4f0] ss:$24 sps:$4 sm:$0xff]  }
 0x106   : > { %2534 = vmatpush1.bf16.msra.mxu1 %v16531_v41  ;;  %v16617_v41 = vld [vmem:[#allocation2 + $0x81c] ss:$24 sps:$4 sm:$0xff]  }
 0x107   : > { %2680 = vmatpush1.bf16.msra.mxu0 %v16534_v45  ;;  %2535 = vmatprep.subr.bf16.mxu1 %v16539_v6  ;;  %v16620_v45 = vld [vmem:[#allocation2 + $0x524] ss:$24 sps:$4 sm:$0xff]   ;;  %v16615_v6 = vld [vmem:[#allocation2 + $0x818] ss:$24 sps:$4 sm:$0xff]  }
 0x108   : > { %2681 = vmatprep.subr.bf16.mxu0 %v16542_v46  ;;  %v16618_v46 = vld [vmem:[#allocation2 + $0x520] ss:$24 sps:$4 sm:$0xff]  }
 0x10a   : > { %2536 = vmatpush1.bf16.msra.mxu1 %v16537_v50  ;;  %v16623_v50 = vld [vmem:[#allocation2 + $0x84c] ss:$24 sps:$4 sm:$0xff]  }
 0x10b   : > { %2682 = vmatpush1.bf16.msra.mxu0 %v16540_v52  ;;  %2537 = vmatprep.subr.bf16.mxu1 %v16545_v53  ;;  %v16626_v52 = vld [vmem:[#allocation2 + $0x554] ss:$24 sps:$4 sm:$0xff]   ;;  %v16621_v53 = vld [vmem:[#allocation2 + $0x848] ss:$24 sps:$4 sm:$0xff]  }
 0x10c   : > { %2683 = vmatprep.subr.bf16.mxu0 %v16548_v54  ;;  %v16624_v54 = vld [vmem:[#allocation2 + $0x550] ss:$24 sps:$4 sm:$0xff]  }
 0x10e   : > { %2538 = vmatpush1.bf16.msra.mxu1 %v16543_v57  ;;  %v16629_v57 = vld [vmem:[#allocation2 + $0x87c] ss:$24 sps:$4 sm:$0xff]  }
 0x10f   : > { %2684 = vmatpush1.bf16.msra.mxu0 %v16546_v58  ;;  %2580 = vmatprep.subr.bf16.mxu1 %v16551_v59  ;;  %v16632_v58 = vld [vmem:[#allocation2 + $0x584] ss:$24 sps:$4 sm:$0xff]   ;;  %v16627_v59 = vld [vmem:[#allocation2 + $0x878] ss:$24 sps:$4 sm:$0xff]  }
 0x110   : > { %2726 = vmatprep.subr.bf16.mxu0 %v16554_v60  ;;  %v16630_v60 = vld [vmem:[#allocation2 + $0x580] ss:$24 sps:$4 sm:$0xff]  }
 0x111   : > { %2540 = vmatmul.mubr.bf16.vlgmr.msra.gmra.mrb[16].mxu1 %v17127_v3 }
 0x112   : > { %2686 = vmatmul.mubr.bf16.vlgmr.msra.gmra.mrb[16].mxu0 %v16710_v4  ;;  %2581 = vmatpush1.bf16.msra.mxu1 %v16549_v62  ;;  %v16635_v62 = vld [vmem:[#allocation2 + $0x8ac] ss:$24 sps:$4 sm:$0xff]   ;;  %v16641_v4 = vld [vmem:[#allocation2 + $0x8dc] ss:$24 sps:$4 sm:$0xff]  }
 0x113   : > { %2727 = vmatpush1.bf16.msra.mxu0 %v16552_v63  ;;  %2582 = vmatprep.subr.bf16.mxu1 %v16557_v0  ;;  %v16638_v63 = vld [vmem:[#allocation2 + $0x5b4] ss:$24 sps:$4 sm:$0xff]   ;;  %v16633_v0 = vld [vmem:[#allocation2 + $0x8a8] ss:$24 sps:$4 sm:$0xff]  }
 0x114   : > { %2728 = vmatprep.subr.bf16.mxu0 %v16560_v1  ;;  %2549 = vmatprep.mubr.bf16.mxu1 %v17037_v18  ;;  %v16578_v18 = vld [vmem:[#allocation2 + $0x3d4] ss:$24 sps:$4 sm:$0xff]   ;;  %v16636_v1 = vld [vmem:[#allocation2 + $0x5b0] ss:$24 sps:$4 sm:$0xff]  }
 0x115   : > { %2695 = vmatprep.mubr.bf16.mxu0 %v17040_v19  ;;  %v16573_v19 = vld [vmem:[#allocation2 + $0x6c8] ss:$24 sps:$4 sm:$0xff]  }
 0x116   : > { %2583 = vmatpush1.bf16.msra.mxu1 %v16555_v5  ;;  %v16644_v5 = vld [vmem:[#allocation2 + $0x5e4] ss:$24 sps:$4 sm:$0xff]  }
 0x117   : > { %2729 = vmatpush1.bf16.msra.mxu0 %v16558_v7  ;;  %2584 = vmatprep.subr.bf16.mxu1 %v16563_v8  ;;  %v16639_v7 = vld [vmem:[#allocation2 + $0x8d8] ss:$24 sps:$4 sm:$0xff]  }
 0x118   : > { %2730 = vmatprep.subr.bf16.mxu0 %v16566_v9  ;;  %v16642_v8 = vld [vmem:[#allocation2 + $0x5e0] ss:$24 sps:$4 sm:$0xff]   ;;  %v16647_v9 = vld [vmem:[#allocation2 + $0x614] ss:$24 sps:$4 sm:$0xff]  }
 0x119   : > { %2550 = vmatmul.mubr.bf16.gmra.mrb[20].mxu1 %v17044_v20  ;;  %v16584_v20 = vld [vmem:[#allocation2 + $0x404] ss:$24 sps:$4 sm:$0xff]  }
 0x11a   : > { %2696 = vmatmul.mubr.bf16.gmra.mrb[20].mxu0 %v17048_v25  ;;  %2585 = vmatpush1.bf16.msra.mxu1 %v16561_v10  ;;  %v16579_v25 = vld [vmem:[#allocation2 + $0x6f8] ss:$24 sps:$4 sm:$0xff]  }
 0x11b   : > { %2731 = vmatpush1.bf16.msra.mxu0 %v16564_v11  ;;  %2586 = vmatprep.subr.bf16.mxu1 %v16569_v12  ;;  %v16645_v10 = vld [vmem:[#allocation2 + $0x610] ss:$24 sps:$4 sm:$0xff]   ;;  %v16650_v11 = vld [vmem:[#allocation2 + $0x644] ss:$24 sps:$4 sm:$0xff]   ;;  %v16648_v12 = vld [vmem:[#allocation2 + $0x640] ss:$24 sps:$4 sm:$0xff]  }
 0x11c   : > { %2732 = vmatprep.subr.bf16.mxu0 %v16572_v13  ;;  %2559 = vmatprep.mubr.bf16.mxu1 %v17053_v30  ;;  %v16587_v30 = vld [vmem:[#allocation2 + $0x72c] ss:$24 sps:$4 sm:$0xff]  }
 0x11d   : > { %2705 = vmatprep.mubr.bf16.mxu0 %v17056_v31  ;;  %v16590_v31 = vld [vmem:[#allocation2 + $0x434] ss:$24 sps:$4 sm:$0xff]  }
 0x11e   : > { %2587 = vmatpush1.bf16.msra.mxu1 %v16567_v14  ;;  %v16653_v13 = vld [vmem:[#allocation2 + $0x674] ss:$24 sps:$4 sm:$0xff]  }
 0x11f   : > { %2733 = vmatpush1.bf16.msra.mxu0 %v16570_v15  ;;  %2588 = vmatprep.subr.bf16.mxu1 %v16575_v16  ;;  %v16712_v14 = vld [vmem:[%s17021_s17 + $0x3c] ss:$24 sps:$4 sm:$0xff]   ;;  %v16651_v15 = vld [vmem:[#allocation2 + $0x670] ss:$24 sps:$4 sm:$0xff]  }
 0x120   : > { %2734 = vmatprep.subr.bf16.mxu0 %v16578_v18  ;;  %v16656_v16 = vld [vmem:[#allocation2 + $0x6a4] ss:$24 sps:$4 sm:$0xff]   ;;  %v16713_v18 = vld [vmem:[%s17021_s17 + $0x38] ss:$24 sps:$4 sm:$0xff]  }
 0x121   : > { %2560 = vmatmul.mubr.bf16.gmra.mrb[24].mxu1 %v17060_v32  ;;  %v16593_v32 = vld [vmem:[#allocation2 + $0x75c] ss:$24 sps:$4 sm:$0xff]  }
 0x122   : > { %2706 = vmatmul.mubr.bf16.gmra.mrb[24].mxu0 %v17064_v37  ;;  %2589 = vmatpush1.bf16.msra.mxu1 %v16573_v19  ;;  %v16596_v37 = vld [vmem:[#allocation2 + $0x464] ss:$24 sps:$4 sm:$0xff]  }
 0x123   : > { %2735 = vmatpush1.bf16.msra.mxu0 %v16576_v17  ;;  %2590 = vmatprep.subr.bf16.mxu1 %v16581_v21  ;;  %v16714_v19 = vld [vmem:[%s17021_s17 + $0x6c] ss:$24 sps:$4 sm:$0xff]   ;;  %v16657_v17 = vld [vmem:[#allocation2 + $0x6d0] ss:$24 sps:$4 sm:$0xff]  }
 0x124   : > { %2736 = vmatprep.subr.bf16.mxu0 %v16584_v20  ;;  %2569 = vmatprep.mubr.bf16.mxu1 %v17069_v42  ;;  %v16599_v42 = vld [vmem:[#allocation2 + $0x78c] ss:$24 sps:$4 sm:$0xff]   ;;  %v16715_v20 = vld [vmem:[%s17021_s17 + $0x68] ss:$24 sps:$4 sm:$0xff]  }
 0x125   : > { %2715 = vmatprep.mubr.bf16.mxu0 %v17072_v43  ;;  %v16602_v43 = vld [vmem:[#allocation2 + $0x494] ss:$24 sps:$4 sm:$0xff]   ;;  %v16662_v21 = vld [vmem:[#allocation2 + $0x704] ss:$24 sps:$4 sm:$0xff]  }
 0x126   : > { %2591 = vmatpush1.bf16.msra.mxu1 %v16579_v25  ;;  %v16660_v25 = vld [vmem:[#allocation2 + $0x700] ss:$24 sps:$4 sm:$0xff]  }
 0x127   : > { %2737 = vmatpush1.bf16.msra.mxu0 %v16582_v22  ;;  %2592 = vmatprep.subr.bf16.mxu1 %v16587_v30  ;;  %v16665_v22 = vld [vmem:[#allocation2 + $0x734] ss:$24 sps:$4 sm:$0xff]  }
 0x128   : > { %2738 = vmatprep.subr.bf16.mxu0 %v16590_v31  ;;  %v16716_v30 = vld [vmem:[%s17021_s17 + $0x9c] ss:$24 sps:$4 sm:$0xff]  }
 0x129   : > { %2570 = vmatmul.mubr.bf16.gmra.mrb[28].mxu1 %v17076_v44  ;;  %v16605_v44 = vld [vmem:[#allocation2 + $0x7bc] ss:$24 sps:$4 sm:$0xff]  }
 0x12a   : > { %2716 = vmatmul.mubr.bf16.gmra.mrb[28].mxu0 %v17080_v51  ;;  %2593 = vmatpush1.bf16.msra.mxu1 %v16585_v23  ;;  %v16608_v51 = vld [vmem:[#allocation2 + $0x4c4] ss:$24 sps:$4 sm:$0xff]  }
 0x12b   : > { %2739 = vmatpush1.bf16.msra.mxu0 %v16588_v49  ;;  %2594 = vmatprep.subr.bf16.mxu1 %v16593_v32  ;;  %v16663_v49 = vld [vmem:[#allocation2 + $0x730] ss:$24 sps:$4 sm:$0xff]  }
 0x12c   : > { %2740 = vmatprep.subr.bf16.mxu0 %v16596_v37  ;;  %2612 = vmatprep.mubr.bf16.mxu1 %v17085_v56  ;;  %v16609_v56 = vld [vmem:[#allocation2 + $0x7e8] ss:$24 sps:$4 sm:$0xff]   ;;  %v16668_v37 = vld [vmem:[#allocation2 + $0x764] ss:$24 sps:$4 sm:$0xff]  }
 0x12d   : > { %2758 = vmatprep.mubr.bf16.mxu0 %v16711_v27  ;;  %v16671_v27 = vld [vmem:[#allocation2 + $0x794] ss:$24 sps:$4 sm:$0xff]  }
 0x12e   : > { %2595 = vmatpush1.bf16.msra.mxu1 %v16591_v48 }
 0x12f   : > { %2741 = vmatpush1.bf16.msra.mxu0 %v16594_v24  ;;  %2596 = vmatprep.subr.bf16.mxu1 %v16599_v42  ;;  %v16717_v24 = vld [vmem:[%s17021_s17 + $0x98] ss:$24 sps:$4 sm:$0xff]  }
 0x130   : > { %2742 = vmatprep.subr.bf16.mxu0 %v16602_v43  ;;  %v16666_v42 = vld [vmem:[#allocation2 + $0x760] ss:$24 sps:$4 sm:$0xff]   ;;  %v16718_v43 = vld [vmem:[%s17021_s17 + $0x14] ss:$24 sps:$4 sm:$0xff]  }
 0x132   : > { %2597 = vmatpush1.bf16.msra.mxu1 %v16597_v28  ;;  %v16669_v28 = vld [vmem:[#allocation2 + $0x790] ss:$24 sps:$4 sm:$0xff]  }
 0x133   : > { %2743 = vmatpush1.bf16.msra.mxu0 %v16600_v29  ;;  %2598 = vmatprep.subr.bf16.mxu1 %v16605_v44  ;;  %v16674_v29 = vld [vmem:[#allocation2 + $0x7c4] ss:$24 sps:$4 sm:$0xff]  }
 0x134   : > { %2744 = vmatprep.subr.bf16.mxu0 %v16608_v51 }
 0x136   : > { %2599 = vmatpush1.bf16.msra.mxu1 %v16603_v33  ;;  %v16672_v33 = vld [vmem:[#allocation2 + $0x7c0] ss:$24 sps:$4 sm:$0xff]  }
 0x137   : > { %2745 = vmatpush1.bf16.msra.mxu0 %v16606_v35  ;;  %2600 = vmatprep.subr.bf16.mxu1 %v16611_v36  ;;  %v16677_v36 = vld [vmem:[#allocation2 + $0x7f4] ss:$24 sps:$4 sm:$0xff]  }
 0x138   : > { %2746 = vmatprep.subr.bf16.mxu0 %v16614_v38 }
 0x13a   : > { %2601 = vmatpush1.bf16.msra.mxu1 %v16609_v56  ;;  %v16675_v56 = vld [vmem:[#allocation2 + $0x7f0] ss:$24 sps:$4 sm:$0xff]  }
 0x13b   : > { %2747 = vmatpush1.bf16.msra.mxu0 %v16612_v39  ;;  %2602 = vmatprep.subr.bf16.mxu1 %v16617_v41  ;;  %v16680_v39 = vld [vmem:[#allocation2 + $0x824] ss:$24 sps:$4 sm:$0xff]  }
 0x13c   : > { %2748 = vmatprep.subr.bf16.mxu0 %v16620_v45 }
 0x13e   : > { %2603 = vmatpush1.bf16.msra.mxu1 %v16615_v6  ;;  %v16678_v6 = vld [vmem:[#allocation2 + $0x820] ss:$24 sps:$4 sm:$0xff]  }
 0x13f   : > { %2749 = vmatpush1.bf16.msra.mxu0 %v16618_v46  ;;  %2604 = vmatprep.subr.bf16.mxu1 %v16623_v50  ;;  %v16683_v50 = vld [vmem:[#allocation2 + $0x854] ss:$24 sps:$4 sm:$0xff]  }
 0x140   : > { %2750 = vmatprep.subr.bf16.mxu0 %v16626_v52 }
 0x142   : > { %2605 = vmatpush1.bf16.msra.mxu1 %v16621_v53  ;;  %v16681_v53 = vld [vmem:[#allocation2 + $0x850] ss:$24 sps:$4 sm:$0xff]  }
 0x143   : > { %2751 = vmatpush1.bf16.msra.mxu0 %v16624_v54  ;;  %2606 = vmatprep.subr.bf16.mxu1 %v16629_v57  ;;  %v16686_v54 = vld [vmem:[#allocation2 + $0x884] ss:$24 sps:$4 sm:$0xff]  }
 0x144   : > { %2752 = vmatprep.subr.bf16.mxu0 %v16632_v58 }
 0x146   : > { %2607 = vmatpush1.bf16.msra.mxu1 %v16627_v59  ;;  %v16684_v59 = vld [vmem:[#allocation2 + $0x880] ss:$24 sps:$4 sm:$0xff]  }
 0x147   : > { %2753 = vmatpush1.bf16.msra.mxu0 %v16630_v60  ;;  %2608 = vmatprep.subr.bf16.mxu1 %v16635_v62  ;;  %v16689_v62 = vld [vmem:[#allocation2 + $0x8b4] ss:$24 sps:$4 sm:$0xff]  }
 0x148   : > { %2754 = vmatprep.subr.bf16.mxu0 %v16638_v63 }
 0x14a   : > { %2609 = vmatpush1.bf16.msra.mxu1 %v16633_v0  ;;  %v16687_v0 = vld [vmem:[#allocation2 + $0x8b0] ss:$24 sps:$4 sm:$0xff]  }
 0x14b   : > { %2755 = vmatpush1.bf16.msra.mxu0 %v16636_v1  ;;  %2610 = vmatprep.subr.bf16.mxu1 %v16641_v4  ;;  %v16692_v1 = vld [vmem:[#allocation2 + $0x8e4] ss:$24 sps:$4 sm:$0xff]   ;;  %v16690_v4 = vld [vmem:[#allocation2 + $0x8e0] ss:$24 sps:$4 sm:$0xff]  }
 0x14c   : > { %2756 = vmatprep.subr.bf16.mxu0 %v16644_v5  ;;  %v16719_v5 = vld [vmem:[%s17021_s17 + $0x10] ss:$24 sps:$4 sm:$0xff]   ;;  %s16784_s17 = scalar_lea.vmem %s16783_s16, 24576 }
 0x14e   : > { %2611 = vmatpush1.bf16.msra.mxu1 %v16639_v7  ;;  %v625_v7 = vlaneseq }
 0x14f   : > { %2757 = vmatpush1.bf16.msra.mxu0 %v16642_v8 }
 0x150   : > { %2799 = vmatprep.subr.bf16.mxu0 %v16647_v9  ;;  %v17194_v8 = vshrl.u32 %v625_v7, 7 }
 0x151   : > { %2613 = vmatmul.mubr.bf16.vlgmr.msra.gmra.mrb[16].mxu1 %v17090_v26  ;;  %v16654_v26 = vld [vmem:[#allocation2 + $0x6a0] ss:$24 sps:$4 sm:$0xff]  }
 0x152   : > { %2759 = vmatmul.mubr.bf16.vlgmr.msra.gmra.mrb[16].mxu0 %v17127_v3  ;;  %2622 = vmatprep.mubr.bf16.mxu1 %v17093_v34  ;;  %v16659_v3 = vld [vmem:[#allocation2 + $0x6d4] ss:$24 sps:$4 sm:$0xff]   ;;  %18866 = vst [vmem:[#allocation11_spill] sm:$0xff] %v17194_v8  ;;  %v17198_v9 = vsub.s32 0, %v17194_v8 }
 0x153   : > { %2800 = vmatpush1.bf16.msra.mxu0 %v16645_v10  ;;  %2768 = vmatprep.mubr.bf16.mxu0 %v16712_v14  ;;  %v17203_v10 = vld [vmem:[%s18816_s3] sm:$0x3f] }
 0x154   : > { %2801 = vmatprep.subr.bf16.mxu0 %v16650_v11  ;;  %18867 = vst [vmem:[#allocation12_spill] sm:$0xff] %v17198_v9  ;;  %v17207_v11 = vsub.s32 1, %v17194_v8  ;;  %v2872_v14 = vld [vmem:[%s17221_s11] sm:$0xff] }
 0x156   : > { %18868 = vst [vmem:[#allocation13_spill] sm:$0xff] %v17207_v11 }
 0x157   : > { %2802 = vmatpush1.bf16.msra.mxu0 %v16648_v12 }
 0x158   : > { %2803 = vmatprep.subr.bf16.mxu0 %v16653_v13 }
 0x159   : > { %2623 = vmatmul.mubr.bf16.gmra.mrb[20].mxu1 %v17099_v40 }
 0x15a   : > { %2769 = vmatmul.mubr.bf16.gmra.mrb[20].mxu0 %v16713_v18  ;;  %2632 = vmatprep.mubr.bf16.mxu1 %v17103_v47 }
 0x15b   : > { %2804 = vmatpush1.bf16.msra.mxu0 %v16651_v15  ;;  %2778 = vmatprep.mubr.bf16.mxu0 %v16714_v19 }
 0x15c   : > { %2805 = vmatprep.subr.bf16.mxu0 %v16656_v16 }
 0x15f   : > { %2806 = vmatpush1.bf16.msra.mxu0 %v16654_v26  ;;  %v2873_v26 = vld [vmem:[%s17221_s11 + $0x8] sm:$0xff] }
 0x160   : > { %2807 = vmatprep.subr.bf16.mxu0 %v16659_v3 }
 0x161   : > { %2633 = vmatmul.mubr.bf16.gmra.mrb[24].mxu1 %v17109_v55 }
 0x162   : > { %2779 = vmatmul.mubr.bf16.gmra.mrb[24].mxu0 %v16715_v20  ;;  %2642 = vmatprep.mubr.bf16.mxu1 %v17113_v61 }
 0x163   : > { %2808 = vmatpush1.bf16.msra.mxu0 %v16657_v17  ;;  %2788 = vmatprep.mubr.bf16.mxu0 %v16716_v30  ;;  %v2878_v17 = vld [vmem:[%s17221_s11 + $0x30] sm:$0xff] }
 0x164   : > { %2809 = vmatprep.subr.bf16.mxu0 %v16662_v21  ;;  %v17157_v31 = vpop.f32.mrb[0].mxu1 }
 0x165   : > { %v17159_v23 = vpop.f32.mrb[1].mxu1 }
 0x166   : > { %v17161_v32 = vpop.f32.mrb[2].mxu1 }
 0x167   : > { %2810 = vmatpush1.bf16.msra.mxu0 %v16660_v25  ;;  %v17163_v48 = vpop.f32.mrb[3].mxu1  ;;  %v2879_v25 = vld [vmem:[%s17221_s11 + $0x38] sm:$0xff] }
 0x168   : > { %2811 = vmatprep.subr.bf16.mxu0 %v16665_v22 }
 0x169   : > { %2643 = vmatmul.mubr.bf16.gmra.mrb[28].mxu1 %v17119_v2 }
 0x16a   : > { %2789 = vmatmul.mubr.bf16.gmra.mrb[28].mxu0 %v16717_v24  ;;  %v2884_v24 = vld [vmem:[%s17221_s11 + $0x60] sm:$0xff] }
 0x16b   : > { %2812 = vmatpush1.bf16.msra.mxu0 %v16663_v49  ;;  %2831 = vmatprep.mubr.bf16.mxu0 %v16718_v43 }
 0x16c   : > { %2813 = vmatprep.subr.bf16.mxu0 %v16668_v37  ;;  %v17168_v44 = vpop.f32.mrb[4].mxu1 }
 0x16d   : > { %v17170_v51 = vpop.f32.mrb[5].mxu1 }
 0x16e   : > { %v17172_v35 = vpop.f32.mrb[6].mxu1 }
 0x16f   : > { %2814 = vmatpush1.bf16.msra.mxu0 %v16666_v42  ;;  %v17174_v38 = vpop.f32.mrb[7].mxu1 }
 0x170   : > { %2815 = vmatprep.subr.bf16.mxu0 %v16671_v27 }
 0x173   : > { %2816 = vmatpush1.bf16.msra.mxu0 %v16669_v28 }
 0x174   : > { %2817 = vmatprep.subr.bf16.mxu0 %v16674_v29  ;;  %v17176_v41 = vpop.f32.mrb[8].mxu1 }
 0x175   : > { %v17178_v45 = vpop.f32.mrb[9].mxu1 }
 0x176   : > { %v17180_v46 = vpop.f32.mrb[10].mxu1 }
 0x177   : > { %2818 = vmatpush1.bf16.msra.mxu0 %v16672_v33  ;;  %v17182_v52 = vpop.f32.mrb[11].mxu1 }
 0x178   : > { %2819 = vmatprep.subr.bf16.mxu0 %v16677_v36 }
 0x17b   : > { %2820 = vmatpush1.bf16.msra.mxu0 %v16675_v56  ;;  %v2891_v56 = vld [vmem:[%s17221_s11 + $0x98] sm:$0xff] }
 0x17c   : > { %2821 = vmatprep.subr.bf16.mxu0 %v16680_v39  ;;  %v17184_v57 = vpop.f32.mrb[12].mxu1 }
 0x17d   : > { %v17186_v58 = vpop.f32.mrb[13].mxu1 }
 0x17e   : > { %v17188_v60 = vpop.f32.mrb[14].mxu1 }
 0x17f   : > { %2822 = vmatpush1.bf16.msra.mxu0 %v16678_v6  ;;  %v17190_v63 = vpop.f32.mrb[15].mxu1 }
 0x180   : > { %2823 = vmatprep.subr.bf16.mxu0 %v16683_v50 }
 0x183   : > { %2824 = vmatpush1.bf16.msra.mxu0 %v16681_v53 }
 0x184   : > { %2825 = vmatprep.subr.bf16.mxu0 %v16686_v54 }
 0x187   : > { %2826 = vmatpush1.bf16.msra.mxu0 %v16684_v59 }
 0x188   : > { %2827 = vmatprep.subr.bf16.mxu0 %v16689_v62  ;;  %v2896_v62 = vld [vmem:[%s17221_s11 + $0xc0] sm:$0xff] }
 0x18b   : > { %2828 = vmatpush1.bf16.msra.mxu0 %v16687_v0 }
 0x18c   : > { %2829 = vmatprep.subr.bf16.mxu0 %v16692_v1 }
 0x18f   : > { %2830 = vmatpush1.bf16.msra.mxu0 %v16690_v4 }
 0x192   : > { %2832 = vmatmul.mubr.bf16.vlgmr.msra.gmra.mrb[16].mxu0 %v16719_v5  ;;  %v2897_v5 = vld [vmem:[%s17221_s11 + $0xc8] sm:$0xff] }
 0x193   : > { %2841 = vmatprep.mubr.bf16.mxu0 %v17093_v34  ;;  %v17212_v34 = vrot.slane %v17203_v10, %v17198_v9 }
 0x195   : > { %v2254_v15 = vadd.f32 %v17161_v32, %v17212_v34  ;;  %v2264_v37 = vadd.f32 %v17172_v35, %v17212_v34  ;;  %v2274_v54 = vadd.f32 %v17180_v46, %v17212_v34 }
 0x19a   : > { %2842 = vmatmul.mubr.bf16.gmra.mrb[20].mxu0 %v17099_v40  ;;  %v17216_v40 = vrot.slane %v17203_v10, %v17207_v11 }
 0x19b   : > { %2851 = vmatprep.mubr.bf16.mxu0 %v17103_v47  ;;  %v2250_v47 = vadd.f32 %v17157_v31, %v17212_v34 }
 0x19c   : > { %v2252_v12 = vadd.f32 %v17159_v23, %v17216_v40  ;;  %v2256_v3 = vadd.f32 %v17163_v48, %v17216_v40  ;;  %v2260_v23 = vadd.f32 %v17168_v44, %v17212_v34  ;;  %v2262_v32 = vadd.f32 %v17170_v51, %v17216_v40  ;;  %v2890_v44 = vld [vmem:[%s17221_s11 + $0x90] sm:$0xff] }
 0x19d   : > { %v2266_v42 = vadd.f32 %v17174_v38, %v17216_v40  ;;  %v2270_v38 = vadd.f32 %v17176_v41, %v17212_v34  ;;  %v2272_v53 = vadd.f32 %v17178_v45, %v17216_v40  ;;  %v2276_v0 = vadd.f32 %v17182_v52, %v17216_v40 }
 0x19e   : > { %v2280_v52 = vadd.f32 %v17184_v57, %v17212_v34 }
 0x1a2   : > { %2852 = vmatmul.mubr.bf16.gmra.mrb[24].mxu0 %v17109_v55 }
 0x1a3   : > { %2861 = vmatprep.mubr.bf16.mxu0 %v17113_v61 }
 0x1a5   : > { %v2395_v13 = vpop.f32.mrb[0].mxu0 }
 0x1a6   : > { %v15436_v16 = vadd.f32 %v2395_v13, %v2250_v47  ;;  %v2397_v18 = vpop.f32.mrb[1].mxu0  ;;  %v2902_v47 = vld [vmem:[%s17221_s11 + $0xf0] sm:$0xff] }
 0x1a7   : > { %v15438_v19 = vadd.f32 %v2397_v18, %v2252_v12  ;;  %v2399_v55 = vpop.f32.mrb[2].mxu0 }
 0x1a8   : > { %v17236_v21 = vadd.f32 %v15436_v16, %v2872_v14  ;;  %v15440_v61 = vadd.f32 %v2399_v55, %v2254_v15  ;;  %v2401_v20 = vpop.f32.mrb[3].mxu0  ;;  %v2903_v14 = vld [vmem:[%s17221_s11 + $0xf8] sm:$0xff]  ;;  %v2908_v55 = vld [vmem:[%s17221_s11 + $0x120] sm:$0xff] }
 0x1a9   : > { %v17239_v22 = vadd.f32 %v15438_v19, %v2873_v26  ;;  %v15442_v30 = vadd.f32 %v2401_v20, %v2256_v3  ;;  %v2282_v26 = vadd.f32 %v17186_v58, %v17216_v40  ;;  %v2284_v3 = vadd.f32 %v17188_v60, %v17212_v34 }
 0x1aa   : > { %v17241_v31 = vadd.f32 %v15440_v61, %v2878_v17  ;;  %2862 = vmatmul.mubr.bf16.gmra.mrb[28].mxu0 %v17119_v2  ;;  %v2885_v2 = vld [vmem:[%s17221_s11 + $0x68] sm:$0xff]  ;;  %v2286_v17 = vadd.f32 %v17190_v63, %v17216_v40  ;;  %v17307_v40 = vsub.s32 2, %v17194_v8 }
 0x1ab   : > { %v17246_v49 = vadd.f32 %v15442_v30, %v2879_v25  ;;  %v2909_v25 = vld [vmem:[%s17221_s11 + $0x128] sm:$0xff] }
 0x1ac   : > { %18871 = vst [vmem:[#allocation16_spill] sm:$0xff] %v17307_v40 }
 0x1ad   : > { %v2405_v48 = vpop.f32.mrb[4].mxu0 }
 0x1ae   : > { %v15444_v43 = vadd.f32 %v2405_v48, %v2260_v23  ;;  %v2407_v27 = vpop.f32.mrb[5].mxu0  ;;  %v2914_v23 = vld [vmem:[%s17221_s11 + $0x150] sm:$0xff]  ;;  %v2915_v48 = vld [vmem:[%s17221_s11 + $0x158] sm:$0xff] }
 0x1af   : > { %v15446_v28 = vadd.f32 %v2407_v27, %v2262_v32  ;;  %v2409_v29 = vpop.f32.mrb[6].mxu0 }
 0x1b0   : > { %v17257_v33 = vadd.f32 %v15444_v43, %v2884_v24  ;;  %v15448_v36 = vadd.f32 %v2409_v29, %v2264_v37  ;;  %v2411_v51 = vpop.f32.mrb[7].mxu0  ;;  %v636_v43 = vrot.slane %v17203_v10, %v17307_v40 }
 0x1b1   : > { %v17260_v35 = vadd.f32 %v15446_v28, %v2885_v2  ;;  %v15450_v39 = vadd.f32 %v2411_v51, %v2266_v42  ;;  %v17310_v42 = vsub.s32 3, %v17194_v8  ;;  %v2874_v28 = vld [vmem:[%s17221_s11 + $0x10] sm:$0xff] }
 0x1b2   : > { %v17262_v6 = vadd.f32 %v15448_v36, %v2890_v44  ;;  %v2875_v36 = vld [vmem:[%s17221_s11 + $0x18] sm:$0xff] }
 0x1b3   : > { %v17266_v50 = vadd.f32 %v15450_v39, %v2891_v56  ;;  %18872 = vst [vmem:[#allocation17_spill] sm:$0xff] %v17310_v42  ;;  %v640_v27 = vrot.slane %v17203_v10, %v17310_v42  ;;  %v2880_v39 = vld [vmem:[%s17221_s11 + $0x40] sm:$0xff] }
 0x1b5   : > { %v2415_v59 = vpop.f32.mrb[8].mxu0 }
 0x1b6   : > { %v15452_v1 = vadd.f32 %v2415_v59, %v2270_v38  ;;  %v2417_v4 = vpop.f32.mrb[9].mxu0  ;;  %v2881_v59 = vld [vmem:[%s17221_s11 + $0x48] sm:$0xff] }
 0x1b7   : > { %v15454_v7 = vadd.f32 %v2417_v4, %v2272_v53  ;;  %v2419_v41 = vpop.f32.mrb[10].mxu0 }
 0x1b8   : > { %v17277_v12 = vadd.f32 %v15452_v1, %v2896_v62  ;;  %v15456_v13 = vadd.f32 %v2419_v41, %v2274_v54  ;;  %v2421_v45 = vpop.f32.mrb[11].mxu0 }
 0x1b9   : > { %v17280_v46 = vadd.f32 %v15454_v7, %v2897_v5  ;;  %v15458_v15 = vadd.f32 %v2421_v45, %v2276_v0  ;;  %v2886_v7 = vld [vmem:[%s17221_s11 + $0x70] sm:$0xff] }
 0x1ba   : > { %v17282_v16 = vadd.f32 %v15456_v13, %v2902_v47  ;;  %v2887_v13 = vld [vmem:[%s17221_s11 + $0x78] sm:$0xff] }
 0x1bb   : > { %v17286_v18 = vadd.f32 %v15458_v15, %v2903_v14  ;;  %v2892_v15 = vld [vmem:[%s17221_s11 + $0xa0] sm:$0xff] }
 0x1bd   : > { %v2425_v19 = vpop.f32.mrb[12].mxu0 }
 0x1be   : > { %v15460_v61 = vadd.f32 %v2425_v19, %v2280_v52  ;;  %v2427_v20 = vpop.f32.mrb[13].mxu0  ;;  %v2893_v19 = vld [vmem:[%s17221_s11 + $0xa8] sm:$0xff] }
 0x1bf   : > { %v15462_v30 = vadd.f32 %v2427_v20, %v2282_v26  ;;  %v2429_v57 = vpop.f32.mrb[14].mxu0 }
 0x1c0   : > { %v17297_v32 = vadd.f32 %v15460_v61, %v2908_v55  ;;  %v15464_v37 = vadd.f32 %v2429_v57, %v2284_v3  ;;  %v2431_v58 = vpop.f32.mrb[15].mxu0 }
 0x1c1   : > { %v17300_v60 = vadd.f32 %v15462_v30, %v2909_v25  ;;  %v15466_v34 = vadd.f32 %v2431_v58, %v2286_v17  ;;  %v2898_v30 = vld [vmem:[%s17221_s11 + $0xd0] sm:$0xff] }
 0x1c2   : > { %v17302_v24 = vadd.f32 %v15464_v37, %v2914_v23  ;;  %v2899_v37 = vld [vmem:[%s17221_s11 + $0xd8] sm:$0xff] }
 0x1c3   : > { %v17304_v63 = vadd.f32 %v15466_v34, %v2915_v48  ;;  %v2904_v34 = vld [vmem:[%s17221_s11 + $0x100] sm:$0xff] }
 0x1c4   : > { %18869 = vst [vmem:[#allocation14_spill] sm:$0xff] %v17302_v24 }
 0x1c5   : > { %18870 = vst [vmem:[#allocation15_spill] sm:$0xff] %v17304_v63 }
 0x224   : > { %v2614_v2 = vpop.f32.mrb[16].mxu1 }
 0x225   : > { %v15467_v29 = vadd.f32 %v2614_v2, %v636_v43  ;;  %v2616_v44 = vpop.f32.mrb[17].mxu1 }
 0x226   : > { %v15468_v51 = vadd.f32 %v2616_v44, %v640_v27  ;;  %v2618_v56 = vpop.f32.mrb[18].mxu1  ;;  %v2905_v44 = vld [vmem:[%s17221_s11 + $0x108] sm:$0xff] }
 0x227   : > { %v17319_v38 = vadd.f32 %v15467_v29, %v2874_v28  ;;  %v15469_v53 = vadd.f32 %v2618_v56, %v636_v43  ;;  %v2620_v54 = vpop.f32.mrb[19].mxu1 }
 0x228   : > { %v17322_v62 = vadd.f32 %v15468_v51, %v2875_v36  ;;  %v15470_v0 = vadd.f32 %v2620_v54, %v640_v27  ;;  %v2910_v54 = vld [vmem:[%s17221_s11 + $0x130] sm:$0xff] }
 0x229   : > { %v17324_v1 = vadd.f32 %v15469_v53, %v2880_v39 }
 0x22a   : > { %v17326_v4 = vadd.f32 %v15470_v0, %v2881_v59 }
 0x22c   : > { %v2624_v5 = vpop.f32.mrb[20].mxu1 }
 0x22d   : > { %v15471_v41 = vadd.f32 %v2624_v5, %v636_v43  ;;  %v2626_v47 = vpop.f32.mrb[21].mxu1  ;;  %v2911_v5 = vld [vmem:[%s17221_s11 + $0x138] sm:$0xff] }
 0x22e   : > { %v15472_v45 = vadd.f32 %v2626_v47, %v640_v27  ;;  %v2628_v14 = vpop.f32.mrb[22].mxu1  ;;  %v2916_v47 = vld [vmem:[%s17221_s11 + $0x160] sm:$0xff] }
 0x22f   : > { %v17331_v52 = vadd.f32 %v15471_v41, %v2886_v7  ;;  %v15473_v26 = vadd.f32 %v2628_v14, %v636_v43  ;;  %v2630_v3 = vpop.f32.mrb[23].mxu1 }
 0x230   : > { %v17334_v55 = vadd.f32 %v15472_v45, %v2887_v13  ;;  %v15474_v17 = vadd.f32 %v2630_v3, %v640_v27 }
 0x231   : > { %v17336_v61 = vadd.f32 %v15473_v26, %v2892_v15  ;;  %v2917_v15 = vld [vmem:[%s17221_s11 + $0x168] sm:$0xff] }
 0x232   : > { %v17338_v20 = vadd.f32 %v15474_v17, %v2893_v19 }
 0x234   : > { %v2634_v25 = vpop.f32.mrb[24].mxu1 }
 0x235   : > { %v15475_v57 = vadd.f32 %v2634_v25, %v636_v43  ;;  %v2636_v23 = vpop.f32.mrb[25].mxu1  ;;  %v17365_v25 = vsub.s32 4, %v17194_v8 }
 0x236   : > { %v15476_v58 = vadd.f32 %v2636_v23, %v640_v27  ;;  %v2638_v48 = vpop.f32.mrb[26].mxu1  ;;  %v2975_v23 = vadd.f32 %v17246_v49, %v17241_v31 }
 0x237   : > { %v17343_v2 = vadd.f32 %v15475_v57, %v2898_v30  ;;  %v15477_v28 = vadd.f32 %v2638_v48, %v636_v43  ;;  %v2640_v29 = vpop.f32.mrb[27].mxu1  ;;  %18875 = vst [vmem:[#allocation20_spill] sm:$0xff] %v17365_v25  ;;  %v17368_v30 = vsub.s32 5, %v17194_v8  ;;  %v17374_v57 = vrot.slane %v17203_v10, %v17365_v25  ;;  %v2876_v48 = vld [vmem:[%s17221_s11 + $0x20] sm:$0xff]  ;;  %v2907_v8 = vld [vmem:[%s17221_s11 + $0x118] sm:$0xff] }
 0x238   : > { %v17346_v36 = vadd.f32 %v15476_v58, %v2899_v37  ;;  %v15478_v51 = vadd.f32 %v2640_v29, %v640_v27 }
 0x239   : > { %v17348_v56 = vadd.f32 %v15477_v28, %v2904_v34  ;;  %18876 = vst [vmem:[#allocation21_spill] sm:$0xff] %v17368_v30  ;;  %v2976_v34 = vadd.f32 %v2975_v23, %v17324_v1  ;;  %v2989_v23 = vadd.f32 %v17266_v50, %v17262_v6 }
 0x23a   : > { %v17350_v39 = vadd.f32 %v15478_v51, %v2905_v44  ;;  %v2877_v44 = vld [vmem:[%s17221_s11 + $0x28] sm:$0xff] }
 0x23c   : > { %v2644_v53 = vpop.f32.mrb[28].mxu1 }
 0x23d   : > { %v15479_v59 = vadd.f32 %v2644_v53, %v636_v43  ;;  %v2646_v0 = vpop.f32.mrb[29].mxu1 }
 0x23e   : > { %v15480_v7 = vadd.f32 %v2646_v0, %v640_v27  ;;  %v2648_v41 = vpop.f32.mrb[30].mxu1 }
 0x23f   : > { %v17355_v13 = vadd.f32 %v15479_v59, %v2910_v54  ;;  %v15481_v45 = vadd.f32 %v2648_v41, %v636_v43  ;;  %v2650_v14 = vpop.f32.mrb[31].mxu1  ;;  %v2968_v43 = vadd.f32 %v17239_v22, %v17236_v21  ;;  %v2882_v54 = vld [vmem:[%s17221_s11 + $0x50] sm:$0xff] }
 0x240   : > { %v17358_v26 = vadd.f32 %v15480_v7, %v2911_v5  ;;  %v15482_v3 = vadd.f32 %v2650_v14, %v640_v27  ;;  %v17378_v27 = vrot.slane %v17203_v10, %v17368_v30  ;;  %v2883_v5 = vld [vmem:[%s17221_s11 + $0x58] sm:$0xff]  ;;  %v2977_v14 = vadd.f32 %v2976_v34, %v17326_v4  ;;  %v2906_v30 = vld [vmem:[%s17221_s11 + $0x110] sm:$0xff] }
 0x241   : > { %v17360_v19 = vadd.f32 %v15481_v45, %v2916_v47  ;;  %v2969_v37 = vadd.f32 %v2968_v43, %v17319_v38  ;;  %v2982_v45 = vadd.f32 %v17260_v35, %v17257_v33  ;;  %v2990_v34 = vadd.f32 %v2989_v23, %v17336_v61 }
 0x242   : > { %v17362_v17 = vadd.f32 %v15482_v3, %v2917_v15 }
 0x243   : > { %18873 = vst [vmem:[#allocation18_spill] sm:$0xff] %v17360_v19  ;;  %v2970_v7 = vadd.f32 %v2969_v37, %v17322_v62  ;;  %v2983_v37 = vadd.f32 %v2982_v45, %v17331_v52  ;;  %v2895_v45 = vld [vmem:[%s17221_s11 + $0xb8] sm:$0xff] }
 0x244   : > { %18874 = vst [vmem:[#allocation19_spill] sm:$0xff] %v17362_v17 }
 0x265   : > { %v2833_v58 = vpop.f32.mrb[16].mxu0 }
 0x266   : > { %v15483_v28 = vadd.f32 %v2833_v58, %v17374_v57  ;;  %v2835_v29 = vpop.f32.mrb[17].mxu0 }
 0x267   : > { %v15484_v51 = vadd.f32 %v2835_v29, %v17378_v27  ;;  %v2837_v53 = vpop.f32.mrb[18].mxu0  ;;  %v2888_v29 = vld [vmem:[%s17221_s11 + $0x80] sm:$0xff] }
 0x268   : > { %v17389_v59 = vadd.f32 %v15483_v28, %v2876_v48  ;;  %v15485_v10 = vadd.f32 %v2837_v53, %v17374_v57  ;;  %v2839_v0 = vpop.f32.mrb[19].mxu0  ;;  %v2889_v53 = vld [vmem:[%s17221_s11 + $0x88] sm:$0xff] }
 0x269   : > { %v15486_v41 = vadd.f32 %v2839_v0, %v17378_v27  ;;  %v17395_v47 = vadd.f32 %v15484_v51, %v2877_v44  ;;  %v2894_v0 = vld [vmem:[%s17221_s11 + $0xb0] sm:$0xff] }
 0x26a   : > { %v17400_v15 = vadd.f32 %v15485_v10, %v2882_v54  ;;  %v2971_v3 = vadd.f32 %v2970_v7, %v17389_v59 }
 0x26b   : > { %v17403_v43 = vadd.f32 %v15486_v41, %v2883_v5 }
 0x26c   : > { %v2972_v58 = vadd.f32 %v2971_v3, %v17395_v47  ;;  %v2978_v48 = vadd.f32 %v2977_v14, %v17400_v15  ;;  %v2984_v3 = vadd.f32 %v2983_v37, %v17334_v55  ;;  %v3003_v37 = vadd.f32 %v17286_v18, %v17282_v16 }
 0x26d   : > { %v2843_v28 = vpop.f32.mrb[20].mxu0 }
 0x26e   : > { %v15487_v44 = vadd.f32 %v2843_v28, %v17374_v57  ;;  %v2845_v51 = vpop.f32.mrb[21].mxu0  ;;  %2973 = vadd.xlane.f32.xlu0 %v2972_v58  ;;  %v2979_v14 = vadd.f32 %v2978_v48, %v17403_v43  ;;  %v2996_v58 = vadd.f32 %v17280_v46, %v17277_v12 }
 0x26f   : > { %v15488_v54 = vadd.f32 %v2845_v51, %v17378_v27  ;;  %v2847_v10 = vpop.f32.mrb[22].mxu0 }
 0x270   : > { %v17416_v5 = vadd.f32 %v15487_v44, %v2888_v29  ;;  %v15489_v7 = vadd.f32 %v2847_v10, %v17374_v57  ;;  %v2849_v41 = vpop.f32.mrb[23].mxu0  ;;  %v2991_v29 = vadd.f32 %v2990_v34, %v17338_v20  ;;  %v2997_v48 = vadd.f32 %v2996_v58, %v17343_v2  ;;  %v2900_v34 = vld [vmem:[%s17221_s11 + $0xe0] sm:$0xff] }
 0x271   : > { %v15490_v23 = vadd.f32 %v2849_v41, %v17378_v27  ;;  %v17423_v28 = vadd.f32 %v15488_v54, %v2889_v53 }
 0x272   : > { %v17428_v44 = vadd.f32 %v15489_v7, %v2894_v0  ;;  %2980 = vadd.xlane.f32.xlu0 %v2979_v14  ;;  %v2985_v51 = vadd.f32 %v2984_v3, %v17416_v5  ;;  %v3004_v0 = vadd.f32 %v3003_v37, %v17348_v56  ;;  %v2901_v3 = vld [vmem:[%s17221_s11 + $0xe8] sm:$0xff]  ;;  %v2998_v58 = vadd.f32 %v2997_v48, %v17346_v36 }
 0x273   : > { %v17431_v10 = vadd.f32 %v15490_v23, %v2895_v45 }
 0x274   : > { %v2986_v53 = vadd.f32 %v2985_v51, %v17423_v28  ;;  %v2992_v54 = vadd.f32 %v2991_v29, %v17428_v44 }
 0x275   : > { %v2853_v41 = vpop.f32.mrb[24].mxu0 }
 0x276   : > { %v15491_v7 = vadd.f32 %v2853_v41, %v17374_v57  ;;  %v2855_v14 = vpop.f32.mrb[25].mxu0  ;;  %2987 = vadd.xlane.f32.xlu1 %v2986_v53  ;;  %v2993_v37 = vadd.f32 %v2992_v54, %v17431_v10  ;;  %v3010_v53 = vadd.f32 %v17300_v60, %v17297_v32  ;;  %v3017_v54 = vadd.f32 %v17304_v63, %v17302_v24  ;;  %v2919_v63 = vld [vmem:[%s17221_s11 + $0x178] sm:$0xff] }
 0x277   : > { %v15492_v45 = vadd.f32 %v2855_v14, %v17378_v27  ;;  %v2857_v23 = vpop.f32.mrb[26].mxu0  ;;  %v3005_v14 = vadd.f32 %v3004_v0, %v17350_v39  ;;  %v2912_v0 = vld [vmem:[%s17221_s11 + $0x140] sm:$0xff] }
 0x278   : > { %v17445_v25 = vadd.f32 %v15491_v7, %v2900_v34  ;;  %v15493_v51 = vadd.f32 %v2857_v23, %v17374_v57  ;;  %v2859_v29 = vpop.f32.mrb[27].mxu0 }
 0x279   : > { %v17450_v42 = vadd.f32 %v15492_v45, %v2901_v3  ;;  %v15494_v41 = vadd.f32 %v2859_v29, %v17378_v27  ;;  %v3011_v3 = vadd.f32 %v3010_v53, %v17355_v13  ;;  %v2918_v53 = vld [vmem:[%s17221_s11 + $0x170] sm:$0xff] }
 0x27a   : > { %v17456_v48 = vadd.f32 %v15493_v51, %v2906_v30  ;;  %2994 = vadd.xlane.f32.xlu1 %v2993_v37  ;;  %v2999_v34 = vadd.f32 %v2998_v58, %v17445_v25  ;;  %v3018_v30 = vadd.f32 %v3017_v54, %v17360_v19  ;;  %v2913_v37 = vld [vmem:[%s17221_s11 + $0x148] sm:$0xff]  ;;  %s13634_s11 = sshll.u32 %s18044_s9, 4  ;;  %s18766_s11 = int_to_ptr.vmem [resolvable:$true] %s13634_s11 }
 0x27b   : > { %v17459_v7 = vadd.f32 %v15494_v41, %v2907_v8  ;;  %s16778_s12 = scalar_lea.vmem %s18766_s11, 12288  ;;  %p16785_p4 = scmp.lt.s32.totalorder %s18766_s11, %s16783_s16 }
 0x27c   : > { %v3000_v45 = vadd.f32 %v2999_v34, %v17450_v42  ;;  %v3006_v23 = vadd.f32 %v3005_v14, %v17456_v48  ;;  %v3012_v34 = vadd.f32 %v3011_v3, %v17358_v26  ;;  %p16779_p10 = scmp.ne.s32.totalorder %s18766_s11, %s16778_s12  ;;  %p16786_p7 = scmp.lt.s32.totalorder %s16784_s17, %s16778_s12 }
 0x27d   : > { %v2863_v29 = vpop.f32.mrb[28].mxu0 }
 0x27e   : > { %v15495_v51 = vadd.f32 %v2863_v29, %v17374_v57  ;;  %v2865_v58 = vpop.f32.mrb[29].mxu0  ;;  %3001 = vadd.xlane.f32.xlu0 %v3000_v45  ;;  %v3007_v8 = vadd.f32 %v3006_v23, %v17459_v7  ;;  %v3019_v45 = vadd.f32 %v3018_v30, %v17362_v17  ;;  %v3294_v30 = vld [vmem:[#allocation5 + $0x68] sm:$0xff]  ;;  %v3353_v17 = vld [vmem:[#allocation5 + $0x240] sm:$0xff]  ;;  %p16780_p2 = pnand %p16779_p10, %p18918_p1  ;;  %p16787_p8 = por %p16786_p7, %p16785_p4 }
 0x27f   : > { %v15496_v41 = vadd.f32 %v2865_v58, %v17378_v27  ;;  %v2867_v11 = vpop.f32.mrb[30].mxu0 }
 0x280   : > { %v17474_v40 = vadd.f32 %v15495_v51, %v2912_v0  ;;  %v15497_v14 = vadd.f32 %v2867_v11, %v17374_v57  ;;  %v2869_v9 = vpop.f32.mrb[31].mxu0  ;;  %3008 = vadd.xlane.f32.xlu1 %v3007_v8  ;;  %v3281_v57 = vld [vmem:[#allocation5] sm:$0xff]  ;;  %p16781_p3 = pneg %p16780_p2 }
 0x281   : > { %v17478_v54 = vadd.f32 %v15496_v41, %v2913_v37  ;;  %v15498_v29 = vadd.f32 %v2869_v9, %v17378_v27  ;;  %v3293_v51 = vld [vmem:[#allocation5 + $0x60] sm:$0xff]  ;;  %v3282_v37 = vld [vmem:[#allocation5 + $0x8] sm:$0xff] }
 0x282   : > { %18877 = vst [vmem:[#allocation22_spill] sm:$0xff] %v17474_v40  ;;  %v17482_v23 = vadd.f32 %v15497_v14, %v2918_v53  ;;  %v3013_v58 = vadd.f32 %v3012_v34, %v17474_v40  ;;  %v14054_v9 = vcombine.low %v3281_v57, %v3293_v51  ;;  %v14055_v27 = vcombine.high %v3281_v57, %v3293_v51  ;;  %v3305_v8 = vld [vmem:[#allocation5 + $0xc0] sm:$0xff]  ;;  %v3306_v14 = vld [vmem:[#allocation5 + $0xc8] sm:$0xff]  ;;  %p16788_p11 = pnand %p16787_p8, %p16781_p3 }
 0x283   : > { %18878 = vst [vmem:[#allocation23_spill] sm:$0xff] %v17478_v54  ;;  %v17485_v19 = vadd.f32 %v15498_v29, %v2919_v63  ;;  %v3317_v41 = vld [vmem:[#allocation5 + $0x120] sm:$0xff]  ;;  %v14056_v53 = vcombine.low %v3282_v37, %v3294_v30  ;;  %v14057_v34 = vcombine.high %v3282_v37, %v3294_v30  ;;  %v3318_v29 = vld [vmem:[#allocation5 + $0x128] sm:$0xff] }
 0x284   : > { %18879 = vst [vmem:[#allocation24_spill] sm:$0xff] %v17482_v23  ;;  %v3014_v3 = vadd.f32 %v3013_v58, %v17478_v54  ;;  %v3020_v0 = vadd.f32 %v3019_v45, %v17482_v23  ;;  %v14079_v63 = vcombine.high %v3305_v8, %v3317_v41  ;;  %v3329_v58 = vld [vmem:[#allocation5 + $0x180] sm:$0xff]  ;;  %10319 = vmatprep.subr.bf16.mxu1 %v14055_v27  ;;  %v3330_v23 = vld [vmem:[#allocation5 + $0x188] sm:$0xff] }
 0x285   : > { %18880 = vst [vmem:[#allocation25_spill] sm:$0xff] %v17485_v19  ;;  %v14081_v45 = vcombine.high %v3306_v14, %v3318_v29  ;;  %10538 = vmatprep.subr.bf16.mxu0 %v14057_v34  ;;  %10320 = vmatpush1.bf16.msra.mxu1 %v14054_v9  ;;  %v14080_v57 = vcombine.low %v3306_v14, %v3318_v29  ;;  %v3365_v37 = vld [vmem:[#allocation5 + $0x2a0] sm:$0xff]  ;;  %v3354_v30 = vld [vmem:[#allocation5 + $0x248] sm:$0xff] }
 0x286   : > { %3015 = vadd.xlane.f32.xlu0 %v3014_v3  ;;  %v3021_v11 = vadd.f32 %v3020_v0, %v17485_v19  ;;  %v3341_v3 = vld [vmem:[#allocation5 + $0x1e0] sm:$0xff]  ;;  %v3342_v0 = vld [vmem:[#allocation5 + $0x1e8] sm:$0xff]  ;;  %10539 = vmatpush1.bf16.msra.mxu0 %v14056_v53  ;;  %v14127_v40 = vcombine.high %v3353_v17, %v3365_v37 }
 0x287   : > { %10321 = vmatprep.subr.bf16.mxu1 %v14079_v63  ;;  %v14103_v51 = vcombine.high %v3329_v58, %v3341_v3  ;;  %10540 = vmatprep.subr.bf16.mxu0 %v14081_v45  ;;  %v14105_v19 = vcombine.high %v3330_v23, %v3342_v0  ;;  %v3366_v54 = vld [vmem:[#allocation5 + $0x2a8] sm:$0xff]  ;;  %v14102_v24 = vcombine.low %v3329_v58, %v3341_v3  ;;  %v3377_v9 = vld [vmem:[#allocation5 + $0x300] sm:$0xff] }
 0x288   : > { %3022 = vadd.xlane.f32.xlu1 %v3021_v11  ;;  %v14078_v11 = vcombine.low %v3305_v8, %v3317_v41  ;;  %v14104_v27 = vcombine.low %v3330_v23, %v3342_v0  ;;  %v14129_v34 = vcombine.high %v3354_v30, %v3366_v54  ;;  %v3389_v8 = vld [vmem:[#allocation5 + $0x360] sm:$0xff]  ;;  %v3378_v41 = vld [vmem:[#allocation5 + $0x308] sm:$0xff]  ;;  %v14126_v63 = vcombine.low %v3353_v17, %v3365_v37 }
 0x289   : > { %v3390_v53 = vld [vmem:[#allocation5 + $0x368] sm:$0xff]  ;;  %v14128_v14 = vcombine.low %v3354_v30, %v3366_v54  ;;  %v14151_v29 = vcombine.high %v3377_v9, %v3389_v8  ;;  %v3413_v58 = vld [vmem:[#allocation5 + $0x420] sm:$0xff]  ;;  %v14150_v23 = vcombine.low %v3377_v9, %v3389_v8 }
 0x28a   : > { %10322 = vmatpush1.bf16.msra.mxu1 %v14078_v11  ;;  %10541 = vmatpush1.bf16.msra.mxu0 %v14080_v57  ;;  %v14153_v45 = vcombine.high %v3378_v41, %v3390_v53  ;;  %v3401_v11 = vld [vmem:[#allocation5 + $0x3c0] sm:$0xff]  ;;  %v3402_v3 = vld [vmem:[#allocation5 + $0x3c8] sm:$0xff] }
 0x28b   : > { %10323 = vmatprep.subr.bf16.mxu1 %v14103_v51  ;;  %10542 = vmatprep.subr.bf16.mxu0 %v14105_v19  ;;  %v3414_v57 = vld [vmem:[#allocation5 + $0x428] sm:$0xff]  ;;  %v14152_v19 = vcombine.low %v3378_v41, %v3390_v53  ;;  %v14175_v0 = vcombine.high %v3401_v11, %v3413_v58  ;;  %v3437_v17 = vld [vmem:[#allocation5 + $0x4e0] sm:$0xff]  ;;  %v14174_v54 = vcombine.low %v3401_v11, %v3413_v58 }
 0x28c   : > { %v14177_v51 = vcombine.high %v3402_v3, %v3414_v57  ;;  %v3426_v37 = vld [vmem:[#allocation5 + $0x488] sm:$0xff]  ;;  %v14176_v30 = vcombine.low %v3402_v3, %v3414_v57  ;;  %v3461_v9 = vld [vmem:[#allocation5 + $0x5a0] sm:$0xff] }
 0x28d   : > { %v3450_v8 = vld [vmem:[#allocation5 + $0x548] sm:$0xff]  ;;  %v3485_v11 = vld [vmem:[#allocation5 + $0x660] sm:$0xff] }
 0x28e   : > { %10324 = vmatpush1.bf16.msra.mxu1 %v14102_v24  ;;  %10543 = vmatpush1.bf16.msra.mxu0 %v14104_v27  ;;  %v3425_v24 = vld [vmem:[#allocation5 + $0x480] sm:$0xff]  ;;  %v3474_v58 = vld [vmem:[#allocation5 + $0x608] sm:$0xff] }
 0x28f   : > { %10325 = vmatprep.subr.bf16.mxu1 %v14127_v40  ;;  %10544 = vmatprep.subr.bf16.mxu0 %v14129_v34  ;;  %v3438_v40 = vld [vmem:[#allocation5 + $0x4e8] sm:$0xff]  ;;  %v14199_v27 = vcombine.high %v3425_v24, %v3437_v17  ;;  %v14198_v41 = vcombine.low %v3425_v24, %v3437_v17  ;;  %v3509_v24 = vld [vmem:[#allocation5 + $0x720] sm:$0xff] }
 0x290   : > { %v14201_v34 = vcombine.high %v3426_v37, %v3438_v40  ;;  %v14200_v53 = vcombine.low %v3426_v37, %v3438_v40  ;;  %v3498_v17 = vld [vmem:[#allocation5 + $0x6c8] sm:$0xff] }
 0x292   : > { %10326 = vmatpush1.bf16.msra.mxu1 %v14126_v63  ;;  %10545 = vmatpush1.bf16.msra.mxu0 %v14128_v14  ;;  %v3449_v63 = vld [vmem:[#allocation5 + $0x540] sm:$0xff]  ;;  %v3462_v14 = vld [vmem:[#allocation5 + $0x5a8] sm:$0xff] }
 0x293   : > { %10327 = vmatprep.subr.bf16.mxu1 %v14151_v29  ;;  %10546 = vmatprep.subr.bf16.mxu0 %v14153_v45  ;;  %v14223_v29 = vcombine.high %v3449_v63, %v3461_v9  ;;  %v14225_v45 = vcombine.high %v3450_v8, %v3462_v14  ;;  %v14222_v3 = vcombine.low %v3449_v63, %v3461_v9  ;;  %v3533_v63 = vld [vmem:[#allocation5 + $0x7e0] sm:$0xff]  ;;  %v3522_v9 = vld [vmem:[#allocation5 + $0x788] sm:$0xff] }
 0x294   : > { %v14224_v57 = vcombine.low %v3450_v8, %v3462_v14 }
 0x296   : > { %10328 = vmatpush1.bf16.msra.mxu1 %v14150_v23  ;;  %10547 = vmatpush1.bf16.msra.mxu0 %v14152_v19  ;;  %v3473_v23 = vld [vmem:[#allocation5 + $0x600] sm:$0xff]  ;;  %v3486_v19 = vld [vmem:[#allocation5 + $0x668] sm:$0xff] }
 0x297   : > { %10329 = vmatprep.subr.bf16.mxu1 %v14175_v0  ;;  %10548 = vmatprep.subr.bf16.mxu0 %v14177_v51  ;;  %v14247_v0 = vcombine.high %v3473_v23, %v3485_v11  ;;  %v14249_v51 = vcombine.high %v3474_v58, %v3486_v19  ;;  %v14246_v37 = vcombine.low %v3473_v23, %v3485_v11 }
 0x298   : > { %v14248_v40 = vcombine.low %v3474_v58, %v3486_v19 }
 0x29a   : > { %10330 = vmatpush1.bf16.msra.mxu1 %v14174_v54  ;;  %10549 = vmatpush1.bf16.msra.mxu0 %v14176_v30  ;;  %v3497_v54 = vld [vmem:[#allocation5 + $0x6c0] sm:$0xff]  ;;  %v3510_v30 = vld [vmem:[#allocation5 + $0x728] sm:$0xff] }
 0x29b   : > { %10331 = vmatprep.subr.bf16.mxu1 %v14199_v27  ;;  %10550 = vmatprep.subr.bf16.mxu0 %v14201_v34  ;;  %v14271_v27 = vcombine.high %v3497_v54, %v3509_v24  ;;  %v14273_v34 = vcombine.high %v3498_v17, %v3510_v30  ;;  %v14270_v8 = vcombine.low %v3497_v54, %v3509_v24 }
 0x29c   : > { %v14272_v14 = vcombine.low %v3498_v17, %v3510_v30 }
 0x29e   : > { %10332 = vmatpush1.bf16.msra.mxu1 %v14198_v41  ;;  %10551 = vmatpush1.bf16.msra.mxu0 %v14200_v53  ;;  %v3521_v41 = vld [vmem:[#allocation5 + $0x780] sm:$0xff]  ;;  %v3534_v53 = vld [vmem:[#allocation5 + $0x7e8] sm:$0xff] }
 0x29f   : > { %10333 = vmatprep.subr.bf16.mxu1 %v14223_v29  ;;  %10552 = vmatprep.subr.bf16.mxu0 %v14225_v45  ;;  %v14295_v29 = vcombine.high %v3521_v41, %v3533_v63  ;;  %v14297_v45 = vcombine.high %v3522_v9, %v3534_v53  ;;  %v14294_v23 = vcombine.low %v3521_v41, %v3533_v63 }
 0x2a0   : > { %v14296_v11 = vcombine.low %v3522_v9, %v3534_v53 }
 0x2a2   : > { %10334 = vmatpush1.bf16.msra.mxu1 %v14222_v3  ;;  %10553 = vmatpush1.bf16.msra.mxu0 %v14224_v57 }
 0x2a3   : > { %10335 = vmatprep.subr.bf16.mxu1 %v14247_v0  ;;  %10554 = vmatprep.subr.bf16.mxu0 %v14249_v51 }
 0x2a6   : > { %10336 = vmatpush1.bf16.msra.mxu1 %v14246_v37  ;;  %10555 = vmatpush1.bf16.msra.mxu0 %v14248_v40 }
 0x2a7   : > { %10337 = vmatprep.subr.bf16.mxu1 %v14271_v27  ;;  %10556 = vmatprep.subr.bf16.mxu0 %v14273_v34 }
 0x2aa   : > { %10338 = vmatpush1.bf16.msra.mxu1 %v14270_v8  ;;  %10557 = vmatpush1.bf16.msra.mxu0 %v14272_v14 }
 0x2ab   : > { %10339 = vmatprep.subr.bf16.mxu1 %v14295_v29  ;;  %10558 = vmatprep.subr.bf16.mxu0 %v14297_v45 }
 0x2ae   : > { %10340 = vmatpush1.bf16.msra.mxu1 %v14294_v23  ;;  %10559 = vmatpush1.bf16.msra.mxu0 %v14296_v11 }
 0x2fb   : > { %v2974_v58 = vpop.xlane.xlu0 %2973 }
 0x2fc   : > { %v3025_v19 = vmul.f32 0.0013020834, %v2974_v58 }
 0x2fe   : > { %v17491_v3 = vsub.f32 %v17236_v21, %v3025_v19  ;;  %v17494_v57 = vsub.f32 %v17239_v22, %v3025_v19  ;;  %v17497_v0 = vsub.f32 %v17319_v38, %v3025_v19  ;;  %v17500_v54 = vsub.f32 %v17322_v62, %v3025_v19 }
 0x2ff   : > { %v2981_v51 = vpop.xlane.xlu0 %2980  ;;  %v17507_v21 = vsub.f32 %v17389_v59, %v3025_v19  ;;  %v17521_v34 = vsub.f32 %v17395_v47, %v3025_v19 }
 0x300   : > { %18881 = vst [vmem:[#allocation26_spill] sm:$0xff] %v17500_v54  ;;  %v3026_v24 = vmul.f32 0.0013020834, %v2981_v51  ;;  %v3081_v17 = vmul.f32 %v17491_v3, %v17491_v3  ;;  %v3082_v30 = vmul.f32 %v17494_v57, %v17494_v57  ;;  %v3083_v22 = vmul.f32 %v17497_v0, %v17497_v0 }
 0x301   : > { %v3084_v59 = vmul.f32 %v17500_v54, %v17500_v54  ;;  %v3086_v11 = vmul.f32 %v17521_v34, %v17521_v34 }
 0x302   : > { %v3129_v37 = vadd.f32 %v3082_v30, %v3081_v17  ;;  %v17512_v38 = vsub.f32 %v17241_v31, %v3026_v24  ;;  %v17515_v62 = vsub.f32 %v17246_v49, %v3026_v24  ;;  %v17518_v40 = vsub.f32 %v17324_v1, %v3026_v24 }
 0x303   : > { %v2988_v27 = vpop.xlane.xlu1 %2987  ;;  %v17526_v41 = vsub.f32 %v17326_v4, %v3026_v24  ;;  %v3085_v1 = vmul.f32 %v17507_v21, %v17507_v21  ;;  %v17535_v47 = vsub.f32 %v17400_v15, %v3026_v24  ;;  %v17538_v53 = vsub.f32 %v17403_v43, %v3026_v24 }
 0x304   : > { %v3027_v63 = vmul.f32 0.0013020834, %v2988_v27  ;;  %v3130_v9 = vadd.f32 %v3129_v37, %v3083_v22  ;;  %v3087_v31 = vmul.f32 %v17512_v38, %v17512_v38  ;;  %v3088_v49 = vmul.f32 %v17515_v62, %v17515_v62 }
 0x305   : > { %18882 = vst [vmem:[#allocation27_spill] sm:$0xff] %v17526_v41  ;;  %v3089_v4 = vmul.f32 %v17518_v40, %v17518_v40  ;;  %v3090_v15 = vmul.f32 %v17526_v41, %v17526_v41  ;;  %v3091_v24 = vmul.f32 %v17535_v47, %v17535_v47  ;;  %v3092_v17 = vmul.f32 %v17538_v53, %v17538_v53 }
 0x306   : > { %v3131_v8 = vadd.f32 %v3130_v9, %v3084_v59  ;;  %v3136_v14 = vadd.f32 %v3088_v49, %v3087_v31  ;;  %v17543_v29 = vsub.f32 %v17257_v33, %v3027_v63  ;;  %v17546_v45 = vsub.f32 %v17260_v35, %v3027_v63 }
 0x307   : > { %v2995_v23 = vpop.xlane.xlu1 %2994  ;;  %v17553_v43 = vsub.f32 %v17331_v52, %v3027_v63  ;;  %v17556_v58 = vsub.f32 %v17334_v55, %v3027_v63  ;;  %v17565_v30 = vsub.f32 %v17416_v5, %v3027_v63  ;;  %v17570_v37 = vsub.f32 %v17423_v28, %v3027_v63 }
 0x308   : > { %v3028_v19 = vmul.f32 0.0013020834, %v2995_v23  ;;  %v3132_v51 = vadd.f32 %v3131_v8, %v3085_v1  ;;  %v3137_v33 = vadd.f32 %v3136_v14, %v3089_v4  ;;  %v3093_v35 = vmul.f32 %v17543_v29, %v17543_v29 }
 0x309   : > { %v3094_v52 = vmul.f32 %v17546_v45, %v17546_v45  ;;  %v3095_v9 = vmul.f32 %v17553_v43, %v17553_v43  ;;  %v3096_v28 = vmul.f32 %v17556_v58, %v17556_v58  ;;  %v3097_v8 = vmul.f32 %v17565_v30, %v17565_v30 }
 0x30a   : > { %v3133_v55 = vadd.f32 %v3132_v51, %v3086_v11  ;;  %v3138_v22 = vadd.f32 %v3137_v33, %v3090_v15  ;;  %v17573_v27 = vsub.f32 %v17262_v6, %v3028_v19  ;;  %v17578_v49 = vsub.f32 %v17266_v50, %v3028_v19 }
 0x30b   : > { %v3002_v59 = vpop.xlane.xlu0 %3001  ;;  %v3143_v31 = vadd.f32 %v3094_v52, %v3093_v35  ;;  %v17581_v5 = vsub.f32 %v17336_v61, %v3028_v19  ;;  %v17586_v6 = vsub.f32 %v17338_v20, %v3028_v19  ;;  %v17595_v11 = vsub.f32 %v17428_v44, %v3028_v19 }
 0x30c   : > { %v3029_v1 = vmul.f32 0.0013020834, %v3002_v59  ;;  %3134 = vadd.xlane.f32.xlu0 %v3133_v55  ;;  %v3139_v4 = vadd.f32 %v3138_v22, %v3091_v24  ;;  %v3099_v50 = vmul.f32 %v17573_v27, %v17573_v27  ;;  %v3100_v61 = vmul.f32 %v17578_v49, %v17578_v49 }
 0x30d   : > { %v3009_v63 = vpop.xlane.xlu1 %3008  ;;  %v3144_v14 = vadd.f32 %v3143_v31, %v3095_v9  ;;  %v17598_v15 = vsub.f32 %v17431_v10, %v3028_v19  ;;  %v3101_v20 = vmul.f32 %v17581_v5, %v17581_v5  ;;  %v3098_v52 = vmul.f32 %v17570_v37, %v17570_v37 }
 0x30e   : > { %v3140_v23 = vadd.f32 %v3139_v4, %v3092_v17  ;;  %v3030_v51 = vmul.f32 0.0013020834, %v3009_v63  ;;  %v3150_v35 = vadd.f32 %v3100_v61, %v3099_v50  ;;  %v17603_v24 = vsub.f32 %v17277_v12, %v3029_v1 }
 0x30f   : > { %v3145_v33 = vadd.f32 %v3144_v14, %v3096_v28  ;;  %v3102_v44 = vmul.f32 %v17586_v6, %v17586_v6  ;;  %v17610_v17 = vsub.f32 %v17280_v46, %v3029_v1  ;;  %v17613_v10 = vsub.f32 %v17343_v2, %v3029_v1 }
 0x310   : > { %3141 = vadd.xlane.f32.xlu1 %v3140_v23  ;;  %v3151_v55 = vadd.f32 %v3150_v35, %v3101_v20  ;;  %v17616_v22 = vsub.f32 %v17346_v36, %v3029_v1  ;;  %v3105_v12 = vmul.f32 %v17603_v24, %v17603_v24  ;;  %v3103_v59 = vmul.f32 %v17595_v11, %v17595_v11 }
 0x311   : > { %v3146_v19 = vadd.f32 %v3145_v33, %v3097_v8  ;;  %v3104_v9 = vmul.f32 %v17598_v15, %v17598_v15  ;;  %v17625_v46 = vsub.f32 %v17445_v25, %v3029_v1  ;;  %v3106_v2 = vmul.f32 %v17610_v17, %v17610_v17 }
 0x312   : > { %v3152_v28 = vadd.f32 %v3151_v55, %v3102_v44  ;;  %v3107_v36 = vmul.f32 %v17613_v10, %v17613_v10  ;;  %v17632_v63 = vsub.f32 %v17282_v16, %v3030_v51  ;;  %v17635_v50 = vsub.f32 %v17286_v18, %v3030_v51 }
 0x313   : > { %18883 = vst [vmem:[#allocation28_spill] sm:$0xff] %v17625_v46  ;;  %v3016_v31 = vpop.xlane.xlu0 %3015  ;;  %v3147_v4 = vadd.f32 %v3146_v19, %v3098_v52  ;;  %v3157_v14 = vadd.f32 %v3106_v2, %v3105_v12  ;;  %v17638_v25 = vsub.f32 %v17348_v56, %v3030_v51  ;;  %v17641_v20 = vsub.f32 %v17450_v42, %v3029_v1 }
 0x314   : > { %v3031_v8 = vmul.f32 0.0013020834, %v3016_v31  ;;  %v3153_v23 = vadd.f32 %v3152_v28, %v3103_v59  ;;  %v3108_v33 = vmul.f32 %v17616_v22, %v17616_v22  ;;  %v17646_v16 = vsub.f32 %v17350_v39, %v3030_v51 }
 0x315   : > { %3148 = vadd.xlane.f32.xlu0 %v3147_v4  ;;  %v3023_v61 = vpop.xlane.xlu1 %3022  ;;  %v3109_v35 = vmul.f32 %v17625_v46, %v17625_v46  ;;  %v3158_v18 = vadd.f32 %v3157_v14, %v3107_v36  ;;  %v3111_v56 = vmul.f32 %v17632_v63, %v17632_v63  ;;  %v3112_v52 = vmul.f32 %v17635_v50, %v17635_v50  ;;  %v18887_v36 = vld [vmem:[#allocation22_spill] sm:$0xff] }
 0x316   : > { %v3032_v44 = vmul.f32 0.0013020834, %v3023_v61  ;;  %v3154_v19 = vadd.f32 %v3153_v23, %v3104_v9  ;;  %v17655_v42 = vsub.f32 %v17456_v48, %v3030_v51  ;;  %v17658_v1 = vsub.f32 %v17459_v7, %v3030_v51 }
 0x317   : > { %v3159_v39 = vadd.f32 %v3158_v18, %v3108_v33  ;;  %v3113_v55 = vmul.f32 %v17638_v25, %v17638_v25  ;;  %v3164_v12 = vadd.f32 %v3112_v52, %v3111_v56  ;;  %v17663_v59 = vsub.f32 %v17297_v32, %v3031_v8  ;;  %v18889_v33 = vld [vmem:[#allocation14_spill] sm:$0xff]  ;;  %v18891_v56 = vld [vmem:[#allocation15_spill] sm:$0xff] }
 0x318   : > { %3155 = vadd.xlane.f32.xlu1 %v3154_v19  ;;  %v3110_v2 = vmul.f32 %v17641_v20, %v17641_v20  ;;  %v3114_v9 = vmul.f32 %v17646_v16, %v17646_v16  ;;  %v17670_v48 = vsub.f32 %v17300_v60, %v3031_v8  ;;  %v17673_v7 = vsub.f32 %v17355_v13, %v3031_v8  ;;  %v18893_v19 = vld [vmem:[#allocation18_spill] sm:$0xff] }
 0x319   : > { %18884 = vst [vmem:[#allocation29_spill] sm:$0xff] %v17663_v59  ;;  %v3160_v51 = vadd.f32 %v3159_v39, %v3109_v35  ;;  %v3165_v31 = vadd.f32 %v3164_v12, %v3113_v55  ;;  %v17676_v4 = vsub.f32 %v17358_v26, %v3031_v8  ;;  %v3117_v32 = vmul.f32 %v17663_v59, %v17663_v59  ;;  %v18895_v12 = vld [vmem:[#allocation23_spill] sm:$0xff] }
 0x31a   : > { %18885 = vst [vmem:[#allocation30_spill] sm:$0xff] %v17673_v7  ;;  %v3115_v28 = vmul.f32 %v17655_v42, %v17655_v42  ;;  %v17683_v14 = vsub.f32 %v18887_v36, %v3031_v8  ;;  %v3118_v60 = vmul.f32 %v17670_v48, %v17670_v48  ;;  %v3116_v13 = vmul.f32 %v17658_v1, %v17658_v1  ;;  %v3557_v36 = vld [vmem:[#allocation5 + $0x8a0] sm:$0xff] }
 0x31b   : > { %18886 = vst [vmem:[#allocation31_spill] sm:$0xff] %v17676_v4  ;;  %v3161_v61 = vadd.f32 %v3160_v51, %v3110_v2  ;;  %v3166_v23 = vadd.f32 %v3165_v31, %v3114_v9  ;;  %v17690_v26 = vsub.f32 %v18889_v33, %v3032_v44  ;;  %v3119_v35 = vmul.f32 %v17673_v7, %v17673_v7  ;;  %v3545_v31 = vld [vmem:[#allocation5 + $0x840] sm:$0xff] }
 0x31c   : > { %18888 = vst [vmem:[#allocation22_spill] sm:$0xff] %v17683_v14  ;;  %v3171_v18 = vadd.f32 %v3118_v60, %v3117_v32  ;;  %v17695_v52 = vsub.f32 %v18891_v56, %v3032_v44  ;;  %v17698_v39 = vsub.f32 %v18893_v19, %v3032_v44  ;;  %v17701_v2 = vsub.f32 %v18895_v12, %v3031_v8  ;;  %v3546_v32 = vld [vmem:[#allocation5 + $0x848] sm:$0xff]  ;;  %v18896_v56 = vld [vmem:[#allocation19_spill] sm:$0xff] }
 0x31d   : > { %18890 = vst [vmem:[#allocation14_spill] sm:$0xff] %v17690_v26  ;;  %3162 = vadd.xlane.f32.xlu0 %v3161_v61  ;;  %v3167_v55 = vadd.f32 %v3166_v23, %v3115_v28  ;;  %v3120_v9 = vmul.f32 %v17676_v4, %v17676_v4  ;;  %v3123_v51 = vmul.f32 %v17690_v26, %v17690_v26  ;;  %v3558_v28 = vld [vmem:[#allocation5 + $0x8a8] sm:$0xff] }
 0x31e   : > { %18892 = vst [vmem:[#allocation15_spill] sm:$0xff] %v17695_v52  ;;  %18894 = vst [vmem:[#allocation18_spill] sm:$0xff] %v17698_v39  ;;  %v3121_v60 = vmul.f32 %v17683_v14, %v17683_v14  ;;  %v3172_v33 = vadd.f32 %v3171_v18, %v3119_v35  ;;  %v17710_v19 = vsub.f32 %v18896_v56, %v3032_v44  ;;  %v18897_v23 = vld [vmem:[#allocation24_spill] sm:$0xff]  ;;  %v18898_v18 = vld [vmem:[#allocation25_spill] sm:$0xff] }
 0x31f   : > { %v3124_v8 = vmul.f32 %v17695_v52, %v17695_v52  ;;  %v3168_v61 = vadd.f32 %v3167_v55, %v3116_v13  ;;  %v17715_v12 = vsub.f32 %v18897_v23, %v3032_v44  ;;  %v3125_v54 = vmul.f32 %v17698_v39, %v17698_v39  ;;  %v3569_v13 = vld [vmem:[#allocation5 + $0x900] sm:$0xff]  ;;  %v3570_v23 = vld [vmem:[#allocation5 + $0x908] sm:$0xff] }
 0x320   : > { %v14318_v7 = vcombine.low %v3545_v31, %v3557_v36  ;;  %v3173_v59 = vadd.f32 %v3172_v33, %v3120_v9  ;;  %v14319_v46 = vcombine.high %v3545_v31, %v3557_v36  ;;  %v14320_v14 = vcombine.low %v3546_v32, %v3558_v28  ;;  %v3581_v55 = vld [vmem:[#allocation5 + $0x960] sm:$0xff] }
 0x321   : > { %v3178_v26 = vadd.f32 %v3124_v8, %v3123_v51  ;;  %3169 = vadd.xlane.f32.xlu1 %v3168_v61  ;;  %v3122_v35 = vmul.f32 %v17701_v2, %v17701_v2  ;;  %v17722_v56 = vsub.f32 %v18898_v18, %v3032_v44  ;;  %v14321_v52 = vcombine.high %v3546_v32, %v3558_v28  ;;  %v3582_v51 = vld [vmem:[#allocation5 + $0x968] sm:$0xff] }
 0x322   : > { %v3174_v4 = vadd.f32 %v3173_v59, %v3121_v60  ;;  %v3126_v39 = vmul.f32 %v17710_v19, %v17710_v19  ;;  %10341 = vmatprep.subr.bf16.mxu1 %v14319_v46  ;;  %v14343_v9 = vcombine.high %v3569_v13, %v3581_v55  ;;  %v3127_v31 = vmul.f32 %v17715_v12, %v17715_v12  ;;  %v3593_v59 = vld [vmem:[#allocation5 + $0x9c0] sm:$0xff]  ;;  %v3594_v60 = vld [vmem:[#allocation5 + $0x9c8] sm:$0xff] }
 0x323   : > { %v3179_v41 = vadd.f32 %v3178_v26, %v3125_v54  ;;  %10560 = vmatprep.subr.bf16.mxu0 %v14321_v52  ;;  %10342 = vmatpush1.bf16.msra.mxu1 %v14318_v7  ;;  %v14342_v36 = vcombine.low %v3569_v13, %v3581_v55  ;;  %v14345_v44 = vcombine.high %v3570_v23, %v3582_v51  ;;  %v3605_v26 = vld [vmem:[#allocation5 + $0xa20] sm:$0xff]  ;;  %v3606_v7 = vld [vmem:[#allocation5 + $0xa28] sm:$0xff] }
 0x324   : > { %v3175_v33 = vadd.f32 %v3174_v4, %v3122_v35  ;;  %10561 = vmatpush1.bf16.msra.mxu0 %v14320_v14  ;;  %10343 = vmatprep.subr.bf16.mxu1 %v14343_v9  ;;  %v14344_v8 = vcombine.low %v3570_v23, %v3582_v51  ;;  %v3128_v54 = vmul.f32 %v17722_v56, %v17722_v56  ;;  %v3617_v14 = vld [vmem:[#allocation5 + $0xa80] sm:$0xff]  ;;  %v3618_v35 = vld [vmem:[#allocation5 + $0xa88] sm:$0xff] }
 0x325   : > { %v3180_v32 = vadd.f32 %v3179_v41, %v3126_v39  ;;  %10562 = vmatprep.subr.bf16.mxu0 %v14345_v44  ;;  %v14366_v28 = vcombine.low %v3593_v59, %v3605_v26  ;;  %v14367_v52 = vcombine.high %v3593_v59, %v3605_v26  ;;  %v14368_v4 = vcombine.low %v3594_v60, %v3606_v7  ;;  %v3629_v39 = vld [vmem:[#allocation5 + $0xae0] sm:$0xff]  ;;  %v3630_v55 = vld [vmem:[#allocation5 + $0xae8] sm:$0xff] }
 0x326   : > { %3176 = vadd.xlane.f32.xlu0 %v3175_v33  ;;  %v14369_v41 = vcombine.high %v3594_v60, %v3606_v7  ;;  %v14390_v18 = vcombine.low %v3617_v14, %v3629_v39  ;;  %v14391_v13 = vcombine.high %v3617_v14, %v3629_v39  ;;  %v14392_v23 = vcombine.low %v3618_v35, %v3630_v55  ;;  %v3641_v51 = vld [vmem:[#allocation5 + $0xb40] sm:$0xff]  ;;  %v3654_v33 = vld [vmem:[#allocation5 + $0xba8] sm:$0xff] }
 0x327   : > { %v3181_v46 = vadd.f32 %v3180_v32, %v3127_v31  ;;  %10344 = vmatpush1.bf16.msra.mxu1 %v14342_v36  ;;  %v14393_v9 = vcombine.high %v3618_v35, %v3630_v55  ;;  %v3653_v31 = vld [vmem:[#allocation5 + $0xba0] sm:$0xff]  ;;  %v3642_v36 = vld [vmem:[#allocation5 + $0xb48] sm:$0xff] }
 0x328   : > { %10563 = vmatpush1.bf16.msra.mxu0 %v14344_v8  ;;  %10345 = vmatprep.subr.bf16.mxu1 %v14367_v52  ;;  %v14415_v44 = vcombine.high %v3641_v51, %v3653_v31  ;;  %v14414_v32 = vcombine.low %v3641_v51, %v3653_v31  ;;  %v14416_v8 = vcombine.low %v3642_v36, %v3654_v33  ;;  %v17732_v59 = vld [vmem:[#allocation5 + $0xc60] sm:$0xff]  ;;  %v17734_v26 = vld [vmem:[#allocation5 + $0xc08] sm:$0xff] }
 0x329   : > { %v3182_v61 = vadd.f32 %v3181_v46, %v3128_v54  ;;  %10564 = vmatprep.subr.bf16.mxu0 %v14369_v41  ;;  %v14417_v54 = vcombine.high %v3642_v36, %v3654_v33  ;;  %v17730_v46 = vld [vmem:[#allocation5 + $0xc00] sm:$0xff]  ;;  %v3678_v52 = vld [vmem:[#allocation5 + $0xc68] sm:$0xff] }
 0x32a   : > { %v14438_v60 = vcombine.low %v17730_v46, %v17732_v59  ;;  %v14440_v7 = vcombine.low %v17734_v26, %v3678_v52 }
 0x32b   : > { %3183 = vadd.xlane.f32.xlu1 %v3182_v61  ;;  %10346 = vmatpush1.bf16.msra.mxu1 %v14366_v28  ;;  %v14439_v28 = vcombine.high %v17730_v46, %v17732_v59  ;;  %v14441_v61 = vcombine.high %v17734_v26, %v3678_v52  ;;  %v3689_v46 = vld [vmem:[#allocation5 + $0xcc0] sm:$0xff]  ;;  %v3690_v52 = vld [vmem:[#allocation5 + $0xcc8] sm:$0xff] }
 0x32c   : > { %10565 = vmatpush1.bf16.msra.mxu0 %v14368_v4  ;;  %10347 = vmatprep.subr.bf16.mxu1 %v14391_v13 }
 0x32d   : > { %10566 = vmatprep.subr.bf16.mxu0 %v14393_v9 }
 0x32f   : > { %10348 = vmatpush1.bf16.msra.mxu1 %v14390_v18 }
 0x330   : > { %10567 = vmatpush1.bf16.msra.mxu0 %v14392_v23  ;;  %10349 = vmatprep.subr.bf16.mxu1 %v14415_v44 }
 0x331   : > { %10568 = vmatprep.subr.bf16.mxu0 %v14417_v54 }
 0x333   : > { %10350 = vmatpush1.bf16.msra.mxu1 %v14414_v32 }
 0x334   : > { %10569 = vmatpush1.bf16.msra.mxu0 %v14416_v8  ;;  %10392 = vmatprep.subr.bf16.mxu1 %v14439_v28  ;;  %v3701_v28 = vld [vmem:[#allocation5 + $0xd20] sm:$0xff] }
 0x335   : > { %10611 = vmatprep.subr.bf16.mxu0 %v14441_v61  ;;  %v3702_v61 = vld [vmem:[#allocation5 + $0xd28] sm:$0xff] }
 0x399   : > { %v3135_v4 = vpop.xlane.xlu0 %3134 }
 0x39a   : > { %v3185_v41 = vmul.f32 0.0013020834, %v3135_v4 }
 0x39c   : > { %v3193_v14 = vadd.f32 1e-12, %v3185_v41 }
 0x39d   : > { %v3142_v39 = vpop.xlane.xlu1 %3141 }
 0x39e   : > { %v3186_v35 = vmul.f32 0.0013020834, %v3142_v39  ;;  %16693 = vrsqrt.f32 %v3193_v14 }
 0x3a0   : > { %v3194_v18 = vadd.f32 1e-12, %v3186_v35 }
 0x3a2   : > { %16695 = vrsqrt.f32 %v3194_v18  ;;  %v3149_v13 = vpop.xlane.xlu0 %3148 }
 0x3a3   : > { %v3187_v55 = vmul.f32 0.0013020834, %v3149_v13  ;;  %v14463_v13 = vcombine.high %v3689_v46, %v3701_v28 }
 0x3a5   : > { %v3195_v23 = vadd.f32 1e-12, %v3187_v55  ;;  %v3156_v9 = vpop.xlane.xlu1 %3155  ;;  %v17768_v55 = vld [vmem:[#allocation5 + $0xd80] sm:$0xff] }
 0x3a6   : > { %v3188_v51 = vmul.f32 0.0013020834, %v3156_v9  ;;  %v3726_v9 = vld [vmem:[#allocation5 + $0xde8] sm:$0xff] }
 0x3a7   : > { %16697 = vrsqrt.f32 %v3195_v23 }
 0x3a8   : > { %v17742_v31 = vpop.eup %16693  ;;  %v3196_v36 = vadd.f32 1e-12, %v3188_v51 }
 0x3a9   : > { %v3210_v8 = vmul.f32 %v17742_v31, %v17494_v57  ;;  %v3209_v54 = vmul.f32 %v17742_v31, %v17491_v3  ;;  %v3211_v4 = vmul.f32 %v17742_v31, %v17497_v0  ;;  %v3214_v3 = vmul.f32 %v17742_v31, %v17521_v34 }
 0x3aa   : > { %16699 = vrsqrt.f32 %v3196_v36  ;;  %v3163_v44 = vpop.xlane.xlu0 %3162  ;;  %v14465_v0 = vcombine.high %v3690_v52, %v3702_v61  ;;  %v14462_v36 = vcombine.low %v3689_v46, %v3701_v28  ;;  %v17790_v46 = vld [vmem:[#allocation5 + $0xe40] sm:$0xff] }
 0x3ab   : > { %v3189_v32 = vmul.f32 0.0013020834, %v3163_v44  ;;  %v14464_v44 = vcombine.low %v3690_v52, %v3702_v61  ;;  %v17792_v28 = vld [vmem:[#allocation5 + $0xea0] sm:$0xff] }
 0x3ac   : > { %v17744_v33 = vpop.eup %16695 }
 0x3ad   : > { %v3216_v59 = vmul.f32 %v17744_v33, %v17515_v62  ;;  %v3215_v26 = vmul.f32 %v17744_v33, %v17512_v38  ;;  %v3217_v41 = vmul.f32 %v17744_v33, %v17518_v40  ;;  %v3197_v57 = vadd.f32 1e-12, %v3189_v32  ;;  %v17770_v40 = vld [vmem:[#allocation5 + $0xde0] sm:$0xff] }
 0x3ae   : > { %v3220_v14 = vmul.f32 %v17744_v33, %v17538_v53  ;;  %v3170_v62 = vpop.xlane.xlu1 %3169  ;;  %v3714_v53 = vld [vmem:[#allocation5 + $0xd88] sm:$0xff]  ;;  %v14486_v32 = vcombine.low %v17768_v55, %v17770_v40 }
 0x3af   : > { %v17762_v39 = vpack.c.bf16 %v3216_v59, %v3210_v8  ;;  %v17764_v38 = vpack.c.bf16 %v3215_v26, %v3209_v54  ;;  %v17766_v35 = vpack.c.bf16 %v3217_v41, %v3211_v4  ;;  %v3190_v18 = vmul.f32 0.0013020834, %v3170_v62 }
 0x3b0   : > { %v17772_v23 = vpack.c.bf16 %v3220_v14, %v3214_v3  ;;  %16701 = vrsqrt.f32 %v3197_v57  ;;  %v3213_v8 = vmul.f32 %v17742_v31, %v17507_v21  ;;  %v3219_v54 = vmul.f32 %v17744_v33, %v17535_v47  ;;  %v3738_v57 = vld [vmem:[#allocation5 + $0xe48] sm:$0xff] }
 0x3b1   : > { %v17774_v34 = vpop.eup %16697  ;;  %10351 = vmatprep.mubr.bf16.mxu1 %v17762_v39  ;;  %10570 = vmatprep.mubr.bf16.mxu0 %v17762_v39  ;;  %v3198_v51 = vadd.f32 1e-12, %v3190_v18  ;;  %v3750_v3 = vld [vmem:[#allocation5 + $0xea8] sm:$0xff] }
 0x3b2   : > { %10352 = vmatmul.mubr.bf16.vlgmr.msra.gmra.mrb[32].mxu1 %v17764_v38  ;;  %10571 = vmatmul.mubr.bf16.vlgmr.msra.gmra.mrb[32].mxu0 %v17764_v38  ;;  %v3222_v26 = vmul.f32 %v17774_v34, %v17546_v45  ;;  %v3221_v47 = vmul.f32 %v17774_v34, %v17543_v29  ;;  %v3224_v61 = vmul.f32 %v17774_v34, %v17556_v58 }
 0x3b3   : > { %10393 = vmatpush1.bf16.msra.mxu1 %v14438_v60  ;;  %10612 = vmatpush1.bf16.msra.mxu0 %v14440_v7  ;;  %16703 = vrsqrt.f32 %v3198_v51  ;;  %v3177_v59 = vpop.xlane.xlu0 %3176  ;;  %v14487_v60 = vcombine.high %v17768_v55, %v17770_v40  ;;  %v14489_v7 = vcombine.high %v3714_v53, %v3726_v9  ;;  %v17798_v4 = vpack.c.bf16 %v3219_v54, %v3213_v8  ;;  %v17814_v40 = vld [vmem:[#allocation5 + $0xf00] sm:$0xff] }
 0x3b4   : > { %10394 = vmatprep.subr.bf16.mxu1 %v14463_v13  ;;  %10613 = vmatprep.subr.bf16.mxu0 %v14465_v0  ;;  %v16700_v52 = vpop.eup %16699  ;;  %v3191_v21 = vmul.f32 0.0013020834, %v3177_v59  ;;  %v14488_v13 = vcombine.low %v3714_v53, %v3726_v9  ;;  %v14511_v29 = vcombine.high %v17790_v46, %v17792_v28  ;;  %v3223_v58 = vmul.f32 %v17774_v34, %v17553_v43  ;;  %v17816_v53 = vld [vmem:[#allocation5 + $0xf60] sm:$0xff]  ;;  %v3762_v43 = vld [vmem:[#allocation5 + $0xf08] sm:$0xff] }
 0x3b5   : > { %v3228_v45 = vmul.f32 %v16700_v52, %v17578_v49  ;;  %v3227_v41 = vmul.f32 %v16700_v52, %v17573_v27  ;;  %v3230_v14 = vmul.f32 %v16700_v52, %v17586_v6  ;;  %v3229_v62 = vmul.f32 %v16700_v52, %v17581_v5 }
 0x3b6   : > { %v3199_v18 = vadd.f32 1e-12, %v3191_v21  ;;  %v14513_v55 = vcombine.high %v3738_v57, %v3750_v3  ;;  %v3232_v51 = vmul.f32 %v16700_v52, %v17598_v15  ;;  %v14510_v15 = vcombine.low %v17790_v46, %v17792_v28  ;;  %v3785_v28 = vld [vmem:[#allocation5 + $0xfc0] sm:$0xff] }
 0x3b7   : > { %10395 = vmatpush1.bf16.msra.mxu1 %v14462_v36  ;;  %10614 = vmatpush1.bf16.msra.mxu0 %v14464_v44  ;;  %v17808_v49 = vpack.c.bf16 %v3228_v45, %v3222_v26  ;;  %v17810_v27 = vpack.c.bf16 %v3227_v41, %v3221_v47  ;;  %v17812_v6 = vpack.c.bf16 %v3230_v14, %v3224_v61  ;;  %v3774_v36 = vld [vmem:[#allocation5 + $0xf68] sm:$0xff]  ;;  %v3797_v61 = vld [vmem:[#allocation5 + $0x1020] sm:$0xff] }
 0x3b8   : > { %v3184_v0 = vpop.xlane.xlu1 %3183  ;;  %10396 = vmatprep.subr.bf16.mxu1 %v14487_v60  ;;  %10615 = vmatprep.subr.bf16.mxu0 %v14489_v7  ;;  %v17818_v9 = vpack.c.bf16 %v3229_v62, %v3223_v58  ;;  %16705 = vrsqrt.f32 %v3199_v18  ;;  %v3226_v44 = vmul.f32 %v17774_v34, %v17570_v37  ;;  %v14512_v59 = vcombine.low %v3738_v57, %v3750_v3  ;;  %v3786_v14 = vld [vmem:[#allocation5 + $0xfc8] sm:$0xff] }
 0x3b9   : > { %v3192_v5 = vmul.f32 0.0013020834, %v3184_v0  ;;  %10361 = vmatprep.mubr.bf16.mxu1 %v17808_v49  ;;  %10580 = vmatprep.mubr.bf16.mxu0 %v17808_v49  ;;  %v14534_v26 = vcombine.low %v17814_v40, %v17816_v53  ;;  %v14535_v37 = vcombine.high %v17814_v40, %v17816_v53  ;;  %v14537_v7 = vcombine.high %v3762_v43, %v3774_v36  ;;  %v3798_v62 = vld [vmem:[#allocation5 + $0x1028] sm:$0xff]  ;;  %v17873_v0 = vld [vmem:[#allocation5 + $0x1140] sm:$0xff] }
 0x3ba   : > { %v17825_v8 = vpop.eup %16701  ;;  %10362 = vmatmul.mubr.bf16.gmra.mrb[36].mxu1 %v17810_v27  ;;  %10581 = vmatmul.mubr.bf16.gmra.mrb[36].mxu0 %v17810_v27  ;;  %v17833_v60 = vpack.c.bf16 %v3232_v51, %v3226_v44  ;;  %v3231_v21 = vmul.f32 %v16700_v52, %v17595_v11  ;;  %v14536_v46 = vcombine.low %v3762_v43, %v3774_v36 }
 0x3bb   : > { %v3200_v54 = vadd.f32 1e-12, %v3192_v5  ;;  %10397 = vmatpush1.bf16.msra.mxu1 %v14486_v32  ;;  %10616 = vmatpush1.bf16.msra.mxu0 %v14488_v13  ;;  %v3234_v32 = vmul.f32 %v17825_v8, %v17610_v17  ;;  %v3236_v45 = vmul.f32 %v17825_v8, %v17616_v22  ;;  %v3225_v41 = vmul.f32 %v17774_v34, %v17565_v30  ;;  %v17875_v5 = vld [vmem:[#allocation5 + $0x11a0] sm:$0xff] }
 0x3bc   : > { %10398 = vmatprep.subr.bf16.mxu1 %v14511_v29  ;;  %10617 = vmatprep.subr.bf16.mxu0 %v14513_v55  ;;  %v3233_v17 = vmul.f32 %v17825_v8, %v17603_v24  ;;  %v3235_v22 = vmul.f32 %v17825_v8, %v17613_v10  ;;  %v14561_v13 = vcombine.high %v3786_v14, %v3798_v62  ;;  %v17864_v24 = vld [vmem:[#allocation5 + $0x1088] sm:$0xff] }
 0x3bd   : > { %16707 = vrsqrt.f32 %v3200_v54  ;;  %v16704_v47 = vpop.eup %16703  ;;  %v17852_v18 = vpack.c.bf16 %v3231_v21, %v3225_v41  ;;  %v17866_v29 = vld [vmem:[#allocation5 + $0x10e8] sm:$0xff]  ;;  %v3238_v55 = vmul.f32 %v17825_v8, %v17641_v20  ;;  %v14558_v53 = vcombine.low %v3785_v28, %v3797_v61  ;;  %v18900_v21 = vld [vmem:[#allocation31_spill] sm:$0xff]  ;;  %v18903_v41 = vld [vmem:[#allocation14_spill] sm:$0xff] }
 0x3be   : > { %v3240_v57 = vmul.f32 %v16704_v47, %v17635_v50  ;;  %v3239_v3 = vmul.f32 %v16704_v47, %v17632_v63  ;;  %v3242_v11 = vmul.f32 %v16704_v47, %v17646_v16  ;;  %v3241_v52 = vmul.f32 %v16704_v47, %v17638_v25  ;;  %v17856_v50 = vld [vmem:[#allocation5 + $0x1080] sm:$0xff] }
 0x3bf   : > { %10399 = vmatpush1.bf16.msra.mxu1 %v14510_v15  ;;  %10618 = vmatpush1.bf16.msra.mxu0 %v14512_v59  ;;  %v14559_v63 = vcombine.high %v3785_v28, %v3797_v61  ;;  %v17858_v16 = vld [vmem:[#allocation5 + $0x10e0] sm:$0xff]  ;;  %v3244_v58 = vmul.f32 %v16704_v47, %v17658_v1  ;;  %v14560_v51 = vcombine.low %v3786_v14, %v3798_v62  ;;  %v18904_v14 = vld [vmem:[#allocation18_spill] sm:$0xff] }
 0x3c0   : > { %v17854_v30 = vpack.c.bf16 %v3240_v57, %v3234_v32  ;;  %10400 = vmatprep.subr.bf16.mxu1 %v14535_v37  ;;  %10619 = vmatprep.subr.bf16.mxu0 %v14537_v7  ;;  %v17860_v25 = vpack.c.bf16 %v3242_v11, %v3236_v45  ;;  %v17862_v34 = vpack.c.bf16 %v3239_v3, %v3233_v17  ;;  %v18899_v37 = vld [vmem:[#allocation27_spill] sm:$0xff]  ;;  %v3846_v11 = vld [vmem:[#allocation5 + $0x11a8] sm:$0xff] }
 0x3c1   : > { %v17868_v10 = vpack.c.bf16 %v3241_v52, %v3235_v22  ;;  %v14582_v1 = vcombine.low %v17856_v50, %v17858_v16  ;;  %v14583_v43 = vcombine.high %v17856_v50, %v17858_v16  ;;  %v14584_v36 = vcombine.low %v17864_v24, %v17866_v29  ;;  %v18902_v61 = vld [vmem:[#allocation15_spill] sm:$0xff] }
 0x3c2   : > { %10371 = vmatprep.mubr.bf16.mxu1 %v17854_v30  ;;  %10590 = vmatprep.mubr.bf16.mxu0 %v17854_v30  ;;  %v16706_v40 = vpop.eup %16705  ;;  %v17887_v44 = vpack.c.bf16 %v3244_v58, %v3238_v55  ;;  %v14585_v20 = vcombine.high %v17864_v24, %v17866_v29  ;;  %v14607_v54 = vcombine.high %v17873_v0, %v17875_v5  ;;  %v3857_v16 = vld [vmem:[#allocation5 + $0x1200] sm:$0xff] }
 0x3c3   : > { %10372 = vmatmul.mubr.bf16.gmra.mrb[40].mxu1 %v17862_v34  ;;  %10591 = vmatmul.mubr.bf16.gmra.mrb[40].mxu0 %v17862_v34  ;;  %v3243_v15 = vmul.f32 %v16704_v47, %v17655_v42  ;;  %v3218_v7 = vmul.f32 %v17744_v33, %v18899_v37  ;;  %v3248_v32 = vmul.f32 %v16706_v40, %v18900_v21  ;;  %v18905_v42 = vld [vmem:[#allocation29_spill] sm:$0xff]  ;;  %v3834_v47 = vld [vmem:[#allocation5 + $0x1148] sm:$0xff]  ;;  %v18906_v33 = vld [vmem:[#allocation30_spill] sm:$0xff] }
 0x3c4   : > { %10401 = vmatpush1.bf16.msra.mxu1 %v14534_v26  ;;  %10620 = vmatpush1.bf16.msra.mxu0 %v14536_v46  ;;  %v3246_v26 = vmul.f32 %v16706_v40, %v17670_v48  ;;  %v18901_v46 = vld [vmem:[#allocation28_spill] sm:$0xff]  ;;  %v3245_v48 = vmul.f32 %v16706_v40, %v18905_v42  ;;  %v3247_v52 = vmul.f32 %v16706_v40, %v18906_v33  ;;  %v3869_v55 = vld [vmem:[#allocation5 + $0x1260] sm:$0xff] }
 0x3c5   : > { %10402 = vmatprep.subr.bf16.mxu1 %v14559_v63  ;;  %10621 = vmatprep.subr.bf16.mxu0 %v14561_v13  ;;  %v3237_v28 = vmul.f32 %v17825_v8, %v18901_v46  ;;  %v18907_v8 = vld [vmem:[#allocation26_spill] sm:$0xff]  ;;  %v3250_v24 = vmul.f32 %v16706_v40, %v17701_v2  ;;  %v14609_v58 = vcombine.high %v3834_v47, %v3846_v11  ;;  %v3882_v21 = vld [vmem:[#allocation5 + $0x12c8] sm:$0xff]  ;;  %v3905_v46 = vld [vmem:[#allocation5 + $0x1380] sm:$0xff] }
 0x3c6   : > { %v3212_v63 = vmul.f32 %v17742_v31, %v18907_v8  ;;  %v18908_v31 = vld [vmem:[#allocation22_spill] sm:$0xff]  ;;  %v3930_v42 = vld [vmem:[#allocation5 + $0x1448] sm:$0xff]  ;;  %v3953_v8 = vld [vmem:[#allocation5 + $0x1500] sm:$0xff] }
 0x3c7   : > { %v16708_v59 = vpop.eup %16707  ;;  %v17906_v17 = vpack.c.bf16 %v3243_v15, %v3237_v28  ;;  %v3917_v28 = vld [vmem:[#allocation5 + $0x13e0] sm:$0xff] }
 0x3c8   : > { %v3252_v45 = vmul.f32 %v16708_v59, %v18902_v61  ;;  %v3251_v57 = vmul.f32 %v16708_v59, %v18903_v41  ;;  %v3254_v3 = vmul.f32 %v16708_v59, %v17710_v19  ;;  %v3253_v62 = vmul.f32 %v16708_v59, %v18904_v14  ;;  %10403 = vmatpush1.bf16.msra.mxu1 %v14558_v53  ;;  %v3858_v53 = vld [vmem:[#allocation5 + $0x1208] sm:$0xff]  ;;  %v3929_v14 = vld [vmem:[#allocation5 + $0x1440] sm:$0xff] }
 0x3c9   : > { %10622 = vmatpush1.bf16.msra.mxu0 %v14560_v51  ;;  %10404 = vmatprep.subr.bf16.mxu1 %v14583_v43  ;;  %v3256_v29 = vmul.f32 %v16708_v59, %v17722_v56  ;;  %v3870_v51 = vld [vmem:[#allocation5 + $0x1268] sm:$0xff]  ;;  %v3249_v43 = vmul.f32 %v16706_v40, %v18908_v31  ;;  %v17926_v15 = vpack.c.bf16 %v3218_v7, %v3212_v63  ;;  %v3893_v7 = vld [vmem:[#allocation5 + $0x1320] sm:$0xff] }
 0x3ca   : > { %v17908_v22 = vpack.c.bf16 %v3252_v45, %v3246_v26  ;;  %10623 = vmatprep.subr.bf16.mxu0 %v14585_v20  ;;  %v17912_v19 = vpack.c.bf16 %v3254_v3, %v3248_v32  ;;  %v17914_v50 = vpack.c.bf16 %v3251_v57, %v3245_v48  ;;  %v17916_v13 = vpack.c.bf16 %v3253_v62, %v3247_v52  ;;  %v3894_v32 = vld [vmem:[#allocation5 + $0x1328] sm:$0xff]  ;;  %v3941_v62 = vld [vmem:[#allocation5 + $0x14a0] sm:$0xff] }
 0x3cb   : > { %v3255_v20 = vmul.f32 %v16708_v59, %v17715_v12  ;;  %v17928_v2 = vpack.c.bf16 %v3256_v29, %v3250_v24  ;;  %v14606_v56 = vcombine.low %v17873_v0, %v17875_v5  ;;  %v14608_v26 = vcombine.low %v3834_v47, %v3846_v11  ;;  %v3881_v59 = vld [vmem:[#allocation5 + $0x12c0] sm:$0xff]  ;;  %v3906_v61 = vld [vmem:[#allocation5 + $0x1388] sm:$0xff] }
 0x3cc   : > { %10381 = vmatprep.mubr.bf16.mxu1 %v17908_v22  ;;  %10600 = vmatprep.mubr.bf16.mxu0 %v17908_v22  ;;  %v14631_v12 = vcombine.high %v3857_v16, %v3869_v55  ;;  %v14633_v40 = vcombine.high %v3858_v53, %v3870_v51  ;;  %v14655_v0 = vcombine.high %v3881_v59, %v3893_v7  ;;  %v3918_v45 = vld [vmem:[#allocation5 + $0x13e8] sm:$0xff]  ;;  %v3965_v63 = vld [vmem:[#allocation5 + $0x1560] sm:$0xff] }
 0x3cd   : > { %10382 = vmatmul.mubr.bf16.gmra.mrb[44].mxu1 %v17914_v50  ;;  %10601 = vmatmul.mubr.bf16.gmra.mrb[44].mxu0 %v17914_v50  ;;  %v17932_v37 = vpack.c.bf16 %v3255_v20, %v3249_v43  ;;  %v14657_v5 = vcombine.high %v3882_v21, %v3894_v32  ;;  %v14654_v41 = vcombine.low %v3881_v59, %v3893_v7  ;;  %v3942_v48 = vld [vmem:[#allocation5 + $0x14a8] sm:$0xff]  ;;  %v3989_v31 = vld [vmem:[#allocation5 + $0x1620] sm:$0xff] }
 0x3ce   : > { %10405 = vmatpush1.bf16.msra.mxu1 %v14582_v1  ;;  %10624 = vmatpush1.bf16.msra.mxu0 %v14584_v36  ;;  %v14630_v1 = vcombine.low %v3857_v16, %v3869_v55  ;;  %v14632_v36 = vcombine.low %v3858_v53, %v3870_v51  ;;  %v14679_v57 = vcombine.high %v3905_v46, %v3917_v28  ;;  %v3954_v16 = vld [vmem:[#allocation5 + $0x1508] sm:$0xff]  ;;  %v3977_v51 = vld [vmem:[#allocation5 + $0x15c0] sm:$0xff] }
 0x3cf   : > { %10424 = vmatprep.mubr.bf16.mxu1 %v17926_v15  ;;  %10643 = vmatprep.mubr.bf16.mxu0 %v17926_v15  ;;  %v14681_v3 = vcombine.high %v3906_v61, %v3918_v45  ;;  %v14678_v47 = vcombine.low %v3905_v46, %v3917_v28  ;;  %v14680_v11 = vcombine.low %v3906_v61, %v3918_v45  ;;  %v3966_v24 = vld [vmem:[#allocation5 + $0x1568] sm:$0xff]  ;;  %v4001_v59 = vld [vmem:[#allocation5 + $0x1680] sm:$0xff] }
 0x3d0   : > { %10406 = vmatprep.subr.bf16.mxu1 %v14607_v54  ;;  %10625 = vmatprep.subr.bf16.mxu0 %v14609_v58  ;;  %v14656_v54 = vcombine.low %v3882_v21, %v3894_v32  ;;  %v14703_v33 = vcombine.high %v3929_v14, %v3941_v62  ;;  %v14705_v52 = vcombine.high %v3930_v42, %v3942_v48  ;;  %v3978_v43 = vld [vmem:[#allocation5 + $0x15c8] sm:$0xff]  ;;  %v4013_v7 = vld [vmem:[#allocation5 + $0x16e0] sm:$0xff] }
 0x3d1   : > { %v14702_v29 = vcombine.low %v3929_v14, %v3941_v62  ;;  %v14704_v58 = vcombine.low %v3930_v42, %v3942_v48  ;;  %v14727_v55 = vcombine.high %v3953_v8, %v3965_v63  ;;  %v14729_v53 = vcombine.high %v3954_v16, %v3966_v24  ;;  %v3990_v20 = vld [vmem:[#allocation5 + $0x1628] sm:$0xff]  ;;  %v4025_v46 = vld [vmem:[#allocation5 + $0x1740] sm:$0xff] }
 0x3d2   : > { %10407 = vmatpush1.bf16.msra.mxu1 %v14606_v56  ;;  %10626 = vmatpush1.bf16.msra.mxu0 %v14608_v26  ;;  %v14726_v56 = vcombine.low %v3953_v8, %v3965_v63  ;;  %v14728_v26 = vcombine.low %v3954_v16, %v3966_v24  ;;  %v4002_v21 = vld [vmem:[#allocation5 + $0x1688] sm:$0xff]  ;;  %v4037_v28 = vld [vmem:[#allocation5 + $0x17a0] sm:$0xff] }
 0x3d3   : > { %10408 = vmatprep.subr.bf16.mxu1 %v14631_v12  ;;  %10627 = vmatprep.subr.bf16.mxu0 %v14633_v40  ;;  %v14751_v12 = vcombine.high %v3977_v51, %v3989_v31  ;;  %v14753_v40 = vcombine.high %v3978_v43, %v3990_v20  ;;  %v4014_v32 = vld [vmem:[#allocation5 + $0x16e8] sm:$0xff]  ;;  %v4049_v14 = vld [vmem:[#allocation5 + $0x1800] sm:$0xff] }
 0x3d4   : > { %v4026_v61 = vld [vmem:[#allocation5 + $0x1748] sm:$0xff]  ;;  %v4061_v62 = vld [vmem:[#allocation5 + $0x1860] sm:$0xff] }
 0x3d5   : > { %v4038_v45 = vld [vmem:[#allocation5 + $0x17a8] sm:$0xff]  ;;  %v4073_v8 = vld [vmem:[#allocation5 + $0x18c0] sm:$0xff] }
 0x3d6   : > { %10409 = vmatpush1.bf16.msra.mxu1 %v14630_v1  ;;  %10628 = vmatpush1.bf16.msra.mxu0 %v14632_v36  ;;  %v14750_v1 = vcombine.low %v3977_v51, %v3989_v31  ;;  %v14752_v36 = vcombine.low %v3978_v43, %v3990_v20  ;;  %v4050_v42 = vld [vmem:[#allocation5 + $0x1808] sm:$0xff]  ;;  %v4085_v63 = vld [vmem:[#allocation5 + $0x1920] sm:$0xff] }
 0x3d7   : > { %10410 = vmatprep.subr.bf16.mxu1 %v14655_v0  ;;  %10629 = vmatprep.subr.bf16.mxu0 %v14657_v5  ;;  %v14775_v0 = vcombine.high %v4001_v59, %v4013_v7  ;;  %v14777_v5 = vcombine.high %v4002_v21, %v4014_v32  ;;  %v4062_v48 = vld [vmem:[#allocation5 + $0x1868] sm:$0xff]  ;;  %v4097_v51 = vld [vmem:[#allocation5 + $0x1980] sm:$0xff] }
 0x3d8   : > { %v4074_v16 = vld [vmem:[#allocation5 + $0x18c8] sm:$0xff]  ;;  %v4109_v31 = vld [vmem:[#allocation5 + $0x19e0] sm:$0xff] }
 0x3d9   : > { %v4086_v24 = vld [vmem:[#allocation5 + $0x1928] sm:$0xff] }
 0x3da   : > { %10411 = vmatpush1.bf16.msra.mxu1 %v14654_v41  ;;  %10630 = vmatpush1.bf16.msra.mxu0 %v14656_v54  ;;  %v14774_v41 = vcombine.low %v4001_v59, %v4013_v7  ;;  %v14776_v54 = vcombine.low %v4002_v21, %v4014_v32  ;;  %v4098_v43 = vld [vmem:[#allocation5 + $0x1988] sm:$0xff]  ;;  %v4121_v59 = vld [vmem:[#allocation5 + $0x1a40] sm:$0xff] }
 0x3db   : > { %10412 = vmatprep.subr.bf16.mxu1 %v14679_v57  ;;  %10631 = vmatprep.subr.bf16.mxu0 %v14681_v3  ;;  %v14799_v57 = vcombine.high %v4025_v46, %v4037_v28  ;;  %v14801_v3 = vcombine.high %v4026_v61, %v4038_v45  ;;  %v4110_v20 = vld [vmem:[#allocation5 + $0x19e8] sm:$0xff]  ;;  %v4133_v7 = vld [vmem:[#allocation5 + $0x1aa0] sm:$0xff] }
 0x3dc   : > { %v4122_v21 = vld [vmem:[#allocation5 + $0x1a48] sm:$0xff] }
 0x3dd   : > { %v4134_v32 = vld [vmem:[#allocation5 + $0x1aa8] sm:$0xff] }
 0x3de   : > { %10413 = vmatpush1.bf16.msra.mxu1 %v14678_v47  ;;  %10632 = vmatpush1.bf16.msra.mxu0 %v14680_v11  ;;  %v14798_v47 = vcombine.low %v4025_v46, %v4037_v28  ;;  %v14800_v11 = vcombine.low %v4026_v61, %v4038_v45  ;;  %v4145_v46 = vld [vmem:[#allocation5 + $0x1b00] sm:$0xff]  ;;  %v4146_v61 = vld [vmem:[#allocation5 + $0x1b08] sm:$0xff] }
 0x3df   : > { %10414 = vmatprep.subr.bf16.mxu1 %v14703_v33  ;;  %10633 = vmatprep.subr.bf16.mxu0 %v14705_v52  ;;  %v14823_v33 = vcombine.high %v4049_v14, %v4061_v62  ;;  %v14825_v52 = vcombine.high %v4050_v42, %v4062_v48  ;;  %v4157_v28 = vld [vmem:[#allocation5 + $0x1b60] sm:$0xff]  ;;  %v4158_v45 = vld [vmem:[#allocation5 + $0x1b68] sm:$0xff] }
 0x3e2   : > { %10415 = vmatpush1.bf16.msra.mxu1 %v14702_v29  ;;  %10634 = vmatpush1.bf16.msra.mxu0 %v14704_v58  ;;  %v14822_v29 = vcombine.low %v4049_v14, %v4061_v62  ;;  %v14824_v58 = vcombine.low %v4050_v42, %v4062_v48  ;;  %v4169_v14 = vld [vmem:[#allocation5 + $0x1bc0] sm:$0xff]  ;;  %v4170_v42 = vld [vmem:[#allocation5 + $0x1bc8] sm:$0xff] }
 0x3e3   : > { %10416 = vmatprep.subr.bf16.mxu1 %v14727_v55  ;;  %10635 = vmatprep.subr.bf16.mxu0 %v14729_v53  ;;  %v14847_v55 = vcombine.high %v4073_v8, %v4085_v63  ;;  %v14849_v53 = vcombine.high %v4074_v16, %v4086_v24  ;;  %v4181_v62 = vld [vmem:[#allocation5 + $0x1c20] sm:$0xff]  ;;  %v4182_v48 = vld [vmem:[#allocation5 + $0x1c28] sm:$0xff] }
 0x3e6   : > { %10417 = vmatpush1.bf16.msra.mxu1 %v14726_v56  ;;  %10636 = vmatpush1.bf16.msra.mxu0 %v14728_v26  ;;  %v14846_v56 = vcombine.low %v4073_v8, %v4085_v63  ;;  %v14848_v26 = vcombine.low %v4074_v16, %v4086_v24  ;;  %v4193_v8 = vld [vmem:[#allocation5 + $0x1c80] sm:$0xff]  ;;  %v4194_v16 = vld [vmem:[#allocation5 + $0x1c88] sm:$0xff] }
 0x3e7   : > { %10418 = vmatprep.subr.bf16.mxu1 %v14751_v12  ;;  %10637 = vmatprep.subr.bf16.mxu0 %v14753_v40  ;;  %v14871_v12 = vcombine.high %v4097_v51, %v4109_v31  ;;  %v14873_v40 = vcombine.high %v4098_v43, %v4110_v20  ;;  %v4205_v63 = vld [vmem:[#allocation5 + $0x1ce0] sm:$0xff]  ;;  %v4206_v24 = vld [vmem:[#allocation5 + $0x1ce8] sm:$0xff] }
 0x3ea   : > { %10419 = vmatpush1.bf16.msra.mxu1 %v14750_v1  ;;  %10638 = vmatpush1.bf16.msra.mxu0 %v14752_v36  ;;  %v14870_v1 = vcombine.low %v4097_v51, %v4109_v31  ;;  %v14872_v36 = vcombine.low %v4098_v43, %v4110_v20  ;;  %v4217_v51 = vld [vmem:[#allocation5 + $0x1d40] sm:$0xff]  ;;  %v4218_v43 = vld [vmem:[#allocation5 + $0x1d48] sm:$0xff] }
 0x3eb   : > { %10420 = vmatprep.subr.bf16.mxu1 %v14775_v0  ;;  %10639 = vmatprep.subr.bf16.mxu0 %v14777_v5  ;;  %v14895_v0 = vcombine.high %v4121_v59, %v4133_v7  ;;  %v14897_v5 = vcombine.high %v4122_v21, %v4134_v32  ;;  %v4229_v31 = vld [vmem:[#allocation5 + $0x1da0] sm:$0xff]  ;;  %v4230_v20 = vld [vmem:[#allocation5 + $0x1da8] sm:$0xff] }
 0x3ee   : > { %10421 = vmatpush1.bf16.msra.mxu1 %v14774_v41  ;;  %10640 = vmatpush1.bf16.msra.mxu0 %v14776_v54  ;;  %v14894_v41 = vcombine.low %v4121_v59, %v4133_v7  ;;  %v14896_v54 = vcombine.low %v4122_v21, %v4134_v32  ;;  %v4241_v59 = vld [vmem:[#allocation5 + $0x1e00] sm:$0xff]  ;;  %v4242_v21 = vld [vmem:[#allocation5 + $0x1e08] sm:$0xff] }
 0x3ef   : > { %10422 = vmatprep.subr.bf16.mxu1 %v14799_v57  ;;  %10641 = vmatprep.subr.bf16.mxu0 %v14801_v3  ;;  %v14919_v57 = vcombine.high %v4145_v46, %v4157_v28  ;;  %v14921_v3 = vcombine.high %v4146_v61, %v4158_v45  ;;  %v4253_v7 = vld [vmem:[#allocation5 + $0x1e60] sm:$0xff]  ;;  %v4254_v32 = vld [vmem:[#allocation5 + $0x1e68] sm:$0xff] }
 0x3f2   : > { %10423 = vmatpush1.bf16.msra.mxu1 %v14798_v47  ;;  %10642 = vmatpush1.bf16.msra.mxu0 %v14800_v11  ;;  %v14918_v47 = vcombine.low %v4145_v46, %v4157_v28  ;;  %v14920_v11 = vcombine.low %v4146_v61, %v4158_v45  ;;  %v4265_v46 = vld [vmem:[#allocation5 + $0x1ec0] sm:$0xff]  ;;  %v4266_v61 = vld [vmem:[#allocation5 + $0x1ec8] sm:$0xff] }
 0x3f3   : > { %10465 = vmatprep.subr.bf16.mxu1 %v14823_v33  ;;  %10684 = vmatprep.subr.bf16.mxu0 %v14825_v52  ;;  %v14943_v33 = vcombine.high %v4169_v14, %v4181_v62  ;;  %v14945_v52 = vcombine.high %v4170_v42, %v4182_v48  ;;  %v4277_v28 = vld [vmem:[#allocation5 + $0x1f20] sm:$0xff]  ;;  %v4278_v45 = vld [vmem:[#allocation5 + $0x1f28] sm:$0xff] }
 0x3f5   : > { %10425 = vmatmul.mubr.bf16.vlgmr.msra.gmra.mrb[32].mxu1 %v17766_v35  ;;  %10644 = vmatmul.mubr.bf16.vlgmr.msra.gmra.mrb[32].mxu0 %v17766_v35 }
 0x3f6   : > { %10434 = vmatprep.mubr.bf16.mxu1 %v17812_v6  ;;  %10466 = vmatpush1.bf16.msra.mxu1 %v14822_v29  ;;  %v14942_v29 = vcombine.low %v4169_v14, %v4181_v62  ;;  %v4289_v14 = vld [vmem:[#allocation5 + $0x1f80] sm:$0xff] }
 0x3f7   : > { %10653 = vmatprep.mubr.bf16.mxu0 %v17812_v6  ;;  %10685 = vmatpush1.bf16.msra.mxu0 %v14824_v58  ;;  %v14944_v58 = vcombine.low %v4170_v42, %v4182_v48  ;;  %v4301_v62 = vld [vmem:[#allocation5 + $0x1fe0] sm:$0xff]  ;;  %v4290_v42 = vld [vmem:[#allocation5 + $0x1f88] sm:$0xff] }
 0x3f8   : > { %10467 = vmatprep.subr.bf16.mxu1 %v14847_v55  ;;  %10686 = vmatprep.subr.bf16.mxu0 %v14849_v53  ;;  %v14967_v55 = vcombine.high %v4193_v8, %v4205_v63  ;;  %v14969_v53 = vcombine.high %v4194_v16, %v4206_v24  ;;  %v4302_v48 = vld [vmem:[#allocation5 + $0x1fe8] sm:$0xff] }
 0x3fa   : > { %10468 = vmatpush1.bf16.msra.mxu1 %v14846_v56  ;;  %v14966_v56 = vcombine.low %v4193_v8, %v4205_v63  ;;  %v4313_v8 = vld [vmem:[#allocation5 + $0x2040] sm:$0xff] }
 0x3fb   : > { %10687 = vmatpush1.bf16.msra.mxu0 %v14848_v26  ;;  %10469 = vmatprep.subr.bf16.mxu1 %v14871_v12  ;;  %v14968_v26 = vcombine.low %v4194_v16, %v4206_v24  ;;  %v14991_v12 = vcombine.high %v4217_v51, %v4229_v31  ;;  %v4325_v63 = vld [vmem:[#allocation5 + $0x20a0] sm:$0xff]  ;;  %v4314_v16 = vld [vmem:[#allocation5 + $0x2048] sm:$0xff] }
 0x3fc   : > { %10688 = vmatprep.subr.bf16.mxu0 %v14873_v40  ;;  %v14993_v40 = vcombine.high %v4218_v43, %v4230_v20  ;;  %v4326_v24 = vld [vmem:[#allocation5 + $0x20a8] sm:$0xff] }
 0x3fd   : > { %10435 = vmatmul.mubr.bf16.gmra.mrb[36].mxu1 %v17818_v9  ;;  %10654 = vmatmul.mubr.bf16.gmra.mrb[36].mxu0 %v17818_v9 }
 0x3fe   : > { %10444 = vmatprep.mubr.bf16.mxu1 %v17860_v25  ;;  %10470 = vmatpush1.bf16.msra.mxu1 %v14870_v1  ;;  %v14990_v1 = vcombine.low %v4217_v51, %v4229_v31  ;;  %v4337_v51 = vld [vmem:[#allocation5 + $0x2100] sm:$0xff] }
 0x3ff   : > { %10663 = vmatprep.mubr.bf16.mxu0 %v17860_v25  ;;  %10689 = vmatpush1.bf16.msra.mxu0 %v14872_v36  ;;  %v14992_v36 = vcombine.low %v4218_v43, %v4230_v20  ;;  %v4349_v31 = vld [vmem:[#allocation5 + $0x2160] sm:$0xff]  ;;  %v4338_v43 = vld [vmem:[#allocation5 + $0x2108] sm:$0xff] }
 0x400   : > { %10471 = vmatprep.subr.bf16.mxu1 %v14895_v0  ;;  %10690 = vmatprep.subr.bf16.mxu0 %v14897_v5  ;;  %v15015_v0 = vcombine.high %v4241_v59, %v4253_v7  ;;  %v15017_v5 = vcombine.high %v4242_v21, %v4254_v32  ;;  %v4350_v20 = vld [vmem:[#allocation5 + $0x2168] sm:$0xff] }
 0x402   : > { %10472 = vmatpush1.bf16.msra.mxu1 %v14894_v41  ;;  %v15014_v41 = vcombine.low %v4241_v59, %v4253_v7  ;;  %v4361_v59 = vld [vmem:[#allocation5 + $0x21c0] sm:$0xff] }
 0x403   : > { %10691 = vmatpush1.bf16.msra.mxu0 %v14896_v54  ;;  %10473 = vmatprep.subr.bf16.mxu1 %v14919_v57  ;;  %v15016_v54 = vcombine.low %v4242_v21, %v4254_v32  ;;  %v15039_v57 = vcombine.high %v4265_v46, %v4277_v28  ;;  %v4373_v7 = vld [vmem:[#allocation5 + $0x2220] sm:$0xff]  ;;  %v4362_v21 = vld [vmem:[#allocation5 + $0x21c8] sm:$0xff] }
 0x404   : > { %10692 = vmatprep.subr.bf16.mxu0 %v14921_v3  ;;  %v15041_v3 = vcombine.high %v4266_v61, %v4278_v45  ;;  %v4374_v32 = vld [vmem:[#allocation5 + $0x2228] sm:$0xff] }
 0x405   : > { %10445 = vmatmul.mubr.bf16.gmra.mrb[40].mxu1 %v17868_v10  ;;  %10664 = vmatmul.mubr.bf16.gmra.mrb[40].mxu0 %v17868_v10 }
 0x406   : > { %10454 = vmatprep.mubr.bf16.mxu1 %v17912_v19  ;;  %10474 = vmatpush1.bf16.msra.mxu1 %v14918_v47  ;;  %v15038_v47 = vcombine.low %v4265_v46, %v4277_v28  ;;  %v4385_v46 = vld [vmem:[#allocation5 + $0x2280] sm:$0xff] }
 0x407   : > { %10673 = vmatprep.mubr.bf16.mxu0 %v17912_v19  ;;  %10693 = vmatpush1.bf16.msra.mxu0 %v14920_v11  ;;  %v15040_v11 = vcombine.low %v4266_v61, %v4278_v45  ;;  %v4397_v28 = vld [vmem:[#allocation5 + $0x22e0] sm:$0xff]  ;;  %v4386_v61 = vld [vmem:[#allocation5 + $0x2288] sm:$0xff] }
 0x408   : > { %10475 = vmatprep.subr.bf16.mxu1 %v14943_v33  ;;  %10694 = vmatprep.subr.bf16.mxu0 %v14945_v52  ;;  %v15063_v33 = vcombine.high %v4289_v14, %v4301_v62  ;;  %v15065_v52 = vcombine.high %v4290_v42, %v4302_v48  ;;  %v4398_v45 = vld [vmem:[#allocation5 + $0x22e8] sm:$0xff] }
 0x40a   : > { %10476 = vmatpush1.bf16.msra.mxu1 %v14942_v29  ;;  %v15062_v29 = vcombine.low %v4289_v14, %v4301_v62  ;;  %v4409_v14 = vld [vmem:[#allocation5 + $0x2340] sm:$0xff] }
 0x40b   : > { %10695 = vmatpush1.bf16.msra.mxu0 %v14944_v58  ;;  %10477 = vmatprep.subr.bf16.mxu1 %v14967_v55  ;;  %v15064_v58 = vcombine.low %v4290_v42, %v4302_v48  ;;  %v15087_v55 = vcombine.high %v4313_v8, %v4325_v63  ;;  %v4421_v62 = vld [vmem:[#allocation5 + $0x23a0] sm:$0xff]  ;;  %v4410_v42 = vld [vmem:[#allocation5 + $0x2348] sm:$0xff] }
 0x40c   : > { %10696 = vmatprep.subr.bf16.mxu0 %v14969_v53  ;;  %v15089_v53 = vcombine.high %v4314_v16, %v4326_v24  ;;  %v4422_v48 = vld [vmem:[#allocation5 + $0x23a8] sm:$0xff] }
 0x40d   : > { %10455 = vmatmul.mubr.bf16.gmra.mrb[44].mxu1 %v17916_v13  ;;  %10674 = vmatmul.mubr.bf16.gmra.mrb[44].mxu0 %v17916_v13 }
 0x40e   : > { %10478 = vmatpush1.bf16.msra.mxu1 %v14966_v56  ;;  %10497 = vmatprep.mubr.bf16.mxu1 %v17772_v23  ;;  %v15086_v56 = vcombine.low %v4313_v8, %v4325_v63  ;;  %v3283_v8 = vld [vmem:[#allocation5 + $0x10] sm:$0xff] }
 0x40f   : > { %10697 = vmatpush1.bf16.msra.mxu0 %v14968_v26  ;;  %10716 = vmatprep.mubr.bf16.mxu0 %v17772_v23  ;;  %v15088_v26 = vcombine.low %v4314_v16, %v4326_v24  ;;  %v3295_v63 = vld [vmem:[#allocation5 + $0x70] sm:$0xff]  ;;  %v3284_v16 = vld [vmem:[#allocation5 + $0x18] sm:$0xff] }
 0x410   : > { %10479 = vmatprep.subr.bf16.mxu1 %v14991_v12  ;;  %10698 = vmatprep.subr.bf16.mxu0 %v14993_v40  ;;  %v15111_v12 = vcombine.high %v4337_v51, %v4349_v31  ;;  %v15113_v40 = vcombine.high %v4338_v43, %v4350_v20  ;;  %v3296_v24 = vld [vmem:[#allocation5 + $0x78] sm:$0xff] }
 0x412   : > { %10480 = vmatpush1.bf16.msra.mxu1 %v14990_v1  ;;  %v15110_v1 = vcombine.low %v4337_v51, %v4349_v31  ;;  %v3307_v51 = vld [vmem:[#allocation5 + $0xd0] sm:$0xff] }
 0x413   : > { %10699 = vmatpush1.bf16.msra.mxu0 %v14992_v36  ;;  %10481 = vmatprep.subr.bf16.mxu1 %v15015_v0  ;;  %v15112_v36 = vcombine.low %v4338_v43, %v4350_v20  ;;  %v15135_v0 = vcombine.high %v4361_v59, %v4373_v7  ;;  %v3319_v31 = vld [vmem:[#allocation5 + $0x130] sm:$0xff]  ;;  %v3308_v43 = vld [vmem:[#allocation5 + $0xd8] sm:$0xff] }
 0x414   : > { %10700 = vmatprep.subr.bf16.mxu0 %v15017_v5  ;;  %v15137_v5 = vcombine.high %v4362_v21, %v4374_v32  ;;  %v3320_v20 = vld [vmem:[#allocation5 + $0x138] sm:$0xff] }
 0x416   : > { %10482 = vmatpush1.bf16.msra.mxu1 %v15014_v41  ;;  %v15134_v41 = vcombine.low %v4361_v59, %v4373_v7  ;;  %v3331_v59 = vld [vmem:[#allocation5 + $0x190] sm:$0xff] }
 0x417   : > { %10701 = vmatpush1.bf16.msra.mxu0 %v15016_v54  ;;  %10483 = vmatprep.subr.bf16.mxu1 %v15039_v57  ;;  %v15136_v54 = vcombine.low %v4362_v21, %v4374_v32  ;;  %v15159_v57 = vcombine.high %v4385_v46, %v4397_v28  ;;  %v3343_v7 = vld [vmem:[#allocation5 + $0x1f0] sm:$0xff]  ;;  %v3332_v21 = vld [vmem:[#allocation5 + $0x198] sm:$0xff] }
 0x418   : > { %10702 = vmatprep.subr.bf16.mxu0 %v15041_v3  ;;  %v15161_v3 = vcombine.high %v4386_v61, %v4398_v45  ;;  %v3344_v32 = vld [vmem:[#allocation5 + $0x1f8] sm:$0xff] }
 0x41a   : > { %10484 = vmatpush1.bf16.msra.mxu1 %v15038_v47  ;;  %v15158_v47 = vcombine.low %v4385_v46, %v4397_v28  ;;  %v3355_v46 = vld [vmem:[#allocation5 + $0x250] sm:$0xff] }
 0x41b   : > { %10703 = vmatpush1.bf16.msra.mxu0 %v15040_v11  ;;  %10485 = vmatprep.subr.bf16.mxu1 %v15063_v33  ;;  %v15160_v11 = vcombine.low %v4386_v61, %v4398_v45  ;;  %v15183_v33 = vcombine.high %v4409_v14, %v4421_v62  ;;  %v3367_v28 = vld [vmem:[#allocation5 + $0x2b0] sm:$0xff]  ;;  %v3356_v61 = vld [vmem:[#allocation5 + $0x258] sm:$0xff] }
 0x41c   : > { %10704 = vmatprep.subr.bf16.mxu0 %v15065_v52  ;;  %v15185_v52 = vcombine.high %v4410_v42, %v4422_v48  ;;  %v3368_v45 = vld [vmem:[#allocation5 + $0x2b8] sm:$0xff] }
 0x41e   : > { %10486 = vmatpush1.bf16.msra.mxu1 %v15062_v29  ;;  %v15182_v29 = vcombine.low %v4409_v14, %v4421_v62  ;;  %v3379_v14 = vld [vmem:[#allocation5 + $0x310] sm:$0xff] }
 0x41f   : > { %10705 = vmatpush1.bf16.msra.mxu0 %v15064_v58  ;;  %10487 = vmatprep.subr.bf16.mxu1 %v15087_v55  ;;  %v15184_v58 = vcombine.low %v4410_v42, %v4422_v48  ;;  %v14059_v55 = vcombine.high %v3283_v8, %v3295_v63  ;;  %v3391_v62 = vld [vmem:[#allocation5 + $0x370] sm:$0xff]  ;;  %v3380_v42 = vld [vmem:[#allocation5 + $0x318] sm:$0xff] }
 0x420   : > { %10706 = vmatprep.subr.bf16.mxu0 %v15089_v53  ;;  %v14061_v53 = vcombine.high %v3284_v16, %v3296_v24  ;;  %v3392_v48 = vld [vmem:[#allocation5 + $0x378] sm:$0xff] }
 0x422   : > { %10488 = vmatpush1.bf16.msra.mxu1 %v15086_v56  ;;  %v14058_v56 = vcombine.low %v3283_v8, %v3295_v63  ;;  %v3403_v8 = vld [vmem:[#allocation5 + $0x3d0] sm:$0xff] }
 0x423   : > { %10707 = vmatpush1.bf16.msra.mxu0 %v15088_v26  ;;  %10489 = vmatprep.subr.bf16.mxu1 %v15111_v12  ;;  %v14060_v26 = vcombine.low %v3284_v16, %v3296_v24  ;;  %v14083_v12 = vcombine.high %v3307_v51, %v3319_v31  ;;  %v3415_v63 = vld [vmem:[#allocation5 + $0x430] sm:$0xff]  ;;  %v3404_v16 = vld [vmem:[#allocation5 + $0x3d8] sm:$0xff] }
 0x424   : > { %10708 = vmatprep.subr.bf16.mxu0 %v15113_v40  ;;  %v14085_v40 = vcombine.high %v3308_v43, %v3320_v20  ;;  %v3416_v24 = vld [vmem:[#allocation5 + $0x438] sm:$0xff] }
 0x426   : > { %10490 = vmatpush1.bf16.msra.mxu1 %v15110_v1  ;;  %v14082_v1 = vcombine.low %v3307_v51, %v3319_v31  ;;  %v3427_v51 = vld [vmem:[#allocation5 + $0x490] sm:$0xff] }
 0x427   : > { %10709 = vmatpush1.bf16.msra.mxu0 %v15112_v36  ;;  %10491 = vmatprep.subr.bf16.mxu1 %v15135_v0  ;;  %v14084_v36 = vcombine.low %v3308_v43, %v3320_v20  ;;  %v14107_v0 = vcombine.high %v3331_v59, %v3343_v7  ;;  %v3439_v31 = vld [vmem:[#allocation5 + $0x4f0] sm:$0xff]  ;;  %v3428_v43 = vld [vmem:[#allocation5 + $0x498] sm:$0xff] }
 0x428   : > { %10710 = vmatprep.subr.bf16.mxu0 %v15137_v5  ;;  %v14109_v5 = vcombine.high %v3332_v21, %v3344_v32  ;;  %v3440_v20 = vld [vmem:[#allocation5 + $0x4f8] sm:$0xff] }
 0x42a   : > { %10492 = vmatpush1.bf16.msra.mxu1 %v15134_v41  ;;  %v14106_v41 = vcombine.low %v3331_v59, %v3343_v7  ;;  %v3451_v59 = vld [vmem:[#allocation5 + $0x550] sm:$0xff] }
 0x42b   : > { %10711 = vmatpush1.bf16.msra.mxu0 %v15136_v54  ;;  %10493 = vmatprep.subr.bf16.mxu1 %v15159_v57  ;;  %v14108_v54 = vcombine.low %v3332_v21, %v3344_v32  ;;  %v14131_v57 = vcombine.high %v3355_v46, %v3367_v28  ;;  %v3463_v7 = vld [vmem:[#allocation5 + $0x5b0] sm:$0xff]  ;;  %v3452_v21 = vld [vmem:[#allocation5 + $0x558] sm:$0xff] }
 0x42c   : > { %10712 = vmatprep.subr.bf16.mxu0 %v15161_v3  ;;  %v14133_v3 = vcombine.high %v3356_v61, %v3368_v45  ;;  %v3464_v32 = vld [vmem:[#allocation5 + $0x5b8] sm:$0xff] }
 0x42e   : > { %10494 = vmatpush1.bf16.msra.mxu1 %v15158_v47  ;;  %v14130_v47 = vcombine.low %v3355_v46, %v3367_v28  ;;  %v3475_v46 = vld [vmem:[#allocation5 + $0x610] sm:$0xff] }
 0x42f   : > { %10713 = vmatpush1.bf16.msra.mxu0 %v15160_v11  ;;  %10495 = vmatprep.subr.bf16.mxu1 %v15183_v33  ;;  %v14132_v11 = vcombine.low %v3356_v61, %v3368_v45  ;;  %v14155_v33 = vcombine.high %v3379_v14, %v3391_v62  ;;  %v3487_v28 = vld [vmem:[#allocation5 + $0x670] sm:$0xff]  ;;  %v3476_v61 = vld [vmem:[#allocation5 + $0x618] sm:$0xff] }
 0x430   : > { %10714 = vmatprep.subr.bf16.mxu0 %v15185_v52  ;;  %v14157_v52 = vcombine.high %v3380_v42, %v3392_v48  ;;  %v3488_v45 = vld [vmem:[#allocation5 + $0x678] sm:$0xff] }
 0x432   : > { %10496 = vmatpush1.bf16.msra.mxu1 %v15182_v29  ;;  %v14154_v29 = vcombine.low %v3379_v14, %v3391_v62  ;;  %v3499_v14 = vld [vmem:[#allocation5 + $0x6d0] sm:$0xff] }
 0x433   : > { %10715 = vmatpush1.bf16.msra.mxu0 %v15184_v58  ;;  %10757 = vmatprep.subr.bf16.mxu1 %v14059_v55  ;;  %v14156_v58 = vcombine.low %v3380_v42, %v3392_v48  ;;  %v14179_v55 = vcombine.high %v3403_v8, %v3415_v63  ;;  %v3511_v62 = vld [vmem:[#allocation5 + $0x730] sm:$0xff]  ;;  %v3500_v42 = vld [vmem:[#allocation5 + $0x6d8] sm:$0xff] }
 0x434   : > { %10976 = vmatprep.subr.bf16.mxu0 %v14061_v53  ;;  %v14181_v53 = vcombine.high %v3404_v16, %v3416_v24  ;;  %v3512_v48 = vld [vmem:[#allocation5 + $0x738] sm:$0xff] }
 0x435   : > { %10498 = vmatmul.mubr.bf16.vlgmr.msra.gmra.mrb[32].mxu1 %v17798_v4 }
 0x436   : > { %10717 = vmatmul.mubr.bf16.vlgmr.msra.gmra.mrb[32].mxu0 %v17798_v4  ;;  %10507 = vmatprep.mubr.bf16.mxu1 %v17833_v60 }
 0x437   : > { %10726 = vmatprep.mubr.bf16.mxu0 %v17833_v60  ;;  %10758 = vmatpush1.bf16.msra.mxu1 %v14058_v56  ;;  %v14178_v56 = vcombine.low %v3403_v8, %v3415_v63  ;;  %v3523_v8 = vld [vmem:[#allocation5 + $0x790] sm:$0xff] }
 0x438   : > { %10977 = vmatpush1.bf16.msra.mxu0 %v14060_v26  ;;  %10759 = vmatprep.subr.bf16.mxu1 %v14083_v12  ;;  %v14180_v26 = vcombine.low %v3404_v16, %v3416_v24  ;;  %v14203_v12 = vcombine.high %v3427_v51, %v3439_v31  ;;  %v3535_v63 = vld [vmem:[#allocation5 + $0x7f0] sm:$0xff]  ;;  %v3524_v16 = vld [vmem:[#allocation5 + $0x798] sm:$0xff] }
 0x439   : > { %10978 = vmatprep.subr.bf16.mxu0 %v14085_v40  ;;  %v14205_v40 = vcombine.high %v3428_v43, %v3440_v20  ;;  %v3536_v24 = vld [vmem:[#allocation5 + $0x7f8] sm:$0xff] }
 0x43b   : > { %10760 = vmatpush1.bf16.msra.mxu1 %v14082_v1  ;;  %v14202_v1 = vcombine.low %v3427_v51, %v3439_v31  ;;  %v3547_v51 = vld [vmem:[#allocation5 + $0x850] sm:$0xff] }
 0x43c   : > { %10979 = vmatpush1.bf16.msra.mxu0 %v14084_v36  ;;  %10761 = vmatprep.subr.bf16.mxu1 %v14107_v0  ;;  %v14204_v36 = vcombine.low %v3428_v43, %v3440_v20  ;;  %v14227_v0 = vcombine.high %v3451_v59, %v3463_v7  ;;  %v3559_v31 = vld [vmem:[#allocation5 + $0x8b0] sm:$0xff]  ;;  %v3548_v43 = vld [vmem:[#allocation5 + $0x858] sm:$0xff] }
 0x43d   : > { %10508 = vmatmul.mubr.bf16.gmra.mrb[36].mxu1 %v17852_v18  ;;  %10980 = vmatprep.subr.bf16.mxu0 %v14109_v5  ;;  %v14229_v5 = vcombine.high %v3452_v21, %v3464_v32  ;;  %v3560_v20 = vld [vmem:[#allocation5 + $0x8b8] sm:$0xff] }
 0x43e   : > { %10727 = vmatmul.mubr.bf16.gmra.mrb[36].mxu0 %v17852_v18  ;;  %10517 = vmatprep.mubr.bf16.mxu1 %v17887_v44 }
 0x43f   : > { %10736 = vmatprep.mubr.bf16.mxu0 %v17887_v44  ;;  %10762 = vmatpush1.bf16.msra.mxu1 %v14106_v41  ;;  %v14226_v41 = vcombine.low %v3451_v59, %v3463_v7  ;;  %v3571_v59 = vld [vmem:[#allocation5 + $0x910] sm:$0xff] }
 0x440   : > { %10981 = vmatpush1.bf16.msra.mxu0 %v14108_v54  ;;  %10763 = vmatprep.subr.bf16.mxu1 %v14131_v57  ;;  %v14228_v54 = vcombine.low %v3452_v21, %v3464_v32  ;;  %v14251_v57 = vcombine.high %v3475_v46, %v3487_v28  ;;  %v3583_v7 = vld [vmem:[#allocation5 + $0x970] sm:$0xff]  ;;  %v3572_v21 = vld [vmem:[#allocation5 + $0x918] sm:$0xff] }
 0x441   : > { %10982 = vmatprep.subr.bf16.mxu0 %v14133_v3  ;;  %v14253_v3 = vcombine.high %v3476_v61, %v3488_v45  ;;  %v3584_v32 = vld [vmem:[#allocation5 + $0x978] sm:$0xff] }
 0x443   : > { %10764 = vmatpush1.bf16.msra.mxu1 %v14130_v47  ;;  %v14250_v47 = vcombine.low %v3475_v46, %v3487_v28  ;;  %v3595_v46 = vld [vmem:[#allocation5 + $0x9d0] sm:$0xff] }
 0x444   : > { %10983 = vmatpush1.bf16.msra.mxu0 %v14132_v11  ;;  %10765 = vmatprep.subr.bf16.mxu1 %v14155_v33  ;;  %v14252_v11 = vcombine.low %v3476_v61, %v3488_v45  ;;  %v14275_v33 = vcombine.high %v3499_v14, %v3511_v62  ;;  %v3607_v28 = vld [vmem:[#allocation5 + $0xa30] sm:$0xff]  ;;  %v3596_v61 = vld [vmem:[#allocation5 + $0x9d8] sm:$0xff] }
 0x445   : > { %10518 = vmatmul.mubr.bf16.gmra.mrb[40].mxu1 %v17906_v17  ;;  %10984 = vmatprep.subr.bf16.mxu0 %v14157_v52  ;;  %v14277_v52 = vcombine.high %v3500_v42, %v3512_v48  ;;  %v3608_v45 = vld [vmem:[#allocation5 + $0xa38] sm:$0xff] }
 0x446   : > { %10737 = vmatmul.mubr.bf16.gmra.mrb[40].mxu0 %v17906_v17  ;;  %10527 = vmatprep.mubr.bf16.mxu1 %v17928_v2 }
 0x447   : > { %10746 = vmatprep.mubr.bf16.mxu0 %v17928_v2  ;;  %10766 = vmatpush1.bf16.msra.mxu1 %v14154_v29  ;;  %v14274_v29 = vcombine.low %v3499_v14, %v3511_v62  ;;  %v3619_v14 = vld [vmem:[#allocation5 + $0xa90] sm:$0xff] }
 0x448   : > { %10985 = vmatpush1.bf16.msra.mxu0 %v14156_v58  ;;  %10767 = vmatprep.subr.bf16.mxu1 %v14179_v55  ;;  %v14276_v58 = vcombine.low %v3500_v42, %v3512_v48  ;;  %v14299_v55 = vcombine.high %v3523_v8, %v3535_v63  ;;  %v3631_v62 = vld [vmem:[#allocation5 + $0xaf0] sm:$0xff]  ;;  %v3620_v42 = vld [vmem:[#allocation5 + $0xa98] sm:$0xff] }
 0x449   : > { %10986 = vmatprep.subr.bf16.mxu0 %v14181_v53  ;;  %v14301_v53 = vcombine.high %v3524_v16, %v3536_v24  ;;  %v3632_v48 = vld [vmem:[#allocation5 + $0xaf8] sm:$0xff] }
 0x44b   : > { %10768 = vmatpush1.bf16.msra.mxu1 %v14178_v56  ;;  %v14298_v56 = vcombine.low %v3523_v8, %v3535_v63  ;;  %v3643_v8 = vld [vmem:[#allocation5 + $0xb50] sm:$0xff] }
 0x44c   : > { %10987 = vmatpush1.bf16.msra.mxu0 %v14180_v26  ;;  %10769 = vmatprep.subr.bf16.mxu1 %v14203_v12  ;;  %v14300_v26 = vcombine.low %v3524_v16, %v3536_v24  ;;  %v14323_v12 = vcombine.high %v3547_v51, %v3559_v31  ;;  %v3655_v63 = vld [vmem:[#allocation5 + $0xbb0] sm:$0xff]  ;;  %v3644_v16 = vld [vmem:[#allocation5 + $0xb58] sm:$0xff] }
 0x44d   : > { %10528 = vmatmul.mubr.bf16.gmra.mrb[44].mxu1 %v17932_v37  ;;  %10988 = vmatprep.subr.bf16.mxu0 %v14205_v40  ;;  %v14325_v40 = vcombine.high %v3548_v43, %v3560_v20  ;;  %v3656_v24 = vld [vmem:[#allocation5 + $0xbb8] sm:$0xff] }
 0x44e   : > { %10747 = vmatmul.mubr.bf16.gmra.mrb[44].mxu0 %v17932_v37  ;;  %10789 = vmatprep.mubr.bf16.mxu1 %v17762_v39 }
 0x44f   : > { %10770 = vmatpush1.bf16.msra.mxu1 %v14202_v1  ;;  %11008 = vmatprep.mubr.bf16.mxu0 %v17762_v39  ;;  %v14322_v1 = vcombine.low %v3547_v51, %v3559_v31  ;;  %v3667_v51 = vld [vmem:[#allocation5 + $0xc10] sm:$0xff] }
 0x450   : > { %10989 = vmatpush1.bf16.msra.mxu0 %v14204_v36  ;;  %10771 = vmatprep.subr.bf16.mxu1 %v14227_v0  ;;  %v14324_v36 = vcombine.low %v3548_v43, %v3560_v20  ;;  %v14347_v0 = vcombine.high %v3571_v59, %v3583_v7  ;;  %v3679_v31 = vld [vmem:[#allocation5 + $0xc70] sm:$0xff]  ;;  %v3668_v43 = vld [vmem:[#allocation5 + $0xc18] sm:$0xff] }
 0x451   : > { %10990 = vmatprep.subr.bf16.mxu0 %v14229_v5  ;;  %v14349_v5 = vcombine.high %v3572_v21, %v3584_v32  ;;  %v3680_v20 = vld [vmem:[#allocation5 + $0xc78] sm:$0xff] }
 0x453   : > { %10772 = vmatpush1.bf16.msra.mxu1 %v14226_v41  ;;  %v14346_v41 = vcombine.low %v3571_v59, %v3583_v7  ;;  %v3691_v59 = vld [vmem:[#allocation5 + $0xcd0] sm:$0xff] }
 0x454   : > { %10991 = vmatpush1.bf16.msra.mxu0 %v14228_v54  ;;  %10773 = vmatprep.subr.bf16.mxu1 %v14251_v57  ;;  %v14348_v54 = vcombine.low %v3572_v21, %v3584_v32  ;;  %v14371_v57 = vcombine.high %v3595_v46, %v3607_v28  ;;  %v3703_v7 = vld [vmem:[#allocation5 + $0xd30] sm:$0xff]  ;;  %v3692_v21 = vld [vmem:[#allocation5 + $0xcd8] sm:$0xff] }
 0x455   : > { %10992 = vmatprep.subr.bf16.mxu0 %v14253_v3  ;;  %v14373_v3 = vcombine.high %v3596_v61, %v3608_v45  ;;  %v3704_v32 = vld [vmem:[#allocation5 + $0xd38] sm:$0xff] }
 0x457   : > { %10774 = vmatpush1.bf16.msra.mxu1 %v14250_v47  ;;  %v14370_v47 = vcombine.low %v3595_v46, %v3607_v28  ;;  %v3715_v46 = vld [vmem:[#allocation5 + $0xd90] sm:$0xff] }
 0x458   : > { %10993 = vmatpush1.bf16.msra.mxu0 %v14252_v11  ;;  %10775 = vmatprep.subr.bf16.mxu1 %v14275_v33  ;;  %v14372_v11 = vcombine.low %v3596_v61, %v3608_v45  ;;  %v14395_v33 = vcombine.high %v3619_v14, %v3631_v62  ;;  %v3727_v28 = vld [vmem:[#allocation5 + $0xdf0] sm:$0xff]  ;;  %v3716_v61 = vld [vmem:[#allocation5 + $0xd98] sm:$0xff] }
 0x459   : > { %10994 = vmatprep.subr.bf16.mxu0 %v14277_v52  ;;  %v14397_v52 = vcombine.high %v3620_v42, %v3632_v48  ;;  %v3728_v45 = vld [vmem:[#allocation5 + $0xdf8] sm:$0xff] }
 0x45b   : > { %10776 = vmatpush1.bf16.msra.mxu1 %v14274_v29  ;;  %v14394_v29 = vcombine.low %v3619_v14, %v3631_v62  ;;  %v3739_v14 = vld [vmem:[#allocation5 + $0xe50] sm:$0xff] }
 0x45c   : > { %10995 = vmatpush1.bf16.msra.mxu0 %v14276_v58  ;;  %10777 = vmatprep.subr.bf16.mxu1 %v14299_v55  ;;  %v14396_v58 = vcombine.low %v3620_v42, %v3632_v48  ;;  %v14419_v55 = vcombine.high %v3643_v8, %v3655_v63  ;;  %v3751_v62 = vld [vmem:[#allocation5 + $0xeb0] sm:$0xff]  ;;  %v3740_v42 = vld [vmem:[#allocation5 + $0xe58] sm:$0xff] }
 0x45d   : > { %10996 = vmatprep.subr.bf16.mxu0 %v14301_v53  ;;  %v14421_v53 = vcombine.high %v3644_v16, %v3656_v24  ;;  %v3752_v48 = vld [vmem:[#allocation5 + $0xeb8] sm:$0xff] }
 0x45f   : > { %10778 = vmatpush1.bf16.msra.mxu1 %v14298_v56  ;;  %v14418_v56 = vcombine.low %v3643_v8, %v3655_v63  ;;  %v3763_v8 = vld [vmem:[#allocation5 + $0xf10] sm:$0xff] }
 0x460   : > { %10997 = vmatpush1.bf16.msra.mxu0 %v14300_v26  ;;  %10779 = vmatprep.subr.bf16.mxu1 %v14323_v12  ;;  %v14420_v26 = vcombine.low %v3644_v16, %v3656_v24  ;;  %v14443_v12 = vcombine.high %v3667_v51, %v3679_v31  ;;  %v3775_v63 = vld [vmem:[#allocation5 + $0xf70] sm:$0xff]  ;;  %v3764_v16 = vld [vmem:[#allocation5 + $0xf18] sm:$0xff] }
 0x461   : > { %10998 = vmatprep.subr.bf16.mxu0 %v14325_v40  ;;  %v14445_v40 = vcombine.high %v3668_v43, %v3680_v20  ;;  %v3776_v24 = vld [vmem:[#allocation5 + $0xf78] sm:$0xff] }
 0x463   : > { %10780 = vmatpush1.bf16.msra.mxu1 %v14322_v1  ;;  %v14442_v1 = vcombine.low %v3667_v51, %v3679_v31  ;;  %v3787_v51 = vld [vmem:[#allocation5 + $0xfd0] sm:$0xff] }
 0x464   : > { %10999 = vmatpush1.bf16.msra.mxu0 %v14324_v36  ;;  %10781 = vmatprep.subr.bf16.mxu1 %v14347_v0  ;;  %v14444_v36 = vcombine.low %v3668_v43, %v3680_v20  ;;  %v14467_v0 = vcombine.high %v3691_v59, %v3703_v7  ;;  %v3799_v31 = vld [vmem:[#allocation5 + $0x1030] sm:$0xff]  ;;  %v3788_v43 = vld [vmem:[#allocation5 + $0xfd8] sm:$0xff] }
 0x465   : > { %11000 = vmatprep.subr.bf16.mxu0 %v14349_v5  ;;  %v14469_v5 = vcombine.high %v3692_v21, %v3704_v32  ;;  %v3800_v20 = vld [vmem:[#allocation5 + $0x1038] sm:$0xff] }
 0x467   : > { %10782 = vmatpush1.bf16.msra.mxu1 %v14346_v41  ;;  %v14466_v41 = vcombine.low %v3691_v59, %v3703_v7  ;;  %v3811_v59 = vld [vmem:[#allocation5 + $0x1090] sm:$0xff] }
 0x468   : > { %11001 = vmatpush1.bf16.msra.mxu0 %v14348_v54  ;;  %10783 = vmatprep.subr.bf16.mxu1 %v14371_v57  ;;  %v14468_v54 = vcombine.low %v3692_v21, %v3704_v32  ;;  %v14491_v57 = vcombine.high %v3715_v46, %v3727_v28  ;;  %v3823_v7 = vld [vmem:[#allocation5 + $0x10f0] sm:$0xff]  ;;  %v3812_v21 = vld [vmem:[#allocation5 + $0x1098] sm:$0xff] }
 0x469   : > { %11002 = vmatprep.subr.bf16.mxu0 %v14373_v3  ;;  %v14493_v3 = vcombine.high %v3716_v61, %v3728_v45  ;;  %v3824_v32 = vld [vmem:[#allocation5 + $0x10f8] sm:$0xff] }
 0x46b   : > { %10784 = vmatpush1.bf16.msra.mxu1 %v14370_v47  ;;  %v14490_v47 = vcombine.low %v3715_v46, %v3727_v28  ;;  %v3835_v46 = vld [vmem:[#allocation5 + $0x1150] sm:$0xff] }
 0x46c   : > { %11003 = vmatpush1.bf16.msra.mxu0 %v14372_v11  ;;  %10785 = vmatprep.subr.bf16.mxu1 %v14395_v33  ;;  %v14492_v11 = vcombine.low %v3716_v61, %v3728_v45  ;;  %v14515_v33 = vcombine.high %v3739_v14, %v3751_v62  ;;  %v3847_v28 = vld [vmem:[#allocation5 + $0x11b0] sm:$0xff]  ;;  %v3836_v61 = vld [vmem:[#allocation5 + $0x1158] sm:$0xff] }
 0x46d   : > { %11004 = vmatprep.subr.bf16.mxu0 %v14397_v52  ;;  %v14517_v52 = vcombine.high %v3740_v42, %v3752_v48  ;;  %v3848_v45 = vld [vmem:[#allocation5 + $0x11b8] sm:$0xff] }
 0x46f   : > { %10786 = vmatpush1.bf16.msra.mxu1 %v14394_v29  ;;  %v14514_v29 = vcombine.low %v3739_v14, %v3751_v62  ;;  %v3859_v14 = vld [vmem:[#allocation5 + $0x1210] sm:$0xff] }
 0x470   : > { %11005 = vmatpush1.bf16.msra.mxu0 %v14396_v58  ;;  %10787 = vmatprep.subr.bf16.mxu1 %v14419_v55  ;;  %v14516_v58 = vcombine.low %v3740_v42, %v3752_v48  ;;  %v14539_v55 = vcombine.high %v3763_v8, %v3775_v63  ;;  %v3871_v62 = vld [vmem:[#allocation5 + $0x1270] sm:$0xff]  ;;  %v3860_v42 = vld [vmem:[#allocation5 + $0x1218] sm:$0xff] }
 0x471   : > { %11006 = vmatprep.subr.bf16.mxu0 %v14421_v53  ;;  %v14541_v53 = vcombine.high %v3764_v16, %v3776_v24  ;;  %v3872_v48 = vld [vmem:[#allocation5 + $0x1278] sm:$0xff] }
 0x473   : > { %10788 = vmatpush1.bf16.msra.mxu1 %v14418_v56  ;;  %v14538_v56 = vcombine.low %v3763_v8, %v3775_v63  ;;  %v3883_v8 = vld [vmem:[#allocation5 + $0x12d0] sm:$0xff] }
 0x474   : > { %11007 = vmatpush1.bf16.msra.mxu0 %v14420_v26  ;;  %10830 = vmatprep.subr.bf16.mxu1 %v14443_v12  ;;  %v14540_v26 = vcombine.low %v3764_v16, %v3776_v24  ;;  %v14563_v12 = vcombine.high %v3787_v51, %v3799_v31  ;;  %v3895_v63 = vld [vmem:[#allocation5 + $0x1330] sm:$0xff]  ;;  %v3884_v16 = vld [vmem:[#allocation5 + $0x12d8] sm:$0xff] }
 0x475   : > { %11049 = vmatprep.subr.bf16.mxu0 %v14445_v40  ;;  %v14565_v40 = vcombine.high %v3788_v43, %v3800_v20  ;;  %v3896_v24 = vld [vmem:[#allocation5 + $0x1338] sm:$0xff] }
 0x476   : > { %10790 = vmatmul.mubr.bf16.vlgmr.msra.gmra.mrb[48].mxu1 %v17764_v38 }
 0x477   : > { %11009 = vmatmul.mubr.bf16.vlgmr.msra.gmra.mrb[48].mxu0 %v17764_v38  ;;  %10799 = vmatprep.mubr.bf16.mxu1 %v17808_v49 }
 0x478   : > { %10831 = vmatpush1.bf16.msra.mxu1 %v14442_v1  ;;  %11018 = vmatprep.mubr.bf16.mxu0 %v17808_v49  ;;  %v14562_v1 = vcombine.low %v3787_v51, %v3799_v31  ;;  %v3907_v51 = vld [vmem:[#allocation5 + $0x1390] sm:$0xff] }
 0x479   : > { %11050 = vmatpush1.bf16.msra.mxu0 %v14444_v36  ;;  %10832 = vmatprep.subr.bf16.mxu1 %v14467_v0  ;;  %v14564_v36 = vcombine.low %v3788_v43, %v3800_v20  ;;  %v14587_v0 = vcombine.high %v3811_v59, %v3823_v7  ;;  %v3919_v31 = vld [vmem:[#allocation5 + $0x13f0] sm:$0xff]  ;;  %v3908_v43 = vld [vmem:[#allocation5 + $0x1398] sm:$0xff] }
 0x47a   : > { %11051 = vmatprep.subr.bf16.mxu0 %v14469_v5  ;;  %v14589_v5 = vcombine.high %v3812_v21, %v3824_v32  ;;  %v3920_v20 = vld [vmem:[#allocation5 + $0x13f8] sm:$0xff] }
 0x47c   : > { %10833 = vmatpush1.bf16.msra.mxu1 %v14466_v41  ;;  %v14586_v41 = vcombine.low %v3811_v59, %v3823_v7  ;;  %v3931_v59 = vld [vmem:[#allocation5 + $0x1450] sm:$0xff] }
 0x47d   : > { %11052 = vmatpush1.bf16.msra.mxu0 %v14468_v54  ;;  %10834 = vmatprep.subr.bf16.mxu1 %v14491_v57  ;;  %v14588_v54 = vcombine.low %v3812_v21, %v3824_v32  ;;  %v14611_v57 = vcombine.high %v3835_v46, %v3847_v28  ;;  %v3943_v7 = vld [vmem:[#allocation5 + $0x14b0] sm:$0xff]  ;;  %v3932_v21 = vld [vmem:[#allocation5 + $0x1458] sm:$0xff] }
 0x47e   : > { %10800 = vmatmul.mubr.bf16.gmra.mrb[52].mxu1 %v17810_v27  ;;  %11053 = vmatprep.subr.bf16.mxu0 %v14493_v3  ;;  %v14613_v3 = vcombine.high %v3836_v61, %v3848_v45  ;;  %v3944_v32 = vld [vmem:[#allocation5 + $0x14b8] sm:$0xff] }
 0x47f   : > { %11019 = vmatmul.mubr.bf16.gmra.mrb[52].mxu0 %v17810_v27  ;;  %10809 = vmatprep.mubr.bf16.mxu1 %v17854_v30 }
 0x480   : > { %10835 = vmatpush1.bf16.msra.mxu1 %v14490_v47  ;;  %11028 = vmatprep.mubr.bf16.mxu0 %v17854_v30  ;;  %v14610_v47 = vcombine.low %v3835_v46, %v3847_v28  ;;  %v3955_v46 = vld [vmem:[#allocation5 + $0x1510] sm:$0xff] }
 0x481   : > { %11054 = vmatpush1.bf16.msra.mxu0 %v14492_v11  ;;  %10836 = vmatprep.subr.bf16.mxu1 %v14515_v33  ;;  %v14612_v11 = vcombine.low %v3836_v61, %v3848_v45  ;;  %v14635_v33 = vcombine.high %v3859_v14, %v3871_v62  ;;  %v3967_v28 = vld [vmem:[#allocation5 + $0x1570] sm:$0xff]  ;;  %v3956_v61 = vld [vmem:[#allocation5 + $0x1518] sm:$0xff] }
 0x482   : > { %11055 = vmatprep.subr.bf16.mxu0 %v14517_v52  ;;  %v14637_v52 = vcombine.high %v3860_v42, %v3872_v48  ;;  %v3968_v45 = vld [vmem:[#allocation5 + $0x1578] sm:$0xff] }
 0x484   : > { %10837 = vmatpush1.bf16.msra.mxu1 %v14514_v29  ;;  %v14634_v29 = vcombine.low %v3859_v14, %v3871_v62  ;;  %v3979_v14 = vld [vmem:[#allocation5 + $0x15d0] sm:$0xff] }
 0x485   : > { %11056 = vmatpush1.bf16.msra.mxu0 %v14516_v58  ;;  %10838 = vmatprep.subr.bf16.mxu1 %v14539_v55  ;;  %v14636_v58 = vcombine.low %v3860_v42, %v3872_v48  ;;  %v14659_v55 = vcombine.high %v3883_v8, %v3895_v63  ;;  %v3991_v62 = vld [vmem:[#allocation5 + $0x1630] sm:$0xff]  ;;  %v3980_v42 = vld [vmem:[#allocation5 + $0x15d8] sm:$0xff] }
 0x486   : > { %10810 = vmatmul.mubr.bf16.gmra.mrb[56].mxu1 %v17862_v34  ;;  %11057 = vmatprep.subr.bf16.mxu0 %v14541_v53  ;;  %v14661_v53 = vcombine.high %v3884_v16, %v3896_v24  ;;  %v3992_v48 = vld [vmem:[#allocation5 + $0x1638] sm:$0xff] }
 0x487   : > { %11029 = vmatmul.mubr.bf16.gmra.mrb[56].mxu0 %v17862_v34  ;;  %10819 = vmatprep.mubr.bf16.mxu1 %v17908_v22 }
 0x488   : > { %10839 = vmatpush1.bf16.msra.mxu1 %v14538_v56  ;;  %11038 = vmatprep.mubr.bf16.mxu0 %v17908_v22  ;;  %v14658_v56 = vcombine.low %v3883_v8, %v3895_v63  ;;  %v4003_v8 = vld [vmem:[#allocation5 + $0x1690] sm:$0xff] }
 0x489   : > { %11058 = vmatpush1.bf16.msra.mxu0 %v14540_v26  ;;  %10840 = vmatprep.subr.bf16.mxu1 %v14563_v12  ;;  %v14660_v26 = vcombine.low %v3884_v16, %v3896_v24  ;;  %v14683_v12 = vcombine.high %v3907_v51, %v3919_v31  ;;  %v4015_v63 = vld [vmem:[#allocation5 + $0x16f0] sm:$0xff]  ;;  %v4004_v16 = vld [vmem:[#allocation5 + $0x1698] sm:$0xff] }
 0x48a   : > { %11059 = vmatprep.subr.bf16.mxu0 %v14565_v40  ;;  %v14685_v40 = vcombine.high %v3908_v43, %v3920_v20  ;;  %v4016_v24 = vld [vmem:[#allocation5 + $0x16f8] sm:$0xff] }
 0x48c   : > { %10841 = vmatpush1.bf16.msra.mxu1 %v14562_v1  ;;  %v14682_v1 = vcombine.low %v3907_v51, %v3919_v31  ;;  %v4027_v51 = vld [vmem:[#allocation5 + $0x1750] sm:$0xff] }
 0x48d   : > { %11060 = vmatpush1.bf16.msra.mxu0 %v14564_v36  ;;  %10842 = vmatprep.subr.bf16.mxu1 %v14587_v0  ;;  %v14684_v36 = vcombine.low %v3908_v43, %v3920_v20  ;;  %v14707_v0 = vcombine.high %v3931_v59, %v3943_v7  ;;  %v4039_v31 = vld [vmem:[#allocation5 + $0x17b0] sm:$0xff]  ;;  %v4028_v43 = vld [vmem:[#allocation5 + $0x1758] sm:$0xff] }
 0x48e   : > { %10820 = vmatmul.mubr.bf16.gmra.mrb[60].mxu1 %v17914_v50  ;;  %11061 = vmatprep.subr.bf16.mxu0 %v14589_v5  ;;  %v14709_v5 = vcombine.high %v3932_v21, %v3944_v32  ;;  %v4040_v20 = vld [vmem:[#allocation5 + $0x17b8] sm:$0xff] }
 0x48f   : > { %11039 = vmatmul.mubr.bf16.gmra.mrb[60].mxu0 %v17914_v50  ;;  %10862 = vmatprep.mubr.bf16.mxu1 %v17926_v15 }
 0x490   : > { %10843 = vmatpush1.bf16.msra.mxu1 %v14586_v41  ;;  %11081 = vmatprep.mubr.bf16.mxu0 %v17926_v15  ;;  %v14706_v41 = vcombine.low %v3931_v59, %v3943_v7  ;;  %v4051_v59 = vld [vmem:[#allocation5 + $0x1810] sm:$0xff] }
 0x491   : > { %11062 = vmatpush1.bf16.msra.mxu0 %v14588_v54  ;;  %10844 = vmatprep.subr.bf16.mxu1 %v14611_v57  ;;  %v14708_v54 = vcombine.low %v3932_v21, %v3944_v32  ;;  %v14731_v57 = vcombine.high %v3955_v46, %v3967_v28  ;;  %v4063_v7 = vld [vmem:[#allocation5 + $0x1870] sm:$0xff]  ;;  %v4052_v21 = vld [vmem:[#allocation5 + $0x1818] sm:$0xff] }
 0x492   : > { %11063 = vmatprep.subr.bf16.mxu0 %v14613_v3  ;;  %v14733_v3 = vcombine.high %v3956_v61, %v3968_v45  ;;  %v4064_v32 = vld [vmem:[#allocation5 + $0x1878] sm:$0xff] }
 0x494   : > { %10845 = vmatpush1.bf16.msra.mxu1 %v14610_v47  ;;  %v14730_v47 = vcombine.low %v3955_v46, %v3967_v28  ;;  %v4075_v46 = vld [vmem:[#allocation5 + $0x18d0] sm:$0xff] }
 0x495   : > { %11064 = vmatpush1.bf16.msra.mxu0 %v14612_v11  ;;  %10846 = vmatprep.subr.bf16.mxu1 %v14635_v33  ;;  %v14732_v11 = vcombine.low %v3956_v61, %v3968_v45  ;;  %v14755_v33 = vcombine.high %v3979_v14, %v3991_v62  ;;  %v4087_v28 = vld [vmem:[#allocation5 + $0x1930] sm:$0xff]  ;;  %v4076_v61 = vld [vmem:[#allocation5 + $0x18d8] sm:$0xff] }
 0x496   : > { %11065 = vmatprep.subr.bf16.mxu0 %v14637_v52  ;;  %v14757_v52 = vcombine.high %v3980_v42, %v3992_v48  ;;  %v4088_v45 = vld [vmem:[#allocation5 + $0x1938] sm:$0xff] }
 0x498   : > { %10847 = vmatpush1.bf16.msra.mxu1 %v14634_v29  ;;  %v14754_v29 = vcombine.low %v3979_v14, %v3991_v62  ;;  %v4099_v14 = vld [vmem:[#allocation5 + $0x1990] sm:$0xff] }
 0x499   : > { %11066 = vmatpush1.bf16.msra.mxu0 %v14636_v58  ;;  %10848 = vmatprep.subr.bf16.mxu1 %v14659_v55  ;;  %v14756_v58 = vcombine.low %v3980_v42, %v3992_v48  ;;  %v14779_v55 = vcombine.high %v4003_v8, %v4015_v63  ;;  %v4111_v62 = vld [vmem:[#allocation5 + $0x19f0] sm:$0xff]  ;;  %v4100_v42 = vld [vmem:[#allocation5 + $0x1998] sm:$0xff] }
 0x49a   : > { %11067 = vmatprep.subr.bf16.mxu0 %v14661_v53  ;;  %v14781_v53 = vcombine.high %v4004_v16, %v4016_v24  ;;  %v4112_v48 = vld [vmem:[#allocation5 + $0x19f8] sm:$0xff] }
 0x49c   : > { %10849 = vmatpush1.bf16.msra.mxu1 %v14658_v56  ;;  %v14778_v56 = vcombine.low %v4003_v8, %v4015_v63  ;;  %v4123_v8 = vld [vmem:[#allocation5 + $0x1a50] sm:$0xff] }
 0x49d   : > { %11068 = vmatpush1.bf16.msra.mxu0 %v14660_v26  ;;  %10850 = vmatprep.subr.bf16.mxu1 %v14683_v12  ;;  %v14780_v26 = vcombine.low %v4004_v16, %v4016_v24  ;;  %v14803_v12 = vcombine.high %v4027_v51, %v4039_v31  ;;  %v4135_v63 = vld [vmem:[#allocation5 + $0x1ab0] sm:$0xff]  ;;  %v4124_v16 = vld [vmem:[#allocation5 + $0x1a58] sm:$0xff] }
 0x49e   : > { %11069 = vmatprep.subr.bf16.mxu0 %v14685_v40  ;;  %v14805_v40 = vcombine.high %v4028_v43, %v4040_v20  ;;  %v4136_v24 = vld [vmem:[#allocation5 + $0x1ab8] sm:$0xff] }
 0x4a0   : > { %10851 = vmatpush1.bf16.msra.mxu1 %v14682_v1  ;;  %v14802_v1 = vcombine.low %v4027_v51, %v4039_v31  ;;  %v4147_v51 = vld [vmem:[#allocation5 + $0x1b10] sm:$0xff] }
 0x4a1   : > { %11070 = vmatpush1.bf16.msra.mxu0 %v14684_v36  ;;  %10852 = vmatprep.subr.bf16.mxu1 %v14707_v0  ;;  %v14804_v36 = vcombine.low %v4028_v43, %v4040_v20  ;;  %v14827_v0 = vcombine.high %v4051_v59, %v4063_v7  ;;  %v4159_v31 = vld [vmem:[#allocation5 + $0x1b70] sm:$0xff]  ;;  %v4148_v43 = vld [vmem:[#allocation5 + $0x1b18] sm:$0xff] }
 0x4a2   : > { %11071 = vmatprep.subr.bf16.mxu0 %v14709_v5  ;;  %v14829_v5 = vcombine.high %v4052_v21, %v4064_v32  ;;  %v4160_v20 = vld [vmem:[#allocation5 + $0x1b78] sm:$0xff] }
 0x4a4   : > { %10853 = vmatpush1.bf16.msra.mxu1 %v14706_v41  ;;  %v14826_v41 = vcombine.low %v4051_v59, %v4063_v7  ;;  %v4171_v59 = vld [vmem:[#allocation5 + $0x1bd0] sm:$0xff] }
 0x4a5   : > { %11072 = vmatpush1.bf16.msra.mxu0 %v14708_v54  ;;  %10854 = vmatprep.subr.bf16.mxu1 %v14731_v57  ;;  %v14828_v54 = vcombine.low %v4052_v21, %v4064_v32  ;;  %v14851_v57 = vcombine.high %v4075_v46, %v4087_v28  ;;  %v4183_v7 = vld [vmem:[#allocation5 + $0x1c30] sm:$0xff]  ;;  %v4172_v21 = vld [vmem:[#allocation5 + $0x1bd8] sm:$0xff] }
 0x4a6   : > { %11073 = vmatprep.subr.bf16.mxu0 %v14733_v3  ;;  %v14853_v3 = vcombine.high %v4076_v61, %v4088_v45  ;;  %v4184_v32 = vld [vmem:[#allocation5 + $0x1c38] sm:$0xff] }
 0x4a8   : > { %10855 = vmatpush1.bf16.msra.mxu1 %v14730_v47  ;;  %v14850_v47 = vcombine.low %v4075_v46, %v4087_v28  ;;  %v4195_v46 = vld [vmem:[#allocation5 + $0x1c90] sm:$0xff] }
 0x4a9   : > { %11074 = vmatpush1.bf16.msra.mxu0 %v14732_v11  ;;  %10856 = vmatprep.subr.bf16.mxu1 %v14755_v33  ;;  %v14852_v11 = vcombine.low %v4076_v61, %v4088_v45  ;;  %v14875_v33 = vcombine.high %v4099_v14, %v4111_v62  ;;  %v4207_v28 = vld [vmem:[#allocation5 + $0x1cf0] sm:$0xff]  ;;  %v4196_v61 = vld [vmem:[#allocation5 + $0x1c98] sm:$0xff] }
 0x4aa   : > { %11075 = vmatprep.subr.bf16.mxu0 %v14757_v52  ;;  %v14877_v52 = vcombine.high %v4100_v42, %v4112_v48  ;;  %v4208_v45 = vld [vmem:[#allocation5 + $0x1cf8] sm:$0xff] }
 0x4ac   : > { %10857 = vmatpush1.bf16.msra.mxu1 %v14754_v29  ;;  %v14874_v29 = vcombine.low %v4099_v14, %v4111_v62  ;;  %v4219_v14 = vld [vmem:[#allocation5 + $0x1d50] sm:$0xff] }
 0x4ad   : > { %11076 = vmatpush1.bf16.msra.mxu0 %v14756_v58  ;;  %10858 = vmatprep.subr.bf16.mxu1 %v14779_v55  ;;  %v14876_v58 = vcombine.low %v4100_v42, %v4112_v48  ;;  %v14899_v55 = vcombine.high %v4123_v8, %v4135_v63  ;;  %v4231_v62 = vld [vmem:[#allocation5 + $0x1db0] sm:$0xff]  ;;  %v4220_v42 = vld [vmem:[#allocation5 + $0x1d58] sm:$0xff] }
 0x4ae   : > { %11077 = vmatprep.subr.bf16.mxu0 %v14781_v53  ;;  %v14901_v53 = vcombine.high %v4124_v16, %v4136_v24  ;;  %v4232_v48 = vld [vmem:[#allocation5 + $0x1db8] sm:$0xff] }
 0x4b0   : > { %10859 = vmatpush1.bf16.msra.mxu1 %v14778_v56  ;;  %v14898_v56 = vcombine.low %v4123_v8, %v4135_v63  ;;  %v4243_v8 = vld [vmem:[#allocation5 + $0x1e10] sm:$0xff] }
 0x4b1   : > { %11078 = vmatpush1.bf16.msra.mxu0 %v14780_v26  ;;  %10860 = vmatprep.subr.bf16.mxu1 %v14803_v12  ;;  %v14900_v26 = vcombine.low %v4124_v16, %v4136_v24  ;;  %v14923_v12 = vcombine.high %v4147_v51, %v4159_v31  ;;  %v4255_v63 = vld [vmem:[#allocation5 + $0x1e70] sm:$0xff]  ;;  %v4244_v16 = vld [vmem:[#allocation5 + $0x1e18] sm:$0xff] }
 0x4b2   : > { %11079 = vmatprep.subr.bf16.mxu0 %v14805_v40  ;;  %v14925_v40 = vcombine.high %v4148_v43, %v4160_v20  ;;  %v4256_v24 = vld [vmem:[#allocation5 + $0x1e78] sm:$0xff] }
 0x4b4   : > { %10861 = vmatpush1.bf16.msra.mxu1 %v14802_v1  ;;  %v14922_v1 = vcombine.low %v4147_v51, %v4159_v31  ;;  %v4267_v51 = vld [vmem:[#allocation5 + $0x1ed0] sm:$0xff] }
 0x4b5   : > { %11080 = vmatpush1.bf16.msra.mxu0 %v14804_v36  ;;  %10903 = vmatprep.subr.bf16.mxu1 %v14827_v0  ;;  %v14924_v36 = vcombine.low %v4148_v43, %v4160_v20  ;;  %v14947_v0 = vcombine.high %v4171_v59, %v4183_v7  ;;  %v4279_v31 = vld [vmem:[#allocation5 + $0x1f30] sm:$0xff]  ;;  %v4268_v43 = vld [vmem:[#allocation5 + $0x1ed8] sm:$0xff] }
 0x4b6   : > { %11122 = vmatprep.subr.bf16.mxu0 %v14829_v5  ;;  %v14949_v5 = vcombine.high %v4172_v21, %v4184_v32  ;;  %v4280_v20 = vld [vmem:[#allocation5 + $0x1f38] sm:$0xff] }
 0x4b7   : > { %10863 = vmatmul.mubr.bf16.vlgmr.msra.gmra.mrb[48].mxu1 %v17766_v35 }
 0x4b8   : > { %11082 = vmatmul.mubr.bf16.vlgmr.msra.gmra.mrb[48].mxu0 %v17766_v35  ;;  %10872 = vmatprep.mubr.bf16.mxu1 %v17812_v6 }
 0x4b9   : > { %10904 = vmatpush1.bf16.msra.mxu1 %v14826_v41  ;;  %11091 = vmatprep.mubr.bf16.mxu0 %v17812_v6  ;;  %v14946_v41 = vcombine.low %v4171_v59, %v4183_v7  ;;  %v4291_v59 = vld [vmem:[#allocation5 + $0x1f90] sm:$0xff] }
 0x4ba   : > { %11123 = vmatpush1.bf16.msra.mxu0 %v14828_v54  ;;  %10905 = vmatprep.subr.bf16.mxu1 %v14851_v57  ;;  %v14948_v54 = vcombine.low %v4172_v21, %v4184_v32  ;;  %v14971_v57 = vcombine.high %v4195_v46, %v4207_v28  ;;  %v4303_v7 = vld [vmem:[#allocation5 + $0x1ff0] sm:$0xff]  ;;  %v4292_v21 = vld [vmem:[#allocation5 + $0x1f98] sm:$0xff] }
 0x4bb   : > { %11124 = vmatprep.subr.bf16.mxu0 %v14853_v3  ;;  %v14973_v3 = vcombine.high %v4196_v61, %v4208_v45  ;;  %v4304_v32 = vld [vmem:[#allocation5 + $0x1ff8] sm:$0xff] }
 0x4bd   : > { %10906 = vmatpush1.bf16.msra.mxu1 %v14850_v47  ;;  %v14970_v47 = vcombine.low %v4195_v46, %v4207_v28  ;;  %v4315_v46 = vld [vmem:[#allocation5 + $0x2050] sm:$0xff] }
 0x4be   : > { %11125 = vmatpush1.bf16.msra.mxu0 %v14852_v11  ;;  %10907 = vmatprep.subr.bf16.mxu1 %v14875_v33  ;;  %v14972_v11 = vcombine.low %v4196_v61, %v4208_v45  ;;  %v14995_v33 = vcombine.high %v4219_v14, %v4231_v62  ;;  %v4327_v28 = vld [vmem:[#allocation5 + $0x20b0] sm:$0xff]  ;;  %v4316_v61 = vld [vmem:[#allocation5 + $0x2058] sm:$0xff] }
 0x4bf   : > { %10873 = vmatmul.mubr.bf16.gmra.mrb[52].mxu1 %v17818_v9  ;;  %11126 = vmatprep.subr.bf16.mxu0 %v14877_v52  ;;  %v14997_v52 = vcombine.high %v4220_v42, %v4232_v48  ;;  %v4328_v45 = vld [vmem:[#allocation5 + $0x20b8] sm:$0xff] }
 0x4c0   : > { %11092 = vmatmul.mubr.bf16.gmra.mrb[52].mxu0 %v17818_v9  ;;  %10882 = vmatprep.mubr.bf16.mxu1 %v17860_v25 }
 0x4c1   : > { %10908 = vmatpush1.bf16.msra.mxu1 %v14874_v29  ;;  %11101 = vmatprep.mubr.bf16.mxu0 %v17860_v25  ;;  %v14994_v29 = vcombine.low %v4219_v14, %v4231_v62  ;;  %v4339_v14 = vld [vmem:[#allocation5 + $0x2110] sm:$0xff] }
 0x4c2   : > { %11127 = vmatpush1.bf16.msra.mxu0 %v14876_v58  ;;  %10909 = vmatprep.subr.bf16.mxu1 %v14899_v55  ;;  %v14996_v58 = vcombine.low %v4220_v42, %v4232_v48  ;;  %v15019_v55 = vcombine.high %v4243_v8, %v4255_v63  ;;  %v4351_v62 = vld [vmem:[#allocation5 + $0x2170] sm:$0xff]  ;;  %v4340_v42 = vld [vmem:[#allocation5 + $0x2118] sm:$0xff] }
 0x4c3   : > { %11128 = vmatprep.subr.bf16.mxu0 %v14901_v53  ;;  %v15021_v53 = vcombine.high %v4244_v16, %v4256_v24  ;;  %v4352_v48 = vld [vmem:[#allocation5 + $0x2178] sm:$0xff] }
 0x4c5   : > { %10910 = vmatpush1.bf16.msra.mxu1 %v14898_v56  ;;  %v15018_v56 = vcombine.low %v4243_v8, %v4255_v63  ;;  %v4363_v8 = vld [vmem:[#allocation5 + $0x21d0] sm:$0xff] }
 0x4c6   : > { %11129 = vmatpush1.bf16.msra.mxu0 %v14900_v26  ;;  %10911 = vmatprep.subr.bf16.mxu1 %v14923_v12  ;;  %v15020_v26 = vcombine.low %v4244_v16, %v4256_v24  ;;  %v15043_v12 = vcombine.high %v4267_v51, %v4279_v31  ;;  %v4375_v63 = vld [vmem:[#allocation5 + $0x2230] sm:$0xff]  ;;  %v4364_v16 = vld [vmem:[#allocation5 + $0x21d8] sm:$0xff] }
 0x4c7   : > { %10883 = vmatmul.mubr.bf16.gmra.mrb[56].mxu1 %v17868_v10  ;;  %11130 = vmatprep.subr.bf16.mxu0 %v14925_v40  ;;  %v15045_v40 = vcombine.high %v4268_v43, %v4280_v20  ;;  %v4376_v24 = vld [vmem:[#allocation5 + $0x2238] sm:$0xff] }
 0x4c8   : > { %11102 = vmatmul.mubr.bf16.gmra.mrb[56].mxu0 %v17868_v10  ;;  %10892 = vmatprep.mubr.bf16.mxu1 %v17912_v19 }
 0x4c9   : > { %10912 = vmatpush1.bf16.msra.mxu1 %v14922_v1  ;;  %11111 = vmatprep.mubr.bf16.mxu0 %v17912_v19  ;;  %v15042_v1 = vcombine.low %v4267_v51, %v4279_v31  ;;  %v4387_v51 = vld [vmem:[#allocation5 + $0x2290] sm:$0xff] }
 0x4ca   : > { %11131 = vmatpush1.bf16.msra.mxu0 %v14924_v36  ;;  %10913 = vmatprep.subr.bf16.mxu1 %v14947_v0  ;;  %v15044_v36 = vcombine.low %v4268_v43, %v4280_v20  ;;  %v15067_v0 = vcombine.high %v4291_v59, %v4303_v7  ;;  %v4399_v31 = vld [vmem:[#allocation5 + $0x22f0] sm:$0xff]  ;;  %v4388_v43 = vld [vmem:[#allocation5 + $0x2298] sm:$0xff] }
 0x4cb   : > { %11132 = vmatprep.subr.bf16.mxu0 %v14949_v5  ;;  %v15069_v5 = vcombine.high %v4292_v21, %v4304_v32  ;;  %v4400_v20 = vld [vmem:[#allocation5 + $0x22f8] sm:$0xff] }
 0x4cd   : > { %10914 = vmatpush1.bf16.msra.mxu1 %v14946_v41  ;;  %v15066_v41 = vcombine.low %v4291_v59, %v4303_v7  ;;  %v4411_v59 = vld [vmem:[#allocation5 + $0x2350] sm:$0xff] }
 0x4ce   : > { %11133 = vmatpush1.bf16.msra.mxu0 %v14948_v54  ;;  %10915 = vmatprep.subr.bf16.mxu1 %v14971_v57  ;;  %v15068_v54 = vcombine.low %v4292_v21, %v4304_v32  ;;  %v15091_v57 = vcombine.high %v4315_v46, %v4327_v28  ;;  %v4423_v7 = vld [vmem:[#allocation5 + $0x23b0] sm:$0xff]  ;;  %v4412_v21 = vld [vmem:[#allocation5 + $0x2358] sm:$0xff] }
 0x4cf   : > { %10893 = vmatmul.mubr.bf16.gmra.mrb[60].mxu1 %v17916_v13  ;;  %11134 = vmatprep.subr.bf16.mxu0 %v14973_v3  ;;  %v15093_v3 = vcombine.high %v4316_v61, %v4328_v45  ;;  %v4424_v32 = vld [vmem:[#allocation5 + $0x23b8] sm:$0xff] }
 0x4d0   : > { %11112 = vmatmul.mubr.bf16.gmra.mrb[60].mxu0 %v17916_v13  ;;  %10935 = vmatprep.mubr.bf16.mxu1 %v17772_v23 }
 0x4d1   : > { %10916 = vmatpush1.bf16.msra.mxu1 %v14970_v47  ;;  %11154 = vmatprep.mubr.bf16.mxu0 %v17772_v23  ;;  %v15090_v47 = vcombine.low %v4315_v46, %v4327_v28  ;;  %v3285_v46 = vld [vmem:[#allocation5 + $0x20] sm:$0xff] }
 0x4d2   : > { %11135 = vmatpush1.bf16.msra.mxu0 %v14972_v11  ;;  %10917 = vmatprep.subr.bf16.mxu1 %v14995_v33  ;;  %v15092_v11 = vcombine.low %v4316_v61, %v4328_v45  ;;  %v15115_v33 = vcombine.high %v4339_v14, %v4351_v62  ;;  %v3297_v28 = vld [vmem:[#allocation5 + $0x80] sm:$0xff]  ;;  %v3286_v61 = vld [vmem:[#allocation5 + $0x28] sm:$0xff] }
 0x4d3   : > { %11136 = vmatprep.subr.bf16.mxu0 %v14997_v52  ;;  %v15117_v52 = vcombine.high %v4340_v42, %v4352_v48  ;;  %v3298_v45 = vld [vmem:[#allocation5 + $0x88] sm:$0xff] }
 0x4d5   : > { %10918 = vmatpush1.bf16.msra.mxu1 %v14994_v29  ;;  %v15114_v29 = vcombine.low %v4339_v14, %v4351_v62  ;;  %v3309_v14 = vld [vmem:[#allocation5 + $0xe0] sm:$0xff] }
 0x4d6   : > { %11137 = vmatpush1.bf16.msra.mxu0 %v14996_v58  ;;  %10919 = vmatprep.subr.bf16.mxu1 %v15019_v55  ;;  %v15116_v58 = vcombine.low %v4340_v42, %v4352_v48  ;;  %v15139_v55 = vcombine.high %v4363_v8, %v4375_v63  ;;  %v3321_v62 = vld [vmem:[#allocation5 + $0x140] sm:$0xff]  ;;  %v3310_v42 = vld [vmem:[#allocation5 + $0xe8] sm:$0xff] }
 0x4d7   : > { %11138 = vmatprep.subr.bf16.mxu0 %v15021_v53  ;;  %v15141_v53 = vcombine.high %v4364_v16, %v4376_v24  ;;  %v3322_v48 = vld [vmem:[#allocation5 + $0x148] sm:$0xff] }
 0x4d9   : > { %10920 = vmatpush1.bf16.msra.mxu1 %v15018_v56  ;;  %v15138_v56 = vcombine.low %v4363_v8, %v4375_v63  ;;  %v3333_v8 = vld [vmem:[#allocation5 + $0x1a0] sm:$0xff] }
 0x4da   : > { %11139 = vmatpush1.bf16.msra.mxu0 %v15020_v26  ;;  %10921 = vmatprep.subr.bf16.mxu1 %v15043_v12  ;;  %v15140_v26 = vcombine.low %v4364_v16, %v4376_v24  ;;  %v15163_v12 = vcombine.high %v4387_v51, %v4399_v31  ;;  %v3345_v63 = vld [vmem:[#allocation5 + $0x200] sm:$0xff]  ;;  %v3334_v16 = vld [vmem:[#allocation5 + $0x1a8] sm:$0xff] }
 0x4db   : > { %11140 = vmatprep.subr.bf16.mxu0 %v15045_v40  ;;  %v15165_v40 = vcombine.high %v4388_v43, %v4400_v20  ;;  %v3346_v24 = vld [vmem:[#allocation5 + $0x208] sm:$0xff] }
 0x4dd   : > { %10922 = vmatpush1.bf16.msra.mxu1 %v15042_v1  ;;  %v15162_v1 = vcombine.low %v4387_v51, %v4399_v31  ;;  %v3357_v51 = vld [vmem:[#allocation5 + $0x260] sm:$0xff] }
 0x4de   : > { %11141 = vmatpush1.bf16.msra.mxu0 %v15044_v36  ;;  %10923 = vmatprep.subr.bf16.mxu1 %v15067_v0  ;;  %v15164_v36 = vcombine.low %v4388_v43, %v4400_v20  ;;  %v15187_v0 = vcombine.high %v4411_v59, %v4423_v7  ;;  %v3369_v31 = vld [vmem:[#allocation5 + $0x2c0] sm:$0xff]  ;;  %v3358_v43 = vld [vmem:[#allocation5 + $0x268] sm:$0xff] }
 0x4df   : > { %11142 = vmatprep.subr.bf16.mxu0 %v15069_v5  ;;  %v15189_v5 = vcombine.high %v4412_v21, %v4424_v32  ;;  %v3370_v20 = vld [vmem:[#allocation5 + $0x2c8] sm:$0xff] }
 0x4e1   : > { %10924 = vmatpush1.bf16.msra.mxu1 %v15066_v41  ;;  %v15186_v41 = vcombine.low %v4411_v59, %v4423_v7  ;;  %v3381_v59 = vld [vmem:[#allocation5 + $0x320] sm:$0xff] }
 0x4e2   : > { %11143 = vmatpush1.bf16.msra.mxu0 %v15068_v54  ;;  %10925 = vmatprep.subr.bf16.mxu1 %v15091_v57  ;;  %v15188_v54 = vcombine.low %v4412_v21, %v4424_v32  ;;  %v14063_v57 = vcombine.high %v3285_v46, %v3297_v28  ;;  %v3393_v7 = vld [vmem:[#allocation5 + $0x380] sm:$0xff]  ;;  %v3382_v21 = vld [vmem:[#allocation5 + $0x328] sm:$0xff] }
 0x4e3   : > { %11144 = vmatprep.subr.bf16.mxu0 %v15093_v3  ;;  %v14065_v3 = vcombine.high %v3286_v61, %v3298_v45  ;;  %v3394_v32 = vld [vmem:[#allocation5 + $0x388] sm:$0xff] }
 0x4e5   : > { %10926 = vmatpush1.bf16.msra.mxu1 %v15090_v47  ;;  %v14062_v47 = vcombine.low %v3285_v46, %v3297_v28  ;;  %v14161_v46 = vcombine.high %v3382_v21, %v3394_v32  ;;  %v3405_v28 = vld [vmem:[#allocation5 + $0x3e0] sm:$0xff] }
 0x4e6   : > { %11145 = vmatpush1.bf16.msra.mxu0 %v15092_v11  ;;  %10927 = vmatprep.subr.bf16.mxu1 %v15115_v33  ;;  %v14064_v11 = vcombine.low %v3286_v61, %v3298_v45  ;;  %v14087_v33 = vcombine.high %v3309_v14, %v3321_v62  ;;  %v3417_v61 = vld [vmem:[#allocation5 + $0x440] sm:$0xff]  ;;  %v18909_v45 = vld [vmem:[#allocation12_spill] sm:$0xff] }
 0x4e7   : > { %11146 = vmatprep.subr.bf16.mxu0 %v15117_v52  ;;  %v14089_v52 = vcombine.high %v3310_v42, %v3322_v48 }
 0x4e9   : > { %10928 = vmatpush1.bf16.msra.mxu1 %v15114_v29  ;;  %v14086_v29 = vcombine.low %v3309_v14, %v3321_v62  ;;  %v18910_v14 = vld [vmem:[#allocation16_spill] sm:$0xff] }
 0x4ea   : > { %11147 = vmatpush1.bf16.msra.mxu0 %v15116_v58  ;;  %10929 = vmatprep.subr.bf16.mxu1 %v15139_v55  ;;  %v14088_v58 = vcombine.low %v3310_v42, %v3322_v48  ;;  %v14111_v55 = vcombine.high %v3333_v8, %v3345_v63  ;;  %v18911_v42 = vld [vmem:[#allocation13_spill] sm:$0xff] }
 0x4eb   : > { %11148 = vmatprep.subr.bf16.mxu0 %v15141_v53  ;;  %v14113_v53 = vcombine.high %v3334_v16, %v3346_v24 }
 0x4ed   : > { %10930 = vmatpush1.bf16.msra.mxu1 %v15138_v56  ;;  %v14110_v56 = vcombine.low %v3333_v8, %v3345_v63 }
 0x4ee   : > { %11149 = vmatpush1.bf16.msra.mxu0 %v15140_v26  ;;  %10931 = vmatprep.subr.bf16.mxu1 %v15163_v12  ;;  %v14112_v26 = vcombine.low %v3334_v16, %v3346_v24  ;;  %v14135_v12 = vcombine.high %v3357_v51, %v3369_v31  ;;  %v18029_v16 = vld [vmem:[#allocation5 + $0x4a0] sm:$0xff] }
 0x4ef   : > { %11150 = vmatprep.subr.bf16.mxu0 %v15165_v40  ;;  %v14137_v40 = vcombine.high %v3358_v43, %v3370_v20  ;;  %v3441_v24 = vld [vmem:[#allocation5 + $0x500] sm:$0xff] }
 0x4f1   : > { %10932 = vmatpush1.bf16.msra.mxu1 %v15162_v1  ;;  %v14134_v1 = vcombine.low %v3357_v51, %v3369_v31  ;;  %v3430_v51 = vld [vmem:[#allocation5 + $0x4a8] sm:$0xff] }
 0x4f2   : > { %11151 = vmatpush1.bf16.msra.mxu0 %v15164_v36  ;;  %10933 = vmatprep.subr.bf16.mxu1 %v15187_v0  ;;  %v4433_v36 = vld [vmem:[%s18818_s5] sm:$0xff]  ;;  %v14136_v0 = vcombine.low %v3358_v43, %v3370_v20  ;;  %v3442_v31 = vld [vmem:[#allocation5 + $0x508] sm:$0xff] }
 0x4f3   : > { %11152 = vmatprep.subr.bf16.mxu0 %v15189_v5  ;;  %v14159_v5 = vcombine.high %v3381_v59, %v3393_v7  ;;  %v18016_v62 = vrot.slane %v4433_v36, %v18910_v14  ;;  %v18019_v48 = vrot.slane %v4433_v36, %v18911_v42 }
 0x4f5   : > { %10934 = vmatpush1.bf16.msra.mxu1 %v15186_v41  ;;  %v18013_v41 = vrot.slane %v4433_v36, %v18909_v45 }
 0x4f6   : > { %11153 = vmatpush1.bf16.msra.mxu0 %v15188_v54  ;;  %11195 = vmatprep.subr.bf16.mxu1 %v14063_v57  ;;  %v3406_v54 = vld [vmem:[#allocation5 + $0x3e8] sm:$0xff] }
 0x4f7   : > { %11414 = vmatprep.subr.bf16.mxu0 %v14065_v3  ;;  %v3418_v57 = vld [vmem:[#allocation5 + $0x448] sm:$0xff]  ;;  %v14158_v3 = vcombine.low %v3381_v59, %v3393_v7 }
 0x4f8   : > { %10936 = vmatmul.mubr.bf16.vlgmr.msra.gmra.mrb[48].mxu1 %v17798_v4  ;;  %v14185_v63 = vcombine.high %v3406_v54, %v3418_v57 }
 0x4f9   : > { %11155 = vmatmul.mubr.bf16.vlgmr.msra.gmra.mrb[48].mxu0 %v17798_v4  ;;  %10945 = vmatprep.mubr.bf16.mxu1 %v17833_v60 }
 0x4fa   : > { %11164 = vmatprep.mubr.bf16.mxu0 %v17833_v60  ;;  %11196 = vmatpush1.bf16.msra.mxu1 %v14062_v47  ;;  %v14160_v47 = vcombine.low %v3382_v21, %v3394_v32  ;;  %v14207_v32 = vcombine.high %v18029_v16, %v3441_v24 }
 0x4fb   : > { %11415 = vmatpush1.bf16.msra.mxu0 %v14064_v11  ;;  %11197 = vmatprep.subr.bf16.mxu1 %v14087_v33  ;;  %v18912_v11 = vld [vmem:[#allocation17_spill] sm:$0xff] }
 0x4fc   : > { %11416 = vmatprep.subr.bf16.mxu0 %v14089_v52  ;;  %v18026_v33 = vrot.slane %v4433_v36, %v18912_v11  ;;  %v14183_v52 = vcombine.high %v3405_v28, %v3417_v61 }
 0x4fe   : > { %11198 = vmatpush1.bf16.msra.mxu1 %v14086_v29 }
 0x4ff   : > { %11417 = vmatpush1.bf16.msra.mxu0 %v14088_v58  ;;  %11199 = vmatprep.subr.bf16.mxu1 %v14111_v55 }
 0x500   : > { %10946 = vmatmul.mubr.bf16.gmra.mrb[52].mxu1 %v17852_v18  ;;  %11418 = vmatprep.subr.bf16.mxu0 %v14113_v53  ;;  %v14182_v53 = vcombine.low %v3405_v28, %v3417_v61  ;;  %v3453_v28 = vld [vmem:[#allocation5 + $0x560] sm:$0xff] }
 0x501   : > { %11165 = vmatmul.mubr.bf16.gmra.mrb[52].mxu0 %v17852_v18  ;;  %10955 = vmatprep.mubr.bf16.mxu1 %v17887_v44  ;;  %v3465_v61 = vld [vmem:[#allocation5 + $0x5c0] sm:$0xff] }
 0x502   : > { %11174 = vmatprep.mubr.bf16.mxu0 %v17887_v44  ;;  %11200 = vmatpush1.bf16.msra.mxu1 %v14110_v56 }
 0x503   : > { %11419 = vmatpush1.bf16.msra.mxu0 %v14112_v26  ;;  %11201 = vmatprep.subr.bf16.mxu1 %v14135_v12  ;;  %v14184_v26 = vcombine.low %v3406_v54, %v3418_v57 }
 0x504   : > { %11420 = vmatprep.subr.bf16.mxu0 %v14137_v40 }
 0x506   : > { %11202 = vmatpush1.bf16.msra.mxu1 %v14134_v1 }
 0x507   : > { %11421 = vmatpush1.bf16.msra.mxu0 %v14136_v0  ;;  %11203 = vmatprep.subr.bf16.mxu1 %v14159_v5 }
 0x508   : > { %10956 = vmatmul.mubr.bf16.gmra.mrb[56].mxu1 %v17906_v17  ;;  %11422 = vmatprep.subr.bf16.mxu0 %v14161_v46  ;;  %v10499_v8 = vpop.f32.mrb[32].mxu1  ;;  %v14209_v46 = vcombine.high %v3430_v51, %v3442_v31 }
 0x509   : > { %11175 = vmatmul.mubr.bf16.gmra.mrb[56].mxu0 %v17906_v17  ;;  %10965 = vmatprep.mubr.bf16.mxu1 %v17928_v2  ;;  %v15499_v29 = vadd.f32 %v10499_v8, %v18013_v41  ;;  %v10718_v58 = vpop.f32.mrb[32].mxu0  ;;  %v10501_v55 = vpop.f32.mrb[33].mxu1  ;;  %v14206_v8 = vcombine.low %v18029_v16, %v3441_v24 }
 0x50a   : > { %11184 = vmatprep.mubr.bf16.mxu0 %v17928_v2  ;;  %11204 = vmatpush1.bf16.msra.mxu1 %v14158_v3  ;;  %v15515_v43 = vadd.f32 %v10718_v58, %v18016_v62  ;;  %v15500_v20 = vadd.f32 %v10501_v55, %v18019_v48  ;;  %v10720_v56 = vpop.f32.mrb[33].mxu0  ;;  %v10503_v12 = vpop.f32.mrb[34].mxu1  ;;  %v3454_v3 = vld [vmem:[#allocation5 + $0x568] sm:$0xff]  ;;  %v14231_v58 = vcombine.high %v3453_v28, %v3465_v61 }
 0x50b   : > { %11423 = vmatpush1.bf16.msra.mxu0 %v14160_v47  ;;  %v15516_v40 = vadd.f32 %v10720_v56, %v18026_v33  ;;  %11205 = vmatprep.subr.bf16.mxu1 %v14183_v52  ;;  %v15501_v59 = vadd.f32 %v10503_v12, %v18013_v41  ;;  %v10722_v7 = vpop.f32.mrb[34].mxu0  ;;  %v10505_v21 = vpop.f32.mrb[35].mxu1  ;;  %v3466_v47 = vld [vmem:[#allocation5 + $0x5c8] sm:$0xff]  ;;  %v3489_v56 = vld [vmem:[#allocation5 + $0x680] sm:$0xff] }
 0x50c   : > { %v15307_v1 = vpack.c.bf16 %v15500_v20, %v15499_v29  ;;  %11424 = vmatprep.subr.bf16.mxu0 %v14185_v63  ;;  %v15517_v36 = vadd.f32 %v10722_v7, %v18016_v62  ;;  %v15502_v0 = vadd.f32 %v10505_v21, %v18019_v48  ;;  %v10724_v5 = vpop.f32.mrb[35].mxu0  ;;  %v14208_v29 = vcombine.low %v3430_v51, %v3442_v31  ;;  %v3477_v20 = vld [vmem:[#allocation5 + $0x620] sm:$0xff]  ;;  %v3478_v51 = vld [vmem:[#allocation5 + $0x628] sm:$0xff] }
 0x50d   : > { %v15308_v54 = vpack.c.bf16 %v15516_v40, %v15515_v43  ;;  %v15518_v57 = vadd.f32 %v10724_v5, %v18026_v33  ;;  %v14233_v43 = vcombine.high %v3454_v3, %v3466_v47  ;;  %v3490_v31 = vld [vmem:[#allocation5 + $0x688] sm:$0xff]  ;;  %v14232_v7 = vcombine.low %v3454_v3, %v3466_v47  ;;  %v3501_v3 = vld [vmem:[#allocation5 + $0x6e0] sm:$0xff] }
 0x50e   : > { %13523 = vst [vmem:[%s18044_s9] sm:$0xff] %v15307_v1  ;;  %11206 = vmatpush1.bf16.msra.mxu1 %v14182_v53  ;;  %v15319_v52 = vpack.c.bf16 %v15502_v0, %v15501_v59  ;;  %v14255_v5 = vcombine.high %v3477_v20, %v3489_v56  ;;  %v3513_v47 = vld [vmem:[#allocation5 + $0x740] sm:$0xff] }
 0x50f   : > { %13524 = vst [vmem:[%s18044_s9 + $0x8] sm:$0xff] %v15308_v54  ;;  %11425 = vmatpush1.bf16.msra.mxu0 %v14184_v26  ;;  %v15320_v63 = vpack.c.bf16 %v15518_v57, %v15517_v36  ;;  %11207 = vmatprep.subr.bf16.mxu1 %v14207_v32  ;;  %v14230_v26 = vcombine.low %v3453_v28, %v3465_v61 }
 0x510   : > { %13535 = vst [vmem:[%s18044_s9 + $0x60] sm:$0xff] %v15319_v52  ;;  %10966 = vmatmul.mubr.bf16.gmra.mrb[60].mxu1 %v17932_v37  ;;  %11426 = vmatprep.subr.bf16.mxu0 %v14209_v46  ;;  %v10509_v55 = vpop.f32.mrb[36].mxu1  ;;  %v14257_v57 = vcombine.high %v3478_v51, %v3490_v31 }
 0x511   : > { %13536 = vst [vmem:[%s18044_s9 + $0x68] sm:$0xff] %v15320_v63  ;;  %11185 = vmatmul.mubr.bf16.gmra.mrb[60].mxu0 %v17932_v37  ;;  %11227 = vmatprep.mubr.bf16.mxu1 %v17762_v39  ;;  %v15503_v16 = vadd.f32 %v10509_v55, %v18013_v41  ;;  %v10728_v24 = vpop.f32.mrb[36].mxu0  ;;  %v10511_v53 = vpop.f32.mrb[37].mxu1  ;;  %v3502_v63 = vld [vmem:[#allocation5 + $0x6e8] sm:$0xff]  ;;  %v14254_v55 = vcombine.low %v3477_v20, %v3489_v56 }
 0x512   : > { %11208 = vmatpush1.bf16.msra.mxu1 %v14206_v8  ;;  %11446 = vmatprep.mubr.bf16.mxu0 %v17762_v39  ;;  %v15519_v12 = vadd.f32 %v10728_v24, %v18016_v62  ;;  %v15504_v40 = vadd.f32 %v10511_v53, %v18019_v48  ;;  %v10730_v59 = vpop.f32.mrb[37].mxu0  ;;  %v10513_v21 = vpop.f32.mrb[38].mxu1  ;;  %v14279_v24 = vcombine.high %v3501_v3, %v3513_v47 }
 0x513   : > { %11427 = vmatpush1.bf16.msra.mxu0 %v14208_v29  ;;  %v15520_v32 = vadd.f32 %v10730_v59, %v18026_v33  ;;  %11209 = vmatprep.subr.bf16.mxu1 %v14231_v58  ;;  %v15505_v1 = vadd.f32 %v10513_v21, %v18013_v41  ;;  %v10732_v36 = vpop.f32.mrb[38].mxu0  ;;  %v10515_v0 = vpop.f32.mrb[39].mxu1  ;;  %v3514_v29 = vld [vmem:[#allocation5 + $0x748] sm:$0xff]  ;;  %v3537_v59 = vld [vmem:[#allocation5 + $0x800] sm:$0xff] }
 0x514   : > { %v15331_v46 = vpack.c.bf16 %v15504_v40, %v15503_v16  ;;  %11428 = vmatprep.subr.bf16.mxu0 %v14233_v43  ;;  %v15521_v28 = vadd.f32 %v10732_v36, %v18016_v62  ;;  %v15506_v61 = vadd.f32 %v10515_v0, %v18019_v48  ;;  %v10734_v54 = vpop.f32.mrb[39].mxu0  ;;  %v14256_v16 = vcombine.low %v3478_v51, %v3490_v31 }
 0x515   : > { %v15332_v52 = vpack.c.bf16 %v15520_v32, %v15519_v12  ;;  %v15522_v8 = vadd.f32 %v10734_v54, %v18026_v33  ;;  %v14281_v40 = vcombine.high %v3502_v63, %v3514_v29  ;;  %v3525_v12 = vld [vmem:[#allocation5 + $0x7a0] sm:$0xff]  ;;  %v14278_v31 = vcombine.low %v3501_v3, %v3513_v47 }
 0x516   : > { %13547 = vst [vmem:[%s18044_s9 + $0xc0] sm:$0xff] %v15331_v46  ;;  %11210 = vmatpush1.bf16.msra.mxu1 %v14230_v26  ;;  %v15343_v58 = vpack.c.bf16 %v15506_v61, %v15505_v1  ;;  %v3526_v26 = vld [vmem:[#allocation5 + $0x7a8] sm:$0xff]  ;;  %v14303_v54 = vcombine.high %v3525_v12, %v3537_v59 }
 0x517   : > { %13548 = vst [vmem:[%s18044_s9 + $0xc8] sm:$0xff] %v15332_v52  ;;  %11429 = vmatpush1.bf16.msra.mxu0 %v14232_v7  ;;  %v15344_v43 = vpack.c.bf16 %v15522_v8, %v15521_v28  ;;  %11211 = vmatprep.subr.bf16.mxu1 %v14255_v5  ;;  %v3538_v1 = vld [vmem:[#allocation5 + $0x808] sm:$0xff]  ;;  %v14280_v7 = vcombine.low %v3502_v63, %v3514_v29  ;;  %v3549_v63 = vld [vmem:[#allocation5 + $0x860] sm:$0xff] }
 0x518   : > { %13559 = vst [vmem:[%s18044_s9 + $0x120] sm:$0xff] %v15343_v58  ;;  %11430 = vmatprep.subr.bf16.mxu0 %v14257_v57  ;;  %v10519_v53 = vpop.f32.mrb[40].mxu1  ;;  %v14305_v47 = vcombine.high %v3526_v26, %v3538_v1  ;;  %v3561_v29 = vld [vmem:[#allocation5 + $0x8c0] sm:$0xff] }
 0x519   : > { %13560 = vst [vmem:[%s18044_s9 + $0x128] sm:$0xff] %v15344_v43  ;;  %v15507_v21 = vadd.f32 %v10519_v53, %v18013_v41  ;;  %v10738_v32 = vpop.f32.mrb[40].mxu0  ;;  %v10521_v36 = vpop.f32.mrb[41].mxu1  ;;  %v3550_v43 = vld [vmem:[#allocation5 + $0x868] sm:$0xff]  ;;  %v14302_v53 = vcombine.low %v3525_v12, %v3537_v59 }
 0x51a   : > { %11212 = vmatpush1.bf16.msra.mxu1 %v14254_v55  ;;  %v15523_v20 = vadd.f32 %v10738_v32, %v18016_v62  ;;  %v15508_v56 = vadd.f32 %v10521_v36, %v18019_v48  ;;  %v10740_v51 = vpop.f32.mrb[41].mxu0  ;;  %v10523_v0 = vpop.f32.mrb[42].mxu1  ;;  %v14327_v32 = vcombine.high %v3549_v63, %v3561_v29 }
 0x51b   : > { %11431 = vmatpush1.bf16.msra.mxu0 %v14256_v16  ;;  %v15524_v5 = vadd.f32 %v10740_v51, %v18026_v33  ;;  %11213 = vmatprep.subr.bf16.mxu1 %v14279_v24  ;;  %v15509_v46 = vadd.f32 %v10523_v0, %v18013_v41  ;;  %v10742_v28 = vpop.f32.mrb[42].mxu0  ;;  %v10525_v61 = vpop.f32.mrb[43].mxu1  ;;  %v3562_v16 = vld [vmem:[#allocation5 + $0x8c8] sm:$0xff]  ;;  %v3585_v51 = vld [vmem:[#allocation5 + $0x980] sm:$0xff] }
 0x51c   : > { %v15355_v57 = vpack.c.bf16 %v15508_v56, %v15507_v21  ;;  %11432 = vmatprep.subr.bf16.mxu0 %v14281_v40  ;;  %v15525_v52 = vadd.f32 %v10742_v28, %v18016_v62  ;;  %v15510_v8 = vadd.f32 %v10525_v61, %v18019_v48  ;;  %v10744_v3 = vpop.f32.mrb[43].mxu0  ;;  %v14304_v21 = vcombine.low %v3526_v26, %v3538_v1 }
 0x51d   : > { %v15356_v58 = vpack.c.bf16 %v15524_v5, %v15523_v20  ;;  %v15526_v55 = vadd.f32 %v10744_v3, %v18026_v33  ;;  %v14329_v56 = vcombine.high %v3550_v43, %v3562_v16  ;;  %v3573_v20 = vld [vmem:[#allocation5 + $0x920] sm:$0xff]  ;;  %v14326_v1 = vcombine.low %v3549_v63, %v3561_v29 }
 0x51e   : > { %13571 = vst [vmem:[%s18044_s9 + $0x180] sm:$0xff] %v15355_v57  ;;  %11214 = vmatpush1.bf16.msra.mxu1 %v14278_v31  ;;  %v15367_v24 = vpack.c.bf16 %v15510_v8, %v15509_v46  ;;  %v3574_v31 = vld [vmem:[#allocation5 + $0x928] sm:$0xff]  ;;  %v14351_v3 = vcombine.high %v3573_v20, %v3585_v51 }
 0x51f   : > { %13572 = vst [vmem:[%s18044_s9 + $0x188] sm:$0xff] %v15356_v58  ;;  %11433 = vmatpush1.bf16.msra.mxu0 %v14280_v7  ;;  %v15368_v40 = vpack.c.bf16 %v15526_v55, %v15525_v52  ;;  %11215 = vmatprep.subr.bf16.mxu1 %v14303_v54  ;;  %v3586_v46 = vld [vmem:[#allocation5 + $0x988] sm:$0xff]  ;;  %v14328_v7 = vcombine.low %v3550_v43, %v3562_v16  ;;  %v3597_v43 = vld [vmem:[#allocation5 + $0x9e0] sm:$0xff] }
 0x520   : > { %13583 = vst [vmem:[%s18044_s9 + $0x1e0] sm:$0xff] %v15367_v24  ;;  %11434 = vmatprep.subr.bf16.mxu0 %v14305_v47  ;;  %v10529_v36 = vpop.f32.mrb[44].mxu1  ;;  %v14353_v29 = vcombine.high %v3574_v31, %v3586_v46  ;;  %v3609_v16 = vld [vmem:[#allocation5 + $0xa40] sm:$0xff] }
 0x521   : > { %13584 = vst [vmem:[%s18044_s9 + $0x1e8] sm:$0xff] %v15368_v40  ;;  %v15511_v0 = vadd.f32 %v10529_v36, %v18013_v41  ;;  %v10748_v5 = vpop.f32.mrb[44].mxu0  ;;  %v10531_v28 = vpop.f32.mrb[45].mxu1  ;;  %v3610_v40 = vld [vmem:[#allocation5 + $0xa48] sm:$0xff]  ;;  %v14375_v36 = vcombine.high %v3597_v43, %v3609_v16 }
 0x522   : > { %11216 = vmatpush1.bf16.msra.mxu1 %v14302_v53  ;;  %v15527_v12 = vadd.f32 %v10748_v5, %v18016_v62  ;;  %v15512_v59 = vadd.f32 %v10531_v28, %v18019_v48  ;;  %v10750_v26 = vpop.f32.mrb[45].mxu0  ;;  %v10533_v61 = vpop.f32.mrb[46].mxu1  ;;  %v3633_v5 = vld [vmem:[#allocation5 + $0xb00] sm:$0xff]  ;;  %v3634_v28 = vld [vmem:[#allocation5 + $0xb08] sm:$0xff] }
 0x523   : > { %11435 = vmatpush1.bf16.msra.mxu0 %v14304_v21  ;;  %v15528_v54 = vadd.f32 %v10750_v26, %v18026_v33  ;;  %11217 = vmatprep.subr.bf16.mxu1 %v14327_v32  ;;  %v15513_v57 = vadd.f32 %v10533_v61, %v18013_v41  ;;  %v10752_v52 = vpop.f32.mrb[46].mxu0  ;;  %v10535_v8 = vpop.f32.mrb[47].mxu1  ;;  %v3598_v41 = vld [vmem:[#allocation5 + $0x9e8] sm:$0xff]  ;;  %v14350_v32 = vcombine.low %v3573_v20, %v3585_v51  ;;  %v3645_v26 = vld [vmem:[#allocation5 + $0xb60] sm:$0xff] }
 0x524   : > { %v15379_v47 = vpack.c.bf16 %v15512_v59, %v15511_v0  ;;  %11436 = vmatprep.subr.bf16.mxu0 %v14329_v56  ;;  %v15529_v58 = vadd.f32 %v10752_v52, %v18016_v62  ;;  %v15514_v55 = vadd.f32 %v10535_v8, %v18019_v48  ;;  %v10754_v63 = vpop.f32.mrb[47].mxu0  ;;  %v14352_v48 = vcombine.low %v3574_v31, %v3586_v46  ;;  %v3621_v0 = vld [vmem:[#allocation5 + $0xaa0] sm:$0xff]  ;;  %v3646_v31 = vld [vmem:[#allocation5 + $0xb68] sm:$0xff] }
 0x525   : > { %v15380_v24 = vpack.c.bf16 %v15528_v54, %v15527_v12  ;;  %v15530_v53 = vadd.f32 %v10754_v63, %v18026_v33  ;;  %v14377_v56 = vcombine.high %v3598_v41, %v3610_v40  ;;  %v3622_v33 = vld [vmem:[#allocation5 + $0xaa8] sm:$0xff]  ;;  %v14374_v12 = vcombine.low %v3597_v43, %v3609_v16  ;;  %v3669_v52 = vld [vmem:[#allocation5 + $0xc20] sm:$0xff] }
 0x526   : > { %13595 = vst [vmem:[%s18044_s9 + $0x240] sm:$0xff] %v15379_v47  ;;  %11218 = vmatpush1.bf16.msra.mxu1 %v14326_v1  ;;  %v15391_v21 = vpack.c.bf16 %v15514_v55, %v15513_v57  ;;  %v14376_v59 = vcombine.low %v3598_v41, %v3610_v40  ;;  %v14399_v20 = vcombine.high %v3621_v0, %v3633_v5  ;;  %v3657_v1 = vld [vmem:[#allocation5 + $0xbc0] sm:$0xff]  ;;  %v3658_v46 = vld [vmem:[#allocation5 + $0xbc8] sm:$0xff] }
 0x527   : > { %13596 = vst [vmem:[%s18044_s9 + $0x248] sm:$0xff] %v15380_v24  ;;  %11437 = vmatpush1.bf16.msra.mxu0 %v14328_v7  ;;  %v15392_v62 = vpack.c.bf16 %v15530_v53, %v15529_v58  ;;  %11219 = vmatprep.subr.bf16.mxu1 %v14351_v3  ;;  %v14401_v51 = vcombine.high %v3622_v33, %v3634_v28  ;;  %v3681_v8 = vld [vmem:[#allocation5 + $0xc80] sm:$0xff]  ;;  %v3670_v3 = vld [vmem:[#allocation5 + $0xc28] sm:$0xff] }
 0x528   : > { %13607 = vst [vmem:[%s18044_s9 + $0x2a0] sm:$0xff] %v15391_v21  ;;  %11438 = vmatprep.subr.bf16.mxu0 %v14353_v29  ;;  %v14398_v7 = vcombine.low %v3621_v0, %v3633_v5  ;;  %v14400_v61 = vcombine.low %v3622_v33, %v3634_v28  ;;  %v14423_v54 = vcombine.high %v3645_v26, %v3657_v1  ;;  %v3682_v47 = vld [vmem:[#allocation5 + $0xc88] sm:$0xff]  ;;  %v3693_v43 = vld [vmem:[#allocation5 + $0xce0] sm:$0xff] }
 0x529   : > { %13608 = vst [vmem:[%s18044_s9 + $0x2a8] sm:$0xff] %v15392_v62  ;;  %v14425_v57 = vcombine.high %v3646_v31, %v3658_v46  ;;  %v14422_v58 = vcombine.low %v3645_v26, %v3657_v1  ;;  %v14424_v55 = vcombine.low %v3646_v31, %v3658_v46  ;;  %v14447_v63 = vcombine.high %v3669_v52, %v3681_v8  ;;  %v3705_v16 = vld [vmem:[#allocation5 + $0xd40] sm:$0xff]  ;;  %v3694_v24 = vld [vmem:[#allocation5 + $0xce8] sm:$0xff] }
 0x52a   : > { %11220 = vmatpush1.bf16.msra.mxu1 %v14350_v32  ;;  %v14449_v29 = vcombine.high %v3670_v3, %v3682_v47  ;;  %v3706_v53 = vld [vmem:[#allocation5 + $0xd48] sm:$0xff]  ;;  %v14446_v41 = vcombine.low %v3669_v52, %v3681_v8  ;;  %v14448_v40 = vcombine.low %v3670_v3, %v3682_v47  ;;  %v14471_v21 = vcombine.high %v3693_v43, %v3705_v16  ;;  %v3717_v62 = vld [vmem:[#allocation5 + $0xda0] sm:$0xff] }
 0x52b   : > { %11439 = vmatpush1.bf16.msra.mxu0 %v14352_v48  ;;  %11221 = vmatprep.subr.bf16.mxu1 %v14375_v36  ;;  %v14473_v32 = vcombine.high %v3694_v24, %v3706_v53  ;;  %v3729_v48 = vld [vmem:[#allocation5 + $0xe00] sm:$0xff]  ;;  %v3718_v36 = vld [vmem:[#allocation5 + $0xda8] sm:$0xff]  ;;  %v14470_v0 = vcombine.low %v3693_v43, %v3705_v16  ;;  %v14472_v5 = vcombine.low %v3694_v24, %v3706_v53 }
 0x52c   : > { %11440 = vmatprep.subr.bf16.mxu0 %v14377_v56  ;;  %v3730_v56 = vld [vmem:[#allocation5 + $0xe08] sm:$0xff]  ;;  %v14495_v33 = vcombine.high %v3717_v62, %v3729_v48  ;;  %v14494_v26 = vcombine.low %v3717_v62, %v3729_v48 }
 0x52d   : > { %v14497_v28 = vcombine.high %v3718_v36, %v3730_v56  ;;  %v14496_v1 = vcombine.low %v3718_v36, %v3730_v56 }
 0x52e   : > { %11222 = vmatpush1.bf16.msra.mxu1 %v14374_v12  ;;  %v3741_v12 = vld [vmem:[#allocation5 + $0xe60] sm:$0xff] }
 0x52f   : > { %11441 = vmatpush1.bf16.msra.mxu0 %v14376_v59  ;;  %11223 = vmatprep.subr.bf16.mxu1 %v14399_v20  ;;  %v3753_v59 = vld [vmem:[#allocation5 + $0xec0] sm:$0xff]  ;;  %v3742_v20 = vld [vmem:[#allocation5 + $0xe68] sm:$0xff] }
 0x530   : > { %11442 = vmatprep.subr.bf16.mxu0 %v14401_v51  ;;  %v3754_v51 = vld [vmem:[#allocation5 + $0xec8] sm:$0xff]  ;;  %v14519_v31 = vcombine.high %v3741_v12, %v3753_v59  ;;  %v14518_v52 = vcombine.low %v3741_v12, %v3753_v59 }
 0x531   : > { %v14521_v46 = vcombine.high %v3742_v20, %v3754_v51  ;;  %v14520_v8 = vcombine.low %v3742_v20, %v3754_v51 }
 0x532   : > { %11224 = vmatpush1.bf16.msra.mxu1 %v14398_v7  ;;  %v3765_v7 = vld [vmem:[#allocation5 + $0xf20] sm:$0xff] }
 0x533   : > { %11443 = vmatpush1.bf16.msra.mxu0 %v14400_v61  ;;  %11225 = vmatprep.subr.bf16.mxu1 %v14423_v54  ;;  %v3777_v61 = vld [vmem:[#allocation5 + $0xf80] sm:$0xff]  ;;  %v3766_v54 = vld [vmem:[#allocation5 + $0xf28] sm:$0xff] }
 0x534   : > { %11444 = vmatprep.subr.bf16.mxu0 %v14425_v57  ;;  %v3778_v57 = vld [vmem:[#allocation5 + $0xf88] sm:$0xff]  ;;  %v14543_v3 = vcombine.high %v3765_v7, %v3777_v61  ;;  %v14542_v43 = vcombine.low %v3765_v7, %v3777_v61 }
 0x535   : > { %v14545_v47 = vcombine.high %v3766_v54, %v3778_v57  ;;  %v14544_v16 = vcombine.low %v3766_v54, %v3778_v57 }
 0x536   : > { %11226 = vmatpush1.bf16.msra.mxu1 %v14422_v58  ;;  %v3789_v58 = vld [vmem:[#allocation5 + $0xfe0] sm:$0xff] }
 0x537   : > { %11445 = vmatpush1.bf16.msra.mxu0 %v14424_v55  ;;  %11268 = vmatprep.subr.bf16.mxu1 %v14447_v63  ;;  %v3801_v55 = vld [vmem:[#allocation5 + $0x1040] sm:$0xff]  ;;  %v3790_v63 = vld [vmem:[#allocation5 + $0xfe8] sm:$0xff] }
 0x538   : > { %11487 = vmatprep.subr.bf16.mxu0 %v14449_v29  ;;  %v3802_v29 = vld [vmem:[#allocation5 + $0x1048] sm:$0xff]  ;;  %v14567_v24 = vcombine.high %v3789_v58, %v3801_v55  ;;  %v14566_v62 = vcombine.low %v3789_v58, %v3801_v55 }
 0x539   : > { %11228 = vmatmul.mubr.bf16.vlgmr.msra.gmra.mrb[64].mxu1 %v17764_v38  ;;  %v14569_v53 = vcombine.high %v3790_v63, %v3802_v29  ;;  %v14568_v48 = vcombine.low %v3790_v63, %v3802_v29 }
 0x53a   : > { %11447 = vmatmul.mubr.bf16.vlgmr.msra.gmra.mrb[64].mxu0 %v17764_v38  ;;  %11237 = vmatprep.mubr.bf16.mxu1 %v17808_v49 }
 0x53b   : > { %11269 = vmatpush1.bf16.msra.mxu1 %v14446_v41  ;;  %11456 = vmatprep.mubr.bf16.mxu0 %v17808_v49  ;;  %v3813_v41 = vld [vmem:[#allocation5 + $0x10a0] sm:$0xff] }
 0x53c   : > { %11488 = vmatpush1.bf16.msra.mxu0 %v14448_v40  ;;  %11270 = vmatprep.subr.bf16.mxu1 %v14471_v21  ;;  %v3825_v40 = vld [vmem:[#allocation5 + $0x1100] sm:$0xff]  ;;  %v3814_v21 = vld [vmem:[#allocation5 + $0x10a8] sm:$0xff] }
 0x53d   : > { %11489 = vmatprep.subr.bf16.mxu0 %v14473_v32  ;;  %v3826_v32 = vld [vmem:[#allocation5 + $0x1108] sm:$0xff]  ;;  %v14591_v36 = vcombine.high %v3813_v41, %v3825_v40  ;;  %v14590_v12 = vcombine.low %v3813_v41, %v3825_v40 }
 0x53e   : > { %v14593_v56 = vcombine.high %v3814_v21, %v3826_v32  ;;  %v14592_v59 = vcombine.low %v3814_v21, %v3826_v32 }
 0x53f   : > { %11271 = vmatpush1.bf16.msra.mxu1 %v14470_v0  ;;  %v3837_v0 = vld [vmem:[#allocation5 + $0x1160] sm:$0xff] }
 0x540   : > { %11490 = vmatpush1.bf16.msra.mxu0 %v14472_v5  ;;  %11272 = vmatprep.subr.bf16.mxu1 %v14495_v33  ;;  %v3849_v5 = vld [vmem:[#allocation5 + $0x11c0] sm:$0xff]  ;;  %v3838_v33 = vld [vmem:[#allocation5 + $0x1168] sm:$0xff] }
 0x541   : > { %11238 = vmatmul.mubr.bf16.gmra.mrb[68].mxu1 %v17810_v27  ;;  %11491 = vmatprep.subr.bf16.mxu0 %v14497_v28  ;;  %v3850_v28 = vld [vmem:[#allocation5 + $0x11c8] sm:$0xff]  ;;  %v14615_v20 = vcombine.high %v3837_v0, %v3849_v5  ;;  %v14614_v7 = vcombine.low %v3837_v0, %v3849_v5 }
 0x542   : > { %11457 = vmatmul.mubr.bf16.gmra.mrb[68].mxu0 %v17810_v27  ;;  %11247 = vmatprep.mubr.bf16.mxu1 %v17854_v30  ;;  %v14617_v51 = vcombine.high %v3838_v33, %v3850_v28  ;;  %v14616_v61 = vcombine.low %v3838_v33, %v3850_v28 }
 0x543   : > { %11273 = vmatpush1.bf16.msra.mxu1 %v14494_v26  ;;  %11466 = vmatprep.mubr.bf16.mxu0 %v17854_v30  ;;  %v3861_v26 = vld [vmem:[#allocation5 + $0x1220] sm:$0xff] }
 0x544   : > { %11492 = vmatpush1.bf16.msra.mxu0 %v14496_v1  ;;  %11274 = vmatprep.subr.bf16.mxu1 %v14519_v31  ;;  %v3873_v1 = vld [vmem:[#allocation5 + $0x1280] sm:$0xff]  ;;  %v3862_v31 = vld [vmem:[#allocation5 + $0x1228] sm:$0xff] }
 0x545   : > { %11493 = vmatprep.subr.bf16.mxu0 %v14521_v46  ;;  %v3874_v46 = vld [vmem:[#allocation5 + $0x1288] sm:$0xff]  ;;  %v14639_v54 = vcombine.high %v3861_v26, %v3873_v1  ;;  %v14638_v58 = vcombine.low %v3861_v26, %v3873_v1 }
 0x546   : > { %v14641_v57 = vcombine.high %v3862_v31, %v3874_v46  ;;  %v14640_v55 = vcombine.low %v3862_v31, %v3874_v46 }
 0x547   : > { %11275 = vmatpush1.bf16.msra.mxu1 %v14518_v52  ;;  %v3885_v52 = vld [vmem:[#allocation5 + $0x12e0] sm:$0xff] }
 0x548   : > { %11494 = vmatpush1.bf16.msra.mxu0 %v14520_v8  ;;  %11276 = vmatprep.subr.bf16.mxu1 %v14543_v3  ;;  %v3897_v8 = vld [vmem:[#allocation5 + $0x1340] sm:$0xff]  ;;  %v3886_v3 = vld [vmem:[#allocation5 + $0x12e8] sm:$0xff] }
 0x549   : > { %11248 = vmatmul.mubr.bf16.gmra.mrb[72].mxu1 %v17862_v34  ;;  %11495 = vmatprep.subr.bf16.mxu0 %v14545_v47  ;;  %v3898_v47 = vld [vmem:[#allocation5 + $0x1348] sm:$0xff]  ;;  %v14663_v63 = vcombine.high %v3885_v52, %v3897_v8  ;;  %v14662_v41 = vcombine.low %v3885_v52, %v3897_v8 }
 0x54a   : > { %11467 = vmatmul.mubr.bf16.gmra.mrb[72].mxu0 %v17862_v34  ;;  %11257 = vmatprep.mubr.bf16.mxu1 %v17908_v22  ;;  %v14665_v29 = vcombine.high %v3886_v3, %v3898_v47  ;;  %v14664_v40 = vcombine.low %v3886_v3, %v3898_v47 }
 0x54b   : > { %11277 = vmatpush1.bf16.msra.mxu1 %v14542_v43  ;;  %11476 = vmatprep.mubr.bf16.mxu0 %v17908_v22  ;;  %v3909_v43 = vld [vmem:[#allocation5 + $0x13a0] sm:$0xff] }
 0x54c   : > { %11496 = vmatpush1.bf16.msra.mxu0 %v14544_v16  ;;  %11278 = vmatprep.subr.bf16.mxu1 %v14567_v24  ;;  %v3921_v16 = vld [vmem:[#allocation5 + $0x1400] sm:$0xff]  ;;  %v3910_v24 = vld [vmem:[#allocation5 + $0x13a8] sm:$0xff] }
 0x54d   : > { %11497 = vmatprep.subr.bf16.mxu0 %v14569_v53  ;;  %v3922_v53 = vld [vmem:[#allocation5 + $0x1408] sm:$0xff]  ;;  %v14687_v21 = vcombine.high %v3909_v43, %v3921_v16  ;;  %v14686_v0 = vcombine.low %v3909_v43, %v3921_v16 }
 0x54e   : > { %v14689_v32 = vcombine.high %v3910_v24, %v3922_v53  ;;  %v14688_v5 = vcombine.low %v3910_v24, %v3922_v53 }
 0x54f   : > { %11279 = vmatpush1.bf16.msra.mxu1 %v14566_v62  ;;  %v3933_v62 = vld [vmem:[#allocation5 + $0x1460] sm:$0xff] }
 0x550   : > { %11498 = vmatpush1.bf16.msra.mxu0 %v14568_v48  ;;  %11280 = vmatprep.subr.bf16.mxu1 %v14591_v36  ;;  %v3945_v48 = vld [vmem:[#allocation5 + $0x14c0] sm:$0xff]  ;;  %v3934_v36 = vld [vmem:[#allocation5 + $0x1468] sm:$0xff] }
 0x551   : > { %11258 = vmatmul.mubr.bf16.gmra.mrb[76].mxu1 %v17914_v50  ;;  %11499 = vmatprep.subr.bf16.mxu0 %v14593_v56  ;;  %v3946_v56 = vld [vmem:[#allocation5 + $0x14c8] sm:$0xff]  ;;  %v14711_v33 = vcombine.high %v3933_v62, %v3945_v48  ;;  %v14710_v26 = vcombine.low %v3933_v62, %v3945_v48 }
 0x552   : > { %11477 = vmatmul.mubr.bf16.gmra.mrb[76].mxu0 %v17914_v50  ;;  %11300 = vmatprep.mubr.bf16.mxu1 %v17926_v15  ;;  %v14713_v28 = vcombine.high %v3934_v36, %v3946_v56  ;;  %v14712_v1 = vcombine.low %v3934_v36, %v3946_v56 }
 0x553   : > { %11281 = vmatpush1.bf16.msra.mxu1 %v14590_v12  ;;  %11519 = vmatprep.mubr.bf16.mxu0 %v17926_v15  ;;  %v3957_v12 = vld [vmem:[#allocation5 + $0x1520] sm:$0xff] }
 0x554   : > { %11500 = vmatpush1.bf16.msra.mxu0 %v14592_v59  ;;  %11282 = vmatprep.subr.bf16.mxu1 %v14615_v20  ;;  %v3969_v59 = vld [vmem:[#allocation5 + $0x1580] sm:$0xff]  ;;  %v3958_v20 = vld [vmem:[#allocation5 + $0x1528] sm:$0xff] }
 0x555   : > { %11501 = vmatprep.subr.bf16.mxu0 %v14617_v51  ;;  %v3970_v51 = vld [vmem:[#allocation5 + $0x1588] sm:$0xff]  ;;  %v14735_v31 = vcombine.high %v3957_v12, %v3969_v59  ;;  %v14734_v52 = vcombine.low %v3957_v12, %v3969_v59 }
 0x556   : > { %v14737_v46 = vcombine.high %v3958_v20, %v3970_v51  ;;  %v14736_v8 = vcombine.low %v3958_v20, %v3970_v51 }
 0x557   : > { %11283 = vmatpush1.bf16.msra.mxu1 %v14614_v7  ;;  %v3981_v7 = vld [vmem:[#allocation5 + $0x15e0] sm:$0xff] }
 0x558   : > { %11502 = vmatpush1.bf16.msra.mxu0 %v14616_v61  ;;  %11284 = vmatprep.subr.bf16.mxu1 %v14639_v54  ;;  %v3993_v61 = vld [vmem:[#allocation5 + $0x1640] sm:$0xff]  ;;  %v3982_v54 = vld [vmem:[#allocation5 + $0x15e8] sm:$0xff] }
 0x559   : > { %11503 = vmatprep.subr.bf16.mxu0 %v14641_v57  ;;  %v3994_v57 = vld [vmem:[#allocation5 + $0x1648] sm:$0xff]  ;;  %v14759_v3 = vcombine.high %v3981_v7, %v3993_v61  ;;  %v14758_v43 = vcombine.low %v3981_v7, %v3993_v61 }
 0x55a   : > { %v14761_v47 = vcombine.high %v3982_v54, %v3994_v57  ;;  %v14760_v16 = vcombine.low %v3982_v54, %v3994_v57 }
 0x55b   : > { %11285 = vmatpush1.bf16.msra.mxu1 %v14638_v58  ;;  %v4005_v58 = vld [vmem:[#allocation5 + $0x16a0] sm:$0xff] }
 0x55c   : > { %11504 = vmatpush1.bf16.msra.mxu0 %v14640_v55  ;;  %11286 = vmatprep.subr.bf16.mxu1 %v14663_v63  ;;  %v4017_v55 = vld [vmem:[#allocation5 + $0x1700] sm:$0xff]  ;;  %v4006_v63 = vld [vmem:[#allocation5 + $0x16a8] sm:$0xff] }
 0x55d   : > { %11505 = vmatprep.subr.bf16.mxu0 %v14665_v29  ;;  %v4018_v29 = vld [vmem:[#allocation5 + $0x1708] sm:$0xff]  ;;  %v14783_v24 = vcombine.high %v4005_v58, %v4017_v55  ;;  %v14782_v62 = vcombine.low %v4005_v58, %v4017_v55 }
 0x55e   : > { %v14785_v53 = vcombine.high %v4006_v63, %v4018_v29  ;;  %v14784_v48 = vcombine.low %v4006_v63, %v4018_v29 }
 0x55f   : > { %11287 = vmatpush1.bf16.msra.mxu1 %v14662_v41  ;;  %v4029_v41 = vld [vmem:[#allocation5 + $0x1760] sm:$0xff] }
 0x560   : > { %11506 = vmatpush1.bf16.msra.mxu0 %v14664_v40  ;;  %11288 = vmatprep.subr.bf16.mxu1 %v14687_v21  ;;  %v4041_v40 = vld [vmem:[#allocation5 + $0x17c0] sm:$0xff]  ;;  %v4030_v21 = vld [vmem:[#allocation5 + $0x1768] sm:$0xff] }
 0x561   : > { %11507 = vmatprep.subr.bf16.mxu0 %v14689_v32  ;;  %v4042_v32 = vld [vmem:[#allocation5 + $0x17c8] sm:$0xff]  ;;  %v14807_v36 = vcombine.high %v4029_v41, %v4041_v40  ;;  %v14806_v12 = vcombine.low %v4029_v41, %v4041_v40 }
 0x562   : > { %v14809_v56 = vcombine.high %v4030_v21, %v4042_v32  ;;  %v14808_v59 = vcombine.low %v4030_v21, %v4042_v32 }
 0x563   : > { %11289 = vmatpush1.bf16.msra.mxu1 %v14686_v0  ;;  %v4053_v0 = vld [vmem:[#allocation5 + $0x1820] sm:$0xff] }
 0x564   : > { %11508 = vmatpush1.bf16.msra.mxu0 %v14688_v5  ;;  %11290 = vmatprep.subr.bf16.mxu1 %v14711_v33  ;;  %v4065_v5 = vld [vmem:[#allocation5 + $0x1880] sm:$0xff]  ;;  %v4054_v33 = vld [vmem:[#allocation5 + $0x1828] sm:$0xff] }
 0x565   : > { %11509 = vmatprep.subr.bf16.mxu0 %v14713_v28  ;;  %v4066_v28 = vld [vmem:[#allocation5 + $0x1888] sm:$0xff]  ;;  %v14831_v20 = vcombine.high %v4053_v0, %v4065_v5  ;;  %v14830_v7 = vcombine.low %v4053_v0, %v4065_v5 }
 0x566   : > { %v14833_v51 = vcombine.high %v4054_v33, %v4066_v28  ;;  %v14832_v61 = vcombine.low %v4054_v33, %v4066_v28 }
 0x567   : > { %11291 = vmatpush1.bf16.msra.mxu1 %v14710_v26  ;;  %v4077_v26 = vld [vmem:[#allocation5 + $0x18e0] sm:$0xff] }
 0x568   : > { %11510 = vmatpush1.bf16.msra.mxu0 %v14712_v1  ;;  %11292 = vmatprep.subr.bf16.mxu1 %v14735_v31  ;;  %v4089_v1 = vld [vmem:[#allocation5 + $0x1940] sm:$0xff]  ;;  %v4078_v31 = vld [vmem:[#allocation5 + $0x18e8] sm:$0xff] }
 0x569   : > { %11511 = vmatprep.subr.bf16.mxu0 %v14737_v46  ;;  %v4090_v46 = vld [vmem:[#allocation5 + $0x1948] sm:$0xff]  ;;  %v14855_v54 = vcombine.high %v4077_v26, %v4089_v1  ;;  %v14854_v58 = vcombine.low %v4077_v26, %v4089_v1 }
 0x56a   : > { %v14857_v57 = vcombine.high %v4078_v31, %v4090_v46  ;;  %v14856_v55 = vcombine.low %v4078_v31, %v4090_v46 }
 0x56b   : > { %11293 = vmatpush1.bf16.msra.mxu1 %v14734_v52  ;;  %v4101_v52 = vld [vmem:[#allocation5 + $0x19a0] sm:$0xff] }
 0x56c   : > { %11512 = vmatpush1.bf16.msra.mxu0 %v14736_v8  ;;  %11294 = vmatprep.subr.bf16.mxu1 %v14759_v3  ;;  %v4113_v8 = vld [vmem:[#allocation5 + $0x1a00] sm:$0xff]  ;;  %v4102_v3 = vld [vmem:[#allocation5 + $0x19a8] sm:$0xff] }
 0x56d   : > { %11513 = vmatprep.subr.bf16.mxu0 %v14761_v47  ;;  %v4114_v47 = vld [vmem:[#allocation5 + $0x1a08] sm:$0xff]  ;;  %v14879_v63 = vcombine.high %v4101_v52, %v4113_v8  ;;  %v14878_v41 = vcombine.low %v4101_v52, %v4113_v8 }
 0x56e   : > { %v14881_v29 = vcombine.high %v4102_v3, %v4114_v47  ;;  %v14880_v40 = vcombine.low %v4102_v3, %v4114_v47 }
 0x56f   : > { %11295 = vmatpush1.bf16.msra.mxu1 %v14758_v43  ;;  %v4125_v43 = vld [vmem:[#allocation5 + $0x1a60] sm:$0xff] }
 0x570   : > { %11514 = vmatpush1.bf16.msra.mxu0 %v14760_v16  ;;  %11296 = vmatprep.subr.bf16.mxu1 %v14783_v24  ;;  %v4137_v16 = vld [vmem:[#allocation5 + $0x1ac0] sm:$0xff]  ;;  %v4126_v24 = vld [vmem:[#allocation5 + $0x1a68] sm:$0xff] }
 0x571   : > { %11515 = vmatprep.subr.bf16.mxu0 %v14785_v53  ;;  %v4138_v53 = vld [vmem:[#allocation5 + $0x1ac8] sm:$0xff]  ;;  %v14903_v21 = vcombine.high %v4125_v43, %v4137_v16  ;;  %v14902_v0 = vcombine.low %v4125_v43, %v4137_v16 }
 0x572   : > { %v14905_v32 = vcombine.high %v4126_v24, %v4138_v53  ;;  %v14904_v5 = vcombine.low %v4126_v24, %v4138_v53 }
 0x573   : > { %11297 = vmatpush1.bf16.msra.mxu1 %v14782_v62  ;;  %v4149_v62 = vld [vmem:[#allocation5 + $0x1b20] sm:$0xff] }
 0x574   : > { %11516 = vmatpush1.bf16.msra.mxu0 %v14784_v48  ;;  %11298 = vmatprep.subr.bf16.mxu1 %v14807_v36  ;;  %v4161_v48 = vld [vmem:[#allocation5 + $0x1b80] sm:$0xff]  ;;  %v4150_v36 = vld [vmem:[#allocation5 + $0x1b28] sm:$0xff] }
 0x575   : > { %11517 = vmatprep.subr.bf16.mxu0 %v14809_v56  ;;  %v4162_v56 = vld [vmem:[#allocation5 + $0x1b88] sm:$0xff]  ;;  %v14927_v33 = vcombine.high %v4149_v62, %v4161_v48  ;;  %v14926_v26 = vcombine.low %v4149_v62, %v4161_v48 }
 0x576   : > { %v14929_v28 = vcombine.high %v4150_v36, %v4162_v56  ;;  %v14928_v1 = vcombine.low %v4150_v36, %v4162_v56 }
 0x577   : > { %11299 = vmatpush1.bf16.msra.mxu1 %v14806_v12  ;;  %v4173_v12 = vld [vmem:[#allocation5 + $0x1be0] sm:$0xff] }
 0x578   : > { %11518 = vmatpush1.bf16.msra.mxu0 %v14808_v59  ;;  %11341 = vmatprep.subr.bf16.mxu1 %v14831_v20  ;;  %v4185_v59 = vld [vmem:[#allocation5 + $0x1c40] sm:$0xff]  ;;  %v4174_v20 = vld [vmem:[#allocation5 + $0x1be8] sm:$0xff] }
 0x579   : > { %11560 = vmatprep.subr.bf16.mxu0 %v14833_v51  ;;  %v4186_v51 = vld [vmem:[#allocation5 + $0x1c48] sm:$0xff]  ;;  %v14951_v31 = vcombine.high %v4173_v12, %v4185_v59  ;;  %v14950_v52 = vcombine.low %v4173_v12, %v4185_v59 }
 0x57a   : > { %11301 = vmatmul.mubr.bf16.vlgmr.msra.gmra.mrb[64].mxu1 %v17766_v35  ;;  %v14953_v46 = vcombine.high %v4174_v20, %v4186_v51  ;;  %v14952_v8 = vcombine.low %v4174_v20, %v4186_v51 }
 0x57b   : > { %11520 = vmatmul.mubr.bf16.vlgmr.msra.gmra.mrb[64].mxu0 %v17766_v35  ;;  %11310 = vmatprep.mubr.bf16.mxu1 %v17812_v6 }
 0x57c   : > { %11342 = vmatpush1.bf16.msra.mxu1 %v14830_v7  ;;  %11529 = vmatprep.mubr.bf16.mxu0 %v17812_v6  ;;  %v4197_v7 = vld [vmem:[#allocation5 + $0x1ca0] sm:$0xff] }
 0x57d   : > { %11561 = vmatpush1.bf16.msra.mxu0 %v14832_v61  ;;  %11343 = vmatprep.subr.bf16.mxu1 %v14855_v54  ;;  %v4209_v61 = vld [vmem:[#allocation5 + $0x1d00] sm:$0xff]  ;;  %v4198_v54 = vld [vmem:[#allocation5 + $0x1ca8] sm:$0xff] }
 0x57e   : > { %11562 = vmatprep.subr.bf16.mxu0 %v14857_v57  ;;  %v4210_v57 = vld [vmem:[#allocation5 + $0x1d08] sm:$0xff]  ;;  %v14975_v3 = vcombine.high %v4197_v7, %v4209_v61  ;;  %v14974_v43 = vcombine.low %v4197_v7, %v4209_v61 }
 0x57f   : > { %v14977_v47 = vcombine.high %v4198_v54, %v4210_v57  ;;  %v14976_v16 = vcombine.low %v4198_v54, %v4210_v57 }
 0x580   : > { %11344 = vmatpush1.bf16.msra.mxu1 %v14854_v58  ;;  %v4221_v58 = vld [vmem:[#allocation5 + $0x1d60] sm:$0xff] }
 0x581   : > { %11563 = vmatpush1.bf16.msra.mxu0 %v14856_v55  ;;  %11345 = vmatprep.subr.bf16.mxu1 %v14879_v63  ;;  %v4233_v55 = vld [vmem:[#allocation5 + $0x1dc0] sm:$0xff]  ;;  %v4222_v63 = vld [vmem:[#allocation5 + $0x1d68] sm:$0xff] }
 0x582   : > { %11311 = vmatmul.mubr.bf16.gmra.mrb[68].mxu1 %v17818_v9  ;;  %11564 = vmatprep.subr.bf16.mxu0 %v14881_v29  ;;  %v4234_v29 = vld [vmem:[#allocation5 + $0x1dc8] sm:$0xff]  ;;  %v14999_v24 = vcombine.high %v4221_v58, %v4233_v55  ;;  %v14998_v62 = vcombine.low %v4221_v58, %v4233_v55 }
 0x583   : > { %11530 = vmatmul.mubr.bf16.gmra.mrb[68].mxu0 %v17818_v9  ;;  %11320 = vmatprep.mubr.bf16.mxu1 %v17860_v25  ;;  %v15001_v53 = vcombine.high %v4222_v63, %v4234_v29  ;;  %v15000_v48 = vcombine.low %v4222_v63, %v4234_v29 }
 0x584   : > { %11346 = vmatpush1.bf16.msra.mxu1 %v14878_v41  ;;  %11539 = vmatprep.mubr.bf16.mxu0 %v17860_v25  ;;  %v4245_v41 = vld [vmem:[#allocation5 + $0x1e20] sm:$0xff] }
 0x585   : > { %11565 = vmatpush1.bf16.msra.mxu0 %v14880_v40  ;;  %11347 = vmatprep.subr.bf16.mxu1 %v14903_v21  ;;  %v4257_v40 = vld [vmem:[#allocation5 + $0x1e80] sm:$0xff]  ;;  %v4246_v21 = vld [vmem:[#allocation5 + $0x1e28] sm:$0xff] }
 0x586   : > { %11566 = vmatprep.subr.bf16.mxu0 %v14905_v32  ;;  %v4258_v32 = vld [vmem:[#allocation5 + $0x1e88] sm:$0xff]  ;;  %v15023_v36 = vcombine.high %v4245_v41, %v4257_v40  ;;  %v15022_v12 = vcombine.low %v4245_v41, %v4257_v40 }
 0x587   : > { %v15025_v56 = vcombine.high %v4246_v21, %v4258_v32  ;;  %v15024_v59 = vcombine.low %v4246_v21, %v4258_v32 }
 0x588   : > { %11348 = vmatpush1.bf16.msra.mxu1 %v14902_v0  ;;  %v4269_v0 = vld [vmem:[#allocation5 + $0x1ee0] sm:$0xff] }
 0x589   : > { %11567 = vmatpush1.bf16.msra.mxu0 %v14904_v5  ;;  %11349 = vmatprep.subr.bf16.mxu1 %v14927_v33  ;;  %v4281_v5 = vld [vmem:[#allocation5 + $0x1f40] sm:$0xff]  ;;  %v4270_v33 = vld [vmem:[#allocation5 + $0x1ee8] sm:$0xff] }
 0x58a   : > { %11321 = vmatmul.mubr.bf16.gmra.mrb[72].mxu1 %v17868_v10  ;;  %11568 = vmatprep.subr.bf16.mxu0 %v14929_v28  ;;  %v4282_v28 = vld [vmem:[#allocation5 + $0x1f48] sm:$0xff]  ;;  %v15047_v20 = vcombine.high %v4269_v0, %v4281_v5  ;;  %v15046_v7 = vcombine.low %v4269_v0, %v4281_v5 }
 0x58b   : > { %11540 = vmatmul.mubr.bf16.gmra.mrb[72].mxu0 %v17868_v10  ;;  %11330 = vmatprep.mubr.bf16.mxu1 %v17912_v19  ;;  %v15049_v51 = vcombine.high %v4270_v33, %v4282_v28  ;;  %v15048_v61 = vcombine.low %v4270_v33, %v4282_v28 }
 0x58c   : > { %11350 = vmatpush1.bf16.msra.mxu1 %v14926_v26  ;;  %11549 = vmatprep.mubr.bf16.mxu0 %v17912_v19  ;;  %v4293_v26 = vld [vmem:[#allocation5 + $0x1fa0] sm:$0xff] }
 0x58d   : > { %11569 = vmatpush1.bf16.msra.mxu0 %v14928_v1  ;;  %11351 = vmatprep.subr.bf16.mxu1 %v14951_v31  ;;  %v4305_v1 = vld [vmem:[#allocation5 + $0x2000] sm:$0xff]  ;;  %v4294_v31 = vld [vmem:[#allocation5 + $0x1fa8] sm:$0xff] }
 0x58e   : > { %11570 = vmatprep.subr.bf16.mxu0 %v14953_v46  ;;  %v4306_v46 = vld [vmem:[#allocation5 + $0x2008] sm:$0xff]  ;;  %v15071_v54 = vcombine.high %v4293_v26, %v4305_v1  ;;  %v15070_v58 = vcombine.low %v4293_v26, %v4305_v1 }
 0x58f   : > { %v15073_v57 = vcombine.high %v4294_v31, %v4306_v46  ;;  %v15072_v55 = vcombine.low %v4294_v31, %v4306_v46 }
 0x590   : > { %11352 = vmatpush1.bf16.msra.mxu1 %v14950_v52  ;;  %v4317_v52 = vld [vmem:[#allocation5 + $0x2060] sm:$0xff] }
 0x591   : > { %11571 = vmatpush1.bf16.msra.mxu0 %v14952_v8  ;;  %11353 = vmatprep.subr.bf16.mxu1 %v14975_v3  ;;  %v4329_v8 = vld [vmem:[#allocation5 + $0x20c0] sm:$0xff]  ;;  %v4318_v3 = vld [vmem:[#allocation5 + $0x2068] sm:$0xff] }
 0x592   : > { %11331 = vmatmul.mubr.bf16.gmra.mrb[76].mxu1 %v17916_v13  ;;  %11572 = vmatprep.subr.bf16.mxu0 %v14977_v47  ;;  %v4330_v47 = vld [vmem:[#allocation5 + $0x20c8] sm:$0xff]  ;;  %v15095_v63 = vcombine.high %v4317_v52, %v4329_v8  ;;  %v15094_v41 = vcombine.low %v4317_v52, %v4329_v8 }
 0x593   : > { %11550 = vmatmul.mubr.bf16.gmra.mrb[76].mxu0 %v17916_v13  ;;  %11373 = vmatprep.mubr.bf16.mxu1 %v17772_v23  ;;  %v15097_v29 = vcombine.high %v4318_v3, %v4330_v47  ;;  %v15096_v40 = vcombine.low %v4318_v3, %v4330_v47 }
 0x594   : > { %11354 = vmatpush1.bf16.msra.mxu1 %v14974_v43  ;;  %11592 = vmatprep.mubr.bf16.mxu0 %v17772_v23  ;;  %v4341_v43 = vld [vmem:[#allocation5 + $0x2120] sm:$0xff] }
 0x595   : > { %11573 = vmatpush1.bf16.msra.mxu0 %v14976_v16  ;;  %11355 = vmatprep.subr.bf16.mxu1 %v14999_v24  ;;  %v4353_v16 = vld [vmem:[#allocation5 + $0x2180] sm:$0xff]  ;;  %v4342_v24 = vld [vmem:[#allocation5 + $0x2128] sm:$0xff] }
 0x596   : > { %11574 = vmatprep.subr.bf16.mxu0 %v15001_v53  ;;  %v4354_v53 = vld [vmem:[#allocation5 + $0x2188] sm:$0xff]  ;;  %v15119_v21 = vcombine.high %v4341_v43, %v4353_v16  ;;  %v15118_v0 = vcombine.low %v4341_v43, %v4353_v16 }
 0x597   : > { %v15121_v32 = vcombine.high %v4342_v24, %v4354_v53  ;;  %v15120_v5 = vcombine.low %v4342_v24, %v4354_v53 }
 0x598   : > { %11356 = vmatpush1.bf16.msra.mxu1 %v14998_v62  ;;  %v4365_v62 = vld [vmem:[#allocation5 + $0x21e0] sm:$0xff] }
 0x599   : > { %11575 = vmatpush1.bf16.msra.mxu0 %v15000_v48  ;;  %11357 = vmatprep.subr.bf16.mxu1 %v15023_v36  ;;  %v4377_v48 = vld [vmem:[#allocation5 + $0x2240] sm:$0xff]  ;;  %v4366_v36 = vld [vmem:[#allocation5 + $0x21e8] sm:$0xff] }
 0x59a   : > { %11576 = vmatprep.subr.bf16.mxu0 %v15025_v56  ;;  %v4378_v56 = vld [vmem:[#allocation5 + $0x2248] sm:$0xff]  ;;  %v15143_v33 = vcombine.high %v4365_v62, %v4377_v48  ;;  %v15142_v26 = vcombine.low %v4365_v62, %v4377_v48 }
 0x59b   : > { %v15145_v28 = vcombine.high %v4366_v36, %v4378_v56  ;;  %v15144_v1 = vcombine.low %v4366_v36, %v4378_v56 }
 0x59c   : > { %11358 = vmatpush1.bf16.msra.mxu1 %v15022_v12  ;;  %v4389_v12 = vld [vmem:[#allocation5 + $0x22a0] sm:$0xff] }
 0x59d   : > { %11577 = vmatpush1.bf16.msra.mxu0 %v15024_v59  ;;  %11359 = vmatprep.subr.bf16.mxu1 %v15047_v20  ;;  %v4401_v59 = vld [vmem:[#allocation5 + $0x2300] sm:$0xff]  ;;  %v4390_v20 = vld [vmem:[#allocation5 + $0x22a8] sm:$0xff] }
 0x59e   : > { %11578 = vmatprep.subr.bf16.mxu0 %v15049_v51  ;;  %v4402_v51 = vld [vmem:[#allocation5 + $0x2308] sm:$0xff]  ;;  %v15167_v31 = vcombine.high %v4389_v12, %v4401_v59  ;;  %v15166_v52 = vcombine.low %v4389_v12, %v4401_v59 }
 0x59f   : > { %v15169_v46 = vcombine.high %v4390_v20, %v4402_v51  ;;  %v15168_v8 = vcombine.low %v4390_v20, %v4402_v51 }
 0x5a0   : > { %11360 = vmatpush1.bf16.msra.mxu1 %v15046_v7  ;;  %v4413_v7 = vld [vmem:[#allocation5 + $0x2360] sm:$0xff] }
 0x5a1   : > { %11579 = vmatpush1.bf16.msra.mxu0 %v15048_v61  ;;  %11361 = vmatprep.subr.bf16.mxu1 %v15071_v54  ;;  %v4425_v61 = vld [vmem:[#allocation5 + $0x23c0] sm:$0xff]  ;;  %v4414_v54 = vld [vmem:[#allocation5 + $0x2368] sm:$0xff] }
 0x5a2   : > { %11580 = vmatprep.subr.bf16.mxu0 %v15073_v57  ;;  %v4426_v57 = vld [vmem:[#allocation5 + $0x23c8] sm:$0xff]  ;;  %v15191_v3 = vcombine.high %v4413_v7, %v4425_v61  ;;  %v15190_v43 = vcombine.low %v4413_v7, %v4425_v61 }
 0x5a3   : > { %v15193_v47 = vcombine.high %v4414_v54, %v4426_v57  ;;  %v15192_v16 = vcombine.low %v4414_v54, %v4426_v57 }
 0x5a4   : > { %11362 = vmatpush1.bf16.msra.mxu1 %v15070_v58  ;;  %v3287_v58 = vld [vmem:[#allocation5 + $0x30] sm:$0xff] }
 0x5a5   : > { %11581 = vmatpush1.bf16.msra.mxu0 %v15072_v55  ;;  %11363 = vmatprep.subr.bf16.mxu1 %v15095_v63  ;;  %v3299_v55 = vld [vmem:[#allocation5 + $0x90] sm:$0xff]  ;;  %v3288_v63 = vld [vmem:[#allocation5 + $0x38] sm:$0xff] }
 0x5a6   : > { %11582 = vmatprep.subr.bf16.mxu0 %v15097_v29  ;;  %v3300_v29 = vld [vmem:[#allocation5 + $0x98] sm:$0xff]  ;;  %v14067_v24 = vcombine.high %v3287_v58, %v3299_v55  ;;  %v14066_v62 = vcombine.low %v3287_v58, %v3299_v55  ;;  %v18913_v55 = vld [vmem:[#allocation11_spill] sm:$0xff] }
 0x5a7   : > { %v14069_v53 = vcombine.high %v3288_v63, %v3300_v29  ;;  %v14068_v48 = vcombine.low %v3288_v63, %v3300_v29  ;;  %v18132_v63 = vsub.s32 6, %v18913_v55 }
 0x5a8   : > { %11364 = vmatpush1.bf16.msra.mxu1 %v15094_v41  ;;  %v3311_v41 = vld [vmem:[#allocation5 + $0xf0] sm:$0xff] }
 0x5a9   : > { %11583 = vmatpush1.bf16.msra.mxu0 %v15096_v40  ;;  %11365 = vmatprep.subr.bf16.mxu1 %v15119_v21  ;;  %v3323_v40 = vld [vmem:[#allocation5 + $0x150] sm:$0xff]  ;;  %v3312_v21 = vld [vmem:[#allocation5 + $0xf8] sm:$0xff] }
 0x5aa   : > { %11584 = vmatprep.subr.bf16.mxu0 %v15121_v32  ;;  %v3324_v32 = vld [vmem:[#allocation5 + $0x158] sm:$0xff]  ;;  %v14091_v36 = vcombine.high %v3311_v41, %v3323_v40  ;;  %v14090_v12 = vcombine.low %v3311_v41, %v3323_v40  ;;  %v3419_v41 = vld [vmem:[#allocation5 + $0x450] sm:$0xff]  ;;  %v16720_v40 = vld [vmem:[%s18818_s5] sm:$0xff] }
 0x5ab   : > { %v14093_v56 = vcombine.high %v3312_v21, %v3324_v32  ;;  %v14092_v59 = vcombine.low %v3312_v21, %v3324_v32  ;;  %v18915_v21 = vld [vmem:[#allocation20_spill] sm:$0xff] }
 0x5ac   : > { %11366 = vmatpush1.bf16.msra.mxu1 %v15118_v0  ;;  %v3335_v0 = vld [vmem:[#allocation5 + $0x1b0] sm:$0xff]  ;;  %v18141_v32 = vrot.slane %v16720_v40, %v18915_v21 }
 0x5ad   : > { %11585 = vmatpush1.bf16.msra.mxu0 %v15120_v5  ;;  %11367 = vmatprep.subr.bf16.mxu1 %v15143_v33  ;;  %v3347_v5 = vld [vmem:[#allocation5 + $0x210] sm:$0xff]  ;;  %v3336_v33 = vld [vmem:[#allocation5 + $0x1b8] sm:$0xff] }
 0x5ae   : > { %11586 = vmatprep.subr.bf16.mxu0 %v15145_v28  ;;  %v3348_v28 = vld [vmem:[#allocation5 + $0x218] sm:$0xff]  ;;  %v14115_v20 = vcombine.high %v3335_v0, %v3347_v5  ;;  %v14114_v7 = vcombine.low %v3335_v0, %v3347_v5  ;;  %v18916_v0 = vld [vmem:[#allocation21_spill] sm:$0xff] }
 0x5af   : > { %v14117_v51 = vcombine.high %v3336_v33, %v3348_v28  ;;  %v14116_v61 = vcombine.low %v3336_v33, %v3348_v28  ;;  %v18147_v5 = vrot.slane %v16720_v40, %v18916_v0 }
 0x5b0   : > { %11368 = vmatpush1.bf16.msra.mxu1 %v15142_v26  ;;  %v3359_v26 = vld [vmem:[#allocation5 + $0x270] sm:$0xff] }
 0x5b1   : > { %11587 = vmatpush1.bf16.msra.mxu0 %v15144_v1  ;;  %11369 = vmatprep.subr.bf16.mxu1 %v15167_v31  ;;  %v3371_v1 = vld [vmem:[#allocation5 + $0x2d0] sm:$0xff]  ;;  %v3360_v31 = vld [vmem:[#allocation5 + $0x278] sm:$0xff] }
 0x5b2   : > { %11588 = vmatprep.subr.bf16.mxu0 %v15169_v46  ;;  %v3372_v46 = vld [vmem:[#allocation5 + $0x2d8] sm:$0xff]  ;;  %v14139_v54 = vcombine.high %v3359_v26, %v3371_v1  ;;  %v14138_v58 = vcombine.low %v3359_v26, %v3371_v1  ;;  %v3443_v26 = vld [vmem:[#allocation5 + $0x510] sm:$0xff] }
 0x5b3   : > { %v14141_v57 = vcombine.high %v3360_v31, %v3372_v46  ;;  %v14140_v29 = vcombine.low %v3360_v31, %v3372_v46 }
 0x5b4   : > { %11370 = vmatpush1.bf16.msra.mxu1 %v15166_v52  ;;  %v3383_v52 = vld [vmem:[#allocation5 + $0x330] sm:$0xff] }
 0x5b5   : > { %11589 = vmatpush1.bf16.msra.mxu0 %v15168_v8  ;;  %11371 = vmatprep.subr.bf16.mxu1 %v15191_v3  ;;  %v3395_v8 = vld [vmem:[#allocation5 + $0x390] sm:$0xff]  ;;  %v3384_v3 = vld [vmem:[#allocation5 + $0x338] sm:$0xff] }
 0x5b6   : > { %11590 = vmatprep.subr.bf16.mxu0 %v15193_v47  ;;  %v3396_v47 = vld [vmem:[#allocation5 + $0x398] sm:$0xff] }
 0x5b7   : > { %v14164_v33 = vcombine.low %v3384_v3, %v3396_v47 }
 0x5b8   : > { %11372 = vmatpush1.bf16.msra.mxu1 %v15190_v43  ;;  %v14163_v43 = vcombine.high %v3383_v52, %v3395_v8 }
 0x5b9   : > { %11591 = vmatpush1.bf16.msra.mxu0 %v15192_v16  ;;  %11633 = vmatprep.subr.bf16.mxu1 %v14067_v24  ;;  %v18135_v16 = vsub.s32 7, %v18913_v55  ;;  %v14165_v24 = vcombine.high %v3384_v3, %v3396_v47 }
 0x5ba   : > { %11852 = vmatprep.subr.bf16.mxu0 %v14069_v53  ;;  %v3407_v53 = vld [vmem:[#allocation5 + $0x3f0] sm:$0xff] }
 0x5bb   : > { %11374 = vmatmul.mubr.bf16.vlgmr.msra.gmra.mrb[64].mxu1 %v17798_v4  ;;  %18914 = vst [vmem:[#allocation23_spill] sm:$0xff] %v18135_v16  ;;  %v18150_v28 = vrot.slane %v16720_v40, %v18135_v16 }
 0x5bc   : > { %11593 = vmatmul.mubr.bf16.vlgmr.msra.gmra.mrb[64].mxu0 %v17798_v4  ;;  %11383 = vmatprep.mubr.bf16.mxu1 %v17833_v60 }
 0x5bd   : > { %11602 = vmatprep.mubr.bf16.mxu0 %v17833_v60  ;;  %11634 = vmatpush1.bf16.msra.mxu1 %v14066_v62  ;;  %v3408_v62 = vld [vmem:[#allocation5 + $0x3f8] sm:$0xff] }
 0x5be   : > { %11853 = vmatpush1.bf16.msra.mxu0 %v14068_v48  ;;  %11635 = vmatprep.subr.bf16.mxu1 %v14091_v36  ;;  %v3420_v48 = vld [vmem:[#allocation5 + $0x458] sm:$0xff]  ;;  %v14162_v36 = vcombine.low %v3383_v52, %v3395_v8 }
 0x5bf   : > { %11854 = vmatprep.subr.bf16.mxu0 %v14093_v56  ;;  %v18144_v56 = vrot.slane %v16720_v40, %v18132_v63  ;;  %v14188_v3 = vcombine.low %v3408_v62, %v3420_v48 }
 0x5c1   : > { %11636 = vmatpush1.bf16.msra.mxu1 %v14090_v12  ;;  %v14187_v12 = vcombine.high %v3407_v53, %v3419_v41 }
 0x5c2   : > { %11855 = vmatpush1.bf16.msra.mxu0 %v14092_v59  ;;  %11637 = vmatprep.subr.bf16.mxu1 %v14115_v20  ;;  %v14189_v20 = vcombine.high %v3408_v62, %v3420_v48  ;;  %v3455_v48 = vld [vmem:[#allocation5 + $0x570] sm:$0xff] }
 0x5c3   : > { %11384 = vmatmul.mubr.bf16.gmra.mrb[68].mxu1 %v17852_v18  ;;  %11856 = vmatprep.subr.bf16.mxu0 %v14117_v51  ;;  %v3431_v51 = vld [vmem:[#allocation5 + $0x4b0] sm:$0xff] }
 0x5c4   : > { %11603 = vmatmul.mubr.bf16.gmra.mrb[68].mxu0 %v17852_v18  ;;  %11393 = vmatprep.mubr.bf16.mxu1 %v17887_v44 }
 0x5c5   : > { %11612 = vmatprep.mubr.bf16.mxu0 %v17887_v44  ;;  %11638 = vmatpush1.bf16.msra.mxu1 %v14114_v7  ;;  %v14186_v7 = vcombine.low %v3407_v53, %v3419_v41 }
 0x5c6   : > { %11857 = vmatpush1.bf16.msra.mxu0 %v14116_v61  ;;  %11639 = vmatprep.subr.bf16.mxu1 %v14139_v54  ;;  %v3432_v61 = vld [vmem:[#allocation5 + $0x4b8] sm:$0xff] }
 0x5c7   : > { %11858 = vmatprep.subr.bf16.mxu0 %v14141_v57  ;;  %v3444_v54 = vld [vmem:[#allocation5 + $0x518] sm:$0xff] }
 0x5c8   : > { %v14213_v62 = vcombine.high %v3432_v61, %v3444_v54 }
 0x5c9   : > { %11640 = vmatpush1.bf16.msra.mxu1 %v14138_v58 }
 0x5ca   : > { %11859 = vmatpush1.bf16.msra.mxu0 %v14140_v29  ;;  %11641 = vmatprep.subr.bf16.mxu1 %v14163_v43 }
 0x5cb   : > { %11394 = vmatmul.mubr.bf16.gmra.mrb[72].mxu1 %v17906_v17  ;;  %11860 = vmatprep.subr.bf16.mxu0 %v14165_v24  ;;  %v10937_v59 = vpop.f32.mrb[48].mxu1  ;;  %v14211_v24 = vcombine.high %v3431_v51, %v3443_v26 }
 0x5cc   : > { %11613 = vmatmul.mubr.bf16.gmra.mrb[72].mxu0 %v17906_v17  ;;  %11403 = vmatprep.mubr.bf16.mxu1 %v17928_v2  ;;  %v15531_v1 = vadd.f32 %v10937_v59, %v18141_v32  ;;  %v11156_v31 = vpop.f32.mrb[48].mxu0  ;;  %v10939_v46 = vpop.f32.mrb[49].mxu1 }
 0x5cd   : > { %11622 = vmatprep.mubr.bf16.mxu0 %v17928_v2  ;;  %11642 = vmatpush1.bf16.msra.mxu1 %v14162_v36  ;;  %v15547_v57 = vadd.f32 %v11156_v31, %v18144_v56  ;;  %v15532_v52 = vadd.f32 %v10939_v46, %v18147_v5  ;;  %v11158_v8 = vpop.f32.mrb[49].mxu0  ;;  %v10941_v47 = vpop.f32.mrb[50].mxu1  ;;  %v3456_v31 = vld [vmem:[#allocation5 + $0x578] sm:$0xff] }
 0x5ce   : > { %11861 = vmatpush1.bf16.msra.mxu0 %v14164_v33  ;;  %v15548_v58 = vadd.f32 %v11158_v8, %v18150_v28  ;;  %11643 = vmatprep.subr.bf16.mxu1 %v14187_v12  ;;  %v15533_v55 = vadd.f32 %v10941_v47, %v18141_v32  ;;  %v11160_v29 = vpop.f32.mrb[50].mxu0  ;;  %v10943_v43 = vpop.f32.mrb[51].mxu1  ;;  %v3467_v33 = vld [vmem:[#allocation5 + $0x5d0] sm:$0xff]  ;;  %v3468_v46 = vld [vmem:[#allocation5 + $0x5d8] sm:$0xff]  ;;  %v14212_v8 = vcombine.low %v3432_v61, %v3444_v54 }
 0x5cf   : > { %v15309_v53 = vpack.c.bf16 %v15532_v52, %v15531_v1  ;;  %11862 = vmatprep.subr.bf16.mxu0 %v14189_v20  ;;  %v15549_v41 = vadd.f32 %v11160_v29, %v18144_v56  ;;  %v15534_v40 = vadd.f32 %v10943_v43, %v18147_v5  ;;  %v11162_v36 = vpop.f32.mrb[51].mxu0  ;;  %v14210_v52 = vcombine.low %v3431_v51, %v3443_v26  ;;  %v3479_v29 = vld [vmem:[#allocation5 + $0x630] sm:$0xff]  ;;  %v3480_v61 = vld [vmem:[#allocation5 + $0x638] sm:$0xff] }
 0x5d0   : > { %v15310_v59 = vpack.c.bf16 %v15548_v58, %v15547_v57  ;;  %v15550_v12 = vadd.f32 %v11162_v36, %v18150_v28  ;;  %v14235_v47 = vcombine.high %v3455_v48, %v3467_v33  ;;  %v14237_v58 = vcombine.high %v3456_v31, %v3468_v46  ;;  %v3491_v43 = vld [vmem:[#allocation5 + $0x690] sm:$0xff]  ;;  %v3492_v54 = vld [vmem:[#allocation5 + $0x698] sm:$0xff] }
 0x5d1   : > { %13525 = vst [vmem:[%s18044_s9 + $0x10] sm:$0xff] %v15309_v53  ;;  %11644 = vmatpush1.bf16.msra.mxu1 %v14186_v7  ;;  %v15321_v1 = vpack.c.bf16 %v15534_v40, %v15533_v55 }
 0x5d2   : > { %13526 = vst [vmem:[%s18044_s9 + $0x18] sm:$0xff] %v15310_v59  ;;  %11863 = vmatpush1.bf16.msra.mxu0 %v14188_v3  ;;  %v15322_v20 = vpack.c.bf16 %v15550_v12, %v15549_v41  ;;  %11645 = vmatprep.subr.bf16.mxu1 %v14211_v24  ;;  %v14234_v3 = vcombine.low %v3455_v48, %v3467_v33 }
 0x5d3   : > { %13537 = vst [vmem:[%s18044_s9 + $0x70] sm:$0xff] %v15321_v1  ;;  %11404 = vmatmul.mubr.bf16.gmra.mrb[76].mxu1 %v17932_v37  ;;  %11864 = vmatprep.subr.bf16.mxu0 %v14213_v62  ;;  %v10947_v57 = vpop.f32.mrb[52].mxu1  ;;  %v14236_v41 = vcombine.low %v3456_v31, %v3468_v46  ;;  %v14259_v59 = vcombine.high %v3479_v29, %v3491_v43  ;;  %v3503_v46 = vld [vmem:[#allocation5 + $0x6f0] sm:$0xff] }
 0x5d4   : > { %13538 = vst [vmem:[%s18044_s9 + $0x78] sm:$0xff] %v15322_v20  ;;  %11623 = vmatmul.mubr.bf16.gmra.mrb[76].mxu0 %v17932_v37  ;;  %11665 = vmatprep.mubr.bf16.mxu1 %v17762_v39  ;;  %v15535_v51 = vadd.f32 %v10947_v57, %v18141_v32  ;;  %v11166_v26 = vpop.f32.mrb[52].mxu0  ;;  %v10949_v7 = vpop.f32.mrb[53].mxu1  ;;  %v14261_v31 = vcombine.high %v3480_v61, %v3492_v54 }
 0x5d5   : > { %11646 = vmatpush1.bf16.msra.mxu1 %v14210_v52  ;;  %11884 = vmatprep.mubr.bf16.mxu0 %v17762_v39  ;;  %v15551_v55 = vadd.f32 %v11166_v26, %v18144_v56  ;;  %v15536_v24 = vadd.f32 %v10949_v7, %v18147_v5  ;;  %v11168_v53 = vpop.f32.mrb[53].mxu0  ;;  %v10951_v40 = vpop.f32.mrb[54].mxu1  ;;  %v3504_v26 = vld [vmem:[#allocation5 + $0x6f8] sm:$0xff] }
 0x5d6   : > { %11865 = vmatpush1.bf16.msra.mxu0 %v14212_v8  ;;  %v15552_v36 = vadd.f32 %v11168_v53, %v18150_v28  ;;  %11647 = vmatprep.subr.bf16.mxu1 %v14235_v47  ;;  %v15537_v62 = vadd.f32 %v10951_v40, %v18141_v32  ;;  %v11170_v48 = vpop.f32.mrb[54].mxu0  ;;  %v10953_v33 = vpop.f32.mrb[55].mxu1  ;;  %v3515_v8 = vld [vmem:[#allocation5 + $0x750] sm:$0xff]  ;;  %v3516_v7 = vld [vmem:[#allocation5 + $0x758] sm:$0xff]  ;;  %v14260_v53 = vcombine.low %v3480_v61, %v3492_v54 }
 0x5d7   : > { %v15333_v12 = vpack.c.bf16 %v15536_v24, %v15535_v51  ;;  %11866 = vmatprep.subr.bf16.mxu0 %v14237_v58  ;;  %v15553_v1 = vadd.f32 %v11170_v48, %v18144_v56  ;;  %v15538_v52 = vadd.f32 %v10953_v33, %v18147_v5  ;;  %v11172_v20 = vpop.f32.mrb[55].mxu0  ;;  %v14258_v24 = vcombine.low %v3479_v29, %v3491_v43 }
 0x5d8   : > { %v15334_v57 = vpack.c.bf16 %v15552_v36, %v15551_v55  ;;  %v15554_v47 = vadd.f32 %v11172_v20, %v18150_v28  ;;  %v14283_v40 = vcombine.high %v3503_v46, %v3515_v8  ;;  %v14285_v33 = vcombine.high %v3504_v26, %v3516_v7  ;;  %v3527_v55 = vld [vmem:[#allocation5 + $0x7b0] sm:$0xff] }
 0x5d9   : > { %13549 = vst [vmem:[%s18044_s9 + $0xd0] sm:$0xff] %v15333_v12  ;;  %11648 = vmatpush1.bf16.msra.mxu1 %v14234_v3  ;;  %v15345_v51 = vpack.c.bf16 %v15538_v52, %v15537_v62  ;;  %v3539_v36 = vld [vmem:[#allocation5 + $0x810] sm:$0xff]  ;;  %v3528_v3 = vld [vmem:[#allocation5 + $0x7b8] sm:$0xff]  ;;  %v14282_v54 = vcombine.low %v3503_v46, %v3515_v8 }
 0x5da   : > { %13550 = vst [vmem:[%s18044_s9 + $0xd8] sm:$0xff] %v15334_v57  ;;  %11867 = vmatpush1.bf16.msra.mxu0 %v14236_v41  ;;  %v15346_v58 = vpack.c.bf16 %v15554_v47, %v15553_v1  ;;  %11649 = vmatprep.subr.bf16.mxu1 %v14259_v59  ;;  %v3540_v62 = vld [vmem:[#allocation5 + $0x818] sm:$0xff]  ;;  %v14284_v41 = vcombine.low %v3504_v26, %v3516_v7  ;;  %v3551_v26 = vld [vmem:[#allocation5 + $0x870] sm:$0xff] }
 0x5db   : > { %13561 = vst [vmem:[%s18044_s9 + $0x130] sm:$0xff] %v15345_v51  ;;  %11868 = vmatprep.subr.bf16.mxu0 %v14261_v31  ;;  %v10957_v48 = vpop.f32.mrb[56].mxu1  ;;  %v14307_v47 = vcombine.high %v3527_v55, %v3539_v36  ;;  %v14309_v8 = vcombine.high %v3528_v3, %v3540_v62  ;;  %v3563_v7 = vld [vmem:[#allocation5 + $0x8d0] sm:$0xff] }
 0x5dc   : > { %13562 = vst [vmem:[%s18044_s9 + $0x138] sm:$0xff] %v15346_v58  ;;  %v15539_v20 = vadd.f32 %v10957_v48, %v18141_v32  ;;  %v11176_v12 = vpop.f32.mrb[56].mxu0  ;;  %v10959_v16 = vpop.f32.mrb[57].mxu1  ;;  %v3564_v48 = vld [vmem:[#allocation5 + $0x8d8] sm:$0xff] }
 0x5dd   : > { %11650 = vmatpush1.bf16.msra.mxu1 %v14258_v24  ;;  %v15555_v29 = vadd.f32 %v11176_v12, %v18144_v56  ;;  %v15540_v43 = vadd.f32 %v10959_v16, %v18147_v5  ;;  %v11178_v61 = vpop.f32.mrb[57].mxu0  ;;  %v10961_v59 = vpop.f32.mrb[58].mxu1  ;;  %v14306_v12 = vcombine.low %v3527_v55, %v3539_v36 }
 0x5de   : > { %11869 = vmatpush1.bf16.msra.mxu0 %v14260_v53  ;;  %v15556_v1 = vadd.f32 %v11178_v61, %v18150_v28  ;;  %11651 = vmatprep.subr.bf16.mxu1 %v14283_v40  ;;  %v15541_v52 = vadd.f32 %v10961_v59, %v18141_v32  ;;  %v11180_v31 = vpop.f32.mrb[58].mxu0  ;;  %v10963_v57 = vpop.f32.mrb[59].mxu1  ;;  %v3552_v40 = vld [vmem:[#allocation5 + $0x878] sm:$0xff]  ;;  %v14331_v61 = vcombine.high %v3551_v26, %v3563_v7 }
 0x5df   : > { %v15357_v51 = vpack.c.bf16 %v15540_v43, %v15539_v20  ;;  %11870 = vmatprep.subr.bf16.mxu0 %v14285_v33  ;;  %v15557_v24 = vadd.f32 %v11180_v31, %v18144_v56  ;;  %v15542_v16 = vadd.f32 %v10963_v57, %v18147_v5  ;;  %v11182_v46 = vpop.f32.mrb[59].mxu0  ;;  %v14308_v43 = vcombine.low %v3528_v3, %v3540_v62 }
 0x5e0   : > { %v15358_v58 = vpack.c.bf16 %v15556_v1, %v15555_v29  ;;  %v15558_v53 = vadd.f32 %v11182_v46, %v18150_v28  ;;  %v14333_v31 = vcombine.high %v3552_v40, %v3564_v48  ;;  %v3575_v29 = vld [vmem:[#allocation5 + $0x930] sm:$0xff]  ;;  %v14330_v62 = vcombine.low %v3551_v26, %v3563_v7 }
 0x5e1   : > { %13573 = vst [vmem:[%s18044_s9 + $0x190] sm:$0xff] %v15357_v51  ;;  %11652 = vmatpush1.bf16.msra.mxu1 %v14282_v54  ;;  %v15369_v20 = vpack.c.bf16 %v15542_v16, %v15541_v52  ;;  %v3587_v1 = vld [vmem:[#allocation5 + $0x990] sm:$0xff]  ;;  %v3576_v54 = vld [vmem:[#allocation5 + $0x938] sm:$0xff] }
 0x5e2   : > { %13574 = vst [vmem:[%s18044_s9 + $0x198] sm:$0xff] %v15358_v58  ;;  %11871 = vmatpush1.bf16.msra.mxu0 %v14284_v41  ;;  %v15370_v33 = vpack.c.bf16 %v15558_v53, %v15557_v24  ;;  %11653 = vmatprep.subr.bf16.mxu1 %v14307_v47  ;;  %v3588_v52 = vld [vmem:[#allocation5 + $0x998] sm:$0xff]  ;;  %v14332_v41 = vcombine.low %v3552_v40, %v3564_v48  ;;  %v3599_v40 = vld [vmem:[#allocation5 + $0x9f0] sm:$0xff] }
 0x5e3   : > { %13585 = vst [vmem:[%s18044_s9 + $0x1f0] sm:$0xff] %v15369_v20  ;;  %11872 = vmatprep.subr.bf16.mxu0 %v14309_v8  ;;  %v10967_v59 = vpop.f32.mrb[60].mxu1  ;;  %v14355_v53 = vcombine.high %v3575_v29, %v3587_v1  ;;  %v14357_v7 = vcombine.high %v3576_v54, %v3588_v52  ;;  %v3611_v48 = vld [vmem:[#allocation5 + $0xa50] sm:$0xff] }
 0x5e4   : > { %13586 = vst [vmem:[%s18044_s9 + $0x1f8] sm:$0xff] %v15370_v33  ;;  %v15543_v57 = vadd.f32 %v10967_v59, %v18141_v32  ;;  %v11186_v51 = vpop.f32.mrb[60].mxu0  ;;  %v10969_v46 = vpop.f32.mrb[61].mxu1  ;;  %v3612_v59 = vld [vmem:[#allocation5 + $0xa58] sm:$0xff] }
 0x5e5   : > { %11654 = vmatpush1.bf16.msra.mxu1 %v14306_v12  ;;  %v15559_v55 = vadd.f32 %v11186_v51, %v18144_v56  ;;  %v15544_v36 = vadd.f32 %v10969_v46, %v18147_v5  ;;  %v11188_v3 = vpop.f32.mrb[61].mxu0  ;;  %v10971_v47 = vpop.f32.mrb[62].mxu1  ;;  %v14354_v51 = vcombine.low %v3575_v29, %v3587_v1 }
 0x5e6   : > { %11873 = vmatpush1.bf16.msra.mxu0 %v14308_v43  ;;  %v15560_v24 = vadd.f32 %v11188_v3, %v18150_v28  ;;  %11655 = vmatprep.subr.bf16.mxu1 %v14331_v61  ;;  %v15545_v16 = vadd.f32 %v10971_v47, %v18141_v32  ;;  %v11190_v8 = vpop.f32.mrb[62].mxu0  ;;  %v10973_v58 = vpop.f32.mrb[63].mxu1  ;;  %v3600_v32 = vld [vmem:[#allocation5 + $0x9f8] sm:$0xff]  ;;  %v14378_v47 = vcombine.low %v3599_v40, %v3611_v48 }
 0x5e7   : > { %v15381_v20 = vpack.c.bf16 %v15544_v36, %v15543_v57  ;;  %11874 = vmatprep.subr.bf16.mxu0 %v14333_v31  ;;  %v15561_v12 = vadd.f32 %v11190_v8, %v18144_v56  ;;  %v15546_v33 = vadd.f32 %v10973_v58, %v18147_v5  ;;  %v11192_v26 = vpop.f32.mrb[63].mxu0  ;;  %v14356_v5 = vcombine.low %v3576_v54, %v3588_v52  ;;  %v3623_v36 = vld [vmem:[#allocation5 + $0xab0] sm:$0xff]  ;;  %v3636_v3 = vld [vmem:[#allocation5 + $0xb18] sm:$0xff] }
 0x5e8   : > { %v15382_v43 = vpack.c.bf16 %v15560_v24, %v15559_v55  ;;  %v15562_v61 = vadd.f32 %v11192_v26, %v18150_v28  ;;  %v14379_v31 = vcombine.high %v3599_v40, %v3611_v48  ;;  %v14381_v46 = vcombine.high %v3600_v32, %v3612_v59  ;;  %v3635_v55 = vld [vmem:[#allocation5 + $0xb10] sm:$0xff]  ;;  %v3624_v28 = vld [vmem:[#allocation5 + $0xab8] sm:$0xff] }
 0x5e9   : > { %13597 = vst [vmem:[%s18044_s9 + $0x250] sm:$0xff] %v15381_v20  ;;  %11656 = vmatpush1.bf16.msra.mxu1 %v14330_v62  ;;  %v15393_v57 = vpack.c.bf16 %v15546_v33, %v15545_v16  ;;  %v14380_v62 = vcombine.low %v3600_v32, %v3612_v59  ;;  %v14403_v29 = vcombine.high %v3623_v36, %v3635_v55  ;;  %v3659_v24 = vld [vmem:[#allocation5 + $0xbd0] sm:$0xff]  ;;  %v3648_v54 = vld [vmem:[#allocation5 + $0xb78] sm:$0xff] }
 0x5ea   : > { %13598 = vst [vmem:[%s18044_s9 + $0x258] sm:$0xff] %v15382_v43  ;;  %11875 = vmatpush1.bf16.msra.mxu0 %v14332_v41  ;;  %v15394_v56 = vpack.c.bf16 %v15562_v61, %v15561_v12  ;;  %11657 = vmatprep.subr.bf16.mxu1 %v14355_v53  ;;  %v14405_v1 = vcombine.high %v3624_v28, %v3636_v3  ;;  %v3647_v41 = vld [vmem:[#allocation5 + $0xb70] sm:$0xff]  ;;  %v3660_v52 = vld [vmem:[#allocation5 + $0xbd8] sm:$0xff] }
 0x5eb   : > { %13609 = vst [vmem:[%s18044_s9 + $0x2b0] sm:$0xff] %v15393_v57  ;;  %11876 = vmatprep.subr.bf16.mxu0 %v14357_v7  ;;  %v14402_v16 = vcombine.low %v3623_v36, %v3635_v55  ;;  %v14404_v8 = vcombine.low %v3624_v28, %v3636_v3  ;;  %v14427_v58 = vcombine.high %v3647_v41, %v3659_v24  ;;  %v3671_v20 = vld [vmem:[#allocation5 + $0xc30] sm:$0xff]  ;;  %v3672_v33 = vld [vmem:[#allocation5 + $0xc38] sm:$0xff] }
 0x5ec   : > { %13610 = vst [vmem:[%s18044_s9 + $0x2b8] sm:$0xff] %v15394_v56  ;;  %v14429_v53 = vcombine.high %v3648_v54, %v3660_v52  ;;  %v3683_v12 = vld [vmem:[#allocation5 + $0xc90] sm:$0xff]  ;;  %v3684_v26 = vld [vmem:[#allocation5 + $0xc98] sm:$0xff]  ;;  %v14426_v7 = vcombine.low %v3647_v41, %v3659_v24  ;;  %v14428_v40 = vcombine.low %v3648_v54, %v3660_v52 }
 0x5ed   : > { %11658 = vmatpush1.bf16.msra.mxu1 %v14354_v51  ;;  %v14451_v48 = vcombine.high %v3671_v20, %v3683_v12  ;;  %v14453_v43 = vcombine.high %v3672_v33, %v3684_v26  ;;  %v3695_v61 = vld [vmem:[#allocation5 + $0xcf0] sm:$0xff]  ;;  %v3696_v59 = vld [vmem:[#allocation5 + $0xcf8] sm:$0xff]  ;;  %v14450_v51 = vcombine.low %v3671_v20, %v3683_v12  ;;  %v14452_v56 = vcombine.low %v3672_v33, %v3684_v26 }
 0x5ee   : > { %11877 = vmatpush1.bf16.msra.mxu0 %v14356_v5  ;;  %11659 = vmatprep.subr.bf16.mxu1 %v14379_v31  ;;  %v3707_v32 = vld [vmem:[#allocation5 + $0xd50] sm:$0xff]  ;;  %v3708_v57 = vld [vmem:[#allocation5 + $0xd58] sm:$0xff] }
 0x5ef   : > { %11878 = vmatprep.subr.bf16.mxu0 %v14381_v46  ;;  %v14475_v5 = vcombine.high %v3695_v61, %v3707_v32  ;;  %v14477_v31 = vcombine.high %v3696_v59, %v3708_v57  ;;  %v3719_v46 = vld [vmem:[#allocation5 + $0xdb0] sm:$0xff]  ;;  %v3720_v55 = vld [vmem:[#allocation5 + $0xdb8] sm:$0xff]  ;;  %v14474_v3 = vcombine.low %v3695_v61, %v3707_v32 }
 0x5f0   : > { %v3731_v36 = vld [vmem:[#allocation5 + $0xe10] sm:$0xff]  ;;  %v3732_v28 = vld [vmem:[#allocation5 + $0xe18] sm:$0xff] }
 0x5f1   : > { %11660 = vmatpush1.bf16.msra.mxu1 %v14378_v47  ;;  %v14476_v47 = vcombine.low %v3696_v59, %v3708_v57  ;;  %v3755_v41 = vld [vmem:[#allocation5 + $0xed0] sm:$0xff]  ;;  %v3744_v24 = vld [vmem:[#allocation5 + $0xe78] sm:$0xff]  ;;  %v14498_v52 = vcombine.low %v3719_v46, %v3731_v36 }
 0x5f2   : > { %11879 = vmatpush1.bf16.msra.mxu0 %v14380_v62  ;;  %11661 = vmatprep.subr.bf16.mxu1 %v14403_v29  ;;  %v14499_v62 = vcombine.high %v3719_v46, %v3731_v36  ;;  %v14501_v29 = vcombine.high %v3720_v55, %v3732_v28  ;;  %v3756_v54 = vld [vmem:[#allocation5 + $0xed8] sm:$0xff]  ;;  %v3779_v20 = vld [vmem:[#allocation5 + $0xf90] sm:$0xff] }
 0x5f3   : > { %11880 = vmatprep.subr.bf16.mxu0 %v14405_v1  ;;  %v3743_v1 = vld [vmem:[#allocation5 + $0xe70] sm:$0xff]  ;;  %v3768_v12 = vld [vmem:[#allocation5 + $0xf38] sm:$0xff] }
 0x5f4   : > { %v3780_v33 = vld [vmem:[#allocation5 + $0xf98] sm:$0xff]  ;;  %v14522_v26 = vcombine.low %v3743_v1, %v3755_v41  ;;  %v3803_v61 = vld [vmem:[#allocation5 + $0x1050] sm:$0xff] }
 0x5f5   : > { %11662 = vmatpush1.bf16.msra.mxu1 %v14402_v16  ;;  %v14500_v16 = vcombine.low %v3720_v55, %v3732_v28  ;;  %v3792_v32 = vld [vmem:[#allocation5 + $0xff8] sm:$0xff]  ;;  %v3827_v46 = vld [vmem:[#allocation5 + $0x1110] sm:$0xff] }
 0x5f6   : > { %11881 = vmatpush1.bf16.msra.mxu0 %v14404_v8  ;;  %11663 = vmatprep.subr.bf16.mxu1 %v14427_v58  ;;  %v14523_v8 = vcombine.high %v3743_v1, %v3755_v41  ;;  %v14525_v58 = vcombine.high %v3744_v24, %v3756_v54  ;;  %v3804_v59 = vld [vmem:[#allocation5 + $0x1058] sm:$0xff]  ;;  %v3851_v1 = vld [vmem:[#allocation5 + $0x11d0] sm:$0xff] }
 0x5f7   : > { %11882 = vmatprep.subr.bf16.mxu0 %v14429_v53  ;;  %v3767_v53 = vld [vmem:[#allocation5 + $0xf30] sm:$0xff]  ;;  %v3816_v36 = vld [vmem:[#allocation5 + $0x10b8] sm:$0xff] }
 0x5f8   : > { %v14546_v57 = vcombine.low %v3767_v53, %v3779_v20  ;;  %v3828_v55 = vld [vmem:[#allocation5 + $0x1118] sm:$0xff] }
 0x5f9   : > { %11664 = vmatpush1.bf16.msra.mxu1 %v14426_v7  ;;  %v14524_v7 = vcombine.low %v3744_v24, %v3756_v54  ;;  %v3840_v41 = vld [vmem:[#allocation5 + $0x1178] sm:$0xff] }
 0x5fa   : > { %11883 = vmatpush1.bf16.msra.mxu0 %v14428_v40  ;;  %11706 = vmatprep.subr.bf16.mxu1 %v14451_v48  ;;  %v14547_v40 = vcombine.high %v3767_v53, %v3779_v20  ;;  %v14549_v48 = vcombine.high %v3768_v12, %v3780_v33  ;;  %v3852_v24 = vld [vmem:[#allocation5 + $0x11d8] sm:$0xff]  ;;  %v3875_v53 = vld [vmem:[#allocation5 + $0x1290] sm:$0xff] }
 0x5fb   : > { %11925 = vmatprep.subr.bf16.mxu0 %v14453_v43  ;;  %v3791_v43 = vld [vmem:[#allocation5 + $0xff0] sm:$0xff]  ;;  %v3864_v20 = vld [vmem:[#allocation5 + $0x1238] sm:$0xff] }
 0x5fc   : > { %11666 = vmatmul.mubr.bf16.vlgmr.msra.gmra.mrb[80].mxu1 %v17764_v38  ;;  %v14570_v28 = vcombine.low %v3791_v43, %v3803_v61 }
 0x5fd   : > { %11885 = vmatmul.mubr.bf16.vlgmr.msra.gmra.mrb[80].mxu0 %v17764_v38  ;;  %11675 = vmatprep.mubr.bf16.mxu1 %v17808_v49 }
 0x5fe   : > { %11707 = vmatpush1.bf16.msra.mxu1 %v14450_v51  ;;  %11894 = vmatprep.mubr.bf16.mxu0 %v17808_v49  ;;  %v14548_v51 = vcombine.low %v3768_v12, %v3780_v33  ;;  %v3876_v12 = vld [vmem:[#allocation5 + $0x1298] sm:$0xff] }
 0x5ff   : > { %11926 = vmatpush1.bf16.msra.mxu0 %v14452_v56  ;;  %11708 = vmatprep.subr.bf16.mxu1 %v14475_v5  ;;  %v14571_v56 = vcombine.high %v3791_v43, %v3803_v61  ;;  %v14573_v5 = vcombine.high %v3792_v32, %v3804_v59  ;;  %v3899_v43 = vld [vmem:[#allocation5 + $0x1350] sm:$0xff]  ;;  %v3888_v61 = vld [vmem:[#allocation5 + $0x12f8] sm:$0xff] }
 0x600   : > { %11927 = vmatprep.subr.bf16.mxu0 %v14477_v31  ;;  %v3815_v31 = vld [vmem:[#allocation5 + $0x10b0] sm:$0xff] }
 0x601   : > { %v14594_v54 = vcombine.low %v3815_v31, %v3827_v46 }
 0x602   : > { %11709 = vmatpush1.bf16.msra.mxu1 %v14474_v3  ;;  %v14572_v3 = vcombine.low %v3792_v32, %v3804_v59  ;;  %v3900_v32 = vld [vmem:[#allocation5 + $0x1358] sm:$0xff] }
 0x603   : > { %11928 = vmatpush1.bf16.msra.mxu0 %v14476_v47  ;;  %11710 = vmatprep.subr.bf16.mxu1 %v14499_v62  ;;  %v14595_v47 = vcombine.high %v3815_v31, %v3827_v46  ;;  %v14597_v62 = vcombine.high %v3816_v36, %v3828_v55  ;;  %v3923_v31 = vld [vmem:[#allocation5 + $0x1410] sm:$0xff]  ;;  %v3912_v46 = vld [vmem:[#allocation5 + $0x13b8] sm:$0xff] }
 0x604   : > { %11676 = vmatmul.mubr.bf16.gmra.mrb[84].mxu1 %v17810_v27  ;;  %11929 = vmatprep.subr.bf16.mxu0 %v14501_v29  ;;  %v3839_v29 = vld [vmem:[#allocation5 + $0x1170] sm:$0xff] }
 0x605   : > { %11895 = vmatmul.mubr.bf16.gmra.mrb[84].mxu0 %v17810_v27  ;;  %11685 = vmatprep.mubr.bf16.mxu1 %v17854_v30  ;;  %v14618_v33 = vcombine.low %v3839_v29, %v3851_v1 }
 0x606   : > { %11711 = vmatpush1.bf16.msra.mxu1 %v14498_v52  ;;  %11904 = vmatprep.mubr.bf16.mxu0 %v17854_v30  ;;  %v14596_v52 = vcombine.low %v3816_v36, %v3828_v55  ;;  %v3924_v36 = vld [vmem:[#allocation5 + $0x1418] sm:$0xff] }
 0x607   : > { %11930 = vmatpush1.bf16.msra.mxu0 %v14500_v16  ;;  %11712 = vmatprep.subr.bf16.mxu1 %v14523_v8  ;;  %v14619_v16 = vcombine.high %v3839_v29, %v3851_v1  ;;  %v14621_v8 = vcombine.high %v3840_v41, %v3852_v24  ;;  %v3947_v29 = vld [vmem:[#allocation5 + $0x14d0] sm:$0xff]  ;;  %v3936_v1 = vld [vmem:[#allocation5 + $0x1478] sm:$0xff] }
 0x608   : > { %11931 = vmatprep.subr.bf16.mxu0 %v14525_v58  ;;  %v3863_v58 = vld [vmem:[#allocation5 + $0x1230] sm:$0xff] }
 0x609   : > { %v14642_v59 = vcombine.low %v3863_v58, %v3875_v53 }
 0x60a   : > { %11713 = vmatpush1.bf16.msra.mxu1 %v14522_v26  ;;  %v14620_v26 = vcombine.low %v3840_v41, %v3852_v24  ;;  %v3948_v41 = vld [vmem:[#allocation5 + $0x14d8] sm:$0xff] }
 0x60b   : > { %11932 = vmatpush1.bf16.msra.mxu0 %v14524_v7  ;;  %11714 = vmatprep.subr.bf16.mxu1 %v14547_v40  ;;  %v14643_v7 = vcombine.high %v3863_v58, %v3875_v53  ;;  %v14645_v40 = vcombine.high %v3864_v20, %v3876_v12  ;;  %v3971_v58 = vld [vmem:[#allocation5 + $0x1590] sm:$0xff]  ;;  %v3960_v53 = vld [vmem:[#allocation5 + $0x1538] sm:$0xff] }
 0x60c   : > { %11686 = vmatmul.mubr.bf16.gmra.mrb[88].mxu1 %v17862_v34  ;;  %11933 = vmatprep.subr.bf16.mxu0 %v14549_v48  ;;  %v3887_v48 = vld [vmem:[#allocation5 + $0x12f0] sm:$0xff] }
 0x60d   : > { %11905 = vmatmul.mubr.bf16.gmra.mrb[88].mxu0 %v17862_v34  ;;  %11695 = vmatprep.mubr.bf16.mxu1 %v17908_v22  ;;  %v14666_v55 = vcombine.low %v3887_v48, %v3899_v43 }
 0x60e   : > { %11715 = vmatpush1.bf16.msra.mxu1 %v14546_v57  ;;  %11914 = vmatprep.mubr.bf16.mxu0 %v17908_v22  ;;  %v14644_v57 = vcombine.low %v3864_v20, %v3876_v12  ;;  %v3972_v20 = vld [vmem:[#allocation5 + $0x1598] sm:$0xff] }
 0x60f   : > { %11934 = vmatpush1.bf16.msra.mxu0 %v14548_v51  ;;  %11716 = vmatprep.subr.bf16.mxu1 %v14571_v56  ;;  %v14667_v51 = vcombine.high %v3887_v48, %v3899_v43  ;;  %v14669_v56 = vcombine.high %v3888_v61, %v3900_v32  ;;  %v3995_v48 = vld [vmem:[#allocation5 + $0x1650] sm:$0xff]  ;;  %v3984_v43 = vld [vmem:[#allocation5 + $0x15f8] sm:$0xff] }
 0x610   : > { %11935 = vmatprep.subr.bf16.mxu0 %v14573_v5  ;;  %v3911_v5 = vld [vmem:[#allocation5 + $0x13b0] sm:$0xff] }
 0x611   : > { %v14690_v24 = vcombine.low %v3911_v5, %v3923_v31 }
 0x612   : > { %11717 = vmatpush1.bf16.msra.mxu1 %v14570_v28  ;;  %v14668_v28 = vcombine.low %v3888_v61, %v3900_v32  ;;  %v3996_v61 = vld [vmem:[#allocation5 + $0x1658] sm:$0xff] }
 0x613   : > { %11936 = vmatpush1.bf16.msra.mxu0 %v14572_v3  ;;  %11718 = vmatprep.subr.bf16.mxu1 %v14595_v47  ;;  %v14691_v3 = vcombine.high %v3911_v5, %v3923_v31  ;;  %v14693_v47 = vcombine.high %v3912_v46, %v3924_v36  ;;  %v4019_v5 = vld [vmem:[#allocation5 + $0x1710] sm:$0xff]  ;;  %v4008_v31 = vld [vmem:[#allocation5 + $0x16b8] sm:$0xff] }
 0x614   : > { %11696 = vmatmul.mubr.bf16.gmra.mrb[92].mxu1 %v17914_v50  ;;  %11937 = vmatprep.subr.bf16.mxu0 %v14597_v62  ;;  %v3935_v62 = vld [vmem:[#allocation5 + $0x1470] sm:$0xff] }
 0x615   : > { %11915 = vmatmul.mubr.bf16.gmra.mrb[92].mxu0 %v17914_v50  ;;  %11738 = vmatprep.mubr.bf16.mxu1 %v17926_v15  ;;  %v14714_v12 = vcombine.low %v3935_v62, %v3947_v29 }
 0x616   : > { %11719 = vmatpush1.bf16.msra.mxu1 %v14594_v54  ;;  %11957 = vmatprep.mubr.bf16.mxu0 %v17926_v15  ;;  %v14692_v54 = vcombine.low %v3912_v46, %v3924_v36  ;;  %v4020_v46 = vld [vmem:[#allocation5 + $0x1718] sm:$0xff] }
 0x617   : > { %11938 = vmatpush1.bf16.msra.mxu0 %v14596_v52  ;;  %11720 = vmatprep.subr.bf16.mxu1 %v14619_v16  ;;  %v14715_v52 = vcombine.high %v3935_v62, %v3947_v29  ;;  %v14717_v16 = vcombine.high %v3936_v1, %v3948_v41  ;;  %v4043_v62 = vld [vmem:[#allocation5 + $0x17d0] sm:$0xff]  ;;  %v4032_v29 = vld [vmem:[#allocation5 + $0x1778] sm:$0xff] }
 0x618   : > { %11939 = vmatprep.subr.bf16.mxu0 %v14621_v8  ;;  %v3959_v8 = vld [vmem:[#allocation5 + $0x1530] sm:$0xff] }
 0x619   : > { %v14738_v32 = vcombine.low %v3959_v8, %v3971_v58 }
 0x61a   : > { %11721 = vmatpush1.bf16.msra.mxu1 %v14618_v33  ;;  %v14716_v33 = vcombine.low %v3936_v1, %v3948_v41  ;;  %v4044_v1 = vld [vmem:[#allocation5 + $0x17d8] sm:$0xff] }
 0x61b   : > { %11940 = vmatpush1.bf16.msra.mxu0 %v14620_v26  ;;  %11722 = vmatprep.subr.bf16.mxu1 %v14643_v7  ;;  %v14739_v26 = vcombine.high %v3959_v8, %v3971_v58  ;;  %v14741_v7 = vcombine.high %v3960_v53, %v3972_v20  ;;  %v4067_v8 = vld [vmem:[#allocation5 + $0x1890] sm:$0xff]  ;;  %v4056_v58 = vld [vmem:[#allocation5 + $0x1838] sm:$0xff] }
 0x61c   : > { %11941 = vmatprep.subr.bf16.mxu0 %v14645_v40  ;;  %v3983_v40 = vld [vmem:[#allocation5 + $0x15f0] sm:$0xff] }
 0x61d   : > { %v14762_v36 = vcombine.low %v3983_v40, %v3995_v48 }
 0x61e   : > { %11723 = vmatpush1.bf16.msra.mxu1 %v14642_v59  ;;  %v14740_v59 = vcombine.low %v3960_v53, %v3972_v20  ;;  %v4068_v53 = vld [vmem:[#allocation5 + $0x1898] sm:$0xff] }
 0x61f   : > { %11942 = vmatpush1.bf16.msra.mxu0 %v14644_v57  ;;  %11724 = vmatprep.subr.bf16.mxu1 %v14667_v51  ;;  %v14763_v57 = vcombine.high %v3983_v40, %v3995_v48  ;;  %v14765_v51 = vcombine.high %v3984_v43, %v3996_v61  ;;  %v4091_v40 = vld [vmem:[#allocation5 + $0x1950] sm:$0xff]  ;;  %v4080_v48 = vld [vmem:[#allocation5 + $0x18f8] sm:$0xff] }
 0x620   : > { %11943 = vmatprep.subr.bf16.mxu0 %v14669_v56  ;;  %v4007_v56 = vld [vmem:[#allocation5 + $0x16b0] sm:$0xff] }
 0x621   : > { %v14786_v41 = vcombine.low %v4007_v56, %v4019_v5 }
 0x622   : > { %11725 = vmatpush1.bf16.msra.mxu1 %v14666_v55  ;;  %v14764_v55 = vcombine.low %v3984_v43, %v3996_v61  ;;  %v4092_v43 = vld [vmem:[#allocation5 + $0x1958] sm:$0xff] }
 0x623   : > { %11944 = vmatpush1.bf16.msra.mxu0 %v14668_v28  ;;  %11726 = vmatprep.subr.bf16.mxu1 %v14691_v3  ;;  %v14787_v28 = vcombine.high %v4007_v56, %v4019_v5  ;;  %v14789_v3 = vcombine.high %v4008_v31, %v4020_v46  ;;  %v4115_v56 = vld [vmem:[#allocation5 + $0x1a10] sm:$0xff]  ;;  %v4104_v5 = vld [vmem:[#allocation5 + $0x19b8] sm:$0xff] }
 0x624   : > { %11945 = vmatprep.subr.bf16.mxu0 %v14693_v47  ;;  %v4031_v47 = vld [vmem:[#allocation5 + $0x1770] sm:$0xff] }
 0x625   : > { %v14810_v20 = vcombine.low %v4031_v47, %v4043_v62 }
 0x626   : > { %11727 = vmatpush1.bf16.msra.mxu1 %v14690_v24  ;;  %v14788_v24 = vcombine.low %v4008_v31, %v4020_v46  ;;  %v4116_v31 = vld [vmem:[#allocation5 + $0x1a18] sm:$0xff] }
 0x627   : > { %11946 = vmatpush1.bf16.msra.mxu0 %v14692_v54  ;;  %11728 = vmatprep.subr.bf16.mxu1 %v14715_v52  ;;  %v14811_v54 = vcombine.high %v4031_v47, %v4043_v62  ;;  %v14813_v52 = vcombine.high %v4032_v29, %v4044_v1  ;;  %v4139_v47 = vld [vmem:[#allocation5 + $0x1ad0] sm:$0xff]  ;;  %v4128_v62 = vld [vmem:[#allocation5 + $0x1a78] sm:$0xff] }
 0x628   : > { %11947 = vmatprep.subr.bf16.mxu0 %v14717_v16  ;;  %v4055_v16 = vld [vmem:[#allocation5 + $0x1830] sm:$0xff] }
 0x629   : > { %v14834_v61 = vcombine.low %v4055_v16, %v4067_v8 }
 0x62a   : > { %11729 = vmatpush1.bf16.msra.mxu1 %v14714_v12  ;;  %v14812_v12 = vcombine.low %v4032_v29, %v4044_v1  ;;  %v4140_v29 = vld [vmem:[#allocation5 + $0x1ad8] sm:$0xff] }
 0x62b   : > { %11948 = vmatpush1.bf16.msra.mxu0 %v14716_v33  ;;  %11730 = vmatprep.subr.bf16.mxu1 %v14739_v26  ;;  %v14835_v33 = vcombine.high %v4055_v16, %v4067_v8  ;;  %v14837_v26 = vcombine.high %v4056_v58, %v4068_v53  ;;  %v4163_v16 = vld [vmem:[#allocation5 + $0x1b90] sm:$0xff]  ;;  %v4152_v8 = vld [vmem:[#allocation5 + $0x1b38] sm:$0xff] }
 0x62c   : > { %11949 = vmatprep.subr.bf16.mxu0 %v14741_v7  ;;  %v4079_v7 = vld [vmem:[#allocation5 + $0x18f0] sm:$0xff] }
 0x62d   : > { %v14858_v46 = vcombine.low %v4079_v7, %v4091_v40 }
 0x62e   : > { %11731 = vmatpush1.bf16.msra.mxu1 %v14738_v32  ;;  %v14836_v32 = vcombine.low %v4056_v58, %v4068_v53  ;;  %v4164_v58 = vld [vmem:[#allocation5 + $0x1b98] sm:$0xff] }
 0x62f   : > { %11950 = vmatpush1.bf16.msra.mxu0 %v14740_v59  ;;  %11732 = vmatprep.subr.bf16.mxu1 %v14763_v57  ;;  %v14859_v59 = vcombine.high %v4079_v7, %v4091_v40  ;;  %v14861_v57 = vcombine.high %v4080_v48, %v4092_v43  ;;  %v4187_v7 = vld [vmem:[#allocation5 + $0x1c50] sm:$0xff]  ;;  %v4176_v40 = vld [vmem:[#allocation5 + $0x1bf8] sm:$0xff] }
 0x630   : > { %11951 = vmatprep.subr.bf16.mxu0 %v14765_v51  ;;  %v4103_v51 = vld [vmem:[#allocation5 + $0x19b0] sm:$0xff] }
 0x631   : > { %v14882_v1 = vcombine.low %v4103_v51, %v4115_v56 }
 0x632   : > { %11733 = vmatpush1.bf16.msra.mxu1 %v14762_v36  ;;  %v14860_v36 = vcombine.low %v4080_v48, %v4092_v43  ;;  %v4188_v48 = vld [vmem:[#allocation5 + $0x1c58] sm:$0xff] }
 0x633   : > { %11952 = vmatpush1.bf16.msra.mxu0 %v14764_v55  ;;  %11734 = vmatprep.subr.bf16.mxu1 %v14787_v28  ;;  %v14883_v55 = vcombine.high %v4103_v51, %v4115_v56  ;;  %v14885_v28 = vcombine.high %v4104_v5, %v4116_v31  ;;  %v4211_v51 = vld [vmem:[#allocation5 + $0x1d10] sm:$0xff]  ;;  %v4200_v56 = vld [vmem:[#allocation5 + $0x1cb8] sm:$0xff] }
 0x634   : > { %11953 = vmatprep.subr.bf16.mxu0 %v14789_v3  ;;  %v4127_v3 = vld [vmem:[#allocation5 + $0x1a70] sm:$0xff] }
 0x635   : > { %v14906_v53 = vcombine.low %v4127_v3, %v4139_v47 }
 0x636   : > { %11735 = vmatpush1.bf16.msra.mxu1 %v14786_v41  ;;  %v14884_v41 = vcombine.low %v4104_v5, %v4116_v31  ;;  %v4212_v5 = vld [vmem:[#allocation5 + $0x1d18] sm:$0xff] }
 0x637   : > { %11954 = vmatpush1.bf16.msra.mxu0 %v14788_v24  ;;  %11736 = vmatprep.subr.bf16.mxu1 %v14811_v54  ;;  %v14907_v24 = vcombine.high %v4127_v3, %v4139_v47  ;;  %v14909_v54 = vcombine.high %v4128_v62, %v4140_v29  ;;  %v4235_v3 = vld [vmem:[#allocation5 + $0x1dd0] sm:$0xff]  ;;  %v4224_v47 = vld [vmem:[#allocation5 + $0x1d78] sm:$0xff] }
 0x638   : > { %11955 = vmatprep.subr.bf16.mxu0 %v14813_v52  ;;  %v4151_v52 = vld [vmem:[#allocation5 + $0x1b30] sm:$0xff] }
 0x639   : > { %v14930_v43 = vcombine.low %v4151_v52, %v4163_v16 }
 0x63a   : > { %11737 = vmatpush1.bf16.msra.mxu1 %v14810_v20  ;;  %v14908_v20 = vcombine.low %v4128_v62, %v4140_v29  ;;  %v4236_v62 = vld [vmem:[#allocation5 + $0x1dd8] sm:$0xff] }
 0x63b   : > { %11956 = vmatpush1.bf16.msra.mxu0 %v14812_v12  ;;  %11779 = vmatprep.subr.bf16.mxu1 %v14835_v33  ;;  %v14931_v12 = vcombine.high %v4151_v52, %v4163_v16  ;;  %v14933_v33 = vcombine.high %v4152_v8, %v4164_v58  ;;  %v4259_v52 = vld [vmem:[#allocation5 + $0x1e90] sm:$0xff]  ;;  %v4248_v16 = vld [vmem:[#allocation5 + $0x1e38] sm:$0xff] }
 0x63c   : > { %11998 = vmatprep.subr.bf16.mxu0 %v14837_v26  ;;  %v4175_v26 = vld [vmem:[#allocation5 + $0x1bf0] sm:$0xff] }
 0x63d   : > { %11739 = vmatmul.mubr.bf16.vlgmr.msra.gmra.mrb[80].mxu1 %v17766_v35  ;;  %v14954_v31 = vcombine.low %v4175_v26, %v4187_v7 }
 0x63e   : > { %11958 = vmatmul.mubr.bf16.vlgmr.msra.gmra.mrb[80].mxu0 %v17766_v35  ;;  %11748 = vmatprep.mubr.bf16.mxu1 %v17812_v6 }
 0x63f   : > { %11780 = vmatpush1.bf16.msra.mxu1 %v14834_v61  ;;  %11967 = vmatprep.mubr.bf16.mxu0 %v17812_v6  ;;  %v14932_v61 = vcombine.low %v4152_v8, %v4164_v58  ;;  %v4260_v8 = vld [vmem:[#allocation5 + $0x1e98] sm:$0xff] }
 0x640   : > { %11999 = vmatpush1.bf16.msra.mxu0 %v14836_v32  ;;  %11781 = vmatprep.subr.bf16.mxu1 %v14859_v59  ;;  %v14955_v32 = vcombine.high %v4175_v26, %v4187_v7  ;;  %v14957_v59 = vcombine.high %v4176_v40, %v4188_v48  ;;  %v4283_v26 = vld [vmem:[#allocation5 + $0x1f50] sm:$0xff]  ;;  %v4272_v7 = vld [vmem:[#allocation5 + $0x1ef8] sm:$0xff] }
 0x641   : > { %12000 = vmatprep.subr.bf16.mxu0 %v14861_v57  ;;  %v4199_v57 = vld [vmem:[#allocation5 + $0x1cb0] sm:$0xff] }
 0x642   : > { %v14978_v29 = vcombine.low %v4199_v57, %v4211_v51 }
 0x643   : > { %11782 = vmatpush1.bf16.msra.mxu1 %v14858_v46  ;;  %v14956_v46 = vcombine.low %v4176_v40, %v4188_v48  ;;  %v4284_v40 = vld [vmem:[#allocation5 + $0x1f58] sm:$0xff] }
 0x644   : > { %12001 = vmatpush1.bf16.msra.mxu0 %v14860_v36  ;;  %11783 = vmatprep.subr.bf16.mxu1 %v14883_v55  ;;  %v14979_v36 = vcombine.high %v4199_v57, %v4211_v51  ;;  %v14981_v55 = vcombine.high %v4200_v56, %v4212_v5  ;;  %v4307_v57 = vld [vmem:[#allocation5 + $0x2010] sm:$0xff]  ;;  %v4296_v51 = vld [vmem:[#allocation5 + $0x1fb8] sm:$0xff] }
 0x645   : > { %11749 = vmatmul.mubr.bf16.gmra.mrb[84].mxu1 %v17818_v9  ;;  %12002 = vmatprep.subr.bf16.mxu0 %v14885_v28  ;;  %v4223_v28 = vld [vmem:[#allocation5 + $0x1d70] sm:$0xff] }
 0x646   : > { %11968 = vmatmul.mubr.bf16.gmra.mrb[84].mxu0 %v17818_v9  ;;  %11758 = vmatprep.mubr.bf16.mxu1 %v17860_v25  ;;  %v15002_v58 = vcombine.low %v4223_v28, %v4235_v3 }
 0x647   : > { %11784 = vmatpush1.bf16.msra.mxu1 %v14882_v1  ;;  %11977 = vmatprep.mubr.bf16.mxu0 %v17860_v25  ;;  %v14980_v1 = vcombine.low %v4200_v56, %v4212_v5  ;;  %v4308_v56 = vld [vmem:[#allocation5 + $0x2018] sm:$0xff] }
 0x648   : > { %12003 = vmatpush1.bf16.msra.mxu0 %v14884_v41  ;;  %11785 = vmatprep.subr.bf16.mxu1 %v14907_v24  ;;  %v15003_v41 = vcombine.high %v4223_v28, %v4235_v3  ;;  %v15005_v24 = vcombine.high %v4224_v47, %v4236_v62  ;;  %v4331_v28 = vld [vmem:[#allocation5 + $0x20d0] sm:$0xff]  ;;  %v4320_v3 = vld [vmem:[#allocation5 + $0x2078] sm:$0xff] }
 0x649   : > { %12004 = vmatprep.subr.bf16.mxu0 %v14909_v54  ;;  %v4247_v54 = vld [vmem:[#allocation5 + $0x1e30] sm:$0xff] }
 0x64a   : > { %v15026_v48 = vcombine.low %v4247_v54, %v4259_v52 }
 0x64b   : > { %11786 = vmatpush1.bf16.msra.mxu1 %v14906_v53  ;;  %v15004_v53 = vcombine.low %v4224_v47, %v4236_v62  ;;  %v4332_v47 = vld [vmem:[#allocation5 + $0x20d8] sm:$0xff] }
 0x64c   : > { %12005 = vmatpush1.bf16.msra.mxu0 %v14908_v20  ;;  %11787 = vmatprep.subr.bf16.mxu1 %v14931_v12  ;;  %v15027_v20 = vcombine.high %v4247_v54, %v4259_v52  ;;  %v15029_v12 = vcombine.high %v4248_v16, %v4260_v8  ;;  %v4355_v54 = vld [vmem:[#allocation5 + $0x2190] sm:$0xff]  ;;  %v4344_v52 = vld [vmem:[#allocation5 + $0x2138] sm:$0xff] }
 0x64d   : > { %11759 = vmatmul.mubr.bf16.gmra.mrb[88].mxu1 %v17868_v10  ;;  %12006 = vmatprep.subr.bf16.mxu0 %v14933_v33  ;;  %v4271_v33 = vld [vmem:[#allocation5 + $0x1ef0] sm:$0xff] }
 0x64e   : > { %11978 = vmatmul.mubr.bf16.gmra.mrb[88].mxu0 %v17868_v10  ;;  %11768 = vmatprep.mubr.bf16.mxu1 %v17912_v19  ;;  %v15050_v5 = vcombine.low %v4271_v33, %v4283_v26 }
 0x64f   : > { %11788 = vmatpush1.bf16.msra.mxu1 %v14930_v43  ;;  %11987 = vmatprep.mubr.bf16.mxu0 %v17912_v19  ;;  %v15028_v43 = vcombine.low %v4248_v16, %v4260_v8  ;;  %v4356_v16 = vld [vmem:[#allocation5 + $0x2198] sm:$0xff] }
 0x650   : > { %12007 = vmatpush1.bf16.msra.mxu0 %v14932_v61  ;;  %11789 = vmatprep.subr.bf16.mxu1 %v14955_v32  ;;  %v15051_v61 = vcombine.high %v4271_v33, %v4283_v26  ;;  %v15053_v32 = vcombine.high %v4272_v7, %v4284_v40  ;;  %v4379_v33 = vld [vmem:[#allocation5 + $0x2250] sm:$0xff]  ;;  %v4368_v26 = vld [vmem:[#allocation5 + $0x21f8] sm:$0xff] }
 0x651   : > { %12008 = vmatprep.subr.bf16.mxu0 %v14957_v59  ;;  %v4295_v59 = vld [vmem:[#allocation5 + $0x1fb0] sm:$0xff] }
 0x652   : > { %v15074_v62 = vcombine.low %v4295_v59, %v4307_v57 }
 0x653   : > { %11790 = vmatpush1.bf16.msra.mxu1 %v14954_v31  ;;  %v15052_v31 = vcombine.low %v4272_v7, %v4284_v40  ;;  %v4380_v7 = vld [vmem:[#allocation5 + $0x2258] sm:$0xff] }
 0x654   : > { %12009 = vmatpush1.bf16.msra.mxu0 %v14956_v46  ;;  %11791 = vmatprep.subr.bf16.mxu1 %v14979_v36  ;;  %v15075_v46 = vcombine.high %v4295_v59, %v4307_v57  ;;  %v15077_v36 = vcombine.high %v4296_v51, %v4308_v56  ;;  %v4403_v59 = vld [vmem:[#allocation5 + $0x2310] sm:$0xff]  ;;  %v4392_v57 = vld [vmem:[#allocation5 + $0x22b8] sm:$0xff] }
 0x655   : > { %11769 = vmatmul.mubr.bf16.gmra.mrb[92].mxu1 %v17916_v13  ;;  %12010 = vmatprep.subr.bf16.mxu0 %v14981_v55  ;;  %v4319_v55 = vld [vmem:[#allocation5 + $0x2070] sm:$0xff] }
 0x656   : > { %11988 = vmatmul.mubr.bf16.gmra.mrb[92].mxu0 %v17916_v13  ;;  %11811 = vmatprep.mubr.bf16.mxu1 %v17772_v23  ;;  %v15098_v8 = vcombine.low %v4319_v55, %v4331_v28 }
 0x657   : > { %11792 = vmatpush1.bf16.msra.mxu1 %v14978_v29  ;;  %12030 = vmatprep.mubr.bf16.mxu0 %v17772_v23  ;;  %v15076_v29 = vcombine.low %v4296_v51, %v4308_v56  ;;  %v4404_v51 = vld [vmem:[#allocation5 + $0x2318] sm:$0xff] }
 0x658   : > { %12011 = vmatpush1.bf16.msra.mxu0 %v14980_v1  ;;  %11793 = vmatprep.subr.bf16.mxu1 %v15003_v41  ;;  %v15099_v1 = vcombine.high %v4319_v55, %v4331_v28  ;;  %v15101_v41 = vcombine.high %v4320_v3, %v4332_v47  ;;  %v4427_v55 = vld [vmem:[#allocation5 + $0x23d0] sm:$0xff]  ;;  %v4416_v28 = vld [vmem:[#allocation5 + $0x2378] sm:$0xff] }
 0x659   : > { %12012 = vmatprep.subr.bf16.mxu0 %v15005_v24  ;;  %v4343_v24 = vld [vmem:[#allocation5 + $0x2130] sm:$0xff] }
 0x65a   : > { %v15122_v40 = vcombine.low %v4343_v24, %v4355_v54 }
 0x65b   : > { %11794 = vmatpush1.bf16.msra.mxu1 %v15002_v58  ;;  %v15100_v58 = vcombine.low %v4320_v3, %v4332_v47  ;;  %v4428_v3 = vld [vmem:[#allocation5 + $0x23d8] sm:$0xff] }
 0x65c   : > { %12013 = vmatpush1.bf16.msra.mxu0 %v15004_v53  ;;  %11795 = vmatprep.subr.bf16.mxu1 %v15027_v20  ;;  %v15123_v53 = vcombine.high %v4343_v24, %v4355_v54  ;;  %v15125_v20 = vcombine.high %v4344_v52, %v4356_v16  ;;  %v3301_v24 = vld [vmem:[#allocation5 + $0xa0] sm:$0xff]  ;;  %v3290_v54 = vld [vmem:[#allocation5 + $0x48] sm:$0xff] }
 0x65d   : > { %12014 = vmatprep.subr.bf16.mxu0 %v15029_v12  ;;  %v4367_v12 = vld [vmem:[#allocation5 + $0x21f0] sm:$0xff] }
 0x65e   : > { %v15146_v56 = vcombine.low %v4367_v12, %v4379_v33 }
 0x65f   : > { %11796 = vmatpush1.bf16.msra.mxu1 %v15026_v48  ;;  %v15124_v48 = vcombine.low %v4344_v52, %v4356_v16  ;;  %v3302_v52 = vld [vmem:[#allocation5 + $0xa8] sm:$0xff] }
 0x660   : > { %12015 = vmatpush1.bf16.msra.mxu0 %v15028_v43  ;;  %11797 = vmatprep.subr.bf16.mxu1 %v15051_v61  ;;  %v15147_v43 = vcombine.high %v4367_v12, %v4379_v33  ;;  %v15149_v61 = vcombine.high %v4368_v26, %v4380_v7  ;;  %v3325_v12 = vld [vmem:[#allocation5 + $0x160] sm:$0xff]  ;;  %v3314_v33 = vld [vmem:[#allocation5 + $0x108] sm:$0xff] }
 0x661   : > { %12016 = vmatprep.subr.bf16.mxu0 %v15053_v32  ;;  %v4391_v32 = vld [vmem:[#allocation5 + $0x22b0] sm:$0xff] }
 0x662   : > { %v15170_v47 = vcombine.low %v4391_v32, %v4403_v59 }
 0x663   : > { %11798 = vmatpush1.bf16.msra.mxu1 %v15050_v5  ;;  %v15148_v5 = vcombine.low %v4368_v26, %v4380_v7  ;;  %v3326_v26 = vld [vmem:[#allocation5 + $0x168] sm:$0xff] }
 0x664   : > { %12017 = vmatpush1.bf16.msra.mxu0 %v15052_v31  ;;  %11799 = vmatprep.subr.bf16.mxu1 %v15075_v46  ;;  %v15171_v31 = vcombine.high %v4391_v32, %v4403_v59  ;;  %v15173_v46 = vcombine.high %v4392_v57, %v4404_v51  ;;  %v3349_v32 = vld [vmem:[#allocation5 + $0x220] sm:$0xff]  ;;  %v3338_v59 = vld [vmem:[#allocation5 + $0x1c8] sm:$0xff] }
 0x665   : > { %12018 = vmatprep.subr.bf16.mxu0 %v15077_v36  ;;  %v4415_v36 = vld [vmem:[#allocation5 + $0x2370] sm:$0xff] }
 0x666   : > { %v15194_v16 = vcombine.low %v4415_v36, %v4427_v55 }
 0x667   : > { %11800 = vmatpush1.bf16.msra.mxu1 %v15074_v62  ;;  %v15172_v62 = vcombine.low %v4392_v57, %v4404_v51  ;;  %v3350_v57 = vld [vmem:[#allocation5 + $0x228] sm:$0xff] }
 0x668   : > { %12019 = vmatpush1.bf16.msra.mxu0 %v15076_v29  ;;  %11801 = vmatprep.subr.bf16.mxu1 %v15099_v1  ;;  %v15195_v29 = vcombine.high %v4415_v36, %v4427_v55  ;;  %v15197_v1 = vcombine.high %v4416_v28, %v4428_v3  ;;  %v3373_v36 = vld [vmem:[#allocation5 + $0x2e0] sm:$0xff]  ;;  %v3362_v55 = vld [vmem:[#allocation5 + $0x288] sm:$0xff] }
 0x669   : > { %12020 = vmatprep.subr.bf16.mxu0 %v15101_v41  ;;  %v3289_v41 = vld [vmem:[#allocation5 + $0x40] sm:$0xff] }
 0x66a   : > { %v14070_v7 = vcombine.low %v3289_v41, %v3301_v24 }
 0x66b   : > { %11802 = vmatpush1.bf16.msra.mxu1 %v15098_v8  ;;  %v15196_v8 = vcombine.low %v4416_v28, %v4428_v3  ;;  %v3374_v28 = vld [vmem:[#allocation5 + $0x2e8] sm:$0xff] }
 0x66c   : > { %12021 = vmatpush1.bf16.msra.mxu0 %v15100_v58  ;;  %11803 = vmatprep.subr.bf16.mxu1 %v15123_v53  ;;  %v14071_v58 = vcombine.high %v3289_v41, %v3301_v24  ;;  %v14073_v53 = vcombine.high %v3290_v54, %v3302_v52  ;;  %v3397_v41 = vld [vmem:[#allocation5 + $0x3a0] sm:$0xff]  ;;  %v3386_v24 = vld [vmem:[#allocation5 + $0x348] sm:$0xff] }
 0x66d   : > { %12022 = vmatprep.subr.bf16.mxu0 %v15125_v20  ;;  %v3313_v20 = vld [vmem:[#allocation5 + $0x100] sm:$0xff] }
 0x66e   : > { %v14094_v51 = vcombine.low %v3313_v20, %v3325_v12 }
 0x66f   : > { %11804 = vmatpush1.bf16.msra.mxu1 %v15122_v40  ;;  %v14072_v40 = vcombine.low %v3290_v54, %v3302_v52  ;;  %v3398_v54 = vld [vmem:[#allocation5 + $0x3a8] sm:$0xff] }
 0x670   : > { %12023 = vmatpush1.bf16.msra.mxu0 %v15124_v48  ;;  %11805 = vmatprep.subr.bf16.mxu1 %v15147_v43  ;;  %v14095_v48 = vcombine.high %v3313_v20, %v3325_v12  ;;  %v14097_v43 = vcombine.high %v3314_v33, %v3326_v26  ;;  %v3409_v20 = vld [vmem:[#allocation5 + $0x400] sm:$0xff] }
 0x671   : > { %12024 = vmatprep.subr.bf16.mxu0 %v15149_v61  ;;  %v3337_v61 = vld [vmem:[#allocation5 + $0x1c0] sm:$0xff] }
 0x672   : > { %v14118_v3 = vcombine.low %v3337_v61, %v3349_v32  ;;  %v3421_v12 = vld [vmem:[#allocation5 + $0x460] sm:$0xff] }
 0x673   : > { %11806 = vmatpush1.bf16.msra.mxu1 %v15146_v56  ;;  %v14096_v56 = vcombine.low %v3314_v33, %v3326_v26  ;;  %v3410_v26 = vld [vmem:[#allocation5 + $0x408] sm:$0xff] }
 0x674   : > { %12025 = vmatpush1.bf16.msra.mxu0 %v15148_v5  ;;  %11807 = vmatprep.subr.bf16.mxu1 %v15171_v31  ;;  %v14119_v5 = vcombine.high %v3337_v61, %v3349_v32  ;;  %v14121_v31 = vcombine.high %v3338_v59, %v3350_v57  ;;  %v14168_v61 = vcombine.low %v3386_v24, %v3398_v54 }
 0x675   : > { %12026 = vmatprep.subr.bf16.mxu0 %v15173_v46  ;;  %v3361_v46 = vld [vmem:[#allocation5 + $0x280] sm:$0xff] }
 0x676   : > { %v14142_v52 = vcombine.low %v3361_v46, %v3373_v36 }
 0x677   : > { %11808 = vmatpush1.bf16.msra.mxu1 %v15170_v47  ;;  %v14120_v47 = vcombine.low %v3338_v59, %v3350_v57  ;;  %v14191_v59 = vcombine.high %v3409_v20, %v3421_v12 }
 0x678   : > { %12027 = vmatpush1.bf16.msra.mxu0 %v15172_v62  ;;  %11809 = vmatprep.subr.bf16.mxu1 %v15195_v29  ;;  %v14143_v62 = vcombine.high %v3361_v46, %v3373_v36  ;;  %v14145_v29 = vcombine.high %v3362_v55, %v3374_v28 }
 0x679   : > { %12028 = vmatprep.subr.bf16.mxu0 %v15197_v1  ;;  %v3385_v1 = vld [vmem:[#allocation5 + $0x340] sm:$0xff] }
 0x67b   : > { %11810 = vmatpush1.bf16.msra.mxu1 %v15194_v16  ;;  %v4434_v16 = vld [vmem:[%s18818_s5 + $0x8] sm:$0xff] }
 0x67c   : > { %12029 = vmatpush1.bf16.msra.mxu0 %v15196_v8  ;;  %12071 = vmatprep.subr.bf16.mxu1 %v14071_v58  ;;  %v14144_v8 = vcombine.low %v3362_v55, %v3374_v28  ;;  %v14167_v58 = vcombine.high %v3385_v1, %v3397_v41  ;;  %v18252_v33 = vrot.slane %v4434_v16, %v18909_v45  ;;  %v3434_v28 = vld [vmem:[#allocation5 + $0x4c8] sm:$0xff] }
 0x67d   : > { %12290 = vmatprep.subr.bf16.mxu0 %v14073_v53  ;;  %v14169_v53 = vcombine.high %v3386_v24, %v3398_v54  ;;  %v18261_v32 = vrot.slane %v4434_v16, %v18912_v11  ;;  %v14190_v55 = vcombine.low %v3409_v20, %v3421_v12 }
 0x67e   : > { %11812 = vmatmul.mubr.bf16.vlgmr.msra.gmra.mrb[80].mxu1 %v17798_v4 }
 0x67f   : > { %12031 = vmatmul.mubr.bf16.vlgmr.msra.gmra.mrb[80].mxu0 %v17798_v4  ;;  %11821 = vmatprep.mubr.bf16.mxu1 %v17833_v60 }
 0x680   : > { %12040 = vmatprep.mubr.bf16.mxu0 %v17833_v60  ;;  %12072 = vmatpush1.bf16.msra.mxu1 %v14070_v7  ;;  %v3422_v7 = vld [vmem:[#allocation5 + $0x468] sm:$0xff] }
 0x681   : > { %12291 = vmatpush1.bf16.msra.mxu0 %v14072_v40  ;;  %12073 = vmatprep.subr.bf16.mxu1 %v14095_v48  ;;  %v14166_v40 = vcombine.low %v3385_v1, %v3397_v41  ;;  %v18255_v48 = vrot.slane %v4434_v16, %v18910_v14  ;;  %v14192_v1 = vcombine.low %v3410_v26, %v3422_v7 }
 0x682   : > { %12292 = vmatprep.subr.bf16.mxu0 %v14097_v43  ;;  %v18258_v43 = vrot.slane %v4434_v16, %v18911_v42 }
 0x684   : > { %12074 = vmatpush1.bf16.msra.mxu1 %v14094_v51  ;;  %v14193_v51 = vcombine.high %v3410_v26, %v3422_v7  ;;  %v3457_v7 = vld [vmem:[#allocation5 + $0x580] sm:$0xff] }
 0x685   : > { %12293 = vmatpush1.bf16.msra.mxu0 %v14096_v56  ;;  %12075 = vmatprep.subr.bf16.mxu1 %v14119_v5  ;;  %v3433_v56 = vld [vmem:[#allocation5 + $0x4c0] sm:$0xff] }
 0x686   : > { %11822 = vmatmul.mubr.bf16.gmra.mrb[84].mxu1 %v17852_v18  ;;  %12294 = vmatprep.subr.bf16.mxu0 %v14121_v31  ;;  %v3445_v5 = vld [vmem:[#allocation5 + $0x520] sm:$0xff] }
 0x687   : > { %12041 = vmatmul.mubr.bf16.gmra.mrb[84].mxu0 %v17852_v18  ;;  %11831 = vmatprep.mubr.bf16.mxu1 %v17887_v44 }
 0x688   : > { %12050 = vmatprep.mubr.bf16.mxu0 %v17887_v44  ;;  %12076 = vmatpush1.bf16.msra.mxu1 %v14118_v3  ;;  %v3446_v3 = vld [vmem:[#allocation5 + $0x528] sm:$0xff] }
 0x689   : > { %12295 = vmatpush1.bf16.msra.mxu0 %v14120_v47  ;;  %12077 = vmatprep.subr.bf16.mxu1 %v14143_v62  ;;  %v14217_v26 = vcombine.high %v3434_v28, %v3446_v3 }
 0x68a   : > { %12296 = vmatprep.subr.bf16.mxu0 %v14145_v29 }
 0x68c   : > { %12078 = vmatpush1.bf16.msra.mxu1 %v14142_v52 }
 0x68d   : > { %12297 = vmatpush1.bf16.msra.mxu0 %v14144_v8  ;;  %12079 = vmatprep.subr.bf16.mxu1 %v14167_v58  ;;  %v14215_v8 = vcombine.high %v3433_v56, %v3445_v5 }
 0x68e   : > { %11832 = vmatmul.mubr.bf16.gmra.mrb[88].mxu1 %v17906_v17  ;;  %12298 = vmatprep.subr.bf16.mxu0 %v14169_v53  ;;  %v11375_v57 = vpop.f32.mrb[64].mxu1 }
 0x68f   : > { %12051 = vmatmul.mubr.bf16.gmra.mrb[88].mxu0 %v17906_v17  ;;  %11841 = vmatprep.mubr.bf16.mxu1 %v17928_v2  ;;  %v15563_v31 = vadd.f32 %v11375_v57, %v18252_v33  ;;  %v11594_v46 = vpop.f32.mrb[64].mxu0  ;;  %v11377_v36 = vpop.f32.mrb[65].mxu1  ;;  %v3458_v57 = vld [vmem:[#allocation5 + $0x588] sm:$0xff] }
 0x690   : > { %12060 = vmatprep.mubr.bf16.mxu0 %v17928_v2  ;;  %12080 = vmatpush1.bf16.msra.mxu1 %v14166_v40  ;;  %v15579_v47 = vadd.f32 %v11594_v46, %v18255_v48  ;;  %v15564_v62 = vadd.f32 %v11377_v36, %v18258_v43  ;;  %v11596_v29 = vpop.f32.mrb[65].mxu0  ;;  %v11379_v41 = vpop.f32.mrb[66].mxu1  ;;  %v3469_v40 = vld [vmem:[#allocation5 + $0x5e0] sm:$0xff]  ;;  %v3470_v46 = vld [vmem:[#allocation5 + $0x5e8] sm:$0xff]  ;;  %v14214_v36 = vcombine.low %v3433_v56, %v3445_v5 }
 0x691   : > { %12299 = vmatpush1.bf16.msra.mxu0 %v14168_v61  ;;  %v15580_v24 = vadd.f32 %v11596_v29, %v18261_v32  ;;  %12081 = vmatprep.subr.bf16.mxu1 %v14191_v59  ;;  %v15565_v54 = vadd.f32 %v11379_v41, %v18252_v33  ;;  %v11598_v52 = vpop.f32.mrb[66].mxu0  ;;  %v11381_v16 = vpop.f32.mrb[67].mxu1  ;;  %v14239_v29 = vcombine.high %v3457_v7, %v3469_v40 }
 0x692   : > { %v15311_v58 = vpack.c.bf16 %v15564_v62, %v15563_v31  ;;  %12300 = vmatprep.subr.bf16.mxu0 %v14193_v51  ;;  %v15581_v53 = vadd.f32 %v11598_v52, %v18255_v48  ;;  %v15566_v20 = vadd.f32 %v11381_v16, %v18258_v43  ;;  %v11600_v12 = vpop.f32.mrb[67].mxu0  ;;  %v14216_v62 = vcombine.low %v3434_v28, %v3446_v3  ;;  %v3493_v52 = vld [vmem:[#allocation5 + $0x6a0] sm:$0xff]  ;;  %v3482_v28 = vld [vmem:[#allocation5 + $0x648] sm:$0xff] }
 0x693   : > { %v15312_v61 = vpack.c.bf16 %v15580_v24, %v15579_v47  ;;  %v15582_v59 = vadd.f32 %v11600_v12, %v18261_v32  ;;  %v14241_v41 = vcombine.high %v3458_v57, %v3470_v46  ;;  %v3481_v24 = vld [vmem:[#allocation5 + $0x640] sm:$0xff]  ;;  %v3494_v3 = vld [vmem:[#allocation5 + $0x6a8] sm:$0xff] }
 0x694   : > { %13527 = vst [vmem:[%s18044_s9 + $0x20] sm:$0xff] %v15311_v58  ;;  %12082 = vmatpush1.bf16.msra.mxu1 %v14190_v55  ;;  %v15323_v31 = vpack.c.bf16 %v15566_v20, %v15565_v54  ;;  %v14240_v58 = vcombine.low %v3458_v57, %v3470_v46  ;;  %v14265_v57 = vcombine.high %v3482_v28, %v3494_v3  ;;  %v3505_v46 = vld [vmem:[#allocation5 + $0x700] sm:$0xff] }
 0x695   : > { %13528 = vst [vmem:[%s18044_s9 + $0x28] sm:$0xff] %v15312_v61  ;;  %12301 = vmatpush1.bf16.msra.mxu0 %v14192_v1  ;;  %v15324_v51 = vpack.c.bf16 %v15582_v59, %v15581_v53  ;;  %12083 = vmatprep.subr.bf16.mxu1 %v14215_v8  ;;  %v14238_v1 = vcombine.low %v3457_v7, %v3469_v40 }
 0x696   : > { %13539 = vst [vmem:[%s18044_s9 + $0x80] sm:$0xff] %v15323_v31  ;;  %11842 = vmatmul.mubr.bf16.gmra.mrb[92].mxu1 %v17932_v37  ;;  %12302 = vmatprep.subr.bf16.mxu0 %v14217_v26  ;;  %v11385_v47 = vpop.f32.mrb[68].mxu1  ;;  %v14263_v40 = vcombine.high %v3481_v24, %v3493_v52 }
 0x697   : > { %13540 = vst [vmem:[%s18044_s9 + $0x88] sm:$0xff] %v15324_v51  ;;  %12061 = vmatmul.mubr.bf16.gmra.mrb[92].mxu0 %v17932_v37  ;;  %12103 = vmatprep.mubr.bf16.mxu1 %v17762_v39  ;;  %v15567_v56 = vadd.f32 %v11385_v47, %v18252_v33  ;;  %v11604_v5 = vpop.f32.mrb[68].mxu0  ;;  %v11387_v55 = vpop.f32.mrb[69].mxu1  ;;  %v3517_v51 = vld [vmem:[#allocation5 + $0x760] sm:$0xff]  ;;  %v3506_v47 = vld [vmem:[#allocation5 + $0x708] sm:$0xff] }
 0x698   : > { %12084 = vmatpush1.bf16.msra.mxu1 %v14214_v36  ;;  %12322 = vmatprep.mubr.bf16.mxu0 %v17762_v39  ;;  %v15583_v54 = vadd.f32 %v11604_v5, %v18255_v48  ;;  %v15568_v16 = vadd.f32 %v11387_v55, %v18258_v43  ;;  %v11606_v8 = vpop.f32.mrb[69].mxu0  ;;  %v11389_v53 = vpop.f32.mrb[70].mxu1  ;;  %v3518_v5 = vld [vmem:[#allocation5 + $0x768] sm:$0xff]  ;;  %v14262_v55 = vcombine.low %v3481_v24, %v3493_v52 }
 0x699   : > { %12303 = vmatpush1.bf16.msra.mxu0 %v14216_v62  ;;  %v15584_v20 = vadd.f32 %v11606_v8, %v18261_v32  ;;  %12085 = vmatprep.subr.bf16.mxu1 %v14239_v29  ;;  %v15569_v12 = vadd.f32 %v11389_v53, %v18252_v33  ;;  %v11608_v26 = vpop.f32.mrb[70].mxu0  ;;  %v11391_v7 = vpop.f32.mrb[71].mxu1  ;;  %v14287_v8 = vcombine.high %v3505_v46, %v3517_v51 }
 0x69a   : > { %v15335_v61 = vpack.c.bf16 %v15568_v16, %v15567_v56  ;;  %12304 = vmatprep.subr.bf16.mxu0 %v14241_v41  ;;  %v15585_v59 = vadd.f32 %v11608_v26, %v18255_v48  ;;  %v15570_v31 = vadd.f32 %v11391_v7, %v18258_v43  ;;  %v11610_v36 = vpop.f32.mrb[71].mxu0  ;;  %v14264_v16 = vcombine.low %v3482_v28, %v3494_v3 }
 0x69b   : > { %v15336_v62 = vpack.c.bf16 %v15584_v20, %v15583_v54  ;;  %v15586_v29 = vadd.f32 %v11610_v36, %v18261_v32  ;;  %v14289_v26 = vcombine.high %v3506_v47, %v3518_v5  ;;  %v3529_v54 = vld [vmem:[#allocation5 + $0x7c0] sm:$0xff]  ;;  %v14286_v3 = vcombine.low %v3505_v46, %v3517_v51 }
 0x69c   : > { %13551 = vst [vmem:[%s18044_s9 + $0xe0] sm:$0xff] %v15335_v61  ;;  %12086 = vmatpush1.bf16.msra.mxu1 %v14238_v1  ;;  %v15347_v56 = vpack.c.bf16 %v15570_v31, %v15569_v12  ;;  %v3541_v20 = vld [vmem:[#allocation5 + $0x820] sm:$0xff]  ;;  %v3530_v1 = vld [vmem:[#allocation5 + $0x7c8] sm:$0xff] }
 0x69d   : > { %13552 = vst [vmem:[%s18044_s9 + $0xe8] sm:$0xff] %v15336_v62  ;;  %12305 = vmatpush1.bf16.msra.mxu0 %v14240_v58  ;;  %v15348_v41 = vpack.c.bf16 %v15586_v29, %v15585_v59  ;;  %12087 = vmatprep.subr.bf16.mxu1 %v14263_v40  ;;  %v3542_v12 = vld [vmem:[#allocation5 + $0x828] sm:$0xff]  ;;  %v14288_v58 = vcombine.low %v3506_v47, %v3518_v5  ;;  %v3553_v47 = vld [vmem:[#allocation5 + $0x880] sm:$0xff] }
 0x69e   : > { %13563 = vst [vmem:[%s18044_s9 + $0x140] sm:$0xff] %v15347_v56  ;;  %12306 = vmatprep.subr.bf16.mxu0 %v14265_v57  ;;  %v11395_v53 = vpop.f32.mrb[72].mxu1  ;;  %v14311_v29 = vcombine.high %v3529_v54, %v3541_v20  ;;  %v14313_v51 = vcombine.high %v3530_v1, %v3542_v12  ;;  %v3565_v5 = vld [vmem:[#allocation5 + $0x8e0] sm:$0xff] }
 0x69f   : > { %13564 = vst [vmem:[%s18044_s9 + $0x148] sm:$0xff] %v15348_v41  ;;  %v15571_v7 = vadd.f32 %v11395_v53, %v18252_v33  ;;  %v11614_v61 = vpop.f32.mrb[72].mxu0  ;;  %v11397_v36 = vpop.f32.mrb[73].mxu1  ;;  %v3554_v53 = vld [vmem:[#allocation5 + $0x888] sm:$0xff] }
 0x6a0   : > { %12088 = vmatpush1.bf16.msra.mxu1 %v14262_v55  ;;  %v15587_v24 = vadd.f32 %v11614_v61, %v18255_v48  ;;  %v15572_v52 = vadd.f32 %v11397_v36, %v18258_v43  ;;  %v11616_v28 = vpop.f32.mrb[73].mxu0  ;;  %v11399_v40 = vpop.f32.mrb[74].mxu1  ;;  %v3566_v61 = vld [vmem:[#allocation5 + $0x8e8] sm:$0xff]  ;;  %v14310_v36 = vcombine.low %v3529_v54, %v3541_v20 }
 0x6a1   : > { %12307 = vmatpush1.bf16.msra.mxu0 %v14264_v16  ;;  %v15588_v59 = vadd.f32 %v11616_v28, %v18261_v32  ;;  %12089 = vmatprep.subr.bf16.mxu1 %v14287_v8  ;;  %v15573_v31 = vadd.f32 %v11399_v40, %v18252_v33  ;;  %v11618_v57 = vpop.f32.mrb[74].mxu0  ;;  %v11401_v62 = vpop.f32.mrb[75].mxu1  ;;  %v14335_v28 = vcombine.high %v3553_v47, %v3565_v5 }
 0x6a2   : > { %v15359_v56 = vpack.c.bf16 %v15572_v52, %v15571_v7  ;;  %12308 = vmatprep.subr.bf16.mxu0 %v14289_v26  ;;  %v15589_v55 = vadd.f32 %v11618_v57, %v18255_v48  ;;  %v15574_v41 = vadd.f32 %v11401_v62, %v18258_v43  ;;  %v11620_v46 = vpop.f32.mrb[75].mxu0  ;;  %v14312_v52 = vcombine.low %v3530_v1, %v3542_v12 }
 0x6a3   : > { %v15360_v16 = vpack.c.bf16 %v15588_v59, %v15587_v24  ;;  %v15590_v8 = vadd.f32 %v11620_v46, %v18261_v32  ;;  %v14337_v57 = vcombine.high %v3554_v53, %v3566_v61  ;;  %v3577_v24 = vld [vmem:[#allocation5 + $0x940] sm:$0xff]  ;;  %v14334_v12 = vcombine.low %v3553_v47, %v3565_v5 }
 0x6a4   : > { %13575 = vst [vmem:[%s18044_s9 + $0x1a0] sm:$0xff] %v15359_v56  ;;  %12090 = vmatpush1.bf16.msra.mxu1 %v14286_v3  ;;  %v15371_v7 = vpack.c.bf16 %v15574_v41, %v15573_v31  ;;  %v3589_v59 = vld [vmem:[#allocation5 + $0x9a0] sm:$0xff]  ;;  %v3578_v3 = vld [vmem:[#allocation5 + $0x948] sm:$0xff] }
 0x6a5   : > { %13576 = vst [vmem:[%s18044_s9 + $0x1a8] sm:$0xff] %v15360_v16  ;;  %12309 = vmatpush1.bf16.msra.mxu0 %v14288_v58  ;;  %v15372_v26 = vpack.c.bf16 %v15590_v8, %v15589_v55  ;;  %12091 = vmatprep.subr.bf16.mxu1 %v14311_v29  ;;  %v3590_v31 = vld [vmem:[#allocation5 + $0x9a8] sm:$0xff]  ;;  %v14336_v58 = vcombine.low %v3554_v53, %v3566_v61  ;;  %v3601_v53 = vld [vmem:[#allocation5 + $0xa00] sm:$0xff] }
 0x6a6   : > { %13587 = vst [vmem:[%s18044_s9 + $0x200] sm:$0xff] %v15371_v7  ;;  %12310 = vmatprep.subr.bf16.mxu0 %v14313_v51  ;;  %v11405_v40 = vpop.f32.mrb[76].mxu1  ;;  %v14359_v8 = vcombine.high %v3577_v24, %v3589_v59  ;;  %v14361_v5 = vcombine.high %v3578_v3, %v3590_v31  ;;  %v3613_v61 = vld [vmem:[#allocation5 + $0xa60] sm:$0xff] }
 0x6a7   : > { %13588 = vst [vmem:[%s18044_s9 + $0x208] sm:$0xff] %v15372_v26  ;;  %v15575_v62 = vadd.f32 %v11405_v40, %v18252_v33  ;;  %v11624_v56 = vpop.f32.mrb[76].mxu0  ;;  %v11407_v46 = vpop.f32.mrb[77].mxu1  ;;  %v3614_v40 = vld [vmem:[#allocation5 + $0xa68] sm:$0xff] }
 0x6a8   : > { %12092 = vmatpush1.bf16.msra.mxu1 %v14310_v36  ;;  %v15591_v54 = vadd.f32 %v11624_v56, %v18255_v48  ;;  %v15576_v20 = vadd.f32 %v11407_v46, %v18258_v43  ;;  %v11626_v1 = vpop.f32.mrb[77].mxu0  ;;  %v11409_v29 = vpop.f32.mrb[78].mxu1  ;;  %v14358_v56 = vcombine.low %v3577_v24, %v3589_v59 }
 0x6a9   : > { %12311 = vmatpush1.bf16.msra.mxu0 %v14312_v52  ;;  %v15592_v55 = vadd.f32 %v11626_v1, %v18261_v32  ;;  %12093 = vmatprep.subr.bf16.mxu1 %v14335_v28  ;;  %v15577_v41 = vadd.f32 %v11409_v29, %v18252_v33  ;;  %v11628_v51 = vpop.f32.mrb[78].mxu0  ;;  %v11411_v16 = vpop.f32.mrb[79].mxu1  ;;  %v3602_v33 = vld [vmem:[#allocation5 + $0xa08] sm:$0xff]  ;;  %v14382_v29 = vcombine.low %v3601_v53, %v3613_v61 }
 0x6aa   : > { %v15383_v7 = vpack.c.bf16 %v15576_v20, %v15575_v62  ;;  %12312 = vmatprep.subr.bf16.mxu0 %v14337_v57  ;;  %v15593_v36 = vadd.f32 %v11628_v51, %v18255_v48  ;;  %v15578_v26 = vadd.f32 %v11411_v16, %v18258_v43  ;;  %v11630_v47 = vpop.f32.mrb[79].mxu0  ;;  %v14360_v43 = vcombine.low %v3578_v3, %v3590_v31  ;;  %v3625_v20 = vld [vmem:[#allocation5 + $0xac0] sm:$0xff]  ;;  %v3638_v1 = vld [vmem:[#allocation5 + $0xb28] sm:$0xff] }
 0x6ab   : > { %v15384_v52 = vpack.c.bf16 %v15592_v55, %v15591_v54  ;;  %v15594_v28 = vadd.f32 %v11630_v47, %v18261_v32  ;;  %v14383_v57 = vcombine.high %v3601_v53, %v3613_v61  ;;  %v14385_v46 = vcombine.high %v3602_v33, %v3614_v40  ;;  %v3637_v54 = vld [vmem:[#allocation5 + $0xb20] sm:$0xff]  ;;  %v3626_v32 = vld [vmem:[#allocation5 + $0xac8] sm:$0xff] }
 0x6ac   : > { %13599 = vst [vmem:[%s18044_s9 + $0x260] sm:$0xff] %v15383_v7  ;;  %12094 = vmatpush1.bf16.msra.mxu1 %v14334_v12  ;;  %v15395_v62 = vpack.c.bf16 %v15578_v26, %v15577_v41  ;;  %v14384_v12 = vcombine.low %v3602_v33, %v3614_v40  ;;  %v14407_v24 = vcombine.high %v3625_v20, %v3637_v54  ;;  %v3661_v55 = vld [vmem:[#allocation5 + $0xbe0] sm:$0xff]  ;;  %v3650_v3 = vld [vmem:[#allocation5 + $0xb88] sm:$0xff] }
 0x6ad   : > { %13600 = vst [vmem:[%s18044_s9 + $0x268] sm:$0xff] %v15384_v52  ;;  %12313 = vmatpush1.bf16.msra.mxu0 %v14336_v58  ;;  %v15396_v48 = vpack.c.bf16 %v15594_v28, %v15593_v36  ;;  %12095 = vmatprep.subr.bf16.mxu1 %v14359_v8  ;;  %v14409_v59 = vcombine.high %v3626_v32, %v3638_v1  ;;  %v3649_v58 = vld [vmem:[#allocation5 + $0xb80] sm:$0xff]  ;;  %v3662_v31 = vld [vmem:[#allocation5 + $0xbe8] sm:$0xff] }
 0x6ae   : > { %13611 = vst [vmem:[%s18044_s9 + $0x2c0] sm:$0xff] %v15395_v62  ;;  %12314 = vmatprep.subr.bf16.mxu0 %v14361_v5  ;;  %v14406_v41 = vcombine.low %v3625_v20, %v3637_v54  ;;  %v14408_v51 = vcombine.low %v3626_v32, %v3638_v1  ;;  %v14431_v16 = vcombine.high %v3649_v58, %v3661_v55  ;;  %v3673_v7 = vld [vmem:[#allocation5 + $0xc40] sm:$0xff]  ;;  %v3674_v26 = vld [vmem:[#allocation5 + $0xc48] sm:$0xff] }
 0x6af   : > { %13612 = vst [vmem:[%s18044_s9 + $0x2c8] sm:$0xff] %v15396_v48  ;;  %v14433_v8 = vcombine.high %v3650_v3, %v3662_v31  ;;  %v3685_v36 = vld [vmem:[#allocation5 + $0xca0] sm:$0xff]  ;;  %v3686_v47 = vld [vmem:[#allocation5 + $0xca8] sm:$0xff]  ;;  %v14430_v5 = vcombine.low %v3649_v58, %v3661_v55  ;;  %v14432_v53 = vcombine.low %v3650_v3, %v3662_v31 }
 0x6b0   : > { %12096 = vmatpush1.bf16.msra.mxu1 %v14358_v56  ;;  %v14455_v61 = vcombine.high %v3673_v7, %v3685_v36  ;;  %v14457_v52 = vcombine.high %v3674_v26, %v3686_v47  ;;  %v3697_v28 = vld [vmem:[#allocation5 + $0xd00] sm:$0xff]  ;;  %v3698_v40 = vld [vmem:[#allocation5 + $0xd08] sm:$0xff]  ;;  %v14454_v56 = vcombine.low %v3673_v7, %v3685_v36  ;;  %v14456_v48 = vcombine.low %v3674_v26, %v3686_v47 }
 0x6b1   : > { %12315 = vmatpush1.bf16.msra.mxu0 %v14360_v43  ;;  %12097 = vmatprep.subr.bf16.mxu1 %v14383_v57  ;;  %v3709_v33 = vld [vmem:[#allocation5 + $0xd60] sm:$0xff]  ;;  %v3710_v62 = vld [vmem:[#allocation5 + $0xd68] sm:$0xff] }
 0x6b2   : > { %12316 = vmatprep.subr.bf16.mxu0 %v14385_v46  ;;  %v14479_v43 = vcombine.high %v3697_v28, %v3709_v33  ;;  %v14481_v57 = vcombine.high %v3698_v40, %v3710_v62  ;;  %v3721_v46 = vld [vmem:[#allocation5 + $0xdc0] sm:$0xff]  ;;  %v3722_v54 = vld [vmem:[#allocation5 + $0xdc8] sm:$0xff]  ;;  %v14478_v1 = vcombine.low %v3697_v28, %v3709_v33 }
 0x6b3   : > { %v3733_v20 = vld [vmem:[#allocation5 + $0xe20] sm:$0xff]  ;;  %v3734_v32 = vld [vmem:[#allocation5 + $0xe28] sm:$0xff] }
 0x6b4   : > { %12098 = vmatpush1.bf16.msra.mxu1 %v14382_v29  ;;  %v14480_v29 = vcombine.low %v3698_v40, %v3710_v62  ;;  %v3757_v58 = vld [vmem:[#allocation5 + $0xee0] sm:$0xff]  ;;  %v3746_v55 = vld [vmem:[#allocation5 + $0xe88] sm:$0xff]  ;;  %v14502_v31 = vcombine.low %v3721_v46, %v3733_v20 }
 0x6b5   : > { %12317 = vmatpush1.bf16.msra.mxu0 %v14384_v12  ;;  %12099 = vmatprep.subr.bf16.mxu1 %v14407_v24  ;;  %v14503_v12 = vcombine.high %v3721_v46, %v3733_v20  ;;  %v14505_v24 = vcombine.high %v3722_v54, %v3734_v32  ;;  %v3758_v3 = vld [vmem:[#allocation5 + $0xee8] sm:$0xff]  ;;  %v3781_v7 = vld [vmem:[#allocation5 + $0xfa0] sm:$0xff] }
 0x6b6   : > { %12318 = vmatprep.subr.bf16.mxu0 %v14409_v59  ;;  %v3745_v59 = vld [vmem:[#allocation5 + $0xe80] sm:$0xff]  ;;  %v3770_v36 = vld [vmem:[#allocation5 + $0xf48] sm:$0xff] }
 0x6b7   : > { %v3782_v26 = vld [vmem:[#allocation5 + $0xfa8] sm:$0xff]  ;;  %v14526_v47 = vcombine.low %v3745_v59, %v3757_v58  ;;  %v3805_v28 = vld [vmem:[#allocation5 + $0x1060] sm:$0xff] }
 0x6b8   : > { %12100 = vmatpush1.bf16.msra.mxu1 %v14406_v41  ;;  %v14504_v41 = vcombine.low %v3722_v54, %v3734_v32  ;;  %v3794_v33 = vld [vmem:[#allocation5 + $0x1008] sm:$0xff]  ;;  %v3829_v46 = vld [vmem:[#allocation5 + $0x1120] sm:$0xff] }
 0x6b9   : > { %12319 = vmatpush1.bf16.msra.mxu0 %v14408_v51  ;;  %12101 = vmatprep.subr.bf16.mxu1 %v14431_v16  ;;  %v14527_v51 = vcombine.high %v3745_v59, %v3757_v58  ;;  %v14529_v16 = vcombine.high %v3746_v55, %v3758_v3  ;;  %v3806_v40 = vld [vmem:[#allocation5 + $0x1068] sm:$0xff]  ;;  %v3853_v59 = vld [vmem:[#allocation5 + $0x11e0] sm:$0xff] }
 0x6ba   : > { %12320 = vmatprep.subr.bf16.mxu0 %v14433_v8  ;;  %v3769_v8 = vld [vmem:[#allocation5 + $0xf40] sm:$0xff]  ;;  %v3818_v20 = vld [vmem:[#allocation5 + $0x10c8] sm:$0xff] }
 0x6bb   : > { %v14550_v62 = vcombine.low %v3769_v8, %v3781_v7  ;;  %v3830_v54 = vld [vmem:[#allocation5 + $0x1128] sm:$0xff] }
 0x6bc   : > { %12102 = vmatpush1.bf16.msra.mxu1 %v14430_v5  ;;  %v14528_v5 = vcombine.low %v3746_v55, %v3758_v3  ;;  %v3842_v58 = vld [vmem:[#allocation5 + $0x1188] sm:$0xff] }
 0x6bd   : > { %12321 = vmatpush1.bf16.msra.mxu0 %v14432_v53  ;;  %12144 = vmatprep.subr.bf16.mxu1 %v14455_v61  ;;  %v14551_v53 = vcombine.high %v3769_v8, %v3781_v7  ;;  %v14553_v61 = vcombine.high %v3770_v36, %v3782_v26  ;;  %v3854_v55 = vld [vmem:[#allocation5 + $0x11e8] sm:$0xff]  ;;  %v3877_v8 = vld [vmem:[#allocation5 + $0x12a0] sm:$0xff] }
 0x6be   : > { %12363 = vmatprep.subr.bf16.mxu0 %v14457_v52  ;;  %v3793_v52 = vld [vmem:[#allocation5 + $0x1000] sm:$0xff]  ;;  %v3866_v7 = vld [vmem:[#allocation5 + $0x1248] sm:$0xff] }
 0x6bf   : > { %12104 = vmatmul.mubr.bf16.vlgmr.msra.gmra.mrb[96].mxu1 %v17764_v38  ;;  %v14574_v32 = vcombine.low %v3793_v52, %v3805_v28 }
 0x6c0   : > { %12323 = vmatmul.mubr.bf16.vlgmr.msra.gmra.mrb[96].mxu0 %v17764_v38  ;;  %12113 = vmatprep.mubr.bf16.mxu1 %v17808_v49 }
 0x6c1   : > { %12145 = vmatpush1.bf16.msra.mxu1 %v14454_v56  ;;  %12332 = vmatprep.mubr.bf16.mxu0 %v17808_v49  ;;  %v14552_v56 = vcombine.low %v3770_v36, %v3782_v26  ;;  %v3878_v36 = vld [vmem:[#allocation5 + $0x12a8] sm:$0xff] }
 0x6c2   : > { %12364 = vmatpush1.bf16.msra.mxu0 %v14456_v48  ;;  %12146 = vmatprep.subr.bf16.mxu1 %v14479_v43  ;;  %v14575_v48 = vcombine.high %v3793_v52, %v3805_v28  ;;  %v14577_v43 = vcombine.high %v3794_v33, %v3806_v40  ;;  %v3901_v52 = vld [vmem:[#allocation5 + $0x1360] sm:$0xff]  ;;  %v3890_v28 = vld [vmem:[#allocation5 + $0x1308] sm:$0xff] }
 0x6c3   : > { %12365 = vmatprep.subr.bf16.mxu0 %v14481_v57  ;;  %v3817_v57 = vld [vmem:[#allocation5 + $0x10c0] sm:$0xff] }
 0x6c4   : > { %v14598_v3 = vcombine.low %v3817_v57, %v3829_v46 }
 0x6c5   : > { %12147 = vmatpush1.bf16.msra.mxu1 %v14478_v1  ;;  %v14576_v1 = vcombine.low %v3794_v33, %v3806_v40  ;;  %v3902_v33 = vld [vmem:[#allocation5 + $0x1368] sm:$0xff] }
 0x6c6   : > { %12366 = vmatpush1.bf16.msra.mxu0 %v14480_v29  ;;  %12148 = vmatprep.subr.bf16.mxu1 %v14503_v12  ;;  %v14599_v29 = vcombine.high %v3817_v57, %v3829_v46  ;;  %v14601_v12 = vcombine.high %v3818_v20, %v3830_v54  ;;  %v3925_v57 = vld [vmem:[#allocation5 + $0x1420] sm:$0xff]  ;;  %v3914_v46 = vld [vmem:[#allocation5 + $0x13c8] sm:$0xff] }
 0x6c7   : > { %12114 = vmatmul.mubr.bf16.gmra.mrb[100].mxu1 %v17810_v27  ;;  %12367 = vmatprep.subr.bf16.mxu0 %v14505_v24  ;;  %v3841_v24 = vld [vmem:[#allocation5 + $0x1180] sm:$0xff] }
 0x6c8   : > { %12333 = vmatmul.mubr.bf16.gmra.mrb[100].mxu0 %v17810_v27  ;;  %12123 = vmatprep.mubr.bf16.mxu1 %v17854_v30  ;;  %v14622_v26 = vcombine.low %v3841_v24, %v3853_v59 }
 0x6c9   : > { %12149 = vmatpush1.bf16.msra.mxu1 %v14502_v31  ;;  %12342 = vmatprep.mubr.bf16.mxu0 %v17854_v30  ;;  %v14600_v31 = vcombine.low %v3818_v20, %v3830_v54  ;;  %v3926_v20 = vld [vmem:[#allocation5 + $0x1428] sm:$0xff] }
 0x6ca   : > { %12368 = vmatpush1.bf16.msra.mxu0 %v14504_v41  ;;  %12150 = vmatprep.subr.bf16.mxu1 %v14527_v51  ;;  %v14623_v41 = vcombine.high %v3841_v24, %v3853_v59  ;;  %v14625_v51 = vcombine.high %v3842_v58, %v3854_v55  ;;  %v3949_v24 = vld [vmem:[#allocation5 + $0x14e0] sm:$0xff]  ;;  %v3938_v59 = vld [vmem:[#allocation5 + $0x1488] sm:$0xff] }
 0x6cb   : > { %12369 = vmatprep.subr.bf16.mxu0 %v14529_v16  ;;  %v3865_v16 = vld [vmem:[#allocation5 + $0x1240] sm:$0xff] }
 0x6cc   : > { %v14646_v40 = vcombine.low %v3865_v16, %v3877_v8 }
 0x6cd   : > { %12151 = vmatpush1.bf16.msra.mxu1 %v14526_v47  ;;  %v14624_v47 = vcombine.low %v3842_v58, %v3854_v55  ;;  %v3950_v58 = vld [vmem:[#allocation5 + $0x14e8] sm:$0xff] }
 0x6ce   : > { %12370 = vmatpush1.bf16.msra.mxu0 %v14528_v5  ;;  %12152 = vmatprep.subr.bf16.mxu1 %v14551_v53  ;;  %v14647_v5 = vcombine.high %v3865_v16, %v3877_v8  ;;  %v14649_v53 = vcombine.high %v3866_v7, %v3878_v36  ;;  %v3973_v16 = vld [vmem:[#allocation5 + $0x15a0] sm:$0xff]  ;;  %v3962_v8 = vld [vmem:[#allocation5 + $0x1548] sm:$0xff] }
 0x6cf   : > { %12124 = vmatmul.mubr.bf16.gmra.mrb[104].mxu1 %v17862_v34  ;;  %12371 = vmatprep.subr.bf16.mxu0 %v14553_v61  ;;  %v3889_v61 = vld [vmem:[#allocation5 + $0x1300] sm:$0xff] }
 0x6d0   : > { %12343 = vmatmul.mubr.bf16.gmra.mrb[104].mxu0 %v17862_v34  ;;  %12133 = vmatprep.mubr.bf16.mxu1 %v17908_v22  ;;  %v14670_v54 = vcombine.low %v3889_v61, %v3901_v52 }
 0x6d1   : > { %12153 = vmatpush1.bf16.msra.mxu1 %v14550_v62  ;;  %12352 = vmatprep.mubr.bf16.mxu0 %v17908_v22  ;;  %v14648_v62 = vcombine.low %v3866_v7, %v3878_v36  ;;  %v3974_v7 = vld [vmem:[#allocation5 + $0x15a8] sm:$0xff] }
 0x6d2   : > { %12372 = vmatpush1.bf16.msra.mxu0 %v14552_v56  ;;  %12154 = vmatprep.subr.bf16.mxu1 %v14575_v48  ;;  %v14671_v56 = vcombine.high %v3889_v61, %v3901_v52  ;;  %v14673_v48 = vcombine.high %v3890_v28, %v3902_v33  ;;  %v3997_v61 = vld [vmem:[#allocation5 + $0x1660] sm:$0xff]  ;;  %v3986_v52 = vld [vmem:[#allocation5 + $0x1608] sm:$0xff] }
 0x6d3   : > { %12373 = vmatprep.subr.bf16.mxu0 %v14577_v43  ;;  %v3913_v43 = vld [vmem:[#allocation5 + $0x13c0] sm:$0xff] }
 0x6d4   : > { %v14694_v55 = vcombine.low %v3913_v43, %v3925_v57 }
 0x6d5   : > { %12155 = vmatpush1.bf16.msra.mxu1 %v14574_v32  ;;  %v14672_v32 = vcombine.low %v3890_v28, %v3902_v33  ;;  %v3998_v28 = vld [vmem:[#allocation5 + $0x1668] sm:$0xff] }
 0x6d6   : > { %12374 = vmatpush1.bf16.msra.mxu0 %v14576_v1  ;;  %12156 = vmatprep.subr.bf16.mxu1 %v14599_v29  ;;  %v14695_v1 = vcombine.high %v3913_v43, %v3925_v57  ;;  %v14697_v29 = vcombine.high %v3914_v46, %v3926_v20  ;;  %v4021_v43 = vld [vmem:[#allocation5 + $0x1720] sm:$0xff]  ;;  %v4010_v57 = vld [vmem:[#allocation5 + $0x16c8] sm:$0xff] }
 0x6d7   : > { %12134 = vmatmul.mubr.bf16.gmra.mrb[108].mxu1 %v17914_v50  ;;  %12375 = vmatprep.subr.bf16.mxu0 %v14601_v12  ;;  %v3937_v12 = vld [vmem:[#allocation5 + $0x1480] sm:$0xff] }
 0x6d8   : > { %12353 = vmatmul.mubr.bf16.gmra.mrb[108].mxu0 %v17914_v50  ;;  %12176 = vmatprep.mubr.bf16.mxu1 %v17926_v15  ;;  %v14718_v36 = vcombine.low %v3937_v12, %v3949_v24 }
 0x6d9   : > { %12157 = vmatpush1.bf16.msra.mxu1 %v14598_v3  ;;  %12395 = vmatprep.mubr.bf16.mxu0 %v17926_v15  ;;  %v14696_v3 = vcombine.low %v3914_v46, %v3926_v20  ;;  %v4022_v46 = vld [vmem:[#allocation5 + $0x1728] sm:$0xff] }
 0x6da   : > { %12376 = vmatpush1.bf16.msra.mxu0 %v14600_v31  ;;  %12158 = vmatprep.subr.bf16.mxu1 %v14623_v41  ;;  %v14719_v31 = vcombine.high %v3937_v12, %v3949_v24  ;;  %v14721_v41 = vcombine.high %v3938_v59, %v3950_v58  ;;  %v4045_v12 = vld [vmem:[#allocation5 + $0x17e0] sm:$0xff]  ;;  %v4034_v24 = vld [vmem:[#allocation5 + $0x1788] sm:$0xff] }
 0x6db   : > { %12377 = vmatprep.subr.bf16.mxu0 %v14625_v51  ;;  %v3961_v51 = vld [vmem:[#allocation5 + $0x1540] sm:$0xff] }
 0x6dc   : > { %v14742_v33 = vcombine.low %v3961_v51, %v3973_v16 }
 0x6dd   : > { %12159 = vmatpush1.bf16.msra.mxu1 %v14622_v26  ;;  %v14720_v26 = vcombine.low %v3938_v59, %v3950_v58  ;;  %v4046_v59 = vld [vmem:[#allocation5 + $0x17e8] sm:$0xff] }
 0x6de   : > { %12378 = vmatpush1.bf16.msra.mxu0 %v14624_v47  ;;  %12160 = vmatprep.subr.bf16.mxu1 %v14647_v5  ;;  %v14743_v47 = vcombine.high %v3961_v51, %v3973_v16  ;;  %v14745_v5 = vcombine.high %v3962_v8, %v3974_v7  ;;  %v4069_v51 = vld [vmem:[#allocation5 + $0x18a0] sm:$0xff]  ;;  %v4058_v16 = vld [vmem:[#allocation5 + $0x1848] sm:$0xff] }
 0x6df   : > { %12379 = vmatprep.subr.bf16.mxu0 %v14649_v53  ;;  %v3985_v53 = vld [vmem:[#allocation5 + $0x1600] sm:$0xff] }
 0x6e0   : > { %v14766_v20 = vcombine.low %v3985_v53, %v3997_v61 }
 0x6e1   : > { %12161 = vmatpush1.bf16.msra.mxu1 %v14646_v40  ;;  %v14744_v40 = vcombine.low %v3962_v8, %v3974_v7  ;;  %v4070_v8 = vld [vmem:[#allocation5 + $0x18a8] sm:$0xff] }
 0x6e2   : > { %12380 = vmatpush1.bf16.msra.mxu0 %v14648_v62  ;;  %12162 = vmatprep.subr.bf16.mxu1 %v14671_v56  ;;  %v14767_v62 = vcombine.high %v3985_v53, %v3997_v61  ;;  %v14769_v56 = vcombine.high %v3986_v52, %v3998_v28  ;;  %v4093_v53 = vld [vmem:[#allocation5 + $0x1960] sm:$0xff]  ;;  %v4082_v61 = vld [vmem:[#allocation5 + $0x1908] sm:$0xff] }
 0x6e3   : > { %12381 = vmatprep.subr.bf16.mxu0 %v14673_v48  ;;  %v4009_v48 = vld [vmem:[#allocation5 + $0x16c0] sm:$0xff] }
 0x6e4   : > { %v14790_v58 = vcombine.low %v4009_v48, %v4021_v43 }
 0x6e5   : > { %12163 = vmatpush1.bf16.msra.mxu1 %v14670_v54  ;;  %v14768_v54 = vcombine.low %v3986_v52, %v3998_v28  ;;  %v4094_v52 = vld [vmem:[#allocation5 + $0x1968] sm:$0xff] }
 0x6e6   : > { %12382 = vmatpush1.bf16.msra.mxu0 %v14672_v32  ;;  %12164 = vmatprep.subr.bf16.mxu1 %v14695_v1  ;;  %v14791_v32 = vcombine.high %v4009_v48, %v4021_v43  ;;  %v14793_v1 = vcombine.high %v4010_v57, %v4022_v46  ;;  %v4117_v48 = vld [vmem:[#allocation5 + $0x1a20] sm:$0xff]  ;;  %v4106_v43 = vld [vmem:[#allocation5 + $0x19c8] sm:$0xff] }
 0x6e7   : > { %12383 = vmatprep.subr.bf16.mxu0 %v14697_v29  ;;  %v4033_v29 = vld [vmem:[#allocation5 + $0x1780] sm:$0xff] }
 0x6e8   : > { %v14814_v7 = vcombine.low %v4033_v29, %v4045_v12 }
 0x6e9   : > { %12165 = vmatpush1.bf16.msra.mxu1 %v14694_v55  ;;  %v14792_v55 = vcombine.low %v4010_v57, %v4022_v46  ;;  %v4118_v57 = vld [vmem:[#allocation5 + $0x1a28] sm:$0xff] }
 0x6ea   : > { %12384 = vmatpush1.bf16.msra.mxu0 %v14696_v3  ;;  %12166 = vmatprep.subr.bf16.mxu1 %v14719_v31  ;;  %v14815_v3 = vcombine.high %v4033_v29, %v4045_v12  ;;  %v14817_v31 = vcombine.high %v4034_v24, %v4046_v59  ;;  %v4141_v29 = vld [vmem:[#allocation5 + $0x1ae0] sm:$0xff]  ;;  %v4130_v12 = vld [vmem:[#allocation5 + $0x1a88] sm:$0xff] }
 0x6eb   : > { %12385 = vmatprep.subr.bf16.mxu0 %v14721_v41  ;;  %v4057_v41 = vld [vmem:[#allocation5 + $0x1840] sm:$0xff] }
 0x6ec   : > { %v14838_v28 = vcombine.low %v4057_v41, %v4069_v51 }
 0x6ed   : > { %12167 = vmatpush1.bf16.msra.mxu1 %v14718_v36  ;;  %v14816_v36 = vcombine.low %v4034_v24, %v4046_v59  ;;  %v4142_v24 = vld [vmem:[#allocation5 + $0x1ae8] sm:$0xff] }
 0x6ee   : > { %12386 = vmatpush1.bf16.msra.mxu0 %v14720_v26  ;;  %12168 = vmatprep.subr.bf16.mxu1 %v14743_v47  ;;  %v14839_v26 = vcombine.high %v4057_v41, %v4069_v51  ;;  %v14841_v47 = vcombine.high %v4058_v16, %v4070_v8  ;;  %v4165_v41 = vld [vmem:[#allocation5 + $0x1ba0] sm:$0xff]  ;;  %v4154_v51 = vld [vmem:[#allocation5 + $0x1b48] sm:$0xff] }
 0x6ef   : > { %12387 = vmatprep.subr.bf16.mxu0 %v14745_v5  ;;  %v4081_v5 = vld [vmem:[#allocation5 + $0x1900] sm:$0xff] }
 0x6f0   : > { %v14862_v46 = vcombine.low %v4081_v5, %v4093_v53 }
 0x6f1   : > { %12169 = vmatpush1.bf16.msra.mxu1 %v14742_v33  ;;  %v14840_v33 = vcombine.low %v4058_v16, %v4070_v8  ;;  %v4166_v16 = vld [vmem:[#allocation5 + $0x1ba8] sm:$0xff] }
 0x6f2   : > { %12388 = vmatpush1.bf16.msra.mxu0 %v14744_v40  ;;  %12170 = vmatprep.subr.bf16.mxu1 %v14767_v62  ;;  %v14863_v40 = vcombine.high %v4081_v5, %v4093_v53  ;;  %v14865_v62 = vcombine.high %v4082_v61, %v4094_v52  ;;  %v4189_v5 = vld [vmem:[#allocation5 + $0x1c60] sm:$0xff]  ;;  %v4178_v53 = vld [vmem:[#allocation5 + $0x1c08] sm:$0xff] }
 0x6f3   : > { %12389 = vmatprep.subr.bf16.mxu0 %v14769_v56  ;;  %v4105_v56 = vld [vmem:[#allocation5 + $0x19c0] sm:$0xff] }
 0x6f4   : > { %v14886_v59 = vcombine.low %v4105_v56, %v4117_v48 }
 0x6f5   : > { %12171 = vmatpush1.bf16.msra.mxu1 %v14766_v20  ;;  %v14864_v20 = vcombine.low %v4082_v61, %v4094_v52  ;;  %v4190_v61 = vld [vmem:[#allocation5 + $0x1c68] sm:$0xff] }
 0x6f6   : > { %12390 = vmatpush1.bf16.msra.mxu0 %v14768_v54  ;;  %12172 = vmatprep.subr.bf16.mxu1 %v14791_v32  ;;  %v14887_v54 = vcombine.high %v4105_v56, %v4117_v48  ;;  %v14889_v32 = vcombine.high %v4106_v43, %v4118_v57  ;;  %v4213_v56 = vld [vmem:[#allocation5 + $0x1d20] sm:$0xff]  ;;  %v4202_v48 = vld [vmem:[#allocation5 + $0x1cc8] sm:$0xff] }
 0x6f7   : > { %12391 = vmatprep.subr.bf16.mxu0 %v14793_v1  ;;  %v4129_v1 = vld [vmem:[#allocation5 + $0x1a80] sm:$0xff] }
 0x6f8   : > { %v14910_v8 = vcombine.low %v4129_v1, %v4141_v29 }
 0x6f9   : > { %12173 = vmatpush1.bf16.msra.mxu1 %v14790_v58  ;;  %v14888_v58 = vcombine.low %v4106_v43, %v4118_v57  ;;  %v4214_v43 = vld [vmem:[#allocation5 + $0x1d28] sm:$0xff] }
 0x6fa   : > { %12392 = vmatpush1.bf16.msra.mxu0 %v14792_v55  ;;  %12174 = vmatprep.subr.bf16.mxu1 %v14815_v3  ;;  %v14911_v55 = vcombine.high %v4129_v1, %v4141_v29  ;;  %v14913_v3 = vcombine.high %v4130_v12, %v4142_v24  ;;  %v4237_v1 = vld [vmem:[#allocation5 + $0x1de0] sm:$0xff]  ;;  %v4226_v29 = vld [vmem:[#allocation5 + $0x1d88] sm:$0xff] }
 0x6fb   : > { %12393 = vmatprep.subr.bf16.mxu0 %v14817_v31  ;;  %v4153_v31 = vld [vmem:[#allocation5 + $0x1b40] sm:$0xff] }
 0x6fc   : > { %v14934_v52 = vcombine.low %v4153_v31, %v4165_v41 }
 0x6fd   : > { %12175 = vmatpush1.bf16.msra.mxu1 %v14814_v7  ;;  %v14912_v7 = vcombine.low %v4130_v12, %v4142_v24  ;;  %v4238_v12 = vld [vmem:[#allocation5 + $0x1de8] sm:$0xff] }
 0x6fe   : > { %12394 = vmatpush1.bf16.msra.mxu0 %v14816_v36  ;;  %12217 = vmatprep.subr.bf16.mxu1 %v14839_v26  ;;  %v14935_v36 = vcombine.high %v4153_v31, %v4165_v41  ;;  %v14937_v26 = vcombine.high %v4154_v51, %v4166_v16  ;;  %v4261_v31 = vld [vmem:[#allocation5 + $0x1ea0] sm:$0xff]  ;;  %v4250_v41 = vld [vmem:[#allocation5 + $0x1e48] sm:$0xff] }
 0x6ff   : > { %12436 = vmatprep.subr.bf16.mxu0 %v14841_v47  ;;  %v4177_v47 = vld [vmem:[#allocation5 + $0x1c00] sm:$0xff] }
 0x700   : > { %12177 = vmatmul.mubr.bf16.vlgmr.msra.gmra.mrb[96].mxu1 %v17766_v35  ;;  %v14958_v57 = vcombine.low %v4177_v47, %v4189_v5 }
 0x701   : > { %12396 = vmatmul.mubr.bf16.vlgmr.msra.gmra.mrb[96].mxu0 %v17766_v35  ;;  %12186 = vmatprep.mubr.bf16.mxu1 %v17812_v6 }
 0x702   : > { %12218 = vmatpush1.bf16.msra.mxu1 %v14838_v28  ;;  %12405 = vmatprep.mubr.bf16.mxu0 %v17812_v6  ;;  %v14936_v28 = vcombine.low %v4154_v51, %v4166_v16  ;;  %v4262_v51 = vld [vmem:[#allocation5 + $0x1ea8] sm:$0xff] }
 0x703   : > { %12437 = vmatpush1.bf16.msra.mxu0 %v14840_v33  ;;  %12219 = vmatprep.subr.bf16.mxu1 %v14863_v40  ;;  %v14959_v33 = vcombine.high %v4177_v47, %v4189_v5  ;;  %v14961_v40 = vcombine.high %v4178_v53, %v4190_v61  ;;  %v4285_v47 = vld [vmem:[#allocation5 + $0x1f60] sm:$0xff]  ;;  %v4274_v5 = vld [vmem:[#allocation5 + $0x1f08] sm:$0xff] }
 0x704   : > { %12438 = vmatprep.subr.bf16.mxu0 %v14865_v62  ;;  %v4201_v62 = vld [vmem:[#allocation5 + $0x1cc0] sm:$0xff] }
 0x705   : > { %v14982_v24 = vcombine.low %v4201_v62, %v4213_v56 }
 0x706   : > { %12220 = vmatpush1.bf16.msra.mxu1 %v14862_v46  ;;  %v14960_v46 = vcombine.low %v4178_v53, %v4190_v61  ;;  %v4286_v53 = vld [vmem:[#allocation5 + $0x1f68] sm:$0xff] }
 0x707   : > { %12439 = vmatpush1.bf16.msra.mxu0 %v14864_v20  ;;  %12221 = vmatprep.subr.bf16.mxu1 %v14887_v54  ;;  %v14983_v20 = vcombine.high %v4201_v62, %v4213_v56  ;;  %v14985_v54 = vcombine.high %v4202_v48, %v4214_v43  ;;  %v4309_v62 = vld [vmem:[#allocation5 + $0x2020] sm:$0xff]  ;;  %v4298_v56 = vld [vmem:[#allocation5 + $0x1fc8] sm:$0xff] }
 0x708   : > { %12187 = vmatmul.mubr.bf16.gmra.mrb[100].mxu1 %v17818_v9  ;;  %12440 = vmatprep.subr.bf16.mxu0 %v14889_v32  ;;  %v4225_v32 = vld [vmem:[#allocation5 + $0x1d80] sm:$0xff] }
 0x709   : > { %12406 = vmatmul.mubr.bf16.gmra.mrb[100].mxu0 %v17818_v9  ;;  %12196 = vmatprep.mubr.bf16.mxu1 %v17860_v25  ;;  %v15006_v16 = vcombine.low %v4225_v32, %v4237_v1 }
 0x70a   : > { %12222 = vmatpush1.bf16.msra.mxu1 %v14886_v59  ;;  %12415 = vmatprep.mubr.bf16.mxu0 %v17860_v25  ;;  %v14984_v59 = vcombine.low %v4202_v48, %v4214_v43  ;;  %v4310_v48 = vld [vmem:[#allocation5 + $0x2028] sm:$0xff] }
 0x70b   : > { %12441 = vmatpush1.bf16.msra.mxu0 %v14888_v58  ;;  %12223 = vmatprep.subr.bf16.mxu1 %v14911_v55  ;;  %v15007_v58 = vcombine.high %v4225_v32, %v4237_v1  ;;  %v15009_v55 = vcombine.high %v4226_v29, %v4238_v12  ;;  %v4333_v32 = vld [vmem:[#allocation5 + $0x20e0] sm:$0xff]  ;;  %v4322_v1 = vld [vmem:[#allocation5 + $0x2088] sm:$0xff] }
 0x70c   : > { %12442 = vmatprep.subr.bf16.mxu0 %v14913_v3  ;;  %v4249_v3 = vld [vmem:[#allocation5 + $0x1e40] sm:$0xff] }
 0x70d   : > { %v15030_v61 = vcombine.low %v4249_v3, %v4261_v31 }
 0x70e   : > { %12224 = vmatpush1.bf16.msra.mxu1 %v14910_v8  ;;  %v15008_v8 = vcombine.low %v4226_v29, %v4238_v12  ;;  %v4334_v29 = vld [vmem:[#allocation5 + $0x20e8] sm:$0xff] }
 0x70f   : > { %12443 = vmatpush1.bf16.msra.mxu0 %v14912_v7  ;;  %12225 = vmatprep.subr.bf16.mxu1 %v14935_v36  ;;  %v15031_v7 = vcombine.high %v4249_v3, %v4261_v31  ;;  %v15033_v36 = vcombine.high %v4250_v41, %v4262_v51  ;;  %v4357_v3 = vld [vmem:[#allocation5 + $0x21a0] sm:$0xff]  ;;  %v4346_v31 = vld [vmem:[#allocation5 + $0x2148] sm:$0xff] }
 0x710   : > { %12197 = vmatmul.mubr.bf16.gmra.mrb[104].mxu1 %v17868_v10  ;;  %12444 = vmatprep.subr.bf16.mxu0 %v14937_v26  ;;  %v4273_v26 = vld [vmem:[#allocation5 + $0x1f00] sm:$0xff] }
 0x711   : > { %12416 = vmatmul.mubr.bf16.gmra.mrb[104].mxu0 %v17868_v10  ;;  %12206 = vmatprep.mubr.bf16.mxu1 %v17912_v19  ;;  %v15054_v43 = vcombine.low %v4273_v26, %v4285_v47 }
 0x712   : > { %12226 = vmatpush1.bf16.msra.mxu1 %v14934_v52  ;;  %12425 = vmatprep.mubr.bf16.mxu0 %v17912_v19  ;;  %v15032_v52 = vcombine.low %v4250_v41, %v4262_v51  ;;  %v4358_v41 = vld [vmem:[#allocation5 + $0x21a8] sm:$0xff] }
 0x713   : > { %12445 = vmatpush1.bf16.msra.mxu0 %v14936_v28  ;;  %12227 = vmatprep.subr.bf16.mxu1 %v14959_v33  ;;  %v15055_v28 = vcombine.high %v4273_v26, %v4285_v47  ;;  %v15057_v33 = vcombine.high %v4274_v5, %v4286_v53  ;;  %v4381_v26 = vld [vmem:[#allocation5 + $0x2260] sm:$0xff]  ;;  %v4370_v47 = vld [vmem:[#allocation5 + $0x2208] sm:$0xff] }
 0x714   : > { %12446 = vmatprep.subr.bf16.mxu0 %v14961_v40  ;;  %v4297_v40 = vld [vmem:[#allocation5 + $0x1fc0] sm:$0xff] }
 0x715   : > { %v15078_v12 = vcombine.low %v4297_v40, %v4309_v62 }
 0x716   : > { %12228 = vmatpush1.bf16.msra.mxu1 %v14958_v57  ;;  %v15056_v57 = vcombine.low %v4274_v5, %v4286_v53  ;;  %v4382_v5 = vld [vmem:[#allocation5 + $0x2268] sm:$0xff] }
 0x717   : > { %12447 = vmatpush1.bf16.msra.mxu0 %v14960_v46  ;;  %12229 = vmatprep.subr.bf16.mxu1 %v14983_v20  ;;  %v15079_v46 = vcombine.high %v4297_v40, %v4309_v62  ;;  %v15081_v20 = vcombine.high %v4298_v56, %v4310_v48  ;;  %v4405_v40 = vld [vmem:[#allocation5 + $0x2320] sm:$0xff]  ;;  %v4394_v62 = vld [vmem:[#allocation5 + $0x22c8] sm:$0xff] }
 0x718   : > { %12207 = vmatmul.mubr.bf16.gmra.mrb[108].mxu1 %v17916_v13  ;;  %12448 = vmatprep.subr.bf16.mxu0 %v14985_v54  ;;  %v4321_v54 = vld [vmem:[#allocation5 + $0x2080] sm:$0xff] }
 0x719   : > { %12426 = vmatmul.mubr.bf16.gmra.mrb[108].mxu0 %v17916_v13  ;;  %12249 = vmatprep.mubr.bf16.mxu1 %v17772_v23  ;;  %v15102_v51 = vcombine.low %v4321_v54, %v4333_v32 }
 0x71a   : > { %12230 = vmatpush1.bf16.msra.mxu1 %v14982_v24  ;;  %12468 = vmatprep.mubr.bf16.mxu0 %v17772_v23  ;;  %v15080_v24 = vcombine.low %v4298_v56, %v4310_v48  ;;  %v4406_v56 = vld [vmem:[#allocation5 + $0x2328] sm:$0xff] }
 0x71b   : > { %12449 = vmatpush1.bf16.msra.mxu0 %v14984_v59  ;;  %12231 = vmatprep.subr.bf16.mxu1 %v15007_v58  ;;  %v15103_v59 = vcombine.high %v4321_v54, %v4333_v32  ;;  %v15105_v58 = vcombine.high %v4322_v1, %v4334_v29  ;;  %v4429_v54 = vld [vmem:[#allocation5 + $0x23e0] sm:$0xff]  ;;  %v4418_v32 = vld [vmem:[#allocation5 + $0x2388] sm:$0xff] }
 0x71c   : > { %12450 = vmatprep.subr.bf16.mxu0 %v15009_v55  ;;  %v4345_v55 = vld [vmem:[#allocation5 + $0x2140] sm:$0xff] }
 0x71d   : > { %v15126_v53 = vcombine.low %v4345_v55, %v4357_v3 }
 0x71e   : > { %12232 = vmatpush1.bf16.msra.mxu1 %v15006_v16  ;;  %v15104_v16 = vcombine.low %v4322_v1, %v4334_v29  ;;  %v4430_v1 = vld [vmem:[#allocation5 + $0x23e8] sm:$0xff] }
 0x71f   : > { %12451 = vmatpush1.bf16.msra.mxu0 %v15008_v8  ;;  %12233 = vmatprep.subr.bf16.mxu1 %v15031_v7  ;;  %v15127_v8 = vcombine.high %v4345_v55, %v4357_v3  ;;  %v15129_v7 = vcombine.high %v4346_v31, %v4358_v41  ;;  %v3303_v55 = vld [vmem:[#allocation5 + $0xb0] sm:$0xff]  ;;  %v3292_v3 = vld [vmem:[#allocation5 + $0x58] sm:$0xff] }
 0x720   : > { %12452 = vmatprep.subr.bf16.mxu0 %v15033_v36  ;;  %v4369_v36 = vld [vmem:[#allocation5 + $0x2200] sm:$0xff] }
 0x721   : > { %v15150_v48 = vcombine.low %v4369_v36, %v4381_v26 }
 0x722   : > { %12234 = vmatpush1.bf16.msra.mxu1 %v15030_v61  ;;  %v15128_v61 = vcombine.low %v4346_v31, %v4358_v41  ;;  %v3304_v31 = vld [vmem:[#allocation5 + $0xb8] sm:$0xff] }
 0x723   : > { %12453 = vmatpush1.bf16.msra.mxu0 %v15032_v52  ;;  %12235 = vmatprep.subr.bf16.mxu1 %v15055_v28  ;;  %v15151_v52 = vcombine.high %v4369_v36, %v4381_v26  ;;  %v15153_v28 = vcombine.high %v4370_v47, %v4382_v5  ;;  %v3327_v36 = vld [vmem:[#allocation5 + $0x170] sm:$0xff]  ;;  %v3316_v26 = vld [vmem:[#allocation5 + $0x118] sm:$0xff] }
 0x724   : > { %12454 = vmatprep.subr.bf16.mxu0 %v15057_v33  ;;  %v4393_v33 = vld [vmem:[#allocation5 + $0x22c0] sm:$0xff] }
 0x725   : > { %v15174_v29 = vcombine.low %v4393_v33, %v4405_v40 }
 0x726   : > { %12236 = vmatpush1.bf16.msra.mxu1 %v15054_v43  ;;  %v15152_v43 = vcombine.low %v4370_v47, %v4382_v5  ;;  %v3328_v47 = vld [vmem:[#allocation5 + $0x178] sm:$0xff] }
 0x727   : > { %12455 = vmatpush1.bf16.msra.mxu0 %v15056_v57  ;;  %12237 = vmatprep.subr.bf16.mxu1 %v15079_v46  ;;  %v15175_v57 = vcombine.high %v4393_v33, %v4405_v40  ;;  %v15177_v46 = vcombine.high %v4394_v62, %v4406_v56  ;;  %v3351_v33 = vld [vmem:[#allocation5 + $0x230] sm:$0xff]  ;;  %v3340_v40 = vld [vmem:[#allocation5 + $0x1d8] sm:$0xff] }
 0x728   : > { %12456 = vmatprep.subr.bf16.mxu0 %v15081_v20  ;;  %v4417_v20 = vld [vmem:[#allocation5 + $0x2380] sm:$0xff] }
 0x729   : > { %v15198_v41 = vcombine.low %v4417_v20, %v4429_v54 }
 0x72a   : > { %12238 = vmatpush1.bf16.msra.mxu1 %v15078_v12  ;;  %v15176_v12 = vcombine.low %v4394_v62, %v4406_v56  ;;  %v3352_v62 = vld [vmem:[#allocation5 + $0x238] sm:$0xff] }
 0x72b   : > { %12457 = vmatpush1.bf16.msra.mxu0 %v15080_v24  ;;  %12239 = vmatprep.subr.bf16.mxu1 %v15103_v59  ;;  %v15199_v24 = vcombine.high %v4417_v20, %v4429_v54  ;;  %v15201_v59 = vcombine.high %v4418_v32, %v4430_v1  ;;  %v3375_v20 = vld [vmem:[#allocation5 + $0x2f0] sm:$0xff]  ;;  %v3364_v54 = vld [vmem:[#allocation5 + $0x298] sm:$0xff] }
 0x72c   : > { %12458 = vmatprep.subr.bf16.mxu0 %v15105_v58  ;;  %v3291_v58 = vld [vmem:[#allocation5 + $0x50] sm:$0xff] }
 0x72d   : > { %v14074_v5 = vcombine.low %v3291_v58, %v3303_v55 }
 0x72e   : > { %12240 = vmatpush1.bf16.msra.mxu1 %v15102_v51  ;;  %v15200_v51 = vcombine.low %v4418_v32, %v4430_v1  ;;  %v3376_v32 = vld [vmem:[#allocation5 + $0x2f8] sm:$0xff] }
 0x72f   : > { %12459 = vmatpush1.bf16.msra.mxu0 %v15104_v16  ;;  %12241 = vmatprep.subr.bf16.mxu1 %v15127_v8  ;;  %v14075_v16 = vcombine.high %v3291_v58, %v3303_v55  ;;  %v14077_v8 = vcombine.high %v3292_v3, %v3304_v31  ;;  %v3399_v58 = vld [vmem:[#allocation5 + $0x3b0] sm:$0xff]  ;;  %v3388_v55 = vld [vmem:[#allocation5 + $0x358] sm:$0xff] }
 0x730   : > { %12460 = vmatprep.subr.bf16.mxu0 %v15129_v7  ;;  %v3315_v7 = vld [vmem:[#allocation5 + $0x110] sm:$0xff] }
 0x731   : > { %v14098_v56 = vcombine.low %v3315_v7, %v3327_v36 }
 0x732   : > { %12242 = vmatpush1.bf16.msra.mxu1 %v15126_v53  ;;  %v14076_v53 = vcombine.low %v3292_v3, %v3304_v31  ;;  %v3400_v3 = vld [vmem:[#allocation5 + $0x3b8] sm:$0xff] }
 0x733   : > { %12461 = vmatpush1.bf16.msra.mxu0 %v15128_v61  ;;  %12243 = vmatprep.subr.bf16.mxu1 %v15151_v52  ;;  %v14099_v61 = vcombine.high %v3315_v7, %v3327_v36  ;;  %v14101_v52 = vcombine.high %v3316_v26, %v3328_v47  ;;  %v3423_v7 = vld [vmem:[#allocation5 + $0x470] sm:$0xff]  ;;  %v16721_v36 = vld [vmem:[%s18818_s5 + $0x8] sm:$0xff] }
 0x734   : > { %12462 = vmatprep.subr.bf16.mxu0 %v15153_v28  ;;  %v3339_v28 = vld [vmem:[#allocation5 + $0x1d0] sm:$0xff] }
 0x735   : > { %v14122_v1 = vcombine.low %v3339_v28, %v3351_v33 }
 0x736   : > { %12244 = vmatpush1.bf16.msra.mxu1 %v15150_v48  ;;  %v14100_v48 = vcombine.low %v3316_v26, %v3328_v47  ;;  %v18363_v26 = vrot.slane %v16721_v36, %v18915_v21  ;;  %v3412_v47 = vld [vmem:[#allocation5 + $0x418] sm:$0xff] }
 0x737   : > { %12463 = vmatpush1.bf16.msra.mxu0 %v15152_v43  ;;  %12245 = vmatprep.subr.bf16.mxu1 %v15175_v57  ;;  %v14123_v43 = vcombine.high %v3339_v28, %v3351_v33  ;;  %v14125_v57 = vcombine.high %v3340_v40, %v3352_v62  ;;  %v14172_v28 = vcombine.low %v3388_v55, %v3400_v3  ;;  %v18917_v33 = vld [vmem:[#allocation23_spill] sm:$0xff] }
 0x738   : > { %12464 = vmatprep.subr.bf16.mxu0 %v15177_v46  ;;  %v3363_v46 = vld [vmem:[#allocation5 + $0x290] sm:$0xff] }
 0x739   : > { %v14146_v31 = vcombine.low %v3363_v46, %v3375_v20 }
 0x73a   : > { %12246 = vmatpush1.bf16.msra.mxu1 %v15174_v29  ;;  %v14124_v29 = vcombine.low %v3340_v40, %v3352_v62  ;;  %v18372_v40 = vrot.slane %v16721_v36, %v18917_v33 }
 0x73b   : > { %12465 = vmatpush1.bf16.msra.mxu0 %v15176_v12  ;;  %12247 = vmatprep.subr.bf16.mxu1 %v15199_v24  ;;  %v14147_v12 = vcombine.high %v3363_v46, %v3375_v20  ;;  %v14149_v24 = vcombine.high %v3364_v54, %v3376_v32 }
 0x73c   : > { %12466 = vmatprep.subr.bf16.mxu0 %v15201_v59  ;;  %v3387_v59 = vld [vmem:[#allocation5 + $0x350] sm:$0xff] }
 0x73e   : > { %12248 = vmatpush1.bf16.msra.mxu1 %v15198_v41  ;;  %v14148_v41 = vcombine.low %v3364_v54, %v3376_v32 }
 0x73f   : > { %12467 = vmatpush1.bf16.msra.mxu0 %v15200_v51  ;;  %12509 = vmatprep.subr.bf16.mxu1 %v14075_v16  ;;  %v14171_v51 = vcombine.high %v3387_v59, %v3399_v58  ;;  %v14173_v16 = vcombine.high %v3388_v55, %v3400_v3 }
 0x740   : > { %12728 = vmatprep.subr.bf16.mxu0 %v14077_v8  ;;  %v3411_v8 = vld [vmem:[#allocation5 + $0x410] sm:$0xff] }
 0x741   : > { %12250 = vmatmul.mubr.bf16.vlgmr.msra.gmra.mrb[96].mxu1 %v17798_v4  ;;  %v14195_v62 = vcombine.high %v3411_v8, %v3423_v7  ;;  %v14194_v32 = vcombine.low %v3411_v8, %v3423_v7 }
 0x742   : > { %12469 = vmatmul.mubr.bf16.vlgmr.msra.gmra.mrb[96].mxu0 %v17798_v4  ;;  %12259 = vmatprep.mubr.bf16.mxu1 %v17833_v60 }
 0x743   : > { %12478 = vmatprep.mubr.bf16.mxu0 %v17833_v60  ;;  %12510 = vmatpush1.bf16.msra.mxu1 %v14074_v5  ;;  %v3424_v5 = vld [vmem:[#allocation5 + $0x478] sm:$0xff] }
 0x744   : > { %12729 = vmatpush1.bf16.msra.mxu0 %v14076_v53  ;;  %12511 = vmatprep.subr.bf16.mxu1 %v14099_v61  ;;  %v14170_v53 = vcombine.low %v3387_v59, %v3399_v58  ;;  %v18366_v61 = vrot.slane %v16721_v36, %v18132_v63  ;;  %v14196_v58 = vcombine.low %v3412_v47, %v3424_v5 }
 0x745   : > { %12730 = vmatprep.subr.bf16.mxu0 %v14101_v52  ;;  %v18369_v52 = vrot.slane %v16721_v36, %v18916_v0 }
 0x747   : > { %12512 = vmatpush1.bf16.msra.mxu1 %v14098_v56 }
 0x748   : > { %12731 = vmatpush1.bf16.msra.mxu0 %v14100_v48  ;;  %12513 = vmatprep.subr.bf16.mxu1 %v14123_v43  ;;  %v14197_v48 = vcombine.high %v3412_v47, %v3424_v5  ;;  %v3435_v43 = vld [vmem:[#allocation5 + $0x4d0] sm:$0xff] }
 0x749   : > { %12260 = vmatmul.mubr.bf16.gmra.mrb[100].mxu1 %v17852_v18  ;;  %12732 = vmatprep.subr.bf16.mxu0 %v14125_v57  ;;  %v3447_v57 = vld [vmem:[#allocation5 + $0x530] sm:$0xff] }
 0x74a   : > { %12479 = vmatmul.mubr.bf16.gmra.mrb[100].mxu0 %v17852_v18  ;;  %12269 = vmatprep.mubr.bf16.mxu1 %v17887_v44  ;;  %v3459_v5 = vld [vmem:[#allocation5 + $0x590] sm:$0xff] }
 0x74b   : > { %12488 = vmatprep.mubr.bf16.mxu0 %v17887_v44  ;;  %12514 = vmatpush1.bf16.msra.mxu1 %v14122_v1  ;;  %v3436_v1 = vld [vmem:[#allocation5 + $0x4d8] sm:$0xff] }
 0x74c   : > { %12733 = vmatpush1.bf16.msra.mxu0 %v14124_v29  ;;  %12515 = vmatprep.subr.bf16.mxu1 %v14147_v12  ;;  %v3448_v29 = vld [vmem:[#allocation5 + $0x538] sm:$0xff] }
 0x74d   : > { %12734 = vmatprep.subr.bf16.mxu0 %v14149_v24  ;;  %v14221_v47 = vcombine.high %v3436_v1, %v3448_v29 }
 0x74f   : > { %12516 = vmatpush1.bf16.msra.mxu1 %v14146_v31 }
 0x750   : > { %12735 = vmatpush1.bf16.msra.mxu0 %v14148_v41  ;;  %12517 = vmatprep.subr.bf16.mxu1 %v14171_v51 }
 0x751   : > { %12270 = vmatmul.mubr.bf16.gmra.mrb[104].mxu1 %v17906_v17  ;;  %12736 = vmatprep.subr.bf16.mxu0 %v14173_v16  ;;  %v11813_v56 = vpop.f32.mrb[80].mxu1  ;;  %v14219_v16 = vcombine.high %v3435_v43, %v3447_v57 }
 0x752   : > { %12489 = vmatmul.mubr.bf16.gmra.mrb[104].mxu0 %v17906_v17  ;;  %12279 = vmatprep.mubr.bf16.mxu1 %v17928_v2  ;;  %v15595_v46 = vadd.f32 %v11813_v56, %v18363_v26  ;;  %v12032_v20 = vpop.f32.mrb[80].mxu0  ;;  %v11815_v54 = vpop.f32.mrb[81].mxu1 }
 0x753   : > { %12498 = vmatprep.mubr.bf16.mxu0 %v17928_v2  ;;  %12518 = vmatpush1.bf16.msra.mxu1 %v14170_v53  ;;  %v15611_v12 = vadd.f32 %v12032_v20, %v18366_v61  ;;  %v15596_v24 = vadd.f32 %v11815_v54, %v18369_v52  ;;  %v12034_v59 = vpop.f32.mrb[81].mxu0  ;;  %v11817_v55 = vpop.f32.mrb[82].mxu1  ;;  %v3460_v20 = vld [vmem:[#allocation5 + $0x598] sm:$0xff] }
 0x754   : > { %12737 = vmatpush1.bf16.msra.mxu0 %v14172_v28  ;;  %v15612_v3 = vadd.f32 %v12034_v59, %v18372_v40  ;;  %12519 = vmatprep.subr.bf16.mxu1 %v14195_v62  ;;  %v15597_v31 = vadd.f32 %v11817_v55, %v18363_v26  ;;  %v12036_v41 = vpop.f32.mrb[82].mxu0  ;;  %v11819_v51 = vpop.f32.mrb[83].mxu1  ;;  %v3471_v28 = vld [vmem:[#allocation5 + $0x5f0] sm:$0xff]  ;;  %v3472_v54 = vld [vmem:[#allocation5 + $0x5f8] sm:$0xff]  ;;  %v14220_v59 = vcombine.low %v3436_v1, %v3448_v29 }
 0x755   : > { %v15313_v8 = vpack.c.bf16 %v15596_v24, %v15595_v46  ;;  %12738 = vmatprep.subr.bf16.mxu0 %v14197_v48  ;;  %v15613_v7 = vadd.f32 %v12036_v41, %v18366_v61  ;;  %v15598_v36 = vadd.f32 %v11819_v51, %v18369_v52  ;;  %v12038_v53 = vpop.f32.mrb[83].mxu0  ;;  %v14218_v24 = vcombine.low %v3435_v43, %v3447_v57  ;;  %v3483_v41 = vld [vmem:[#allocation5 + $0x650] sm:$0xff]  ;;  %v3484_v1 = vld [vmem:[#allocation5 + $0x658] sm:$0xff] }
 0x756   : > { %v15314_v56 = vpack.c.bf16 %v15612_v3, %v15611_v12  ;;  %v15614_v62 = vadd.f32 %v12038_v53, %v18372_v40  ;;  %v14243_v55 = vcombine.high %v3459_v5, %v3471_v28  ;;  %v14245_v3 = vcombine.high %v3460_v20, %v3472_v54  ;;  %v3495_v51 = vld [vmem:[#allocation5 + $0x6b0] sm:$0xff]  ;;  %v3496_v29 = vld [vmem:[#allocation5 + $0x6b8] sm:$0xff] }
 0x757   : > { %13529 = vst [vmem:[%s18044_s9 + $0x30] sm:$0xff] %v15313_v8  ;;  %12520 = vmatpush1.bf16.msra.mxu1 %v14194_v32  ;;  %v15325_v46 = vpack.c.bf16 %v15598_v36, %v15597_v31 }
 0x758   : > { %13530 = vst [vmem:[%s18044_s9 + $0x38] sm:$0xff] %v15314_v56  ;;  %12739 = vmatpush1.bf16.msra.mxu0 %v14196_v58  ;;  %v15326_v48 = vpack.c.bf16 %v15614_v62, %v15613_v7  ;;  %12521 = vmatprep.subr.bf16.mxu1 %v14219_v16  ;;  %v14242_v58 = vcombine.low %v3459_v5, %v3471_v28 }
 0x759   : > { %13541 = vst [vmem:[%s18044_s9 + $0x90] sm:$0xff] %v15325_v46  ;;  %12280 = vmatmul.mubr.bf16.gmra.mrb[108].mxu1 %v17932_v37  ;;  %12740 = vmatprep.subr.bf16.mxu0 %v14221_v47  ;;  %v11823_v12 = vpop.f32.mrb[84].mxu1  ;;  %v14244_v7 = vcombine.low %v3460_v20, %v3472_v54  ;;  %v14267_v56 = vcombine.high %v3483_v41, %v3495_v51  ;;  %v3507_v54 = vld [vmem:[#allocation5 + $0x710] sm:$0xff] }
 0x75a   : > { %13542 = vst [vmem:[%s18044_s9 + $0x98] sm:$0xff] %v15326_v48  ;;  %12499 = vmatmul.mubr.bf16.gmra.mrb[108].mxu0 %v17932_v37  ;;  %12541 = vmatprep.mubr.bf16.mxu1 %v17762_v39  ;;  %v15599_v43 = vadd.f32 %v11823_v12, %v18363_v26  ;;  %v12042_v57 = vpop.f32.mrb[84].mxu0  ;;  %v11825_v32 = vpop.f32.mrb[85].mxu1  ;;  %v14269_v20 = vcombine.high %v3484_v1, %v3496_v29  ;;  %v3519_v48 = vld [vmem:[#allocation5 + $0x770] sm:$0xff]  ;;  %v3508_v12 = vld [vmem:[#allocation5 + $0x718] sm:$0xff] }
 0x75b   : > { %12522 = vmatpush1.bf16.msra.mxu1 %v14218_v24  ;;  %12760 = vmatprep.mubr.bf16.mxu0 %v17762_v39  ;;  %v15615_v31 = vadd.f32 %v12042_v57, %v18366_v61  ;;  %v15600_v16 = vadd.f32 %v11825_v32, %v18369_v52  ;;  %v12044_v8 = vpop.f32.mrb[85].mxu0  ;;  %v11827_v36 = vpop.f32.mrb[86].mxu1  ;;  %v3520_v57 = vld [vmem:[#allocation5 + $0x778] sm:$0xff]  ;;  %v14266_v32 = vcombine.low %v3483_v41, %v3495_v51 }
 0x75c   : > { %12741 = vmatpush1.bf16.msra.mxu0 %v14220_v59  ;;  %v15616_v53 = vadd.f32 %v12044_v8, %v18372_v40  ;;  %12523 = vmatprep.subr.bf16.mxu1 %v14243_v55  ;;  %v15601_v47 = vadd.f32 %v11827_v36, %v18363_v26  ;;  %v12046_v5 = vpop.f32.mrb[86].mxu0  ;;  %v11829_v28 = vpop.f32.mrb[87].mxu1  ;;  %v14291_v8 = vcombine.high %v3507_v54, %v3519_v48 }
 0x75d   : > { %v15337_v62 = vpack.c.bf16 %v15600_v16, %v15599_v43  ;;  %12742 = vmatprep.subr.bf16.mxu0 %v14245_v3  ;;  %v15617_v39 = vadd.f32 %v12046_v5, %v18366_v61  ;;  %v15602_v46 = vadd.f32 %v11829_v28, %v18369_v52  ;;  %v12048_v24 = vpop.f32.mrb[87].mxu0  ;;  %v14268_v16 = vcombine.low %v3484_v1, %v3496_v29 }
 0x75e   : > { %v15338_v59 = vpack.c.bf16 %v15616_v53, %v15615_v31  ;;  %v15618_v55 = vadd.f32 %v12048_v24, %v18372_v40  ;;  %v14293_v5 = vcombine.high %v3508_v12, %v3520_v57  ;;  %v3531_v31 = vld [vmem:[#allocation5 + $0x7d0] sm:$0xff]  ;;  %v14290_v29 = vcombine.low %v3507_v54, %v3519_v48 }
 0x75f   : > { %13553 = vst [vmem:[%s18044_s9 + $0xf0] sm:$0xff] %v15337_v62  ;;  %12524 = vmatpush1.bf16.msra.mxu1 %v14242_v58  ;;  %v15349_v43 = vpack.c.bf16 %v15602_v46, %v15601_v47  ;;  %v3543_v53 = vld [vmem:[#allocation5 + $0x830] sm:$0xff]  ;;  %v3532_v58 = vld [vmem:[#allocation5 + $0x7d8] sm:$0xff] }
 0x760   : > { %13554 = vst [vmem:[%s18044_s9 + $0xf8] sm:$0xff] %v15338_v59  ;;  %12743 = vmatpush1.bf16.msra.mxu0 %v14244_v7  ;;  %v15350_v3 = vpack.c.bf16 %v15618_v55, %v15617_v39  ;;  %12525 = vmatprep.subr.bf16.mxu1 %v14267_v56  ;;  %v3544_v47 = vld [vmem:[#allocation5 + $0x838] sm:$0xff]  ;;  %v14292_v7 = vcombine.low %v3508_v12, %v3520_v57  ;;  %v3555_v12 = vld [vmem:[#allocation5 + $0x890] sm:$0xff] }
 0x761   : > { %13565 = vst [vmem:[%s18044_s9 + $0x150] sm:$0xff] %v15349_v43  ;;  %12744 = vmatprep.subr.bf16.mxu0 %v14269_v20  ;;  %v11833_v36 = vpop.f32.mrb[88].mxu1  ;;  %v14315_v55 = vcombine.high %v3531_v31, %v3543_v53  ;;  %v14317_v48 = vcombine.high %v3532_v58, %v3544_v47  ;;  %v3567_v57 = vld [vmem:[#allocation5 + $0x8f0] sm:$0xff] }
 0x762   : > { %13566 = vst [vmem:[%s18044_s9 + $0x158] sm:$0xff] %v15350_v3  ;;  %v15603_v28 = vadd.f32 %v11833_v36, %v18363_v26  ;;  %v12052_v62 = vpop.f32.mrb[88].mxu0  ;;  %v11835_v24 = vpop.f32.mrb[89].mxu1  ;;  %v3556_v36 = vld [vmem:[#allocation5 + $0x898] sm:$0xff] }
 0x763   : > { %12526 = vmatpush1.bf16.msra.mxu1 %v14266_v32  ;;  %v15619_v41 = vadd.f32 %v12052_v62, %v18366_v61  ;;  %v15604_v51 = vadd.f32 %v11835_v24, %v18369_v52  ;;  %v12054_v1 = vpop.f32.mrb[89].mxu0  ;;  %v11837_v56 = vpop.f32.mrb[90].mxu1  ;;  %v3568_v62 = vld [vmem:[#allocation5 + $0x8f8] sm:$0xff]  ;;  %v14314_v24 = vcombine.low %v3531_v31, %v3543_v53 }
 0x764   : > { %12745 = vmatpush1.bf16.msra.mxu0 %v14268_v16  ;;  %v15620_v39 = vadd.f32 %v12054_v1, %v18372_v40  ;;  %12527 = vmatprep.subr.bf16.mxu1 %v14291_v8  ;;  %v15605_v46 = vadd.f32 %v11837_v56, %v18363_v26  ;;  %v12056_v20 = vpop.f32.mrb[90].mxu0  ;;  %v11839_v59 = vpop.f32.mrb[91].mxu1  ;;  %v14339_v1 = vcombine.high %v3555_v12, %v3567_v57 }
 0x765   : > { %v15361_v43 = vpack.c.bf16 %v15604_v51, %v15603_v28  ;;  %12746 = vmatprep.subr.bf16.mxu0 %v14293_v5  ;;  %v15621_v32 = vadd.f32 %v12056_v20, %v18366_v61  ;;  %v15606_v3 = vadd.f32 %v11839_v59, %v18369_v52  ;;  %v12058_v54 = vpop.f32.mrb[91].mxu0  ;;  %v14316_v51 = vcombine.low %v3532_v58, %v3544_v47 }
 0x766   : > { %v15362_v16 = vpack.c.bf16 %v15620_v39, %v15619_v41  ;;  %v15622_v8 = vadd.f32 %v12058_v54, %v18372_v40  ;;  %v14341_v20 = vcombine.high %v3556_v36, %v3568_v62  ;;  %v3579_v41 = vld [vmem:[#allocation5 + $0x950] sm:$0xff]  ;;  %v14338_v47 = vcombine.low %v3555_v12, %v3567_v57 }
 0x767   : > { %13577 = vst [vmem:[%s18044_s9 + $0x1b0] sm:$0xff] %v15361_v43  ;;  %12528 = vmatpush1.bf16.msra.mxu1 %v14290_v29  ;;  %v15373_v28 = vpack.c.bf16 %v15606_v3, %v15605_v46  ;;  %v3591_v39 = vld [vmem:[#allocation5 + $0x9b0] sm:$0xff]  ;;  %v3580_v29 = vld [vmem:[#allocation5 + $0x958] sm:$0xff] }
 0x768   : > { %13578 = vst [vmem:[%s18044_s9 + $0x1b8] sm:$0xff] %v15362_v16  ;;  %12747 = vmatpush1.bf16.msra.mxu0 %v14292_v7  ;;  %v15374_v5 = vpack.c.bf16 %v15622_v8, %v15621_v32  ;;  %12529 = vmatprep.subr.bf16.mxu1 %v14315_v55  ;;  %v3592_v46 = vld [vmem:[#allocation5 + $0x9b8] sm:$0xff]  ;;  %v14340_v7 = vcombine.low %v3556_v36, %v3568_v62  ;;  %v3603_v36 = vld [vmem:[#allocation5 + $0xa10] sm:$0xff] }
 0x769   : > { %13589 = vst [vmem:[%s18044_s9 + $0x210] sm:$0xff] %v15373_v28  ;;  %12748 = vmatprep.subr.bf16.mxu0 %v14317_v48  ;;  %v11843_v56 = vpop.f32.mrb[92].mxu1  ;;  %v14363_v8 = vcombine.high %v3579_v41, %v3591_v39  ;;  %v14365_v57 = vcombine.high %v3580_v29, %v3592_v46  ;;  %v3615_v62 = vld [vmem:[#allocation5 + $0xa70] sm:$0xff] }
 0x76a   : > { %13590 = vst [vmem:[%s18044_s9 + $0x218] sm:$0xff] %v15374_v5  ;;  %v15607_v59 = vadd.f32 %v11843_v56, %v18363_v26  ;;  %v12062_v43 = vpop.f32.mrb[92].mxu0  ;;  %v11845_v54 = vpop.f32.mrb[93].mxu1  ;;  %v3616_v56 = vld [vmem:[#allocation5 + $0xa78] sm:$0xff] }
 0x76b   : > { %12530 = vmatpush1.bf16.msra.mxu1 %v14314_v24  ;;  %v15623_v31 = vadd.f32 %v12062_v43, %v18366_v61  ;;  %v15608_v53 = vadd.f32 %v11845_v54, %v18369_v52  ;;  %v12064_v58 = vpop.f32.mrb[93].mxu0  ;;  %v11847_v55 = vpop.f32.mrb[94].mxu1  ;;  %v14362_v43 = vcombine.low %v3579_v41, %v3591_v39 }
 0x76c   : > { %12749 = vmatpush1.bf16.msra.mxu0 %v14316_v51  ;;  %v15624_v32 = vadd.f32 %v12064_v58, %v18372_v40  ;;  %12531 = vmatprep.subr.bf16.mxu1 %v14339_v1  ;;  %v15609_v3 = vadd.f32 %v11847_v55, %v18363_v26  ;;  %v12066_v48 = vpop.f32.mrb[94].mxu0  ;;  %v11849_v16 = vpop.f32.mrb[95].mxu1  ;;  %v3604_v26 = vld [vmem:[#allocation5 + $0xa18] sm:$0xff]  ;;  %v14386_v55 = vcombine.low %v3603_v36, %v3615_v62 }
 0x76d   : > { %v15385_v28 = vpack.c.bf16 %v15608_v53, %v15607_v59  ;;  %12750 = vmatprep.subr.bf16.mxu0 %v14341_v20  ;;  %v15625_v24 = vadd.f32 %v12066_v48, %v18366_v61  ;;  %v15610_v5 = vadd.f32 %v11849_v16, %v18369_v52  ;;  %v12068_v12 = vpop.f32.mrb[95].mxu0  ;;  %v14364_v52 = vcombine.low %v3580_v29, %v3592_v46  ;;  %v3627_v53 = vld [vmem:[#allocation5 + $0xad0] sm:$0xff]  ;;  %v3640_v58 = vld [vmem:[#allocation5 + $0xb38] sm:$0xff] }
 0x76e   : > { %v15386_v51 = vpack.c.bf16 %v15624_v32, %v15623_v31  ;;  %v15626_v1 = vadd.f32 %v12068_v12, %v18372_v40  ;;  %v14387_v20 = vcombine.high %v3603_v36, %v3615_v62  ;;  %v14389_v54 = vcombine.high %v3604_v26, %v3616_v56  ;;  %v3639_v31 = vld [vmem:[#allocation5 + $0xb30] sm:$0xff]  ;;  %v3628_v40 = vld [vmem:[#allocation5 + $0xad8] sm:$0xff] }
 0x76f   : > { %13601 = vst [vmem:[%s18044_s9 + $0x270] sm:$0xff] %v15385_v28  ;;  %12532 = vmatpush1.bf16.msra.mxu1 %v14338_v47  ;;  %v15397_v59 = vpack.c.bf16 %v15610_v5, %v15609_v3  ;;  %v14388_v47 = vcombine.low %v3604_v26, %v3616_v56  ;;  %v14411_v41 = vcombine.high %v3627_v53, %v3639_v31  ;;  %v3663_v32 = vld [vmem:[#allocation5 + $0xbf0] sm:$0xff]  ;;  %v3652_v29 = vld [vmem:[#allocation5 + $0xb98] sm:$0xff] }
 0x770   : > { %13602 = vst [vmem:[%s18044_s9 + $0x278] sm:$0xff] %v15386_v51  ;;  %12751 = vmatpush1.bf16.msra.mxu0 %v14340_v7  ;;  %v15398_v61 = vpack.c.bf16 %v15626_v1, %v15625_v24  ;;  %12533 = vmatprep.subr.bf16.mxu1 %v14363_v8  ;;  %v14413_v39 = vcombine.high %v3628_v40, %v3640_v58  ;;  %v3651_v7 = vld [vmem:[#allocation5 + $0xb90] sm:$0xff]  ;;  %v3664_v46 = vld [vmem:[#allocation5 + $0xbf8] sm:$0xff] }
 0x771   : > { %13613 = vst [vmem:[%s18044_s9 + $0x2d0] sm:$0xff] %v15397_v59  ;;  %12752 = vmatprep.subr.bf16.mxu0 %v14365_v57  ;;  %v14410_v3 = vcombine.low %v3627_v53, %v3639_v31  ;;  %v14412_v48 = vcombine.low %v3628_v40, %v3640_v58  ;;  %v14435_v16 = vcombine.high %v3651_v7, %v3663_v32  ;;  %v3675_v28 = vld [vmem:[#allocation5 + $0xc50] sm:$0xff]  ;;  %v3676_v5 = vld [vmem:[#allocation5 + $0xc58] sm:$0xff] }
 0x772   : > { %13614 = vst [vmem:[%s18044_s9 + $0x2d8] sm:$0xff] %v15398_v61  ;;  %v14437_v8 = vcombine.high %v3652_v29, %v3664_v46  ;;  %v3687_v24 = vld [vmem:[#allocation5 + $0xcb0] sm:$0xff]  ;;  %v3688_v12 = vld [vmem:[#allocation5 + $0xcb8] sm:$0xff]  ;;  %v14434_v57 = vcombine.low %v3651_v7, %v3663_v32  ;;  %v14436_v36 = vcombine.low %v3652_v29, %v3664_v46 }
 0x773   : > { %12534 = vmatpush1.bf16.msra.mxu1 %v14362_v43  ;;  %v14459_v62 = vcombine.high %v3675_v28, %v3687_v24  ;;  %v14461_v51 = vcombine.high %v3676_v5, %v3688_v12  ;;  %v3699_v1 = vld [vmem:[#allocation5 + $0xd10] sm:$0xff]  ;;  %v3700_v56 = vld [vmem:[#allocation5 + $0xd18] sm:$0xff]  ;;  %v14458_v43 = vcombine.low %v3675_v28, %v3687_v24  ;;  %v14460_v61 = vcombine.low %v3676_v5, %v3688_v12 }
 0x774   : > { %12753 = vmatpush1.bf16.msra.mxu0 %v14364_v52  ;;  %12535 = vmatprep.subr.bf16.mxu1 %v14387_v20  ;;  %v3711_v26 = vld [vmem:[#allocation5 + $0xd70] sm:$0xff]  ;;  %v3712_v59 = vld [vmem:[#allocation5 + $0xd78] sm:$0xff] }
 0x775   : > { %12754 = vmatprep.subr.bf16.mxu0 %v14389_v54  ;;  %v14483_v52 = vcombine.high %v3699_v1, %v3711_v26  ;;  %v14485_v20 = vcombine.high %v3700_v56, %v3712_v59  ;;  %v3723_v54 = vld [vmem:[#allocation5 + $0xdd0] sm:$0xff]  ;;  %v3724_v31 = vld [vmem:[#allocation5 + $0xdd8] sm:$0xff]  ;;  %v14482_v58 = vcombine.low %v3699_v1, %v3711_v26 }
 0x776   : > { %v3735_v53 = vld [vmem:[#allocation5 + $0xe30] sm:$0xff]  ;;  %v3736_v40 = vld [vmem:[#allocation5 + $0xe38] sm:$0xff] }
 0x777   : > { %12536 = vmatpush1.bf16.msra.mxu1 %v14386_v55  ;;  %v14484_v55 = vcombine.low %v3700_v56, %v3712_v59  ;;  %v3759_v7 = vld [vmem:[#allocation5 + $0xef0] sm:$0xff]  ;;  %v3748_v32 = vld [vmem:[#allocation5 + $0xe98] sm:$0xff]  ;;  %v14508_v46 = vcombine.low %v3724_v31, %v3736_v40 }
 0x778   : > { %12755 = vmatpush1.bf16.msra.mxu0 %v14388_v47  ;;  %12537 = vmatprep.subr.bf16.mxu1 %v14411_v41  ;;  %v14507_v47 = vcombine.high %v3723_v54, %v3735_v53  ;;  %v14509_v41 = vcombine.high %v3724_v31, %v3736_v40  ;;  %v3760_v29 = vld [vmem:[#allocation5 + $0xef8] sm:$0xff]  ;;  %v3819_v59 = vld [vmem:[#allocation5 + $0x10d0] sm:$0xff] }
 0x779   : > { %12756 = vmatprep.subr.bf16.mxu0 %v14413_v39  ;;  %v3747_v39 = vld [vmem:[#allocation5 + $0xe90] sm:$0xff]  ;;  %v3784_v28 = vld [vmem:[#allocation5 + $0xfb8] sm:$0xff]  ;;  %v14532_v5 = vcombine.low %v3748_v32, %v3760_v29 }
 0x77a   : > { %v14530_v24 = vcombine.low %v3747_v39, %v3759_v7  ;;  %v3808_v1 = vld [vmem:[#allocation5 + $0x1078] sm:$0xff]  ;;  %v3843_v40 = vld [vmem:[#allocation5 + $0x1190] sm:$0xff] }
 0x77b   : > { %12538 = vmatpush1.bf16.msra.mxu1 %v14410_v3  ;;  %v14531_v3 = vcombine.high %v3747_v39, %v3759_v7  ;;  %v3867_v7 = vld [vmem:[#allocation5 + $0x1250] sm:$0xff] }
 0x77c   : > { %12757 = vmatpush1.bf16.msra.mxu0 %v14412_v48  ;;  %12539 = vmatprep.subr.bf16.mxu1 %v14435_v16  ;;  %v3771_v48 = vld [vmem:[#allocation5 + $0xf50] sm:$0xff] }
 0x77d   : > { %12758 = vmatprep.subr.bf16.mxu0 %v14437_v8  ;;  %v3783_v16 = vld [vmem:[#allocation5 + $0xfb0] sm:$0xff]  ;;  %v3772_v8 = vld [vmem:[#allocation5 + $0xf58] sm:$0xff] }
 0x77e   : > { %v14555_v12 = vcombine.high %v3771_v48, %v3783_v16  ;;  %v14556_v26 = vcombine.low %v3772_v8, %v3784_v28 }
 0x77f   : > { %12540 = vmatpush1.bf16.msra.mxu1 %v14434_v57  ;;  %v14557_v57 = vcombine.high %v3772_v8, %v3784_v28  ;;  %v3903_v8 = vld [vmem:[#allocation5 + $0x1370] sm:$0xff]  ;;  %v3892_v28 = vld [vmem:[#allocation5 + $0x1318] sm:$0xff] }
 0x780   : > { %12759 = vmatpush1.bf16.msra.mxu0 %v14436_v36  ;;  %12582 = vmatprep.subr.bf16.mxu1 %v14459_v62  ;;  %v3795_v36 = vld [vmem:[#allocation5 + $0x1010] sm:$0xff] }
 0x781   : > { %12801 = vmatprep.subr.bf16.mxu0 %v14461_v51  ;;  %v3807_v62 = vld [vmem:[#allocation5 + $0x1070] sm:$0xff]  ;;  %v3796_v51 = vld [vmem:[#allocation5 + $0x1018] sm:$0xff] }
 0x782   : > { %12542 = vmatmul.mubr.bf16.vlgmr.msra.gmra.mrb[112].mxu1 %v17764_v38  ;;  %v14579_v56 = vcombine.high %v3795_v36, %v3807_v62 }
 0x783   : > { %12761 = vmatmul.mubr.bf16.vlgmr.msra.gmra.mrb[112].mxu0 %v17764_v38  ;;  %12551 = vmatprep.mubr.bf16.mxu1 %v17808_v49  ;;  %v14506_v38 = vcombine.low %v3723_v54, %v3735_v53  ;;  %v14580_v54 = vcombine.low %v3796_v51, %v3808_v1 }
 0x784   : > { %12583 = vmatpush1.bf16.msra.mxu1 %v14458_v43  ;;  %12770 = vmatprep.mubr.bf16.mxu0 %v17808_v49  ;;  %v14533_v49 = vcombine.high %v3748_v32, %v3760_v29  ;;  %v3831_v43 = vld [vmem:[#allocation5 + $0x1130] sm:$0xff]  ;;  %v3868_v29 = vld [vmem:[#allocation5 + $0x1258] sm:$0xff] }
 0x785   : > { %12802 = vmatpush1.bf16.msra.mxu0 %v14460_v61  ;;  %12584 = vmatprep.subr.bf16.mxu1 %v14483_v52  ;;  %v3820_v61 = vld [vmem:[#allocation5 + $0x10d8] sm:$0xff]  ;;  %v14603_v53 = vcombine.high %v3819_v59, %v3831_v43  ;;  %v3879_v32 = vld [vmem:[#allocation5 + $0x12b0] sm:$0xff] }
 0x786   : > { %12803 = vmatprep.subr.bf16.mxu0 %v14485_v20  ;;  %v3832_v52 = vld [vmem:[#allocation5 + $0x1138] sm:$0xff]  ;;  %v14578_v20 = vcombine.low %v3795_v36, %v3807_v62  ;;  %v3927_v36 = vld [vmem:[#allocation5 + $0x1430] sm:$0xff] }
 0x787   : > { %v14605_v31 = vcombine.high %v3820_v61, %v3832_v52  ;;  %v3916_v62 = vld [vmem:[#allocation5 + $0x13d8] sm:$0xff] }
 0x788   : > { %12585 = vmatpush1.bf16.msra.mxu1 %v14482_v58  ;;  %v3855_v58 = vld [vmem:[#allocation5 + $0x11f0] sm:$0xff] }
 0x789   : > { %12804 = vmatpush1.bf16.msra.mxu0 %v14484_v55  ;;  %12586 = vmatprep.subr.bf16.mxu1 %v14507_v47  ;;  %v3844_v55 = vld [vmem:[#allocation5 + $0x1198] sm:$0xff]  ;;  %v14627_v39 = vcombine.high %v3843_v40, %v3855_v58 }
 0x78a   : > { %12552 = vmatmul.mubr.bf16.gmra.mrb[116].mxu1 %v17810_v27  ;;  %12805 = vmatprep.subr.bf16.mxu0 %v14509_v41  ;;  %v3856_v47 = vld [vmem:[#allocation5 + $0x11f8] sm:$0xff]  ;;  %v14604_v41 = vcombine.low %v3820_v61, %v3832_v52 }
 0x78b   : > { %12771 = vmatmul.mubr.bf16.gmra.mrb[116].mxu0 %v17810_v27  ;;  %12561 = vmatprep.mubr.bf16.mxu1 %v17854_v30  ;;  %v14554_v27 = vcombine.low %v3771_v48, %v3783_v16  ;;  %v3891_v16 = vld [vmem:[#allocation5 + $0x1310] sm:$0xff]  ;;  %v3952_v61 = vld [vmem:[#allocation5 + $0x14f8] sm:$0xff] }
 0x78c   : > { %12587 = vmatpush1.bf16.msra.mxu1 %v14506_v38  ;;  %12780 = vmatprep.mubr.bf16.mxu0 %v17854_v30  ;;  %v14581_v30 = vcombine.high %v3796_v51, %v3808_v1  ;;  %v3880_v38 = vld [vmem:[#allocation5 + $0x12b8] sm:$0xff]  ;;  %v14674_v1 = vcombine.low %v3891_v16, %v3903_v8 }
 0x78d   : > { %12806 = vmatpush1.bf16.msra.mxu0 %v14508_v46  ;;  %12588 = vmatprep.subr.bf16.mxu1 %v14531_v3  ;;  %v14626_v46 = vcombine.low %v3843_v40, %v3855_v58  ;;  %v14628_v3 = vcombine.low %v3844_v55, %v3856_v47  ;;  %v14653_v48 = vcombine.high %v3868_v29, %v3880_v38  ;;  %v3928_v51 = vld [vmem:[#allocation5 + $0x1438] sm:$0xff]  ;;  %v3975_v40 = vld [vmem:[#allocation5 + $0x15b0] sm:$0xff] }
 0x78e   : > { %12807 = vmatprep.subr.bf16.mxu0 %v14533_v49  ;;  %v14651_v49 = vcombine.high %v3867_v7, %v3879_v32  ;;  %v3964_v58 = vld [vmem:[#allocation5 + $0x1558] sm:$0xff] }
 0x790   : > { %12589 = vmatpush1.bf16.msra.mxu1 %v14530_v24  ;;  %v3904_v24 = vld [vmem:[#allocation5 + $0x1378] sm:$0xff] }
 0x791   : > { %12808 = vmatpush1.bf16.msra.mxu0 %v14532_v5  ;;  %12590 = vmatprep.subr.bf16.mxu1 %v14555_v12  ;;  %v14652_v5 = vcombine.low %v3868_v29, %v3880_v38  ;;  %v14675_v12 = vcombine.high %v3891_v16, %v3903_v8  ;;  %v4000_v29 = vld [vmem:[#allocation5 + $0x1678] sm:$0xff]  ;;  %v4023_v16 = vld [vmem:[#allocation5 + $0x1730] sm:$0xff] }
 0x792   : > { %12562 = vmatmul.mubr.bf16.gmra.mrb[120].mxu1 %v17862_v34  ;;  %12809 = vmatprep.subr.bf16.mxu0 %v14557_v57  ;;  %v14677_v57 = vcombine.high %v3892_v28, %v3904_v24  ;;  %v4012_v8 = vld [vmem:[#allocation5 + $0x16d8] sm:$0xff] }
 0x793   : > { %12781 = vmatmul.mubr.bf16.gmra.mrb[120].mxu0 %v17862_v34  ;;  %12571 = vmatprep.mubr.bf16.mxu1 %v17908_v22  ;;  %v14602_v34 = vcombine.low %v3819_v59, %v3831_v43  ;;  %v3951_v59 = vld [vmem:[#allocation5 + $0x14f0] sm:$0xff]  ;;  %v3940_v43 = vld [vmem:[#allocation5 + $0x1498] sm:$0xff] }
 0x794   : > { %12591 = vmatpush1.bf16.msra.mxu1 %v14554_v27  ;;  %12790 = vmatprep.mubr.bf16.mxu0 %v17908_v22  ;;  %v14629_v22 = vcombine.high %v3844_v55, %v3856_v47  ;;  %v14676_v27 = vcombine.low %v3892_v28, %v3904_v24  ;;  %v3976_v55 = vld [vmem:[#allocation5 + $0x15b8] sm:$0xff] }
 0x795   : > { %12810 = vmatpush1.bf16.msra.mxu0 %v14556_v26  ;;  %12592 = vmatprep.subr.bf16.mxu1 %v14579_v56  ;;  %v14701_v56 = vcombine.high %v3916_v62, %v3928_v51  ;;  %v4024_v28 = vld [vmem:[#allocation5 + $0x1738] sm:$0xff] }
 0x796   : > { %12811 = vmatprep.subr.bf16.mxu0 %v14581_v30  ;;  %v3939_v30 = vld [vmem:[#allocation5 + $0x1490] sm:$0xff] }
 0x797   : > { %v14722_v47 = vcombine.low %v3939_v30, %v3951_v59 }
 0x798   : > { %12593 = vmatpush1.bf16.msra.mxu1 %v14578_v20  ;;  %v14700_v20 = vcombine.low %v3916_v62, %v3928_v51  ;;  %v4048_v62 = vld [vmem:[#allocation5 + $0x17f8] sm:$0xff] }
 0x799   : > { %12812 = vmatpush1.bf16.msra.mxu0 %v14580_v54  ;;  %12594 = vmatprep.subr.bf16.mxu1 %v14603_v53  ;;  %v14723_v54 = vcombine.high %v3939_v30, %v3951_v59  ;;  %v14725_v53 = vcombine.high %v3940_v43, %v3952_v61  ;;  %v4071_v30 = vld [vmem:[#allocation5 + $0x18b0] sm:$0xff]  ;;  %v4060_v59 = vld [vmem:[#allocation5 + $0x1858] sm:$0xff] }
 0x79a   : > { %12572 = vmatmul.mubr.bf16.gmra.mrb[124].mxu1 %v17914_v50  ;;  %12813 = vmatprep.subr.bf16.mxu0 %v14605_v31  ;;  %v3963_v31 = vld [vmem:[#allocation5 + $0x1550] sm:$0xff] }
 0x79b   : > { %12791 = vmatmul.mubr.bf16.gmra.mrb[124].mxu0 %v17914_v50  ;;  %12614 = vmatprep.mubr.bf16.mxu1 %v17926_v15  ;;  %v14650_v50 = vcombine.low %v3867_v7, %v3879_v32  ;;  %v3999_v7 = vld [vmem:[#allocation5 + $0x1670] sm:$0xff]  ;;  %v3988_v32 = vld [vmem:[#allocation5 + $0x1618] sm:$0xff]  ;;  %v14746_v38 = vcombine.low %v3963_v31, %v3975_v40 }
 0x79c   : > { %12595 = vmatpush1.bf16.msra.mxu1 %v14602_v34  ;;  %12833 = vmatprep.mubr.bf16.mxu0 %v17926_v15  ;;  %v3915_v15 = vld [vmem:[#allocation5 + $0x13d0] sm:$0xff]  ;;  %v14724_v34 = vcombine.low %v3940_v43, %v3952_v61  ;;  %v4072_v43 = vld [vmem:[#allocation5 + $0x18b8] sm:$0xff] }
 0x79d   : > { %12814 = vmatpush1.bf16.msra.mxu0 %v14604_v41  ;;  %12596 = vmatprep.subr.bf16.mxu1 %v14627_v39  ;;  %v14699_v26 = vcombine.high %v3915_v15, %v3927_v36  ;;  %v14698_v52 = vcombine.low %v3915_v15, %v3927_v36  ;;  %v14747_v41 = vcombine.high %v3963_v31, %v3975_v40  ;;  %v4047_v15 = vld [vmem:[#allocation5 + $0x17f0] sm:$0xff]  ;;  %v4036_v36 = vld [vmem:[#allocation5 + $0x1798] sm:$0xff] }
 0x79e   : > { %12815 = vmatprep.subr.bf16.mxu0 %v14629_v22  ;;  %v14749_v39 = vcombine.high %v3964_v58, %v3976_v55  ;;  %v3987_v22 = vld [vmem:[#allocation5 + $0x1610] sm:$0xff]  ;;  %v4084_v40 = vld [vmem:[#allocation5 + $0x1918] sm:$0xff] }
 0x79f   : > { %v14770_v24 = vcombine.low %v3987_v22, %v3999_v7  ;;  %v4095_v31 = vld [vmem:[#allocation5 + $0x1970] sm:$0xff] }
 0x7a0   : > { %12597 = vmatpush1.bf16.msra.mxu1 %v14626_v46  ;;  %v14748_v46 = vcombine.low %v3964_v58, %v3976_v55  ;;  %v4096_v58 = vld [vmem:[#allocation5 + $0x1978] sm:$0xff] }
 0x7a1   : > { %12816 = vmatpush1.bf16.msra.mxu0 %v14628_v3  ;;  %12598 = vmatprep.subr.bf16.mxu1 %v14651_v49  ;;  %v14771_v3 = vcombine.high %v3987_v22, %v3999_v7  ;;  %v14773_v49 = vcombine.high %v3988_v32, %v4000_v29  ;;  %v4119_v22 = vld [vmem:[#allocation5 + $0x1a30] sm:$0xff]  ;;  %v4108_v7 = vld [vmem:[#allocation5 + $0x19d8] sm:$0xff] }
 0x7a2   : > { %12817 = vmatprep.subr.bf16.mxu0 %v14653_v48  ;;  %v4011_v48 = vld [vmem:[#allocation5 + $0x16d0] sm:$0xff] }
 0x7a3   : > { %v14794_v51 = vcombine.low %v4011_v48, %v4023_v16 }
 0x7a4   : > { %12599 = vmatpush1.bf16.msra.mxu1 %v14650_v50  ;;  %v14772_v50 = vcombine.low %v3988_v32, %v4000_v29  ;;  %v4120_v32 = vld [vmem:[#allocation5 + $0x1a38] sm:$0xff] }
 0x7a5   : > { %12818 = vmatpush1.bf16.msra.mxu0 %v14652_v5  ;;  %12600 = vmatprep.subr.bf16.mxu1 %v14675_v12  ;;  %v14795_v5 = vcombine.high %v4011_v48, %v4023_v16  ;;  %v14797_v12 = vcombine.high %v4012_v8, %v4024_v28  ;;  %v4132_v48 = vld [vmem:[#allocation5 + $0x1a98] sm:$0xff] }
 0x7a6   : > { %12819 = vmatprep.subr.bf16.mxu0 %v14677_v57  ;;  %v4035_v57 = vld [vmem:[#allocation5 + $0x1790] sm:$0xff]  ;;  %v4144_v16 = vld [vmem:[#allocation5 + $0x1af8] sm:$0xff] }
 0x7a7   : > { %v14818_v61 = vcombine.low %v4035_v57, %v4047_v15 }
 0x7a8   : > { %12601 = vmatpush1.bf16.msra.mxu1 %v14674_v1  ;;  %v14796_v1 = vcombine.low %v4012_v8, %v4024_v28 }
 0x7a9   : > { %12820 = vmatpush1.bf16.msra.mxu0 %v14676_v27  ;;  %12602 = vmatprep.subr.bf16.mxu1 %v14699_v26  ;;  %v14819_v27 = vcombine.high %v4035_v57, %v4047_v15  ;;  %v14821_v26 = vcombine.high %v4036_v36, %v4048_v62  ;;  %v4168_v57 = vld [vmem:[#allocation5 + $0x1bb8] sm:$0xff] }
 0x7aa   : > { %12821 = vmatprep.subr.bf16.mxu0 %v14701_v56  ;;  %v4059_v56 = vld [vmem:[#allocation5 + $0x1850] sm:$0xff] }
 0x7ab   : > { %v14842_v55 = vcombine.low %v4059_v56, %v4071_v30 }
 0x7ac   : > { %12603 = vmatpush1.bf16.msra.mxu1 %v14698_v52  ;;  %v14820_v52 = vcombine.low %v4036_v36, %v4048_v62  ;;  %v18474_v36 = vcombine.low %v4132_v48, %v4144_v16 }
 0x7ad   : > { %12822 = vmatpush1.bf16.msra.mxu0 %v14700_v20  ;;  %12604 = vmatprep.subr.bf16.mxu1 %v14723_v54  ;;  %v14843_v20 = vcombine.high %v4059_v56, %v4071_v30  ;;  %v18446_v54 = vcombine.high %v4060_v59, %v4072_v43 }
 0x7ae   : > { %12823 = vmatprep.subr.bf16.mxu0 %v14725_v53  ;;  %v4083_v53 = vld [vmem:[#allocation5 + $0x1910] sm:$0xff] }
 0x7af   : > { %v14866_v29 = vcombine.low %v4083_v53, %v4095_v31 }
 0x7b0   : > { %12605 = vmatpush1.bf16.msra.mxu1 %v14722_v47  ;;  %v18448_v47 = vcombine.low %v4060_v59, %v4072_v43  ;;  %v4203_v43 = vld [vmem:[#allocation5 + $0x1cd0] sm:$0xff] }
 0x7b1   : > { %12824 = vmatpush1.bf16.msra.mxu0 %v14724_v34  ;;  %12606 = vmatprep.subr.bf16.mxu1 %v14747_v41  ;;  %v14867_v34 = vcombine.high %v4083_v53, %v4095_v31  ;;  %v18452_v41 = vcombine.high %v4084_v40, %v4096_v58 }
 0x7b2   : > { %12825 = vmatprep.subr.bf16.mxu0 %v14749_v39  ;;  %v4107_v39 = vld [vmem:[#allocation5 + $0x19d0] sm:$0xff] }
 0x7b3   : > { %v14890_v8 = vcombine.low %v4107_v39, %v4119_v22 }
 0x7b4   : > { %12607 = vmatpush1.bf16.msra.mxu1 %v14746_v38  ;;  %v18458_v38 = vcombine.low %v4084_v40, %v4096_v58 }
 0x7b5   : > { %12826 = vmatpush1.bf16.msra.mxu0 %v14748_v46  ;;  %12608 = vmatprep.subr.bf16.mxu1 %v14771_v3  ;;  %v14891_v46 = vcombine.high %v4107_v39, %v4119_v22  ;;  %v18461_v3 = vcombine.high %v4108_v7, %v4120_v32  ;;  %v4240_v39 = vld [vmem:[#allocation5 + $0x1df8] sm:$0xff] }
 0x7b6   : > { %12827 = vmatprep.subr.bf16.mxu0 %v14773_v49  ;;  %v4131_v49 = vld [vmem:[#allocation5 + $0x1a90] sm:$0xff] }
 0x7b8   : > { %12609 = vmatpush1.bf16.msra.mxu1 %v14770_v24  ;;  %v18468_v24 = vcombine.high %v4132_v48, %v4144_v16 }
 0x7b9   : > { %12828 = vmatpush1.bf16.msra.mxu0 %v14772_v50  ;;  %12610 = vmatprep.subr.bf16.mxu1 %v14795_v5  ;;  %v4155_v50 = vld [vmem:[#allocation5 + $0x1b50] sm:$0xff] }
 0x7ba   : > { %12829 = vmatprep.subr.bf16.mxu0 %v14797_v12  ;;  %v4167_v5 = vld [vmem:[#allocation5 + $0x1bb0] sm:$0xff]  ;;  %v4156_v12 = vld [vmem:[#allocation5 + $0x1b58] sm:$0xff] }
 0x7bb   : > { %v14939_v62 = vcombine.high %v4155_v50, %v4167_v5  ;;  %v14938_v56 = vcombine.low %v4155_v50, %v4167_v5  ;;  %v4275_v50 = vld [vmem:[#allocation5 + $0x1f10] sm:$0xff]  ;;  %v4276_v5 = vld [vmem:[#allocation5 + $0x1f18] sm:$0xff] }
 0x7bc   : > { %12611 = vmatpush1.bf16.msra.mxu1 %v14794_v51  ;;  %v18477_v51 = vcombine.high %v4156_v12, %v4168_v57 }
 0x7bd   : > { %12830 = vmatpush1.bf16.msra.mxu0 %v14796_v1  ;;  %12612 = vmatprep.subr.bf16.mxu1 %v14819_v27  ;;  %v4179_v1 = vld [vmem:[#allocation5 + $0x1c10] sm:$0xff]  ;;  %v4180_v27 = vld [vmem:[#allocation5 + $0x1c18] sm:$0xff] }
 0x7be   : > { %12831 = vmatprep.subr.bf16.mxu0 %v14821_v26  ;;  %v4192_v26 = vld [vmem:[#allocation5 + $0x1c78] sm:$0xff] }
 0x7bf   : > { %v18484_v59 = vcombine.high %v4180_v27, %v4192_v26  ;;  %v18490_v31 = vcombine.low %v4180_v27, %v4192_v26  ;;  %v4300_v27 = vld [vmem:[#allocation5 + $0x1fd8] sm:$0xff] }
 0x7c0   : > { %12613 = vmatpush1.bf16.msra.mxu1 %v14818_v61  ;;  %v4215_v61 = vld [vmem:[#allocation5 + $0x1d30] sm:$0xff]  ;;  %v4312_v26 = vld [vmem:[#allocation5 + $0x2038] sm:$0xff] }
 0x7c1   : > { %12832 = vmatpush1.bf16.msra.mxu0 %v14820_v52  ;;  %12655 = vmatprep.subr.bf16.mxu1 %v14843_v20  ;;  %v4204_v52 = vld [vmem:[#allocation5 + $0x1cd8] sm:$0xff]  ;;  %v14987_v40 = vcombine.high %v4203_v43, %v4215_v61  ;;  %v14986_v22 = vcombine.low %v4203_v43, %v4215_v61  ;;  %v18521_v61 = vcombine.high %v4300_v27, %v4312_v26 }
 0x7c2   : > { %12874 = vmatprep.subr.bf16.mxu0 %v18446_v54  ;;  %v4216_v20 = vld [vmem:[#allocation5 + $0x1d38] sm:$0xff] }
 0x7c3   : > { %12615 = vmatmul.mubr.bf16.vlgmr.msra.gmra.mrb[112].mxu1 %v17766_v35  ;;  %v18493_v58 = vcombine.high %v4204_v52, %v4216_v20 }
 0x7c4   : > { %12834 = vmatmul.mubr.bf16.vlgmr.msra.gmra.mrb[112].mxu0 %v17766_v35  ;;  %12624 = vmatprep.mubr.bf16.mxu1 %v17812_v6  ;;  %v4143_v35 = vld [vmem:[#allocation5 + $0x1af0] sm:$0xff] }
 0x7c5   : > { %12656 = vmatpush1.bf16.msra.mxu1 %v14842_v55  ;;  %12843 = vmatprep.mubr.bf16.mxu0 %v17812_v6  ;;  %v18464_v6 = vcombine.low %v4108_v7, %v4120_v32  ;;  %v14915_v28 = vcombine.high %v4131_v49, %v4143_v35  ;;  %v14914_v15 = vcombine.low %v4131_v49, %v4143_v35  ;;  %v4227_v55 = vld [vmem:[#allocation5 + $0x1d90] sm:$0xff]  ;;  %v4252_v49 = vld [vmem:[#allocation5 + $0x1e58] sm:$0xff] }
 0x7c6   : > { %12875 = vmatpush1.bf16.msra.mxu0 %v18448_v47  ;;  %12657 = vmatprep.subr.bf16.mxu1 %v14867_v34  ;;  %v4228_v34 = vld [vmem:[#allocation5 + $0x1d98] sm:$0xff] }
 0x7c7   : > { %12876 = vmatprep.subr.bf16.mxu0 %v18452_v41  ;;  %v18500_v32 = vcombine.high %v4228_v34, %v4240_v39  ;;  %v4264_v35 = vld [vmem:[#allocation5 + $0x1eb8] sm:$0xff]  ;;  %v18506_v16 = vcombine.low %v4228_v34, %v4240_v39 }
 0x7c9   : > { %12658 = vmatpush1.bf16.msra.mxu1 %v14866_v29  ;;  %v4251_v29 = vld [vmem:[#allocation5 + $0x1e50] sm:$0xff] }
 0x7ca   : > { %12877 = vmatpush1.bf16.msra.mxu0 %v18458_v38  ;;  %12659 = vmatprep.subr.bf16.mxu1 %v14891_v46  ;;  %v4263_v46 = vld [vmem:[#allocation5 + $0x1eb0] sm:$0xff] }
 0x7cb   : > { %12625 = vmatmul.mubr.bf16.gmra.mrb[116].mxu1 %v17818_v9  ;;  %12878 = vmatprep.subr.bf16.mxu0 %v18461_v3 }
 0x7cc   : > { %12844 = vmatmul.mubr.bf16.gmra.mrb[116].mxu0 %v17818_v9  ;;  %12634 = vmatprep.mubr.bf16.mxu1 %v17860_v25  ;;  %v4191_v9 = vld [vmem:[#allocation5 + $0x1c70] sm:$0xff] }
 0x7cd   : > { %12660 = vmatpush1.bf16.msra.mxu1 %v14890_v8  ;;  %12853 = vmatprep.mubr.bf16.mxu0 %v17860_v25  ;;  %v18480_v25 = vcombine.low %v4156_v12, %v4168_v57  ;;  %v14963_v30 = vcombine.high %v4179_v1, %v4191_v9  ;;  %v14962_v53 = vcombine.low %v4179_v1, %v4191_v9  ;;  %v4288_v12 = vld [vmem:[#allocation5 + $0x1f78] sm:$0xff]  ;;  %v4299_v1 = vld [vmem:[#allocation5 + $0x1fd0] sm:$0xff] }
 0x7ce   : > { %12879 = vmatpush1.bf16.msra.mxu0 %v18464_v6  ;;  %12661 = vmatprep.subr.bf16.mxu1 %v14915_v28  ;;  %v15035_v8 = vcombine.high %v4251_v29, %v4263_v46  ;;  %v18509_v28 = vcombine.high %v4252_v49, %v4264_v35  ;;  %v15034_v57 = vcombine.low %v4251_v29, %v4263_v46  ;;  %v4311_v9 = vld [vmem:[#allocation5 + $0x2030] sm:$0xff]  ;;  %v4348_v29 = vld [vmem:[#allocation5 + $0x2158] sm:$0xff] }
 0x7cf   : > { %12880 = vmatprep.subr.bf16.mxu0 %v18468_v24  ;;  %v15083_v43 = vcombine.high %v4299_v1, %v4311_v9  ;;  %v4360_v46 = vld [vmem:[#allocation5 + $0x21b8] sm:$0xff] }
 0x7d1   : > { %12662 = vmatpush1.bf16.msra.mxu1 %v14914_v15 }
 0x7d2   : > { %12881 = vmatpush1.bf16.msra.mxu0 %v18474_v36  ;;  %12663 = vmatprep.subr.bf16.mxu1 %v14939_v62  ;;  %v18515_v62 = vcombine.high %v4276_v5, %v4288_v12 }
 0x7d3   : > { %12635 = vmatmul.mubr.bf16.gmra.mrb[120].mxu1 %v17868_v10  ;;  %12882 = vmatprep.subr.bf16.mxu0 %v18477_v51 }
 0x7d4   : > { %12854 = vmatmul.mubr.bf16.gmra.mrb[120].mxu0 %v17868_v10  ;;  %12644 = vmatprep.mubr.bf16.mxu1 %v17912_v19  ;;  %v4239_v10 = vld [vmem:[#allocation5 + $0x1df0] sm:$0xff] }
 0x7d5   : > { %12664 = vmatpush1.bf16.msra.mxu1 %v14938_v56  ;;  %12863 = vmatprep.mubr.bf16.mxu0 %v17912_v19  ;;  %v18496_v19 = vcombine.low %v4204_v52, %v4216_v20  ;;  %v15011_v7 = vcombine.high %v4227_v55, %v4239_v10  ;;  %v15010_v48 = vcombine.low %v4227_v55, %v4239_v10  ;;  %v4323_v52 = vld [vmem:[#allocation5 + $0x2090] sm:$0xff] }
 0x7d6   : > { %12883 = vmatpush1.bf16.msra.mxu0 %v18480_v25  ;;  %12665 = vmatprep.subr.bf16.mxu1 %v14963_v30  ;;  %v18518_v30 = vcombine.low %v4276_v5, %v4288_v12  ;;  %v4335_v20 = vld [vmem:[#allocation5 + $0x20f0] sm:$0xff]  ;;  %v15082_v55 = vcombine.low %v4299_v1, %v4311_v9  ;;  %v18524_v10 = vcombine.low %v4300_v27, %v4312_v26  ;;  %v4372_v5 = vld [vmem:[#allocation5 + $0x2218] sm:$0xff] }
 0x7d7   : > { %12884 = vmatprep.subr.bf16.mxu0 %v18484_v59  ;;  %v15107_v34 = vcombine.high %v4323_v52, %v4335_v20  ;;  %v4384_v12 = vld [vmem:[#allocation5 + $0x2278] sm:$0xff]  ;;  %v4395_v27 = vld [vmem:[#allocation5 + $0x22d0] sm:$0xff] }
 0x7d8   : > { %v18539_v9 = vcombine.high %v4372_v5, %v4384_v12  ;;  %v4407_v26 = vld [vmem:[#allocation5 + $0x2330] sm:$0xff] }
 0x7d9   : > { %12666 = vmatpush1.bf16.msra.mxu1 %v14962_v53  ;;  %v4324_v53 = vld [vmem:[#allocation5 + $0x2098] sm:$0xff] }
 0x7da   : > { %12885 = vmatpush1.bf16.msra.mxu0 %v18490_v31  ;;  %12667 = vmatprep.subr.bf16.mxu1 %v14987_v40  ;;  %v4336_v40 = vld [vmem:[#allocation5 + $0x20f8] sm:$0xff] }
 0x7db   : > { %12645 = vmatmul.mubr.bf16.gmra.mrb[124].mxu1 %v17916_v13  ;;  %12886 = vmatprep.subr.bf16.mxu0 %v18493_v58  ;;  %v18527_v39 = vcombine.high %v4324_v53, %v4336_v40 }
 0x7dc   : > { %12864 = vmatmul.mubr.bf16.gmra.mrb[124].mxu0 %v17916_v13  ;;  %12687 = vmatprep.mubr.bf16.mxu1 %v17772_v23  ;;  %v4287_v13 = vld [vmem:[#allocation5 + $0x1f70] sm:$0xff] }
 0x7dd   : > { %12668 = vmatpush1.bf16.msra.mxu1 %v14986_v22  ;;  %12906 = vmatprep.mubr.bf16.mxu0 %v17772_v23  ;;  %v18512_v23 = vcombine.low %v4252_v49, %v4264_v35  ;;  %v15059_v15 = vcombine.high %v4275_v50, %v4287_v13  ;;  %v15058_v56 = vcombine.low %v4275_v50, %v4287_v13  ;;  %v4347_v22 = vld [vmem:[#allocation5 + $0x2150] sm:$0xff] }
 0x7de   : > { %12887 = vmatpush1.bf16.msra.mxu0 %v18496_v19  ;;  %12669 = vmatprep.subr.bf16.mxu1 %v15011_v7  ;;  %v4359_v7 = vld [vmem:[#allocation5 + $0x21b0] sm:$0xff]  ;;  %v15106_v49 = vcombine.low %v4323_v52, %v4335_v20  ;;  %v18530_v35 = vcombine.low %v4324_v53, %v4336_v40  ;;  %v18542_v20 = vcombine.low %v4372_v5, %v4384_v12 }
 0x7df   : > { %12888 = vmatprep.subr.bf16.mxu0 %v18500_v32  ;;  %v4371_v50 = vld [vmem:[#allocation5 + $0x2210] sm:$0xff]  ;;  %v15179_v53 = vcombine.high %v4395_v27, %v4407_v26 }
 0x7e0   : > { %v4383_v13 = vld [vmem:[#allocation5 + $0x2270] sm:$0xff] }
 0x7e1   : > { %12670 = vmatpush1.bf16.msra.mxu1 %v15010_v48  ;;  %v15131_v48 = vcombine.high %v4347_v22, %v4359_v7  ;;  %v15155_v1 = vcombine.high %v4371_v50, %v4383_v13  ;;  %v15154_v52 = vcombine.low %v4371_v50, %v4383_v13 }
 0x7e2   : > { %12889 = vmatpush1.bf16.msra.mxu0 %v18506_v16  ;;  %12671 = vmatprep.subr.bf16.mxu1 %v15035_v8  ;;  %v18533_v8 = vcombine.high %v4348_v29, %v4360_v46 }
 0x7e3   : > { %12890 = vmatprep.subr.bf16.mxu0 %v18509_v28 }
 0x7e5   : > { %12672 = vmatpush1.bf16.msra.mxu1 %v15034_v57  ;;  %v15130_v57 = vcombine.low %v4347_v22, %v4359_v7  ;;  %v4420_v22 = vld [vmem:[#allocation5 + $0x2398] sm:$0xff] }
 0x7e6   : > { %12891 = vmatpush1.bf16.msra.mxu0 %v18512_v23  ;;  %12673 = vmatprep.subr.bf16.mxu1 %v15059_v15  ;;  %v18536_v15 = vcombine.low %v4348_v29, %v4360_v46  ;;  %v4432_v7 = vld [vmem:[#allocation5 + $0x23f8] sm:$0xff]  ;;  %v15178_v29 = vcombine.low %v4395_v27, %v4407_v26 }
 0x7e7   : > { %12892 = vmatprep.subr.bf16.mxu0 %v18515_v62  ;;  %v18554_v13 = vcombine.low %v4420_v22, %v4432_v7 }
 0x7e9   : > { %12674 = vmatpush1.bf16.msra.mxu1 %v15058_v56  ;;  %v4396_v56 = vld [vmem:[#allocation5 + $0x22d8] sm:$0xff] }
 0x7ea   : > { %12893 = vmatpush1.bf16.msra.mxu0 %v18518_v30  ;;  %12675 = vmatprep.subr.bf16.mxu1 %v15083_v43  ;;  %v4408_v43 = vld [vmem:[#allocation5 + $0x2338] sm:$0xff] }
 0x7eb   : > { %12894 = vmatprep.subr.bf16.mxu0 %v18521_v61  ;;  %v18545_v40 = vcombine.high %v4396_v56, %v4408_v43  ;;  %v18548_v46 = vcombine.low %v4396_v56, %v4408_v43 }
 0x7ed   : > { %12676 = vmatpush1.bf16.msra.mxu1 %v15082_v55  ;;  %v4419_v55 = vld [vmem:[#allocation5 + $0x2390] sm:$0xff] }
 0x7ee   : > { %12895 = vmatpush1.bf16.msra.mxu0 %v18524_v10  ;;  %12677 = vmatprep.subr.bf16.mxu1 %v15107_v34  ;;  %v4431_v34 = vld [vmem:[#allocation5 + $0x23f0] sm:$0xff] }
 0x7ef   : > { %12896 = vmatprep.subr.bf16.mxu0 %v18527_v39  ;;  %v15202_v50 = vcombine.low %v4419_v55, %v4431_v34 }
 0x7f1   : > { %12678 = vmatpush1.bf16.msra.mxu1 %v15106_v49  ;;  %v15203_v49 = vcombine.high %v4419_v55, %v4431_v34 }
 0x7f2   : > { %12897 = vmatpush1.bf16.msra.mxu0 %v18530_v35  ;;  %12679 = vmatprep.subr.bf16.mxu1 %v15131_v48  ;;  %v18551_v48 = vcombine.high %v4420_v22, %v4432_v7 }
 0x7f3   : > { %12898 = vmatprep.subr.bf16.mxu0 %v18533_v8 }
 0x7f5   : > { %12680 = vmatpush1.bf16.msra.mxu1 %v15130_v57 }
 0x7f6   : > { %12899 = vmatpush1.bf16.msra.mxu0 %v18536_v15  ;;  %12681 = vmatprep.subr.bf16.mxu1 %v15155_v1 }
 0x7f7   : > { %12900 = vmatprep.subr.bf16.mxu0 %v18539_v9 }
 0x7f9   : > { %12682 = vmatpush1.bf16.msra.mxu1 %v15154_v52 }
 0x7fa   : > { %12901 = vmatpush1.bf16.msra.mxu0 %v18542_v20  ;;  %12683 = vmatprep.subr.bf16.mxu1 %v15179_v53 }
 0x7fb   : > { %12902 = vmatprep.subr.bf16.mxu0 %v18545_v40 }
 0x7fd   : > { %12684 = vmatpush1.bf16.msra.mxu1 %v15178_v29 }
 0x7fe   : > { %12903 = vmatpush1.bf16.msra.mxu0 %v18548_v46  ;;  %12685 = vmatprep.subr.bf16.mxu1 %v15203_v49 }
 0x7ff   : > { %12904 = vmatprep.subr.bf16.mxu0 %v18551_v48 }
 0x801   : > { %12686 = vmatpush1.bf16.msra.mxu1 %v15202_v50 }
 0x802   : > { %12905 = vmatpush1.bf16.msra.mxu0 %v18554_v13  ;;  %15403 = vmatprep.subr.bf16.mxu1 %v18446_v54 }
 0x804   : > { %12688 = vmatmul.mubr.bf16.vlgmr.msra.gmra.mrb[112].mxu1 %v17798_v4 }
 0x805   : > { %12907 = vmatmul.mubr.bf16.vlgmr.msra.gmra.mrb[112].mxu0 %v17798_v4  ;;  %12697 = vmatprep.mubr.bf16.mxu1 %v17833_v60  ;;  %v18574_v4 = vld [vmem:[%s18818_s5 + $0x10] sm:$0xff] }
 0x806   : > { %15419 = vmatpush1.bf16.msra.mxu1 %v18448_v47  ;;  %12916 = vmatprep.mubr.bf16.mxu0 %v17833_v60  ;;  %v18579_v60 = vrot.slane %v18574_v4, %v18909_v45  ;;  %v18588_v54 = vrot.slane %v18574_v4, %v18911_v42  ;;  %v18593_v47 = vrot.slane %v18574_v4, %v18912_v11 }
 0x807   : > { %15404 = vmatprep.subr.bf16.mxu1 %v18452_v41 }
 0x80a   : > { %15420 = vmatpush1.bf16.msra.mxu1 %v18458_v38 }
 0x80b   : > { %15405 = vmatprep.subr.bf16.mxu1 %v18461_v3 }
 0x80c   : > { %12698 = vmatmul.mubr.bf16.gmra.mrb[116].mxu1 %v17852_v18 }
 0x80d   : > { %12917 = vmatmul.mubr.bf16.gmra.mrb[116].mxu0 %v17852_v18  ;;  %12707 = vmatprep.mubr.bf16.mxu1 %v17887_v44  ;;  %v18584_v18 = vrot.slane %v18574_v4, %v18910_v14 }
 0x80e   : > { %15421 = vmatpush1.bf16.msra.mxu1 %v18464_v6 }
 0x80f   : > { %15406 = vmatprep.subr.bf16.mxu1 %v18468_v24 }
 0x812   : > { %15422 = vmatpush1.bf16.msra.mxu1 %v18474_v36 }
 0x813   : > { %15407 = vmatprep.subr.bf16.mxu1 %v18477_v51 }
 0x814   : > { %12708 = vmatmul.mubr.bf16.gmra.mrb[120].mxu1 %v17906_v17  ;;  %v12251_v45 = vpop.f32.mrb[96].mxu1 }
 0x815   : > { %12717 = vmatprep.mubr.bf16.mxu1 %v17928_v2  ;;  %v15627_v41 = vadd.f32 %v12251_v45, %v18579_v60  ;;  %v12470_v38 = vpop.f32.mrb[96].mxu0  ;;  %v12253_v14 = vpop.f32.mrb[97].mxu1 }
 0x816   : > { %15423 = vmatpush1.bf16.msra.mxu1 %v18480_v25  ;;  %v15643_v42 = vadd.f32 %v12470_v38, %v18584_v18  ;;  %v15628_v3 = vadd.f32 %v12253_v14, %v18588_v54  ;;  %v12472_v6 = vpop.f32.mrb[97].mxu0  ;;  %v12255_v11 = vpop.f32.mrb[98].mxu1 }
 0x817   : > { %v15644_v24 = vadd.f32 %v12472_v6, %v18593_v47  ;;  %15408 = vmatprep.subr.bf16.mxu1 %v18484_v59  ;;  %v15629_v36 = vadd.f32 %v12255_v11, %v18579_v60  ;;  %v12474_v51 = vpop.f32.mrb[98].mxu0  ;;  %v12257_v5 = vpop.f32.mrb[99].mxu1 }
 0x818   : > { %v15315_v12 = vpack.c.bf16 %v15628_v3, %v15627_v41  ;;  %v15645_v25 = vadd.f32 %v12474_v51, %v18584_v18  ;;  %v15630_v57 = vadd.f32 %v12257_v5, %v18588_v54  ;;  %v12476_v1 = vpop.f32.mrb[99].mxu0 }
 0x819   : > { %v15316_v27 = vpack.c.bf16 %v15644_v24, %v15643_v42  ;;  %v15646_v26 = vadd.f32 %v12476_v1, %v18593_v47 }
 0x81a   : > { %13531 = vst [vmem:[%s18044_s9 + $0x40] sm:$0xff] %v15315_v12  ;;  %15424 = vmatpush1.bf16.msra.mxu1 %v18490_v31  ;;  %v15327_v56 = vpack.c.bf16 %v15630_v57, %v15629_v36 }
 0x81b   : > { %13532 = vst [vmem:[%s18044_s9 + $0x48] sm:$0xff] %v15316_v27  ;;  %v15328_v59 = vpack.c.bf16 %v15646_v26, %v15645_v25  ;;  %15409 = vmatprep.subr.bf16.mxu1 %v18493_v58 }
 0x81c   : > { %13543 = vst [vmem:[%s18044_s9 + $0xa0] sm:$0xff] %v15327_v56  ;;  %12718 = vmatmul.mubr.bf16.gmra.mrb[124].mxu1 %v17932_v37  ;;  %v12261_v43 = vpop.f32.mrb[100].mxu1 }
 0x81d   : > { %13544 = vst [vmem:[%s18044_s9 + $0xa8] sm:$0xff] %v15328_v59  ;;  %12926 = vmatprep.mubr.bf16.mxu1 %v17887_v44  ;;  %v15631_v52 = vadd.f32 %v12261_v43, %v18579_v60  ;;  %v12480_v53 = vpop.f32.mrb[100].mxu0  ;;  %v12263_v55 = vpop.f32.mrb[101].mxu1 }
 0x81e   : > { %15425 = vmatpush1.bf16.msra.mxu1 %v18496_v19  ;;  %v15647_v31 = vadd.f32 %v12480_v53, %v18584_v18  ;;  %v15632_v34 = vadd.f32 %v12263_v55, %v18588_v54  ;;  %v12482_v22 = vpop.f32.mrb[101].mxu0  ;;  %v12265_v58 = vpop.f32.mrb[102].mxu1 }
 0x81f   : > { %v15648_v7 = vadd.f32 %v12482_v22, %v18593_v47  ;;  %15410 = vmatprep.subr.bf16.mxu1 %v18500_v32  ;;  %v15633_v44 = vadd.f32 %v12265_v58, %v18579_v60  ;;  %v12484_v29 = vpop.f32.mrb[102].mxu0  ;;  %v12267_v49 = vpop.f32.mrb[103].mxu1 }
 0x820   : > { %v15339_v50 = vpack.c.bf16 %v15632_v34, %v15631_v52  ;;  %v15649_v19 = vadd.f32 %v12484_v29, %v18584_v18  ;;  %v15634_v45 = vadd.f32 %v12267_v49, %v18588_v54  ;;  %v12486_v41 = vpop.f32.mrb[103].mxu0 }
 0x821   : > { %v15340_v38 = vpack.c.bf16 %v15648_v7, %v15647_v31  ;;  %v15650_v14 = vadd.f32 %v12486_v41, %v18593_v47 }
 0x822   : > { %13555 = vst [vmem:[%s18044_s9 + $0x100] sm:$0xff] %v15339_v50  ;;  %15426 = vmatpush1.bf16.msra.mxu1 %v18506_v16  ;;  %v15351_v42 = vpack.c.bf16 %v15634_v45, %v15633_v44 }
 0x823   : > { %13556 = vst [vmem:[%s18044_s9 + $0x108] sm:$0xff] %v15340_v38  ;;  %v15352_v32 = vpack.c.bf16 %v15650_v14, %v15649_v19  ;;  %15411 = vmatprep.subr.bf16.mxu1 %v18509_v28 }
 0x824   : > { %13567 = vst [vmem:[%s18044_s9 + $0x160] sm:$0xff] %v15351_v42  ;;  %v12271_v3 = vpop.f32.mrb[104].mxu1 }
 0x825   : > { %13568 = vst [vmem:[%s18044_s9 + $0x168] sm:$0xff] %v15352_v32  ;;  %v15635_v6 = vadd.f32 %v12271_v3, %v18579_v60  ;;  %v12490_v11 = vpop.f32.mrb[104].mxu0  ;;  %v12273_v24 = vpop.f32.mrb[105].mxu1 }
 0x826   : > { %15427 = vmatpush1.bf16.msra.mxu1 %v18512_v23  ;;  %v15651_v36 = vadd.f32 %v12490_v11, %v18584_v18  ;;  %v15636_v51 = vadd.f32 %v12273_v24, %v18588_v54  ;;  %v12492_v16 = vpop.f32.mrb[105].mxu0  ;;  %v12275_v5 = vpop.f32.mrb[106].mxu1 }
 0x827   : > { %v15652_v12 = vadd.f32 %v12492_v16, %v18593_v47  ;;  %15412 = vmatprep.subr.bf16.mxu1 %v18515_v62  ;;  %v15637_v28 = vadd.f32 %v12275_v5, %v18579_v60  ;;  %v12494_v25 = vpop.f32.mrb[106].mxu0  ;;  %v12277_v57 = vpop.f32.mrb[107].mxu1 }
 0x828   : > { %v15363_v1 = vpack.c.bf16 %v15636_v51, %v15635_v6  ;;  %v15653_v23 = vadd.f32 %v12494_v25, %v18584_v18  ;;  %v15638_v27 = vadd.f32 %v12277_v57, %v18588_v54  ;;  %v12496_v26 = vpop.f32.mrb[107].mxu0 }
 0x829   : > { %v15364_v56 = vpack.c.bf16 %v15652_v12, %v15651_v36  ;;  %v15654_v59 = vadd.f32 %v12496_v26, %v18593_v47 }
 0x82a   : > { %13579 = vst [vmem:[%s18044_s9 + $0x1c0] sm:$0xff] %v15363_v1  ;;  %15428 = vmatpush1.bf16.msra.mxu1 %v18518_v30  ;;  %v15375_v43 = vpack.c.bf16 %v15638_v27, %v15637_v28 }
 0x82b   : > { %13580 = vst [vmem:[%s18044_s9 + $0x1c8] sm:$0xff] %v15364_v56  ;;  %v15376_v62 = vpack.c.bf16 %v15654_v59, %v15653_v23  ;;  %15413 = vmatprep.subr.bf16.mxu1 %v18521_v61 }
 0x82c   : > { %13591 = vst [vmem:[%s18044_s9 + $0x220] sm:$0xff] %v15375_v43  ;;  %v12281_v52 = vpop.f32.mrb[108].mxu1 }
 0x82d   : > { %13592 = vst [vmem:[%s18044_s9 + $0x228] sm:$0xff] %v15376_v62  ;;  %v15639_v53 = vadd.f32 %v12281_v52, %v18579_v60  ;;  %v12500_v55 = vpop.f32.mrb[108].mxu0  ;;  %v12283_v31 = vpop.f32.mrb[109].mxu1 }
 0x82e   : > { %15429 = vmatpush1.bf16.msra.mxu1 %v18524_v10  ;;  %v15655_v34 = vadd.f32 %v12500_v55, %v18584_v18  ;;  %v15640_v22 = vadd.f32 %v12283_v31, %v18588_v54  ;;  %v12502_v30 = vpop.f32.mrb[109].mxu0  ;;  %v12285_v58 = vpop.f32.mrb[110].mxu1 }
 0x82f   : > { %v15656_v7 = vadd.f32 %v12502_v30, %v18593_v47  ;;  %15414 = vmatprep.subr.bf16.mxu1 %v18527_v39  ;;  %v15641_v61 = vadd.f32 %v12285_v58, %v18579_v60  ;;  %v12504_v44 = vpop.f32.mrb[110].mxu0  ;;  %v12287_v29 = vpop.f32.mrb[111].mxu1 }
 0x830   : > { %v15387_v49 = vpack.c.bf16 %v15640_v22, %v15639_v53  ;;  %v15657_v10 = vadd.f32 %v12504_v44, %v18584_v18  ;;  %v15642_v50 = vadd.f32 %v12287_v29, %v18588_v54  ;;  %v12506_v19 = vpop.f32.mrb[111].mxu0  ;;  %v18705_v54 = vrot.slane %v18574_v4, %v18915_v21 }
 0x831   : > { %v15388_v45 = vpack.c.bf16 %v15656_v7, %v15655_v34  ;;  %v15658_v41 = vadd.f32 %v12506_v19, %v18593_v47  ;;  %v18709_v47 = vrot.slane %v18574_v4, %v18916_v0 }
 0x832   : > { %13603 = vst [vmem:[%s18044_s9 + $0x280] sm:$0xff] %v15387_v49  ;;  %15430 = vmatpush1.bf16.msra.mxu1 %v18530_v35  ;;  %v15399_v38 = vpack.c.bf16 %v15642_v50, %v15641_v61 }
 0x833   : > { %13604 = vst [vmem:[%s18044_s9 + $0x288] sm:$0xff] %v15388_v45  ;;  %v15400_v39 = vpack.c.bf16 %v15658_v41, %v15657_v10  ;;  %15415 = vmatprep.subr.bf16.mxu1 %v18533_v8  ;;  %v18677_v8 = vrot.slane %v18574_v4, %v18132_v63 }
 0x834   : > { %13615 = vst [vmem:[%s18044_s9 + $0x2e0] sm:$0xff] %v15399_v38 }
 0x835   : > { %13616 = vst [vmem:[%s18044_s9 + $0x2e8] sm:$0xff] %v15400_v39 }
 0x836   : > { %15431 = vmatpush1.bf16.msra.mxu1 %v18536_v15 }
 0x837   : > { %15416 = vmatprep.subr.bf16.mxu1 %v18539_v9  ;;  %v18683_v9 = vrot.slane %v18574_v4, %v18917_v33 }
 0x83a   : > { %15432 = vmatpush1.bf16.msra.mxu1 %v18542_v20 }
 0x83b   : > { %15417 = vmatprep.subr.bf16.mxu1 %v18545_v40 }
 0x83e   : > { %15433 = vmatpush1.bf16.msra.mxu1 %v18548_v46 }
 0x83f   : > { %15418 = vmatprep.subr.bf16.mxu1 %v18551_v48 }
 0x842   : > { %15434 = vmatpush1.bf16.msra.mxu1 %v18554_v13 }
 0x845   : > { %12927 = vmatmul.mubr.bf16.vlgmr.msra.gmra.mrb[128].mxu1 %v17906_v17 }
 0x846   : > { %12936 = vmatprep.mubr.bf16.mxu1 %v17928_v2 }
 0x84d   : > { %12937 = vmatmul.mubr.bf16.gmra.mrb[132].mxu1 %v17932_v37 }
 0x8a7   : > { %v18673_v35 = vpop.f32.mrb[120].mxu0 }
 0x8a8   : > { %v18679_v15 = vpop.f32.mrb[121].mxu0 }
 0x8a9   : > { %v12859_v20 = vpop.f32.mrb[122].mxu0 }
 0x8aa   : > { %v18686_v40 = vadd.f32 %v12859_v20, %v18677_v8  ;;  %v12861_v17 = vpop.f32.mrb[123].mxu0 }
 0x8ab   : > { %v18689_v2 = vadd.f32 %v12861_v17, %v18683_v9 }
 0x8af   : > { %v12865_v37 = vpop.f32.mrb[124].mxu0 }
 0x8b0   : > { %v18692_v46 = vadd.f32 %v12865_v37, %v18677_v8  ;;  %v12867_v63 = vpop.f32.mrb[125].mxu0 }
 0x8b1   : > { %v18695_v48 = vadd.f32 %v12867_v63, %v18683_v9  ;;  %v12869_v13 = vpop.f32.mrb[126].mxu0 }
 0x8b2   : > { %v18698_v33 = vadd.f32 %v12869_v13, %v18677_v8  ;;  %v12871_v60 = vpop.f32.mrb[127].mxu0 }
 0x8b3   : > { %v18701_v18 = vadd.f32 %v12871_v60, %v18683_v9 }
 0x8d7   : > { %v12689_v14 = vpop.f32.mrb[112].mxu1 }
 0x8d8   : > { %v15659_v42 = vadd.f32 %v12689_v14, %v18705_v54  ;;  %v12908_v32 = vpop.f32.mrb[112].mxu0  ;;  %v12691_v3 = vpop.f32.mrb[113].mxu1 }
 0x8d9   : > { %v15675_v6 = vadd.f32 %v12908_v32, %v18677_v8  ;;  %v15660_v11 = vadd.f32 %v12691_v3, %v18709_v47  ;;  %v12910_v24 = vpop.f32.mrb[113].mxu0  ;;  %v12693_v36 = vpop.f32.mrb[114].mxu1 }
 0x8da   : > { %v15676_v21 = vadd.f32 %v12910_v24, %v18683_v9  ;;  %v15661_v0 = vadd.f32 %v12693_v36, %v18705_v54  ;;  %v12912_v4 = vpop.f32.mrb[114].mxu0  ;;  %v12695_v51 = vpop.f32.mrb[115].mxu1 }
 0x8db   : > { %v15317_v16 = vpack.c.bf16 %v15660_v11, %v15659_v42  ;;  %v15677_v5 = vadd.f32 %v12912_v4, %v18677_v8  ;;  %v15662_v12 = vadd.f32 %v12695_v51, %v18709_v47  ;;  %v12914_v28 = vpop.f32.mrb[115].mxu0 }
 0x8dc   : > { %v15318_v25 = vpack.c.bf16 %v15676_v21, %v15675_v6  ;;  %v15678_v57 = vadd.f32 %v12914_v28, %v18683_v9  ;;  %v15683_v21 = vadd.f32 %v18673_v35, %v18677_v8 }
 0x8dd   : > { %13533 = vst [vmem:[%s18044_s9 + $0x50] sm:$0xff] %v15317_v16  ;;  %v15329_v1 = vpack.c.bf16 %v15662_v12, %v15661_v0  ;;  %v15685_v0 = vadd.f32 %v18679_v15, %v18683_v9 }
 0x8de   : > { %13534 = vst [vmem:[%s18044_s9 + $0x58] sm:$0xff] %v15318_v25  ;;  %v15330_v23 = vpack.c.bf16 %v15678_v57, %v15677_v5 }
 0x8df   : > { %13545 = vst [vmem:[%s18044_s9 + $0xb0] sm:$0xff] %v15329_v1  ;;  %v12699_v27 = vpop.f32.mrb[116].mxu1 }
 0x8e0   : > { %13546 = vst [vmem:[%s18044_s9 + $0xb8] sm:$0xff] %v15330_v23  ;;  %v15663_v26 = vadd.f32 %v12699_v27, %v18705_v54  ;;  %v12918_v56 = vpop.f32.mrb[116].mxu0  ;;  %v12701_v59 = vpop.f32.mrb[117].mxu1 }
 0x8e1   : > { %v15679_v43 = vadd.f32 %v12918_v56, %v18677_v8  ;;  %v15664_v62 = vadd.f32 %v12701_v59, %v18709_v47  ;;  %v12920_v52 = vpop.f32.mrb[117].mxu0  ;;  %v12703_v53 = vpop.f32.mrb[118].mxu1 }
 0x8e2   : > { %v15680_v55 = vadd.f32 %v12920_v52, %v18683_v9  ;;  %v15665_v31 = vadd.f32 %v12703_v53, %v18705_v54  ;;  %v12922_v34 = vpop.f32.mrb[118].mxu0  ;;  %v12705_v22 = vpop.f32.mrb[119].mxu1 }
 0x8e3   : > { %v15341_v30 = vpack.c.bf16 %v15664_v62, %v15663_v26  ;;  %v15681_v58 = vadd.f32 %v12922_v34, %v18677_v8  ;;  %v15666_v7 = vadd.f32 %v12705_v22, %v18709_v47  ;;  %v12924_v61 = vpop.f32.mrb[119].mxu0 }
 0x8e4   : > { %v15342_v44 = vpack.c.bf16 %v15680_v55, %v15679_v43  ;;  %v15682_v29 = vadd.f32 %v12924_v61, %v18683_v9 }
 0x8e5   : > { %13557 = vst [vmem:[%s18044_s9 + $0x110] sm:$0xff] %v15341_v30  ;;  %v15353_v49 = vpack.c.bf16 %v15666_v7, %v15665_v31 }
 0x8e6   : > { %13558 = vst [vmem:[%s18044_s9 + $0x118] sm:$0xff] %v15342_v44  ;;  %v15354_v10 = vpack.c.bf16 %v15682_v29, %v15681_v58 }
 0x8e7   : > { %13569 = vst [vmem:[%s18044_s9 + $0x170] sm:$0xff] %v15353_v49  ;;  %v12709_v50 = vpop.f32.mrb[120].mxu1 }
 0x8e8   : > { %13570 = vst [vmem:[%s18044_s9 + $0x178] sm:$0xff] %v15354_v10  ;;  %v15667_v19 = vadd.f32 %v12709_v50, %v18705_v54  ;;  %v12711_v45 = vpop.f32.mrb[121].mxu1 }
 0x8e9   : > { %v15668_v41 = vadd.f32 %v12711_v45, %v18709_v47  ;;  %v12713_v38 = vpop.f32.mrb[122].mxu1 }
 0x8ea   : > { %v15669_v39 = vadd.f32 %v12713_v38, %v18705_v54  ;;  %v12715_v20 = vpop.f32.mrb[123].mxu1 }
 0x8eb   : > { %v15365_v17 = vpack.c.bf16 %v15668_v41, %v15667_v19  ;;  %v15670_v37 = vadd.f32 %v12715_v20, %v18709_v47 }
 0x8ed   : > { %13581 = vst [vmem:[%s18044_s9 + $0x1d0] sm:$0xff] %v15365_v17  ;;  %v15377_v63 = vpack.c.bf16 %v15670_v37, %v15669_v39 }
 0x8ef   : > { %13593 = vst [vmem:[%s18044_s9 + $0x230] sm:$0xff] %v15377_v63  ;;  %v12719_v13 = vpop.f32.mrb[124].mxu1 }
 0x8f0   : > { %v15671_v60 = vadd.f32 %v12719_v13, %v18705_v54  ;;  %v12721_v14 = vpop.f32.mrb[125].mxu1 }
 0x8f1   : > { %v15672_v42 = vadd.f32 %v12721_v14, %v18709_v47  ;;  %v12723_v32 = vpop.f32.mrb[126].mxu1 }
 0x8f2   : > { %v15673_v3 = vadd.f32 %v12723_v32, %v18705_v54  ;;  %v12725_v6 = vpop.f32.mrb[127].mxu1 }
 0x8f3   : > { %v15389_v11 = vpack.c.bf16 %v15672_v42, %v15671_v60  ;;  %v15674_v24 = vadd.f32 %v12725_v6, %v18709_v47 }
 0x8f5   : > { %13605 = vst [vmem:[%s18044_s9 + $0x290] sm:$0xff] %v15389_v11  ;;  %v15401_v36 = vpack.c.bf16 %v15674_v24, %v15673_v3 }
 0x8f7   : > { %13617 = vst [vmem:[%s18044_s9 + $0x2f0] sm:$0xff] %v15401_v36 }
 0x918   : > { %v12928_v4 = vpop.f32.mrb[128].mxu1 }
 0x919   : > { %v15684_v51 = vadd.f32 %v15683_v21, %v12928_v4  ;;  %v12930_v16 = vpop.f32.mrb[129].mxu1 }
 0x91a   : > { %v15686_v54 = vadd.f32 %v15685_v0, %v12930_v16  ;;  %v12932_v5 = vpop.f32.mrb[130].mxu1 }
 0x91b   : > { %v15688_v12 = vadd.f32 %v18686_v40, %v12932_v5  ;;  %v12934_v47 = vpop.f32.mrb[131].mxu1 }
 0x91c   : > { %v15366_v28 = vpack.c.bf16 %v15686_v54, %v15684_v51  ;;  %v15690_v25 = vadd.f32 %v18689_v2, %v12934_v47 }
 0x91e   : > { %13582 = vst [vmem:[%s18044_s9 + $0x1d8] sm:$0xff] %v15366_v28  ;;  %v15378_v57 = vpack.c.bf16 %v15690_v25, %v15688_v12 }
 0x920   : > { %13594 = vst [vmem:[%s18044_s9 + $0x238] sm:$0xff] %v15378_v57  ;;  %v12938_v35 = vpop.f32.mrb[132].mxu1 }
 0x921   : > { %v15692_v8 = vadd.f32 %v18692_v46, %v12938_v35  ;;  %v12940_v15 = vpop.f32.mrb[133].mxu1 }
 0x922   : > { %v15694_v9 = vadd.f32 %v18695_v48, %v12940_v15  ;;  %v12942_v1 = vpop.f32.mrb[134].mxu1 }
 0x923   : > { %v15696_v40 = vadd.f32 %v18698_v33, %v12942_v1  ;;  %v12944_v23 = vpop.f32.mrb[135].mxu1 }
 0x924   : > { %v15390_v2 = vpack.c.bf16 %v15694_v9, %v15692_v8  ;;  %v15698_v27 = vadd.f32 %v18701_v18, %v12944_v23 }
 0x926   : > { %13606 = vst [vmem:[%s18044_s9 + $0x298] sm:$0xff] %v15390_v2  ;;  %v15402_v46 = vpack.c.bf16 %v15698_v27, %v15696_v40 }
 0x928   : > { %13618 = vst [vmem:[%s18044_s9 + $0x2f8] sm:$0xff] %v15402_v46 }
 0x929   : > { %16791 = shalt.err (!%p16788_p11)
}
 0x92a   : > { %s16792_s13 = scalar_lea.hbm %s18764_s15, 12288  ;;  %s16796_s19 = scalar_lea.hbm %s18819_s6, 73728 }
 0x92b   : > { %p16793_p13 = scmp.ne.s32.totalorder %s18764_s15, %s16792_s13  ;;  %p16797_p6 = scmp.lt.u32.totalorder %s18764_s15, %s18819_s6 }
 0x92c   : > { %p16798_p9 = scmp.lt.u32.totalorder %s16796_s19, %s16792_s13  ;;  %p16800_p10 = scmp.lt.u32.totalorder %s16792_s13, %s18764_s15 }
 0x92d   : > { %p16794_p0 = pnand %p16793_p13, %p18918_p1 }
 0x92e   : > { %p16799_p12 = por %p16798_p9, %p16797_p6 }
 0x92f   : > { %p16795_p5 = pneg %p16794_p0 }
 0x930   : > { %p16801_p2 = por %p16800_p10, %p16799_p12 }
 0x932   : > { %p16802_p3 = pnand %p16801_p2, %p16795_p5 }
 0x934   : > { %16805 = shalt.err (!%p16802_p3)
}
 0x935   : > { %s16857_s28 = smov 1536   ;;  %s16858_s29 = smov 96  }
 0x936   : > { %16167 = dma.vmem_to_hbm [thread:$0]  (%p18918_p1), %s18766_s11, 12288, %s18764_s15, %s18772_s25, %s16857_s28, %s16857_s28, %s16858_s29  }
 0x937 PF: > { %p16184_p4 = scmp.ge.s32.totalorder %s16848_s24, 2  ;;  %s13649_s10 = sand.u32 1, %s16836_s21  }
 0x938   : > { %p18919_p7 = scmp.ne.s32.totalorder %s18858_s8, 0  ;;  %s13650_s12 = scalar_lea.sflag [#allocation4], %s13649_s10 }
 0x93a   : > { %p16177_p8 = pnand %p16184_p4, %p18919_p7 }
 0x93c   : > { %16831 = dma.done.wait (!%p16177_p8), %s13650_s12, 12288  }
 0x93d   : > { %16833 = vsyncadd (!%p16177_p8), %s13650_s12, 4294955008  ;;  %p18_p11 = scmp.ge.s32.totalorder %s16919_s27, 8   ;;  %s18920_s21 = smov %s16840_s22 }
 0x93e   : > { %s18921_s22 = smov %s16844_s23  ;;  %s18922_s23 = smov %s16930_s30 }
 0x93f   : > { %s18923_s24 = smov %s16919_s27  ;;  %20 = sbr.rel (!%p18_p11) target bundleno = 5 (0x5), region = 91 }
 0x946   :  { %13655 = vsyncpa [#allocation3], 1 }
 0x947   :  { %13657 = vsyncpa [#allocation3 + $0x1], 1 }
 0x948   :  { %13658 = vsyncpa [#allocation6], 1 }
 0x949   :  { %13659 = vsyncpa [#allocation4], 1 }
 0x94a   :  { %13661 = vsyncpa [#allocation4 + $0x1], 1 }

</bundles_post_ra>
